<compile_context>
chip_gen: v7x
topology: tpu7x:2x2x1
jax: 0.10.0
libtpu: 0.0.40
codegen_flags: <defaults>
</compile_context>

<pallas_src>
import functools

import jax
import jax.numpy as jnp
from jax.experimental import pallas as pl
from jax.experimental.pallas import tpu as pltpu


# (dy, ky) taps per output row-phase for a stride=2, pad=1, k=4 ConvTranspose2d:
#   out[2*i + py] = sum_{(dy, ky)} in[i + dy] * w[ky]   (same structure along cols)
_TAPS = (((0, 1), (-1, 3)),   # phase 0
         ((0, 2), (1, 0)))    # phase 1

_BN_EPS = 1e-5  # PyTorch BatchNorm2d default


def _pick_tile(n, candidates):
    for c in candidates:
        if n % c == 0:
            return c
    return n


# ----------------------------------------------------------------------------
# Pallas kernels
# ----------------------------------------------------------------------------
def _gemm_bnstats_kernel(a_ref, w_ref, y_ref, s_ref, q_ref, acc_ref):
    # grid = (phase, m_tiles, k_tiles); f32 VMEM accumulator over the K axis;
    # per-channel sum / sum-of-squares accumulated in resident (1, N) outputs.
    k = pl.program_id(2)
    nk = pl.num_programs(2)

    @pl.when((pl.program_id(0) == 0) & (pl.program_id(1) == 0) & (k == 0))
    def _init_stats():
        s_ref[...] = jnp.zeros_like(s_ref)
        q_ref[...] = jnp.zeros_like(q_ref)

    @pl.when(k == 0)
    def _init_acc():
        acc_ref[...] = jnp.zeros_like(acc_ref)

    acc_ref[...] += jnp.dot(a_ref[...], w_ref[...],
                            preferred_element_type=jnp.float32)

    @pl.when(k == nk - 1)
    def _finalize():
        acc = acc_ref[...]
        y_ref[...] = acc.astype(y_ref.dtype)
        s_ref[...] += jnp.sum(acc, axis=0, keepdims=True)
        q_ref[...] += jnp.sum(acc * acc, axis=0, keepdims=True)


def _gemm_t_tanh_kernel(w_ref, c_ref, o_ref):
    # Transposed GEMM (Cout, K) @ (K, tm) with tanh fused (EUP slot).
    acc = jnp.dot(w_ref[...], c_ref[...], preferred_element_type=jnp.float32)
    o_ref[...] = jnp.tanh(acc).astype(o_ref.dtype)


def _scale_shift_relu_kernel(x_ref, sc_ref, sh_ref, o_ref):
    # Lane-dense fused BatchNorm(normalize) + ReLU: y = max(x*scale + shift, 0).
    x = x_ref[...].astype(jnp.float32)
    y = x * sc_ref[...] + sh_ref[...]
    o_ref[...] = jnp.maximum(y, 0.0).astype(o_ref.dtype)


# ----------------------------------------------------------------------------
# Pallas wrappers
# ----------------------------------------------------------------------------
def deconv_gemm_bnstats(a, w):
    """a: (P, M, K) bf16 im2col phases; w: (P, K, N) bf16.
    Returns y (P, M, N) bf16 plus f32 per-column sum / sum-of-squares over P,M."""
    p_, m, k = a.shape
    n = w.shape[-1]
    tm = _pick_tile(m, (512, 256, 128, 64, 32, 16, 8))
    tk = _pick_tile(k, (256, 128))
    grid = (p_, m // tm, k // tk)
    return pl.pallas_call(
        _gemm_bnstats_kernel,
        out_shape=(jax.ShapeDtypeStruct((p_, m, n), jnp.bfloat16),
                   jax.ShapeDtypeStruct((1, n), jnp.float32),
                   jax.ShapeDtypeStruct((1, n), jnp.float32)),
        grid=grid,
        in_specs=[pl.BlockSpec((None, tm, tk), lambda p, i, kk: (p, i, kk)),
                  pl.BlockSpec((None, tk, n), lambda p, i, kk: (p, kk, 0))],
        out_specs=(pl.BlockSpec((None, tm, n), lambda p, i, kk: (p, i, 0)),
                   pl.BlockSpec((1, n), lambda p, i, kk: (0, 0)),
                   pl.BlockSpec((1, n), lambda p, i, kk: (0, 0))),
        scratch_shapes=[pltpu.VMEM((tm, n), jnp.float32)],
        compiler_params=pltpu.CompilerParams(
            dimension_semantics=("arbitrary", "arbitrary", "arbitrary")),
    )(a, w)


def deconv_gemm_t_tanh(wt, colt):
    """wt: (P, Cout, K) bf16; colt: (P, K, M) bf16 -> tanh(W @ col): (P, Cout, M) f32."""
    p_, cout, k = wt.shape
    m = colt.shape[-1]
    tm = _pick_tile(m, (512, 256, 128))
    return pl.pallas_call(
        _gemm_t_tanh_kernel,
        out_shape=jax.ShapeDtypeStruct((p_, cout, m), jnp.float32),
        grid=(p_, m // tm),
        in_specs=[pl.BlockSpec((None, cout, k), lambda p, i: (p, 0, 0)),
                  pl.BlockSpec((None, k, tm), lambda p, i: (p, 0, i))],
        out_specs=pl.BlockSpec((None, cout, tm), lambda p, i: (p, 0, i)),
        compiler_params=pltpu.CompilerParams(
            dimension_semantics=("parallel", "parallel")),
    )(wt, colt)


def scale_shift_relu(x2, scale, shift):
    """x2: (R, L) bf16; scale/shift: (1, L) f32 -> bf16 max(x*scale + shift, 0)."""
    r, l = x2.shape
    tr = _pick_tile(r, (1024, 512, 256, 128, 64, 32, 16, 8))
    vec = pl.BlockSpec((1, l), lambda i: (0, 0))
    return pl.pallas_call(
        _scale_shift_relu_kernel,
        out_shape=jax.ShapeDtypeStruct((r, l), jnp.bfloat16),
        grid=(r // tr,),
        in_specs=[pl.BlockSpec((tr, l), lambda i: (i, 0)), vec, vec],
        out_specs=pl.BlockSpec((tr, l), lambda i: (i, 0)),
        compiler_params=pltpu.CompilerParams(dimension_semantics=("parallel",)),
    )(x2, scale, shift)


# ----------------------------------------------------------------------------
# Stride-phase ConvTranspose2d lowering (JAX glue around the kernels)
# ----------------------------------------------------------------------------
def _phase_weights(w):
    """ConvTranspose2d weight (Cin, Cout, 4, 4) -> per-phase GEMM weights (4, 4*Cin, Cout)."""
    w_all = []
    for ty in _TAPS:
        for tx in _TAPS:
            parts = [w[:, :, ky, kx] for (_, ky) in ty for (_, kx) in tx]
            w_all.append(jnp.concatenate(parts, axis=0))
    return jnp.stack(w_all, axis=0)


def _phase_cols(x):
    """NHWC input (B, H, W, Cin) -> per-phase im2col (4, B*H*W, 4*Cin)."""
    b, h, w, cin = x.shape
    xp = jnp.pad(x, ((0, 0), (1, 1), (1, 1), (0, 0)))
    cols = []
    for ty in _TAPS:
        for tx in _TAPS:
            parts = [xp[:, 1 + dy:1 + dy + h, 1 + dx:1 + dx + w, :]
                     for (dy, _) in ty for (dx, _) in tx]
            cols.append(jnp.concatenate(parts, axis=-1).reshape(b * h * w, 4 * cin))
    return jnp.stack(cols, axis=0)


def _phase_cols_t(x):
    """NHWC input -> channel-major per-phase im2col (4, 4*Cin, B*H*W)."""
    b, h, w, cin = x.shape
    xp = jnp.pad(x, ((0, 0), (1, 1), (1, 1), (0, 0)))
    xpt = jnp.transpose(xp, (3, 0, 1, 2))             # (Cin, B, H+2, W+2)
    cols = []
    for ty in _TAPS:
        for tx in _TAPS:
            parts = [xpt[:, :, 1 + dy:1 + dy + h, 1 + dx:1 + dx + w].reshape(cin, b * h * w)
                     for (dy, _) in ty for (dx, _) in tx]
            cols.append(jnp.concatenate(parts, axis=0))
    return jnp.stack(cols, axis=0)


def _phases_to_nhwc(yp, b, h, w, c):
    """(4, B*H*W, C) phase outputs -> (B, 2H, 2W, C)."""
    y = yp.reshape(2, 2, b, h, w, c)
    y = jnp.transpose(y, (2, 3, 0, 4, 1, 5))          # (B, H, py, W, px, C)
    return y.reshape(b, 2 * h, 2 * w, c)


def batchnorm_relu(y, ssum, ssq, gamma, beta, count, cout, spatial_in_n):
    """Training-mode BatchNorm (biased var) + ReLU, applied lane-dense."""
    if spatial_in_n:                       # layer 1: GEMM columns are (ky, kx, cout)
        ssum_c = jnp.sum(ssum.reshape(-1, cout), axis=0)
        ssq_c = jnp.sum(ssq.reshape(-1, cout), axis=0)
    else:
        ssum_c = ssum.reshape(cout)
        ssq_c = ssq.reshape(cout)
    mean = ssum_c / count
    var = jnp.maximum(ssq_c / count - mean * mean, 0.0)   # clamp fp cancellation
    scale = gamma * jax.lax.rsqrt(var + _BN_EPS)
    shift = beta - mean * scale

    # Lane-densify: channel counts < 128 get interleaved onto full 128-lane rows.
    if cout < 128 and 128 % cout == 0 and y.size % 128 == 0:
        lanes = 128
    else:
        lanes = cout
    reps = lanes // cout
    x2 = y.reshape(-1, lanes)
    sc2 = jnp.tile(scale, reps).reshape(1, lanes).astype(jnp.float32)
    sh2 = jnp.tile(shift, reps).reshape(1, lanes).astype(jnp.float32)
    return scale_shift_relu(x2, sc2, sh2).reshape(y.shape)


# ----------------------------------------------------------------------------
# netG forward
# ----------------------------------------------------------------------------
def make_layer_cfg(nz, ngf, nc):
    # (cin, cout, k, stride, pad, has_bn_relu)
    return [
        (nz,       ngf * 16, 4, 1, 0, True),
        (ngf * 16, ngf * 8,  4, 2, 1, True),
        (ngf * 8,  ngf * 4,  4, 2, 1, True),
        (ngf * 4,  ngf * 2,  4, 2, 1, True),
        (ngf * 2,  ngf,      4, 2, 1, True),
        (ngf,      nc,       4, 2, 1, False),   # -> Tanh
    ]


def init_params(key, cfg):
    params = []
    for (cin, cout, k, _s, _p, has_bn) in cfg:
        key, kw, kg, kb = jax.random.split(key, 4)
        w = 0.05 * jax.random.normal(kw, (cin, cout, k, k), jnp.float32)
        layer = {"w": w}
        if has_bn:
            layer["gamma"] = 1.0 + 0.02 * jax.random.normal(kg, (cout,), jnp.float32)
            layer["beta"] = 0.02 * jax.random.normal(kb, (cout,), jnp.float32)
        params.append(layer)
    return params


def netg_forward(x_nchw, params, cfg):
    b = x_nchw.shape[0]
    x = jnp.transpose(x_nchw, (0, 2, 3, 1)).astype(jnp.bfloat16)   # NHWC, bf16
    n_layers = len(cfg)
    out = None
    for idx, ((cin, cout, k, s, p, _has_bn), layer) in enumerate(zip(cfg, params)):
        w = layer["w"]
        last = idx == n_layers - 1

        if s == 1:
            # Layer 1: 1x1 spatial input, stride 1, pad 0 -> one GEMM (B, nz)@(nz, k*k*Cout).
            assert x.shape[1] == 1 and x.shape[2] == 1 and p == 0
            a = x.reshape(1, b, cin)
            wm = jnp.transpose(w, (0, 2, 3, 1)).reshape(1, cin, k * k * cout)
            y, ssum, ssq = deconv_gemm_bnstats(a, wm.astype(jnp.bfloat16))
            ybn = batchnorm_relu(y, ssum, ssq, layer["gamma"], layer["beta"],
                                 count=b * k * k, cout=cout, spatial_in_n=True)
            x = ybn.reshape(b, k, k, cout)
            continue

        h, wsp = x.shape[1], x.shape[2]
        m = b * h * wsp
        w_all = _phase_weights(w)                     # (4, 4*Cin, Cout)

        if last:
            # Final small-Cout layer: transposed GEMM (Cout, M) + fused tanh.
            colt = _phase_cols_t(x)                   # (4, 4*Cin, M) bf16
            wt = jnp.transpose(w_all, (0, 2, 1)).astype(jnp.bfloat16)
            yt = deconv_gemm_t_tanh(wt, colt)         # (4, Cout, M) f32
            y6 = yt.reshape(2, 2, cout, b, h, wsp)
            out = jnp.transpose(y6, (3, 2, 4, 0, 5, 1)).reshape(b, cout, 2 * h, 2 * wsp)
            break

        col = _phase_cols(x)                          # (4, M, 4*Cin) bf16
        y, ssum, ssq = deconv_gemm_bnstats(col, w_all.astype(jnp.bfloat16))
        ybn = batchnorm_relu(y, ssum, ssq, layer["gamma"], layer["beta"],
                             count=4 * m, cout=cout, spatial_in_n=False)
        x = _phases_to_nhwc(ybn, b, h, wsp, cout)
    return out


if __name__ == "__main__":
    # Small-but-consistent shapes: nz=16, ngf=8, nc=3, batch=2 -> out (2, 3, 128, 128).
    nz, ngf, nc, batch = 16, 8, 3, 2
    cfg = make_layer_cfg(nz, ngf, nc)

    key = jax.random.PRNGKey(0)
    key, kx = jax.random.split(key)
    params = init_params(key, cfg)
    x = jax.random.normal(kx, (batch, nz, 1, 1), jnp.float32)

    fwd = jax.jit(functools.partial(netg_forward, cfg=cfg))
    out = jax.block_until_ready(fwd(x, params))

    assert out.shape == (batch, nc, 128, 128), out.shape
    assert out.dtype == jnp.float32
    assert bool(jnp.all(jnp.isfinite(out)))
    assert bool(jnp.all(jnp.abs(out) <= 1.0 + 1e-6))   # tanh range
    print("KERNEL_OK")
</pallas_src>

<mosaic_0001>
module attributes {stable_mosaic.version = 11 : i64} {
  func.func @_gemm_bnstats_kernel(%arg0: i32, %arg1: i32, %arg2: i32, %arg3: memref<1x2x16xbf16, #tpu.memory_space<vmem>>, %arg4: memref<1x16x2048xbf16, #tpu.memory_space<vmem>>, %arg5: memref<1x2x2048xbf16, #tpu.memory_space<vmem>>, %arg6: memref<1x2048xf32, #tpu.memory_space<vmem>>, %arg7: memref<1x2048xf32, #tpu.memory_space<vmem>>, %arg8: memref<2x2048xf32, #tpu.memory_space<vmem>>) attributes {dimension_semantics = [#tpu.dimension_semantics<arbitrary>, #tpu.dimension_semantics<arbitrary>, #tpu.dimension_semantics<arbitrary>], iteration_bounds = array<i64: 1, 1, 1>, scalar_prefetch = 0 : i64, scratch_operands = 1 : i64, tpu.core_type = #tpu.core_type<tc>, window_params = [{transform_indices = @transform_0, window_bounds = array<i64: 1, 2, 16>}, {transform_indices = @transform_1, window_bounds = array<i64: 1, 16, 2048>}, {transform_indices = @transform_2, window_bounds = array<i64: 1, 2, 2048>}, {pipeline_mode = #tpu.pipeline_mode<synchronous>, transform_indices = @transform_3, window_bounds = array<i64: 1, 2048>}, {pipeline_mode = #tpu.pipeline_mode<synchronous>, transform_indices = @transform_4, window_bounds = array<i64: 1, 2048>}]} {
    %c0_i32 = arith.constant 0 : i32
    %0 = arith.cmpi eq, %arg0, %c0_i32 : i32
    %c0_i32_0 = arith.constant 0 : i32
    %1 = arith.cmpi eq, %arg1, %c0_i32_0 : i32
    %2 = arith.andi %0, %1 : i1
    %c0_i32_1 = arith.constant 0 : i32
    %3 = arith.cmpi eq, %arg2, %c0_i32_1 : i32
    %4 = arith.andi %2, %3 : i1
    %5 = arith.extui %4 : i1 to i32
    %c0_i32_2 = arith.constant 0 : i32
    %6 = arith.cmpi ne, %5, %c0_i32_2 : i32
    scf.if %6 {
      %cst_16 = arith.constant 0.000000e+00 : f32
      %21 = vector.broadcast %cst_16 : f32 to vector<1x2048xf32>
      %c0_17 = arith.constant 0 : index
      %c0_18 = arith.constant 0 : index
      %22 = vector.load %arg6[%c0_17, %c0_18] : memref<1x2048xf32, #tpu.memory_space<vmem>>, vector<1x2048xf32>
      tpu.vector_store %arg6[%c0_17, %c0_18], %21 {strides = array<i32>} : memref<1x2048xf32, #tpu.memory_space<vmem>>, vector<1x2048xf32>,
      %cst_19 = arith.constant 0.000000e+00 : f32
      %23 = vector.broadcast %cst_19 : f32 to vector<1x2048xf32>
      %c0_20 = arith.constant 0 : index
      %c0_21 = arith.constant 0 : index
      %24 = vector.load %arg7[%c0_20, %c0_21] : memref<1x2048xf32, #tpu.memory_space<vmem>>, vector<1x2048xf32>
      tpu.vector_store %arg7[%c0_20, %c0_21], %23 {strides = array<i32>} : memref<1x2048xf32, #tpu.memory_space<vmem>>, vector<1x2048xf32>,
    } else {
    }
    %c0_i32_3 = arith.constant 0 : i32
    %7 = arith.cmpi eq, %arg2, %c0_i32_3 : i32
    %8 = arith.extui %7 : i1 to i32
    %c0_i32_4 = arith.constant 0 : i32
    %9 = arith.cmpi ne, %8, %c0_i32_4 : i32
    scf.if %9 {
      %cst_16 = arith.constant 0.000000e+00 : f32
      %21 = vector.broadcast %cst_16 : f32 to vector<2x2048xf32>
      %c0_17 = arith.constant 0 : index
      %c0_18 = arith.constant 0 : index
      %22 = vector.load %arg8[%c0_17, %c0_18] : memref<2x2048xf32, #tpu.memory_space<vmem>>, vector<2x2048xf32>
      tpu.vector_store %arg8[%c0_17, %c0_18], %21 {strides = array<i32>} : memref<2x2048xf32, #tpu.memory_space<vmem>>, vector<2x2048xf32>,
    } else {
    }
    %c0 = arith.constant 0 : index
    %c0_5 = arith.constant 0 : index
    %10 = vector.load %arg8[%c0, %c0_5] : memref<2x2048xf32, #tpu.memory_space<vmem>>, vector<2x2048xf32>
    %c0_6 = arith.constant 0 : index
    %c0_7 = arith.constant 0 : index
    %c0_8 = arith.constant 0 : index
    %11 = vector.load %arg3[%c0_6, %c0_7, %c0_8] : memref<1x2x16xbf16, #tpu.memory_space<vmem>>, vector<1x2x16xbf16>
    %12 = vector.shape_cast %11 : vector<1x2x16xbf16> to vector<2x16xbf16>
    %c0_9 = arith.constant 0 : index
    %c0_10 = arith.constant 0 : index
    %c0_11 = arith.constant 0 : index
    %13 = vector.load %arg4[%c0_9, %c0_10, %c0_11] : memref<1x16x2048xbf16, #tpu.memory_space<vmem>>, vector<1x16x2048xbf16>
    %14 = vector.shape_cast %13 : vector<1x16x2048xbf16> to vector<16x2048xbf16>
    %cst = arith.constant dense<0.000000e+00> : vector<2x2048xf32>
    %15 = tpu.matmul %12, %14, %cst {dimension_numbers = #tpu.dot_dimension_numbers<[1], [0], [0], [1], [0, 0, 1, 1], [], []>} : vector<2x16xbf16>, vector<16x2048xbf16>, vector<2x2048xf32> -> vector<2x2048xf32>
    %16 = arith.addf %10, %15 : vector<2x2048xf32>
    %c0_12 = arith.constant 0 : index
    %c0_13 = arith.constant 0 : index
    %17 = vector.load %arg8[%c0_12, %c0_13] : memref<2x2048xf32, #tpu.memory_space<vmem>>, vector<2x2048xf32>
    tpu.vector_store %arg8[%c0_12, %c0_13], %16 {strides = array<i32>} : memref<2x2048xf32, #tpu.memory_space<vmem>>, vector<2x2048xf32>,
    %c0_i32_14 = arith.constant 0 : i32
    %18 = arith.cmpi eq, %arg2, %c0_i32_14 : i32
    %19 = arith.extui %18 : i1 to i32
    %c0_i32_15 = arith.constant 0 : i32
    %20 = arith.cmpi ne, %19, %c0_i32_15 : i32
    scf.if %20 {
      %c0_16 = arith.constant 0 : index
      %c0_17 = arith.constant 0 : index
      %21 = vector.load %arg8[%c0_16, %c0_17] : memref<2x2048xf32, #tpu.memory_space<vmem>>, vector<2x2048xf32>
      %22 = arith.truncf %21 : vector<2x2048xf32> to vector<2x2048xbf16>
      %c0_18 = arith.constant 0 : index
      %c0_19 = arith.constant 0 : index
      %c0_20 = arith.constant 0 : index
      %23 = vector.load %arg5[%c0_18, %c0_19, %c0_20] : memref<1x2x2048xbf16, #tpu.memory_space<vmem>>, vector<1x2x2048xbf16>
      %24 = vector.shape_cast %23 : vector<1x2x2048xbf16> to vector<2x2048xbf16>
      %25 = vector.shape_cast %22 : vector<2x2048xbf16> to vector<1x2x2048xbf16>
      tpu.vector_store %arg5[%c0_18, %c0_19, %c0_20], %25 {strides = array<i32>} : memref<1x2x2048xbf16, #tpu.memory_space<vmem>>, vector<1x2x2048xbf16>,
      %c0_21 = arith.constant 0 : index
      %c0_22 = arith.constant 0 : index
      %26 = vector.load %arg6[%c0_21, %c0_22] : memref<1x2048xf32, #tpu.memory_space<vmem>>, vector<1x2048xf32>
      %cst_23 = arith.constant dense<0.000000e+00> : vector<2048xf32>
      %27 = vector.multi_reduction <add>, %21, %cst_23 [0] : vector<2x2048xf32> to vector<2048xf32>
      %28 = vector.shape_cast %27 : vector<2048xf32> to vector<1x2048xf32>
      %29 = arith.addf %26, %28 : vector<1x2048xf32>
      %c0_24 = arith.constant 0 : index
      %c0_25 = arith.constant 0 : index
      %30 = vector.load %arg6[%c0_24, %c0_25] : memref<1x2048xf32, #tpu.memory_space<vmem>>, vector<1x2048xf32>
      tpu.vector_store %arg6[%c0_24, %c0_25], %29 {strides = array<i32>} : memref<1x2048xf32, #tpu.memory_space<vmem>>, vector<1x2048xf32>,
      %c0_26 = arith.constant 0 : index
      %c0_27 = arith.constant 0 : index
      %31 = vector.load %arg7[%c0_26, %c0_27] : memref<1x2048xf32, #tpu.memory_space<vmem>>, vector<1x2048xf32>
      %32 = arith.mulf %21, %21 : vector<2x2048xf32>
      %cst_28 = arith.constant dense<0.000000e+00> : vector<2048xf32>
      %33 = vector.multi_reduction <add>, %32, %cst_28 [0] : vector<2x2048xf32> to vector<2048xf32>
      %34 = vector.shape_cast %33 : vector<2048xf32> to vector<1x2048xf32>
      %35 = arith.addf %31, %34 : vector<1x2048xf32>
      %c0_29 = arith.constant 0 : index
      %c0_30 = arith.constant 0 : index
      %36 = vector.load %arg7[%c0_29, %c0_30] : memref<1x2048xf32, #tpu.memory_space<vmem>>, vector<1x2048xf32>
      tpu.vector_store %arg7[%c0_29, %c0_30], %35 {strides = array<i32>} : memref<1x2048xf32, #tpu.memory_space<vmem>>, vector<1x2048xf32>,
    } else {
    }
    return
  }
  func.func @transform_0(%arg0: i32, %arg1: i32, %arg2: i32) -> (i32, i32, i32) {
    %c0_i32 = arith.constant 0 : i32
    return %arg0, %arg1, %arg2 : i32, i32, i32
  }
  func.func @transform_1(%arg0: i32, %arg1: i32, %arg2: i32) -> (i32, i32, i32) {
    %c0_i32 = arith.constant 0 : i32
    %c0_i32_0 = arith.constant 0 : i32
    return %arg0, %arg2, %c0_i32 : i32, i32, i32
  }
  func.func @transform_2(%arg0: i32, %arg1: i32, %arg2: i32) -> (i32, i32, i32) {
    %c0_i32 = arith.constant 0 : i32
    %c0_i32_0 = arith.constant 0 : i32
    return %arg0, %arg1, %c0_i32 : i32, i32, i32
  }
  func.func @transform_3(%arg0: i32, %arg1: i32, %arg2: i32) -> (i32, i32) {
    %c0_i32 = arith.constant 0 : i32
    %c0_i32_0 = arith.constant 0 : i32
    %c0_i32_1 = arith.constant 0 : i32
    return %c0_i32, %c0_i32_0 : i32, i32
  }
  func.func @transform_4(%arg0: i32, %arg1: i32, %arg2: i32) -> (i32, i32) {
    %c0_i32 = arith.constant 0 : i32
    %c0_i32_0 = arith.constant 0 : i32
    %c0_i32_1 = arith.constant 0 : i32
    return %c0_i32, %c0_i32_0 : i32, i32
  }
}

module attributes {stable_mosaic.version = 11 : i64} {
  func.func @_scale_shift_relu_kernel(%arg0: i32, %arg1: memref<32x128xbf16, #tpu.memory_space<vmem>>, %arg2: memref<1x128xf32, #tpu.memory_space<vmem>>, %arg3: memref<1x128xf32, #tpu.memory_space<vmem>>, %arg4: memref<32x128xbf16, #tpu.memory_space<vmem>>) attributes {dimension_semantics = [#tpu.dimension_semantics<parallel>], iteration_bounds = array<i64: 1>, scalar_prefetch = 0 : i64, scratch_operands = 0 : i64, tpu.core_type = #tpu.core_type<tc>, window_params = [{transform_indices = @transform_0, window_bounds = array<i64: 32, 128>}, {pipeline_mode = #tpu.pipeline_mode<synchronous>, transform_indices = @transform_1, window_bounds = array<i64: 1, 128>}, {pipeline_mode = #tpu.pipeline_mode<synchronous>, transform_indices = @transform_2, window_bounds = array<i64: 1, 128>}, {transform_indices = @transform_3, window_bounds = array<i64: 32, 128>}]} {
    %c0 = arith.constant 0 : index
    %c0_0 = arith.constant 0 : index
    %0 = vector.load %arg1[%c0, %c0_0] : memref<32x128xbf16, #tpu.memory_space<vmem>>, vector<32x128xbf16>
    %1 = arith.extf %0 : vector<32x128xbf16> to vector<32x128xf32>
    %c0_1 = arith.constant 0 : index
    %c0_2 = arith.constant 0 : index
    %2 = vector.load %arg2[%c0_1, %c0_2] : memref<1x128xf32, #tpu.memory_space<vmem>>, vector<1x128xf32>
    %3 = vector.broadcast %2 : vector<1x128xf32> to vector<32x128xf32>
    %4 = arith.mulf %1, %3 : vector<32x128xf32>
    %c0_3 = arith.constant 0 : index
    %c0_4 = arith.constant 0 : index
    %5 = vector.load %arg3[%c0_3, %c0_4] : memref<1x128xf32, #tpu.memory_space<vmem>>, vector<1x128xf32>
    %6 = vector.broadcast %5 : vector<1x128xf32> to vector<32x128xf32>
    %7 = arith.addf %4, %6 : vector<32x128xf32>
    %cst = arith.constant 0.000000e+00 : f32
    %8 = vector.broadcast %cst : f32 to vector<32x128xf32>
    %9 = arith.maximumf %7, %8 : vector<32x128xf32>
    %10 = arith.truncf %9 : vector<32x128xf32> to vector<32x128xbf16>
    %c0_5 = arith.constant 0 : index
    %c0_6 = arith.constant 0 : index
    %11 = vector.load %arg4[%c0_5, %c0_6] : memref<32x128xbf16, #tpu.memory_space<vmem>>, vector<32x128xbf16>
    tpu.vector_store %arg4[%c0_5, %c0_6], %10 {strides = array<i32>} : memref<32x128xbf16, #tpu.memory_space<vmem>>, vector<32x128xbf16>,
    return
  }
  func.func @transform_0(%arg0: i32) -> (i32, i32) {
    %c0_i32 = arith.constant 0 : i32
    %c0_i32_0 = arith.constant 0 : i32
    return %arg0, %c0_i32 : i32, i32
  }
  func.func @transform_1(%arg0: i32) -> (i32, i32) {
    %c0_i32 = arith.constant 0 : i32
    %c0_i32_0 = arith.constant 0 : i32
    %c0_i32_1 = arith.constant 0 : i32
    return %c0_i32, %c0_i32_0 : i32, i32
  }
  func.func @transform_2(%arg0: i32) -> (i32, i32) {
    %c0_i32 = arith.constant 0 : i32
    %c0_i32_0 = arith.constant 0 : i32
    %c0_i32_1 = arith.constant 0 : i32
    return %c0_i32, %c0_i32_0 : i32, i32
  }
  func.func @transform_3(%arg0: i32) -> (i32, i32) {
    %c0_i32 = arith.constant 0 : i32
    %c0_i32_0 = arith.constant 0 : i32
    return %arg0, %c0_i32 : i32, i32
  }
}

module attributes {stable_mosaic.version = 11 : i64} {
  func.func @_gemm_bnstats_kernel(%arg0: i32, %arg1: i32, %arg2: i32, %arg3: memref<1x32x256xbf16, #tpu.memory_space<vmem>>, %arg4: memref<1x256x64xbf16, #tpu.memory_space<vmem>>, %arg5: memref<1x32x64xbf16, #tpu.memory_space<vmem>>, %arg6: memref<1x64xf32, #tpu.memory_space<vmem>>, %arg7: memref<1x64xf32, #tpu.memory_space<vmem>>, %arg8: memref<32x64xf32, #tpu.memory_space<vmem>>) attributes {dimension_semantics = [#tpu.dimension_semantics<arbitrary>, #tpu.dimension_semantics<arbitrary>, #tpu.dimension_semantics<arbitrary>], iteration_bounds = array<i64: 4, 1, 2>, scalar_prefetch = 0 : i64, scratch_operands = 1 : i64, tpu.core_type = #tpu.core_type<tc>, window_params = [{transform_indices = @transform_0, window_bounds = array<i64: 1, 32, 256>}, {transform_indices = @transform_1, window_bounds = array<i64: 1, 256, 64>}, {transform_indices = @transform_2, window_bounds = array<i64: 1, 32, 64>}, {pipeline_mode = #tpu.pipeline_mode<synchronous>, transform_indices = @transform_3, window_bounds = array<i64: 1, 64>}, {pipeline_mode = #tpu.pipeline_mode<synchronous>, transform_indices = @transform_4, window_bounds = array<i64: 1, 64>}]} {
    %c0_i32 = arith.constant 0 : i32
    %0 = arith.cmpi eq, %arg0, %c0_i32 : i32
    %c0_i32_0 = arith.constant 0 : i32
    %1 = arith.cmpi eq, %arg1, %c0_i32_0 : i32
    %2 = arith.andi %0, %1 : i1
    %c0_i32_1 = arith.constant 0 : i32
    %3 = arith.cmpi eq, %arg2, %c0_i32_1 : i32
    %4 = arith.andi %2, %3 : i1
    %5 = arith.extui %4 : i1 to i32
    %c0_i32_2 = arith.constant 0 : i32
    %6 = arith.cmpi ne, %5, %c0_i32_2 : i32
    scf.if %6 {
      %cst_15 = arith.constant 0.000000e+00 : f32
      %21 = vector.broadcast %cst_15 : f32 to vector<1x64xf32>
      %c0_16 = arith.constant 0 : index
      %c0_17 = arith.constant 0 : index
      %22 = vector.load %arg6[%c0_16, %c0_17] : memref<1x64xf32, #tpu.memory_space<vmem>>, vector<1x64xf32>
      tpu.vector_store %arg6[%c0_16, %c0_17], %21 {strides = array<i32>} : memref<1x64xf32, #tpu.memory_space<vmem>>, vector<1x64xf32>,
      %cst_18 = arith.constant 0.000000e+00 : f32
      %23 = vector.broadcast %cst_18 : f32 to vector<1x64xf32>
      %c0_19 = arith.constant 0 : index
      %c0_20 = arith.constant 0 : index
      %24 = vector.load %arg7[%c0_19, %c0_20] : memref<1x64xf32, #tpu.memory_space<vmem>>, vector<1x64xf32>
      tpu.vector_store %arg7[%c0_19, %c0_20], %23 {strides = array<i32>} : memref<1x64xf32, #tpu.memory_space<vmem>>, vector<1x64xf32>,
    } else {
    }
    %c0_i32_3 = arith.constant 0 : i32
    %7 = arith.cmpi eq, %arg2, %c0_i32_3 : i32
    %8 = arith.extui %7 : i1 to i32
    %c0_i32_4 = arith.constant 0 : i32
    %9 = arith.cmpi ne, %8, %c0_i32_4 : i32
    scf.if %9 {
      %cst_15 = arith.constant 0.000000e+00 : f32
      %21 = vector.broadcast %cst_15 : f32 to vector<32x64xf32>
      %c0_16 = arith.constant 0 : index
      %c0_17 = arith.constant 0 : index
      %22 = vector.load %arg8[%c0_16, %c0_17] : memref<32x64xf32, #tpu.memory_space<vmem>>, vector<32x64xf32>
      tpu.vector_store %arg8[%c0_16, %c0_17], %21 {strides = array<i32>} : memref<32x64xf32, #tpu.memory_space<vmem>>, vector<32x64xf32>,
    } else {
    }
    %c0 = arith.constant 0 : index
    %c0_5 = arith.constant 0 : index
    %10 = vector.load %arg8[%c0, %c0_5] : memref<32x64xf32, #tpu.memory_space<vmem>>, vector<32x64xf32>
    %c0_6 = arith.constant 0 : index
    %c0_7 = arith.constant 0 : index
    %c0_8 = arith.constant 0 : index
    %11 = vector.load %arg3[%c0_6, %c0_7, %c0_8] : memref<1x32x256xbf16, #tpu.memory_space<vmem>>, vector<1x32x256xbf16>
    %12 = vector.shape_cast %11 : vector<1x32x256xbf16> to vector<32x256xbf16>
    %c0_9 = arith.constant 0 : index
    %c0_10 = arith.constant 0 : index
    %c0_11 = arith.constant 0 : index
    %13 = vector.load %arg4[%c0_9, %c0_10, %c0_11] : memref<1x256x64xbf16, #tpu.memory_space<vmem>>, vector<1x256x64xbf16>
    %14 = vector.shape_cast %13 : vector<1x256x64xbf16> to vector<256x64xbf16>
    %cst = arith.constant dense<0.000000e+00> : vector<32x64xf32>
    %15 = tpu.matmul %12, %14, %cst {dimension_numbers = #tpu.dot_dimension_numbers<[1], [0], [0], [1], [0, 0, 1, 1], [], []>} : vector<32x256xbf16>, vector<256x64xbf16>, vector<32x64xf32> -> vector<32x64xf32>
    %16 = arith.addf %10, %15 : vector<32x64xf32>
    %c0_12 = arith.constant 0 : index
    %c0_13 = arith.constant 0 : index
    %17 = vector.load %arg8[%c0_12, %c0_13] : memref<32x64xf32, #tpu.memory_space<vmem>>, vector<32x64xf32>
    tpu.vector_store %arg8[%c0_12, %c0_13], %16 {strides = array<i32>} : memref<32x64xf32, #tpu.memory_space<vmem>>, vector<32x64xf32>,
    %c1_i32 = arith.constant 1 : i32
    %18 = arith.cmpi eq, %arg2, %c1_i32 : i32
    %19 = arith.extui %18 : i1 to i32
    %c0_i32_14 = arith.constant 0 : i32
    %20 = arith.cmpi ne, %19, %c0_i32_14 : i32
    scf.if %20 {
      %c0_15 = arith.constant 0 : index
      %c0_16 = arith.constant 0 : index
      %21 = vector.load %arg8[%c0_15, %c0_16] : memref<32x64xf32, #tpu.memory_space<vmem>>, vector<32x64xf32>
      %22 = arith.truncf %21 : vector<32x64xf32> to vector<32x64xbf16>
      %c0_17 = arith.constant 0 : index
      %c0_18 = arith.constant 0 : index
      %c0_19 = arith.constant 0 : index
      %23 = vector.load %arg5[%c0_17, %c0_18, %c0_19] : memref<1x32x64xbf16, #tpu.memory_space<vmem>>, vector<1x32x64xbf16>
      %24 = vector.shape_cast %23 : vector<1x32x64xbf16> to vector<32x64xbf16>
      %25 = vector.shape_cast %22 : vector<32x64xbf16> to vector<1x32x64xbf16>
      tpu.vector_store %arg5[%c0_17, %c0_18, %c0_19], %25 {strides = array<i32>} : memref<1x32x64xbf16, #tpu.memory_space<vmem>>, vector<1x32x64xbf16>,
      %c0_20 = arith.constant 0 : index
      %c0_21 = arith.constant 0 : index
      %26 = vector.load %arg6[%c0_20, %c0_21] : memref<1x64xf32, #tpu.memory_space<vmem>>, vector<1x64xf32>
      %cst_22 = arith.constant dense<0.000000e+00> : vector<64xf32>
      %27 = vector.multi_reduction <add>, %21, %cst_22 [0] : vector<32x64xf32> to vector<64xf32>
      %28 = vector.shape_cast %27 : vector<64xf32> to vector<1x64xf32>
      %29 = arith.addf %26, %28 : vector<1x64xf32>
      %c0_23 = arith.constant 0 : index
      %c0_24 = arith.constant 0 : index
      %30 = vector.load %arg6[%c0_23, %c0_24] : memref<1x64xf32, #tpu.memory_space<vmem>>, vector<1x64xf32>
      tpu.vector_store %arg6[%c0_23, %c0_24], %29 {strides = array<i32>} : memref<1x64xf32, #tpu.memory_space<vmem>>, vector<1x64xf32>,
      %c0_25 = arith.constant 0 : index
      %c0_26 = arith.constant 0 : index
      %31 = vector.load %arg7[%c0_25, %c0_26] : memref<1x64xf32, #tpu.memory_space<vmem>>, vector<1x64xf32>
      %32 = arith.mulf %21, %21 : vector<32x64xf32>
      %cst_27 = arith.constant dense<0.000000e+00> : vector<64xf32>
      %33 = vector.multi_reduction <add>, %32, %cst_27 [0] : vector<32x64xf32> to vector<64xf32>
      %34 = vector.shape_cast %33 : vector<64xf32> to vector<1x64xf32>
      %35 = arith.addf %31, %34 : vector<1x64xf32>
      %c0_28 = arith.constant 0 : index
      %c0_29 = arith.constant 0 : index
      %36 = vector.load %arg7[%c0_28, %c0_29] : memref<1x64xf32, #tpu.memory_space<vmem>>, vector<1x64xf32>
      tpu.vector_store %arg7[%c0_28, %c0_29], %35 {strides = array<i32>} : memref<1x64xf32, #tpu.memory_space<vmem>>, vector<1x64xf32>,
    } else {
    }
    return
  }
  func.func @transform_0(%arg0: i32, %arg1: i32, %arg2: i32) -> (i32, i32, i32) {
    %c0_i32 = arith.constant 0 : i32
    return %arg0, %arg1, %arg2 : i32, i32, i32
  }
  func.func @transform_1(%arg0: i32, %arg1: i32, %arg2: i32) -> (i32, i32, i32) {
    %c0_i32 = arith.constant 0 : i32
    %c0_i32_0 = arith.constant 0 : i32
    return %arg0, %arg2, %c0_i32 : i32, i32, i32
  }
  func.func @transform_2(%arg0: i32, %arg1: i32, %arg2: i32) -> (i32, i32, i32) {
    %c0_i32 = arith.constant 0 : i32
    %c0_i32_0 = arith.constant 0 : i32
    return %arg0, %arg1, %c0_i32 : i32, i32, i32
  }
  func.func @transform_3(%arg0: i32, %arg1: i32, %arg2: i32) -> (i32, i32) {
    %c0_i32 = arith.constant 0 : i32
    %c0_i32_0 = arith.constant 0 : i32
    %c0_i32_1 = arith.constant 0 : i32
    return %c0_i32, %c0_i32_0 : i32, i32
  }
  func.func @transform_4(%arg0: i32, %arg1: i32, %arg2: i32) -> (i32, i32) {
    %c0_i32 = arith.constant 0 : i32
    %c0_i32_0 = arith.constant 0 : i32
    %c0_i32_1 = arith.constant 0 : i32
    return %c0_i32, %c0_i32_0 : i32, i32
  }
}

module attributes {stable_mosaic.version = 11 : i64} {
  func.func @_scale_shift_relu_kernel(%arg0: i32, %arg1: memref<64x128xbf16, #tpu.memory_space<vmem>>, %arg2: memref<1x128xf32, #tpu.memory_space<vmem>>, %arg3: memref<1x128xf32, #tpu.memory_space<vmem>>, %arg4: memref<64x128xbf16, #tpu.memory_space<vmem>>) attributes {dimension_semantics = [#tpu.dimension_semantics<parallel>], iteration_bounds = array<i64: 1>, scalar_prefetch = 0 : i64, scratch_operands = 0 : i64, tpu.core_type = #tpu.core_type<tc>, window_params = [{transform_indices = @transform_0, window_bounds = array<i64: 64, 128>}, {pipeline_mode = #tpu.pipeline_mode<synchronous>, transform_indices = @transform_1, window_bounds = array<i64: 1, 128>}, {pipeline_mode = #tpu.pipeline_mode<synchronous>, transform_indices = @transform_2, window_bounds = array<i64: 1, 128>}, {transform_indices = @transform_3, window_bounds = array<i64: 64, 128>}]} {
    %c0 = arith.constant 0 : index
    %c0_0 = arith.constant 0 : index
    %0 = vector.load %arg1[%c0, %c0_0] : memref<64x128xbf16, #tpu.memory_space<vmem>>, vector<64x128xbf16>
    %1 = arith.extf %0 : vector<64x128xbf16> to vector<64x128xf32>
    %c0_1 = arith.constant 0 : index
    %c0_2 = arith.constant 0 : index
    %2 = vector.load %arg2[%c0_1, %c0_2] : memref<1x128xf32, #tpu.memory_space<vmem>>, vector<1x128xf32>
    %3 = vector.broadcast %2 : vector<1x128xf32> to vector<64x128xf32>
    %4 = arith.mulf %1, %3 : vector<64x128xf32>
    %c0_3 = arith.constant 0 : index
    %c0_4 = arith.constant 0 : index
    %5 = vector.load %arg3[%c0_3, %c0_4] : memref<1x128xf32, #tpu.memory_space<vmem>>, vector<1x128xf32>
    %6 = vector.broadcast %5 : vector<1x128xf32> to vector<64x128xf32>
    %7 = arith.addf %4, %6 : vector<64x128xf32>
    %cst = arith.constant 0.000000e+00 : f32
    %8 = vector.broadcast %cst : f32 to vector<64x128xf32>
    %9 = arith.maximumf %7, %8 : vector<64x128xf32>
    %10 = arith.truncf %9 : vector<64x128xf32> to vector<64x128xbf16>
    %c0_5 = arith.constant 0 : index
    %c0_6 = arith.constant 0 : index
    %11 = vector.load %arg4[%c0_5, %c0_6] : memref<64x128xbf16, #tpu.memory_space<vmem>>, vector<64x128xbf16>
    tpu.vector_store %arg4[%c0_5, %c0_6], %10 {strides = array<i32>} : memref<64x128xbf16, #tpu.memory_space<vmem>>, vector<64x128xbf16>,
    return
  }
  func.func @transform_0(%arg0: i32) -> (i32, i32) {
    %c0_i32 = arith.constant 0 : i32
    %c0_i32_0 = arith.constant 0 : i32
    return %arg0, %c0_i32 : i32, i32
  }
  func.func @transform_1(%arg0: i32) -> (i32, i32) {
    %c0_i32 = arith.constant 0 : i32
    %c0_i32_0 = arith.constant 0 : i32
    %c0_i32_1 = arith.constant 0 : i32
    return %c0_i32, %c0_i32_0 : i32, i32
  }
  func.func @transform_2(%arg0: i32) -> (i32, i32) {
    %c0_i32 = arith.constant 0 : i32
    %c0_i32_0 = arith.constant 0 : i32
    %c0_i32_1 = arith.constant 0 : i32
    return %c0_i32, %c0_i32_0 : i32, i32
  }
  func.func @transform_3(%arg0: i32) -> (i32, i32) {
    %c0_i32 = arith.constant 0 : i32
    %c0_i32_0 = arith.constant 0 : i32
    return %arg0, %c0_i32 : i32, i32
  }
}

module attributes {stable_mosaic.version = 11 : i64} {
  func.func @_gemm_bnstats_kernel(%arg0: i32, %arg1: i32, %arg2: i32, %arg3: memref<1x128x256xbf16, #tpu.memory_space<vmem>>, %arg4: memref<1x256x32xbf16, #tpu.memory_space<vmem>>, %arg5: memref<1x128x32xbf16, #tpu.memory_space<vmem>>, %arg6: memref<1x32xf32, #tpu.memory_space<vmem>>, %arg7: memref<1x32xf32, #tpu.memory_space<vmem>>, %arg8: memref<128x32xf32, #tpu.memory_space<vmem>>) attributes {dimension_semantics = [#tpu.dimension_semantics<arbitrary>, #tpu.dimension_semantics<arbitrary>, #tpu.dimension_semantics<arbitrary>], iteration_bounds = array<i64: 4, 1, 1>, scalar_prefetch = 0 : i64, scratch_operands = 1 : i64, tpu.core_type = #tpu.core_type<tc>, window_params = [{transform_indices = @transform_0, window_bounds = array<i64: 1, 128, 256>}, {transform_indices = @transform_1, window_bounds = array<i64: 1, 256, 32>}, {transform_indices = @transform_2, window_bounds = array<i64: 1, 128, 32>}, {pipeline_mode = #tpu.pipeline_mode<synchronous>, transform_indices = @transform_3, window_bounds = array<i64: 1, 32>}, {pipeline_mode = #tpu.pipeline_mode<synchronous>, transform_indices = @transform_4, window_bounds = array<i64: 1, 32>}]} {
    %c0_i32 = arith.constant 0 : i32
    %0 = arith.cmpi eq, %arg0, %c0_i32 : i32
    %c0_i32_0 = arith.constant 0 : i32
    %1 = arith.cmpi eq, %arg1, %c0_i32_0 : i32
    %2 = arith.andi %0, %1 : i1
    %c0_i32_1 = arith.constant 0 : i32
    %3 = arith.cmpi eq, %arg2, %c0_i32_1 : i32
    %4 = arith.andi %2, %3 : i1
    %5 = arith.extui %4 : i1 to i32
    %c0_i32_2 = arith.constant 0 : i32
    %6 = arith.cmpi ne, %5, %c0_i32_2 : i32
    scf.if %6 {
      %cst_16 = arith.constant 0.000000e+00 : f32
      %21 = vector.broadcast %cst_16 : f32 to vector<1x32xf32>
      %c0_17 = arith.constant 0 : index
      %c0_18 = arith.constant 0 : index
      %22 = vector.load %arg6[%c0_17, %c0_18] : memref<1x32xf32, #tpu.memory_space<vmem>>, vector<1x32xf32>
      tpu.vector_store %arg6[%c0_17, %c0_18], %21 {strides = array<i32>} : memref<1x32xf32, #tpu.memory_space<vmem>>, vector<1x32xf32>,
      %cst_19 = arith.constant 0.000000e+00 : f32
      %23 = vector.broadcast %cst_19 : f32 to vector<1x32xf32>
      %c0_20 = arith.constant 0 : index
      %c0_21 = arith.constant 0 : index
      %24 = vector.load %arg7[%c0_20, %c0_21] : memref<1x32xf32, #tpu.memory_space<vmem>>, vector<1x32xf32>
      tpu.vector_store %arg7[%c0_20, %c0_21], %23 {strides = array<i32>} : memref<1x32xf32, #tpu.memory_space<vmem>>, vector<1x32xf32>,
    } else {
    }
    %c0_i32_3 = arith.constant 0 : i32
    %7 = arith.cmpi eq, %arg2, %c0_i32_3 : i32
    %8 = arith.extui %7 : i1 to i32
    %c0_i32_4 = arith.constant 0 : i32
    %9 = arith.cmpi ne, %8, %c0_i32_4 : i32
    scf.if %9 {
      %cst_16 = arith.constant 0.000000e+00 : f32
      %21 = vector.broadcast %cst_16 : f32 to vector<128x32xf32>
      %c0_17 = arith.constant 0 : index
      %c0_18 = arith.constant 0 : index
      %22 = vector.load %arg8[%c0_17, %c0_18] : memref<128x32xf32, #tpu.memory_space<vmem>>, vector<128x32xf32>
      tpu.vector_store %arg8[%c0_17, %c0_18], %21 {strides = array<i32>} : memref<128x32xf32, #tpu.memory_space<vmem>>, vector<128x32xf32>,
    } else {
    }
    %c0 = arith.constant 0 : index
    %c0_5 = arith.constant 0 : index
    %10 = vector.load %arg8[%c0, %c0_5] : memref<128x32xf32, #tpu.memory_space<vmem>>, vector<128x32xf32>
    %c0_6 = arith.constant 0 : index
    %c0_7 = arith.constant 0 : index
    %c0_8 = arith.constant 0 : index
    %11 = vector.load %arg3[%c0_6, %c0_7, %c0_8] : memref<1x128x256xbf16, #tpu.memory_space<vmem>>, vector<1x128x256xbf16>
    %12 = vector.shape_cast %11 : vector<1x128x256xbf16> to vector<128x256xbf16>
    %c0_9 = arith.constant 0 : index
    %c0_10 = arith.constant 0 : index
    %c0_11 = arith.constant 0 : index
    %13 = vector.load %arg4[%c0_9, %c0_10, %c0_11] : memref<1x256x32xbf16, #tpu.memory_space<vmem>>, vector<1x256x32xbf16>
    %14 = vector.shape_cast %13 : vector<1x256x32xbf16> to vector<256x32xbf16>
    %cst = arith.constant dense<0.000000e+00> : vector<128x32xf32>
    %15 = tpu.matmul %12, %14, %cst {dimension_numbers = #tpu.dot_dimension_numbers<[1], [0], [0], [1], [0, 0, 1, 1], [], []>} : vector<128x256xbf16>, vector<256x32xbf16>, vector<128x32xf32> -> vector<128x32xf32>
    %16 = arith.addf %10, %15 : vector<128x32xf32>
    %c0_12 = arith.constant 0 : index
    %c0_13 = arith.constant 0 : index
    %17 = vector.load %arg8[%c0_12, %c0_13] : memref<128x32xf32, #tpu.memory_space<vmem>>, vector<128x32xf32>
    tpu.vector_store %arg8[%c0_12, %c0_13], %16 {strides = array<i32>} : memref<128x32xf32, #tpu.memory_space<vmem>>, vector<128x32xf32>,
    %c0_i32_14 = arith.constant 0 : i32
    %18 = arith.cmpi eq, %arg2, %c0_i32_14 : i32
    %19 = arith.extui %18 : i1 to i32
    %c0_i32_15 = arith.constant 0 : i32
    %20 = arith.cmpi ne, %19, %c0_i32_15 : i32
    scf.if %20 {
      %c0_16 = arith.constant 0 : index
      %c0_17 = arith.constant 0 : index
      %21 = vector.load %arg8[%c0_16, %c0_17] : memref<128x32xf32, #tpu.memory_space<vmem>>, vector<128x32xf32>
      %22 = arith.truncf %21 : vector<128x32xf32> to vector<128x32xbf16>
      %c0_18 = arith.constant 0 : index
      %c0_19 = arith.constant 0 : index
      %c0_20 = arith.constant 0 : index
      %23 = vector.load %arg5[%c0_18, %c0_19, %c0_20] : memref<1x128x32xbf16, #tpu.memory_space<vmem>>, vector<1x128x32xbf16>
      %24 = vector.shape_cast %23 : vector<1x128x32xbf16> to vector<128x32xbf16>
      %25 = vector.shape_cast %22 : vector<128x32xbf16> to vector<1x128x32xbf16>
      tpu.vector_store %arg5[%c0_18, %c0_19, %c0_20], %25 {strides = array<i32>} : memref<1x128x32xbf16, #tpu.memory_space<vmem>>, vector<1x128x32xbf16>,
      %c0_21 = arith.constant 0 : index
      %c0_22 = arith.constant 0 : index
      %26 = vector.load %arg6[%c0_21, %c0_22] : memref<1x32xf32, #tpu.memory_space<vmem>>, vector<1x32xf32>
      %cst_23 = arith.constant dense<0.000000e+00> : vector<32xf32>
      %27 = vector.multi_reduction <add>, %21, %cst_23 [0] : vector<128x32xf32> to vector<32xf32>
      %28 = vector.shape_cast %27 : vector<32xf32> to vector<1x32xf32>
      %29 = arith.addf %26, %28 : vector<1x32xf32>
      %c0_24 = arith.constant 0 : index
      %c0_25 = arith.constant 0 : index
      %30 = vector.load %arg6[%c0_24, %c0_25] : memref<1x32xf32, #tpu.memory_space<vmem>>, vector<1x32xf32>
      tpu.vector_store %arg6[%c0_24, %c0_25], %29 {strides = array<i32>} : memref<1x32xf32, #tpu.memory_space<vmem>>, vector<1x32xf32>,
      %c0_26 = arith.constant 0 : index
      %c0_27 = arith.constant 0 : index
      %31 = vector.load %arg7[%c0_26, %c0_27] : memref<1x32xf32, #tpu.memory_space<vmem>>, vector<1x32xf32>
      %32 = arith.mulf %21, %21 : vector<128x32xf32>
      %cst_28 = arith.constant dense<0.000000e+00> : vector<32xf32>
      %33 = vector.multi_reduction <add>, %32, %cst_28 [0] : vector<128x32xf32> to vector<32xf32>
      %34 = vector.shape_cast %33 : vector<32xf32> to vector<1x32xf32>
      %35 = arith.addf %31, %34 : vector<1x32xf32>
      %c0_29 = arith.constant 0 : index
      %c0_30 = arith.constant 0 : index
      %36 = vector.load %arg7[%c0_29, %c0_30] : memref<1x32xf32, #tpu.memory_space<vmem>>, vector<1x32xf32>
      tpu.vector_store %arg7[%c0_29, %c0_30], %35 {strides = array<i32>} : memref<1x32xf32, #tpu.memory_space<vmem>>, vector<1x32xf32>,
    } else {
    }
    return
  }
  func.func @transform_0(%arg0: i32, %arg1: i32, %arg2: i32) -> (i32, i32, i32) {
    %c0_i32 = arith.constant 0 : i32
    return %arg0, %arg1, %arg2 : i32, i32, i32
  }
  func.func @transform_1(%arg0: i32, %arg1: i32, %arg2: i32) -> (i32, i32, i32) {
    %c0_i32 = arith.constant 0 : i32
    %c0_i32_0 = arith.constant 0 : i32
    return %arg0, %arg2, %c0_i32 : i32, i32, i32
  }
  func.func @transform_2(%arg0: i32, %arg1: i32, %arg2: i32) -> (i32, i32, i32) {
    %c0_i32 = arith.constant 0 : i32
    %c0_i32_0 = arith.constant 0 : i32
    return %arg0, %arg1, %c0_i32 : i32, i32, i32
  }
  func.func @transform_3(%arg0: i32, %arg1: i32, %arg2: i32) -> (i32, i32) {
    %c0_i32 = arith.constant 0 : i32
    %c0_i32_0 = arith.constant 0 : i32
    %c0_i32_1 = arith.constant 0 : i32
    return %c0_i32, %c0_i32_0 : i32, i32
  }
  func.func @transform_4(%arg0: i32, %arg1: i32, %arg2: i32) -> (i32, i32) {
    %c0_i32 = arith.constant 0 : i32
    %c0_i32_0 = arith.constant 0 : i32
    %c0_i32_1 = arith.constant 0 : i32
    return %c0_i32, %c0_i32_0 : i32, i32
  }
}

module attributes {stable_mosaic.version = 11 : i64} {
  func.func @_scale_shift_relu_kernel(%arg0: i32, %arg1: memref<128x128xbf16, #tpu.memory_space<vmem>>, %arg2: memref<1x128xf32, #tpu.memory_space<vmem>>, %arg3: memref<1x128xf32, #tpu.memory_space<vmem>>, %arg4: memref<128x128xbf16, #tpu.memory_space<vmem>>) attributes {dimension_semantics = [#tpu.dimension_semantics<parallel>], iteration_bounds = array<i64: 1>, scalar_prefetch = 0 : i64, scratch_operands = 0 : i64, tpu.core_type = #tpu.core_type<tc>, window_params = [{transform_indices = @transform_0, window_bounds = array<i64: 128, 128>}, {pipeline_mode = #tpu.pipeline_mode<synchronous>, transform_indices = @transform_1, window_bounds = array<i64: 1, 128>}, {pipeline_mode = #tpu.pipeline_mode<synchronous>, transform_indices = @transform_2, window_bounds = array<i64: 1, 128>}, {transform_indices = @transform_3, window_bounds = array<i64: 128, 128>}]} {
    %c0 = arith.constant 0 : index
    %c0_0 = arith.constant 0 : index
    %0 = vector.load %arg1[%c0, %c0_0] : memref<128x128xbf16, #tpu.memory_space<vmem>>, vector<128x128xbf16>
    %1 = arith.extf %0 : vector<128x128xbf16> to vector<128x128xf32>
    %c0_1 = arith.constant 0 : index
    %c0_2 = arith.constant 0 : index
    %2 = vector.load %arg2[%c0_1, %c0_2] : memref<1x128xf32, #tpu.memory_space<vmem>>, vector<1x128xf32>
    %3 = vector.broadcast %2 : vector<1x128xf32> to vector<128x128xf32>
    %4 = arith.mulf %1, %3 : vector<128x128xf32>
    %c0_3 = arith.constant 0 : index
    %c0_4 = arith.constant 0 : index
    %5 = vector.load %arg3[%c0_3, %c0_4] : memref<1x128xf32, #tpu.memory_space<vmem>>, vector<1x128xf32>
    %6 = vector.broadcast %5 : vector<1x128xf32> to vector<128x128xf32>
    %7 = arith.addf %4, %6 : vector<128x128xf32>
    %cst = arith.constant 0.000000e+00 : f32
    %8 = vector.broadcast %cst : f32 to vector<128x128xf32>
    %9 = arith.maximumf %7, %8 : vector<128x128xf32>
    %10 = arith.truncf %9 : vector<128x128xf32> to vector<128x128xbf16>
    %c0_5 = arith.constant 0 : index
    %c0_6 = arith.constant 0 : index
    %11 = vector.load %arg4[%c0_5, %c0_6] : memref<128x128xbf16, #tpu.memory_space<vmem>>, vector<128x128xbf16>
    tpu.vector_store %arg4[%c0_5, %c0_6], %10 {strides = array<i32>} : memref<128x128xbf16, #tpu.memory_space<vmem>>, vector<128x128xbf16>,
    return
  }
  func.func @transform_0(%arg0: i32) -> (i32, i32) {
    %c0_i32 = arith.constant 0 : i32
    %c0_i32_0 = arith.constant 0 : i32
    return %arg0, %c0_i32 : i32, i32
  }
  func.func @transform_1(%arg0: i32) -> (i32, i32) {
    %c0_i32 = arith.constant 0 : i32
    %c0_i32_0 = arith.constant 0 : i32
    %c0_i32_1 = arith.constant 0 : i32
    return %c0_i32, %c0_i32_0 : i32, i32
  }
  func.func @transform_2(%arg0: i32) -> (i32, i32) {
    %c0_i32 = arith.constant 0 : i32
    %c0_i32_0 = arith.constant 0 : i32
    %c0_i32_1 = arith.constant 0 : i32
    return %c0_i32, %c0_i32_0 : i32, i32
  }
  func.func @transform_3(%arg0: i32) -> (i32, i32) {
    %c0_i32 = arith.constant 0 : i32
    %c0_i32_0 = arith.constant 0 : i32
    return %arg0, %c0_i32 : i32, i32
  }
}

module attributes {stable_mosaic.version = 11 : i64} {
  func.func @_gemm_bnstats_kernel(%arg0: i32, %arg1: i32, %arg2: i32, %arg3: memref<1x512x128xbf16, #tpu.memory_space<vmem>>, %arg4: memref<1x128x16xbf16, #tpu.memory_space<vmem>>, %arg5: memref<1x512x16xbf16, #tpu.memory_space<vmem>>, %arg6: memref<1x16xf32, #tpu.memory_space<vmem>>, %arg7: memref<1x16xf32, #tpu.memory_space<vmem>>, %arg8: memref<512x16xf32, #tpu.memory_space<vmem>>) attributes {dimension_semantics = [#tpu.dimension_semantics<arbitrary>, #tpu.dimension_semantics<arbitrary>, #tpu.dimension_semantics<arbitrary>], iteration_bounds = array<i64: 4, 1, 1>, scalar_prefetch = 0 : i64, scratch_operands = 1 : i64, tpu.core_type = #tpu.core_type<tc>, window_params = [{transform_indices = @transform_0, window_bounds = array<i64: 1, 512, 128>}, {transform_indices = @transform_1, window_bounds = array<i64: 1, 128, 16>}, {transform_indices = @transform_2, window_bounds = array<i64: 1, 512, 16>}, {pipeline_mode = #tpu.pipeline_mode<synchronous>, transform_indices = @transform_3, window_bounds = array<i64: 1, 16>}, {pipeline_mode = #tpu.pipeline_mode<synchronous>, transform_indices = @transform_4, window_bounds = array<i64: 1, 16>}]} {
    %c0_i32 = arith.constant 0 : i32
    %0 = arith.cmpi eq, %arg0, %c0_i32 : i32
    %c0_i32_0 = arith.constant 0 : i32
    %1 = arith.cmpi eq, %arg1, %c0_i32_0 : i32
    %2 = arith.andi %0, %1 : i1
    %c0_i32_1 = arith.constant 0 : i32
    %3 = arith.cmpi eq, %arg2, %c0_i32_1 : i32
    %4 = arith.andi %2, %3 : i1
    %5 = arith.extui %4 : i1 to i32
    %c0_i32_2 = arith.constant 0 : i32
    %6 = arith.cmpi ne, %5, %c0_i32_2 : i32
    scf.if %6 {
      %cst_16 = arith.constant 0.000000e+00 : f32
      %21 = vector.broadcast %cst_16 : f32 to vector<1x16xf32>
      %c0_17 = arith.constant 0 : index
      %c0_18 = arith.constant 0 : index
      %22 = vector.load %arg6[%c0_17, %c0_18] : memref<1x16xf32, #tpu.memory_space<vmem>>, vector<1x16xf32>
      tpu.vector_store %arg6[%c0_17, %c0_18], %21 {strides = array<i32>} : memref<1x16xf32, #tpu.memory_space<vmem>>, vector<1x16xf32>,
      %cst_19 = arith.constant 0.000000e+00 : f32
      %23 = vector.broadcast %cst_19 : f32 to vector<1x16xf32>
      %c0_20 = arith.constant 0 : index
      %c0_21 = arith.constant 0 : index
      %24 = vector.load %arg7[%c0_20, %c0_21] : memref<1x16xf32, #tpu.memory_space<vmem>>, vector<1x16xf32>
      tpu.vector_store %arg7[%c0_20, %c0_21], %23 {strides = array<i32>} : memref<1x16xf32, #tpu.memory_space<vmem>>, vector<1x16xf32>,
    } else {
    }
    %c0_i32_3 = arith.constant 0 : i32
    %7 = arith.cmpi eq, %arg2, %c0_i32_3 : i32
    %8 = arith.extui %7 : i1 to i32
    %c0_i32_4 = arith.constant 0 : i32
    %9 = arith.cmpi ne, %8, %c0_i32_4 : i32
    scf.if %9 {
      %cst_16 = arith.constant 0.000000e+00 : f32
      %21 = vector.broadcast %cst_16 : f32 to vector<512x16xf32>
      %c0_17 = arith.constant 0 : index
      %c0_18 = arith.constant 0 : index
      %22 = vector.load %arg8[%c0_17, %c0_18] : memref<512x16xf32, #tpu.memory_space<vmem>>, vector<512x16xf32>
      tpu.vector_store %arg8[%c0_17, %c0_18], %21 {strides = array<i32>} : memref<512x16xf32, #tpu.memory_space<vmem>>, vector<512x16xf32>,
    } else {
    }
    %c0 = arith.constant 0 : index
    %c0_5 = arith.constant 0 : index
    %10 = vector.load %arg8[%c0, %c0_5] : memref<512x16xf32, #tpu.memory_space<vmem>>, vector<512x16xf32>
    %c0_6 = arith.constant 0 : index
    %c0_7 = arith.constant 0 : index
    %c0_8 = arith.constant 0 : index
    %11 = vector.load %arg3[%c0_6, %c0_7, %c0_8] : memref<1x512x128xbf16, #tpu.memory_space<vmem>>, vector<1x512x128xbf16>
    %12 = vector.shape_cast %11 : vector<1x512x128xbf16> to vector<512x128xbf16>
    %c0_9 = arith.constant 0 : index
    %c0_10 = arith.constant 0 : index
    %c0_11 = arith.constant 0 : index
    %13 = vector.load %arg4[%c0_9, %c0_10, %c0_11] : memref<1x128x16xbf16, #tpu.memory_space<vmem>>, vector<1x128x16xbf16>
    %14 = vector.shape_cast %13 : vector<1x128x16xbf16> to vector<128x16xbf16>
    %cst = arith.constant dense<0.000000e+00> : vector<512x16xf32>
    %15 = tpu.matmul %12, %14, %cst {dimension_numbers = #tpu.dot_dimension_numbers<[1], [0], [0], [1], [0, 0, 1, 1], [], []>} : vector<512x128xbf16>, vector<128x16xbf16>, vector<512x16xf32> -> vector<512x16xf32>
    %16 = arith.addf %10, %15 : vector<512x16xf32>
    %c0_12 = arith.constant 0 : index
    %c0_13 = arith.constant 0 : index
    %17 = vector.load %arg8[%c0_12, %c0_13] : memref<512x16xf32, #tpu.memory_space<vmem>>, vector<512x16xf32>
    tpu.vector_store %arg8[%c0_12, %c0_13], %16 {strides = array<i32>} : memref<512x16xf32, #tpu.memory_space<vmem>>, vector<512x16xf32>,
    %c0_i32_14 = arith.constant 0 : i32
    %18 = arith.cmpi eq, %arg2, %c0_i32_14 : i32
    %19 = arith.extui %18 : i1 to i32
    %c0_i32_15 = arith.constant 0 : i32
    %20 = arith.cmpi ne, %19, %c0_i32_15 : i32
    scf.if %20 {
      %c0_16 = arith.constant 0 : index
      %c0_17 = arith.constant 0 : index
      %21 = vector.load %arg8[%c0_16, %c0_17] : memref<512x16xf32, #tpu.memory_space<vmem>>, vector<512x16xf32>
      %22 = arith.truncf %21 : vector<512x16xf32> to vector<512x16xbf16>
      %c0_18 = arith.constant 0 : index
      %c0_19 = arith.constant 0 : index
      %c0_20 = arith.constant 0 : index
      %23 = vector.load %arg5[%c0_18, %c0_19, %c0_20] : memref<1x512x16xbf16, #tpu.memory_space<vmem>>, vector<1x512x16xbf16>
      %24 = vector.shape_cast %23 : vector<1x512x16xbf16> to vector<512x16xbf16>
      %25 = vector.shape_cast %22 : vector<512x16xbf16> to vector<1x512x16xbf16>
      tpu.vector_store %arg5[%c0_18, %c0_19, %c0_20], %25 {strides = array<i32>} : memref<1x512x16xbf16, #tpu.memory_space<vmem>>, vector<1x512x16xbf16>,
      %c0_21 = arith.constant 0 : index
      %c0_22 = arith.constant 0 : index
      %26 = vector.load %arg6[%c0_21, %c0_22] : memref<1x16xf32, #tpu.memory_space<vmem>>, vector<1x16xf32>
      %cst_23 = arith.constant dense<0.000000e+00> : vector<16xf32>
      %27 = vector.multi_reduction <add>, %21, %cst_23 [0] : vector<512x16xf32> to vector<16xf32>
      %28 = vector.shape_cast %27 : vector<16xf32> to vector<1x16xf32>
      %29 = arith.addf %26, %28 : vector<1x16xf32>
      %c0_24 = arith.constant 0 : index
      %c0_25 = arith.constant 0 : index
      %30 = vector.load %arg6[%c0_24, %c0_25] : memref<1x16xf32, #tpu.memory_space<vmem>>, vector<1x16xf32>
      tpu.vector_store %arg6[%c0_24, %c0_25], %29 {strides = array<i32>} : memref<1x16xf32, #tpu.memory_space<vmem>>, vector<1x16xf32>,
      %c0_26 = arith.constant 0 : index
      %c0_27 = arith.constant 0 : index
      %31 = vector.load %arg7[%c0_26, %c0_27] : memref<1x16xf32, #tpu.memory_space<vmem>>, vector<1x16xf32>
      %32 = arith.mulf %21, %21 : vector<512x16xf32>
      %cst_28 = arith.constant dense<0.000000e+00> : vector<16xf32>
      %33 = vector.multi_reduction <add>, %32, %cst_28 [0] : vector<512x16xf32> to vector<16xf32>
      %34 = vector.shape_cast %33 : vector<16xf32> to vector<1x16xf32>
      %35 = arith.addf %31, %34 : vector<1x16xf32>
      %c0_29 = arith.constant 0 : index
      %c0_30 = arith.constant 0 : index
      %36 = vector.load %arg7[%c0_29, %c0_30] : memref<1x16xf32, #tpu.memory_space<vmem>>, vector<1x16xf32>
      tpu.vector_store %arg7[%c0_29, %c0_30], %35 {strides = array<i32>} : memref<1x16xf32, #tpu.memory_space<vmem>>, vector<1x16xf32>,
    } else {
    }
    return
  }
  func.func @transform_0(%arg0: i32, %arg1: i32, %arg2: i32) -> (i32, i32, i32) {
    %c0_i32 = arith.constant 0 : i32
    return %arg0, %arg1, %arg2 : i32, i32, i32
  }
  func.func @transform_1(%arg0: i32, %arg1: i32, %arg2: i32) -> (i32, i32, i32) {
    %c0_i32 = arith.constant 0 : i32
    %c0_i32_0 = arith.constant 0 : i32
    return %arg0, %arg2, %c0_i32 : i32, i32, i32
  }
  func.func @transform_2(%arg0: i32, %arg1: i32, %arg2: i32) -> (i32, i32, i32) {
    %c0_i32 = arith.constant 0 : i32
    %c0_i32_0 = arith.constant 0 : i32
    return %arg0, %arg1, %c0_i32 : i32, i32, i32
  }
  func.func @transform_3(%arg0: i32, %arg1: i32, %arg2: i32) -> (i32, i32) {
    %c0_i32 = arith.constant 0 : i32
    %c0_i32_0 = arith.constant 0 : i32
    %c0_i32_1 = arith.constant 0 : i32
    return %c0_i32, %c0_i32_0 : i32, i32
  }
  func.func @transform_4(%arg0: i32, %arg1: i32, %arg2: i32) -> (i32, i32) {
    %c0_i32 = arith.constant 0 : i32
    %c0_i32_0 = arith.constant 0 : i32
    %c0_i32_1 = arith.constant 0 : i32
    return %c0_i32, %c0_i32_0 : i32, i32
  }
}

module attributes {stable_mosaic.version = 11 : i64} {
  func.func @_scale_shift_relu_kernel(%arg0: i32, %arg1: memref<256x128xbf16, #tpu.memory_space<vmem>>, %arg2: memref<1x128xf32, #tpu.memory_space<vmem>>, %arg3: memref<1x128xf32, #tpu.memory_space<vmem>>, %arg4: memref<256x128xbf16, #tpu.memory_space<vmem>>) attributes {dimension_semantics = [#tpu.dimension_semantics<parallel>], iteration_bounds = array<i64: 1>, scalar_prefetch = 0 : i64, scratch_operands = 0 : i64, tpu.core_type = #tpu.core_type<tc>, window_params = [{transform_indices = @transform_0, window_bounds = array<i64: 256, 128>}, {pipeline_mode = #tpu.pipeline_mode<synchronous>, transform_indices = @transform_1, window_bounds = array<i64: 1, 128>}, {pipeline_mode = #tpu.pipeline_mode<synchronous>, transform_indices = @transform_2, window_bounds = array<i64: 1, 128>}, {transform_indices = @transform_3, window_bounds = array<i64: 256, 128>}]} {
    %c0 = arith.constant 0 : index
    %c0_0 = arith.constant 0 : index
    %0 = vector.load %arg1[%c0, %c0_0] : memref<256x128xbf16, #tpu.memory_space<vmem>>, vector<256x128xbf16>
    %1 = arith.extf %0 : vector<256x128xbf16> to vector<256x128xf32>
    %c0_1 = arith.constant 0 : index
    %c0_2 = arith.constant 0 : index
    %2 = vector.load %arg2[%c0_1, %c0_2] : memref<1x128xf32, #tpu.memory_space<vmem>>, vector<1x128xf32>
    %3 = vector.broadcast %2 : vector<1x128xf32> to vector<256x128xf32>
    %4 = arith.mulf %1, %3 : vector<256x128xf32>
    %c0_3 = arith.constant 0 : index
    %c0_4 = arith.constant 0 : index
    %5 = vector.load %arg3[%c0_3, %c0_4] : memref<1x128xf32, #tpu.memory_space<vmem>>, vector<1x128xf32>
    %6 = vector.broadcast %5 : vector<1x128xf32> to vector<256x128xf32>
    %7 = arith.addf %4, %6 : vector<256x128xf32>
    %cst = arith.constant 0.000000e+00 : f32
    %8 = vector.broadcast %cst : f32 to vector<256x128xf32>
    %9 = arith.maximumf %7, %8 : vector<256x128xf32>
    %10 = arith.truncf %9 : vector<256x128xf32> to vector<256x128xbf16>
    %c0_5 = arith.constant 0 : index
    %c0_6 = arith.constant 0 : index
    %11 = vector.load %arg4[%c0_5, %c0_6] : memref<256x128xbf16, #tpu.memory_space<vmem>>, vector<256x128xbf16>
    tpu.vector_store %arg4[%c0_5, %c0_6], %10 {strides = array<i32>} : memref<256x128xbf16, #tpu.memory_space<vmem>>, vector<256x128xbf16>,
    return
  }
  func.func @transform_0(%arg0: i32) -> (i32, i32) {
    %c0_i32 = arith.constant 0 : i32
    %c0_i32_0 = arith.constant 0 : i32
    return %arg0, %c0_i32 : i32, i32
  }
  func.func @transform_1(%arg0: i32) -> (i32, i32) {
    %c0_i32 = arith.constant 0 : i32
    %c0_i32_0 = arith.constant 0 : i32
    %c0_i32_1 = arith.constant 0 : i32
    return %c0_i32, %c0_i32_0 : i32, i32
  }
  func.func @transform_2(%arg0: i32) -> (i32, i32) {
    %c0_i32 = arith.constant 0 : i32
    %c0_i32_0 = arith.constant 0 : i32
    %c0_i32_1 = arith.constant 0 : i32
    return %c0_i32, %c0_i32_0 : i32, i32
  }
  func.func @transform_3(%arg0: i32) -> (i32, i32) {
    %c0_i32 = arith.constant 0 : i32
    %c0_i32_0 = arith.constant 0 : i32
    return %arg0, %c0_i32 : i32, i32
  }
}

module attributes {stable_mosaic.version = 11 : i64} {
  func.func @_gemm_bnstats_kernel(%arg0: i32, %arg1: i32, %arg2: i32, %arg3: memref<1x512x64xbf16, #tpu.memory_space<vmem>>, %arg4: memref<1x64x8xbf16, #tpu.memory_space<vmem>>, %arg5: memref<1x512x8xbf16, #tpu.memory_space<vmem>>, %arg6: memref<1x8xf32, #tpu.memory_space<vmem>>, %arg7: memref<1x8xf32, #tpu.memory_space<vmem>>, %arg8: memref<512x8xf32, #tpu.memory_space<vmem>>) attributes {dimension_semantics = [#tpu.dimension_semantics<arbitrary>, #tpu.dimension_semantics<arbitrary>, #tpu.dimension_semantics<arbitrary>], iteration_bounds = array<i64: 4, 4, 1>, scalar_prefetch = 0 : i64, scratch_operands = 1 : i64, tpu.core_type = #tpu.core_type<tc>, window_params = [{transform_indices = @transform_0, window_bounds = array<i64: 1, 512, 64>}, {transform_indices = @transform_1, window_bounds = array<i64: 1, 64, 8>}, {transform_indices = @transform_2, window_bounds = array<i64: 1, 512, 8>}, {pipeline_mode = #tpu.pipeline_mode<synchronous>, transform_indices = @transform_3, window_bounds = array<i64: 1, 8>}, {pipeline_mode = #tpu.pipeline_mode<synchronous>, transform_indices = @transform_4, window_bounds = array<i64: 1, 8>}]} {
    %c0_i32 = arith.constant 0 : i32
    %0 = arith.cmpi eq, %arg0, %c0_i32 : i32
    %c0_i32_0 = arith.constant 0 : i32
    %1 = arith.cmpi eq, %arg1, %c0_i32_0 : i32
    %2 = arith.andi %0, %1 : i1
    %c0_i32_1 = arith.constant 0 : i32
    %3 = arith.cmpi eq, %arg2, %c0_i32_1 : i32
    %4 = arith.andi %2, %3 : i1
    %5 = arith.extui %4 : i1 to i32
    %c0_i32_2 = arith.constant 0 : i32
    %6 = arith.cmpi ne, %5, %c0_i32_2 : i32
    scf.if %6 {
      %cst_16 = arith.constant 0.000000e+00 : f32
      %21 = vector.broadcast %cst_16 : f32 to vector<1x8xf32>
      %c0_17 = arith.constant 0 : index
      %c0_18 = arith.constant 0 : index
      %22 = vector.load %arg6[%c0_17, %c0_18] : memref<1x8xf32, #tpu.memory_space<vmem>>, vector<1x8xf32>
      tpu.vector_store %arg6[%c0_17, %c0_18], %21 {strides = array<i32>} : memref<1x8xf32, #tpu.memory_space<vmem>>, vector<1x8xf32>,
      %cst_19 = arith.constant 0.000000e+00 : f32
      %23 = vector.broadcast %cst_19 : f32 to vector<1x8xf32>
      %c0_20 = arith.constant 0 : index
      %c0_21 = arith.constant 0 : index
      %24 = vector.load %arg7[%c0_20, %c0_21] : memref<1x8xf32, #tpu.memory_space<vmem>>, vector<1x8xf32>
      tpu.vector_store %arg7[%c0_20, %c0_21], %23 {strides = array<i32>} : memref<1x8xf32, #tpu.memory_space<vmem>>, vector<1x8xf32>,
    } else {
    }
    %c0_i32_3 = arith.constant 0 : i32
    %7 = arith.cmpi eq, %arg2, %c0_i32_3 : i32
    %8 = arith.extui %7 : i1 to i32
    %c0_i32_4 = arith.constant 0 : i32
    %9 = arith.cmpi ne, %8, %c0_i32_4 : i32
    scf.if %9 {
      %cst_16 = arith.constant 0.000000e+00 : f32
      %21 = vector.broadcast %cst_16 : f32 to vector<512x8xf32>
      %c0_17 = arith.constant 0 : index
      %c0_18 = arith.constant 0 : index
      %22 = vector.load %arg8[%c0_17, %c0_18] : memref<512x8xf32, #tpu.memory_space<vmem>>, vector<512x8xf32>
      tpu.vector_store %arg8[%c0_17, %c0_18], %21 {strides = array<i32>} : memref<512x8xf32, #tpu.memory_space<vmem>>, vector<512x8xf32>,
    } else {
    }
    %c0 = arith.constant 0 : index
    %c0_5 = arith.constant 0 : index
    %10 = vector.load %arg8[%c0, %c0_5] : memref<512x8xf32, #tpu.memory_space<vmem>>, vector<512x8xf32>
    %c0_6 = arith.constant 0 : index
    %c0_7 = arith.constant 0 : index
    %c0_8 = arith.constant 0 : index
    %11 = vector.load %arg3[%c0_6, %c0_7, %c0_8] : memref<1x512x64xbf16, #tpu.memory_space<vmem>>, vector<1x512x64xbf16>
    %12 = vector.shape_cast %11 : vector<1x512x64xbf16> to vector<512x64xbf16>
    %c0_9 = arith.constant 0 : index
    %c0_10 = arith.constant 0 : index
    %c0_11 = arith.constant 0 : index
    %13 = vector.load %arg4[%c0_9, %c0_10, %c0_11] : memref<1x64x8xbf16, #tpu.memory_space<vmem>>, vector<1x64x8xbf16>
    %14 = vector.shape_cast %13 : vector<1x64x8xbf16> to vector<64x8xbf16>
    %cst = arith.constant dense<0.000000e+00> : vector<512x8xf32>
    %15 = tpu.matmul %12, %14, %cst {dimension_numbers = #tpu.dot_dimension_numbers<[1], [0], [0], [1], [0, 0, 1, 1], [], []>} : vector<512x64xbf16>, vector<64x8xbf16>, vector<512x8xf32> -> vector<512x8xf32>
    %16 = arith.addf %10, %15 : vector<512x8xf32>
    %c0_12 = arith.constant 0 : index
    %c0_13 = arith.constant 0 : index
    %17 = vector.load %arg8[%c0_12, %c0_13] : memref<512x8xf32, #tpu.memory_space<vmem>>, vector<512x8xf32>
    tpu.vector_store %arg8[%c0_12, %c0_13], %16 {strides = array<i32>} : memref<512x8xf32, #tpu.memory_space<vmem>>, vector<512x8xf32>,
    %c0_i32_14 = arith.constant 0 : i32
    %18 = arith.cmpi eq, %arg2, %c0_i32_14 : i32
    %19 = arith.extui %18 : i1 to i32
    %c0_i32_15 = arith.constant 0 : i32
    %20 = arith.cmpi ne, %19, %c0_i32_15 : i32
    scf.if %20 {
      %c0_16 = arith.constant 0 : index
      %c0_17 = arith.constant 0 : index
      %21 = vector.load %arg8[%c0_16, %c0_17] : memref<512x8xf32, #tpu.memory_space<vmem>>, vector<512x8xf32>
      %22 = arith.truncf %21 : vector<512x8xf32> to vector<512x8xbf16>
      %c0_18 = arith.constant 0 : index
      %c0_19 = arith.constant 0 : index
      %c0_20 = arith.constant 0 : index
      %23 = vector.load %arg5[%c0_18, %c0_19, %c0_20] : memref<1x512x8xbf16, #tpu.memory_space<vmem>>, vector<1x512x8xbf16>
      %24 = vector.shape_cast %23 : vector<1x512x8xbf16> to vector<512x8xbf16>
      %25 = vector.shape_cast %22 : vector<512x8xbf16> to vector<1x512x8xbf16>
      tpu.vector_store %arg5[%c0_18, %c0_19, %c0_20], %25 {strides = array<i32>} : memref<1x512x8xbf16, #tpu.memory_space<vmem>>, vector<1x512x8xbf16>,
      %c0_21 = arith.constant 0 : index
      %c0_22 = arith.constant 0 : index
      %26 = vector.load %arg6[%c0_21, %c0_22] : memref<1x8xf32, #tpu.memory_space<vmem>>, vector<1x8xf32>
      %cst_23 = arith.constant dense<0.000000e+00> : vector<8xf32>
      %27 = vector.multi_reduction <add>, %21, %cst_23 [0] : vector<512x8xf32> to vector<8xf32>
      %28 = vector.shape_cast %27 : vector<8xf32> to vector<1x8xf32>
      %29 = arith.addf %26, %28 : vector<1x8xf32>
      %c0_24 = arith.constant 0 : index
      %c0_25 = arith.constant 0 : index
      %30 = vector.load %arg6[%c0_24, %c0_25] : memref<1x8xf32, #tpu.memory_space<vmem>>, vector<1x8xf32>
      tpu.vector_store %arg6[%c0_24, %c0_25], %29 {strides = array<i32>} : memref<1x8xf32, #tpu.memory_space<vmem>>, vector<1x8xf32>,
      %c0_26 = arith.constant 0 : index
      %c0_27 = arith.constant 0 : index
      %31 = vector.load %arg7[%c0_26, %c0_27] : memref<1x8xf32, #tpu.memory_space<vmem>>, vector<1x8xf32>
      %32 = arith.mulf %21, %21 : vector<512x8xf32>
      %cst_28 = arith.constant dense<0.000000e+00> : vector<8xf32>
      %33 = vector.multi_reduction <add>, %32, %cst_28 [0] : vector<512x8xf32> to vector<8xf32>
      %34 = vector.shape_cast %33 : vector<8xf32> to vector<1x8xf32>
      %35 = arith.addf %31, %34 : vector<1x8xf32>
      %c0_29 = arith.constant 0 : index
      %c0_30 = arith.constant 0 : index
      %36 = vector.load %arg7[%c0_29, %c0_30] : memref<1x8xf32, #tpu.memory_space<vmem>>, vector<1x8xf32>
      tpu.vector_store %arg7[%c0_29, %c0_30], %35 {strides = array<i32>} : memref<1x8xf32, #tpu.memory_space<vmem>>, vector<1x8xf32>,
    } else {
    }
    return
  }
  func.func @transform_0(%arg0: i32, %arg1: i32, %arg2: i32) -> (i32, i32, i32) {
    %c0_i32 = arith.constant 0 : i32
    return %arg0, %arg1, %arg2 : i32, i32, i32
  }
  func.func @transform_1(%arg0: i32, %arg1: i32, %arg2: i32) -> (i32, i32, i32) {
    %c0_i32 = arith.constant 0 : i32
    %c0_i32_0 = arith.constant 0 : i32
    return %arg0, %arg2, %c0_i32 : i32, i32, i32
  }
  func.func @transform_2(%arg0: i32, %arg1: i32, %arg2: i32) -> (i32, i32, i32) {
    %c0_i32 = arith.constant 0 : i32
    %c0_i32_0 = arith.constant 0 : i32
    return %arg0, %arg1, %c0_i32 : i32, i32, i32
  }
  func.func @transform_3(%arg0: i32, %arg1: i32, %arg2: i32) -> (i32, i32) {
    %c0_i32 = arith.constant 0 : i32
    %c0_i32_0 = arith.constant 0 : i32
    %c0_i32_1 = arith.constant 0 : i32
    return %c0_i32, %c0_i32_0 : i32, i32
  }
  func.func @transform_4(%arg0: i32, %arg1: i32, %arg2: i32) -> (i32, i32) {
    %c0_i32 = arith.constant 0 : i32
    %c0_i32_0 = arith.constant 0 : i32
    %c0_i32_1 = arith.constant 0 : i32
    return %c0_i32, %c0_i32_0 : i32, i32
  }
}

module attributes {stable_mosaic.version = 11 : i64} {
  func.func @_scale_shift_relu_kernel(%arg0: i32, %arg1: memref<512x128xbf16, #tpu.memory_space<vmem>>, %arg2: memref<1x128xf32, #tpu.memory_space<vmem>>, %arg3: memref<1x128xf32, #tpu.memory_space<vmem>>, %arg4: memref<512x128xbf16, #tpu.memory_space<vmem>>) attributes {dimension_semantics = [#tpu.dimension_semantics<parallel>], iteration_bounds = array<i64: 1>, scalar_prefetch = 0 : i64, scratch_operands = 0 : i64, tpu.core_type = #tpu.core_type<tc>, window_params = [{transform_indices = @transform_0, window_bounds = array<i64: 512, 128>}, {pipeline_mode = #tpu.pipeline_mode<synchronous>, transform_indices = @transform_1, window_bounds = array<i64: 1, 128>}, {pipeline_mode = #tpu.pipeline_mode<synchronous>, transform_indices = @transform_2, window_bounds = array<i64: 1, 128>}, {transform_indices = @transform_3, window_bounds = array<i64: 512, 128>}]} {
    %c0 = arith.constant 0 : index
    %c0_0 = arith.constant 0 : index
    %0 = vector.load %arg1[%c0, %c0_0] : memref<512x128xbf16, #tpu.memory_space<vmem>>, vector<512x128xbf16>
    %1 = arith.extf %0 : vector<512x128xbf16> to vector<512x128xf32>
    %c0_1 = arith.constant 0 : index
    %c0_2 = arith.constant 0 : index
    %2 = vector.load %arg2[%c0_1, %c0_2] : memref<1x128xf32, #tpu.memory_space<vmem>>, vector<1x128xf32>
    %3 = vector.broadcast %2 : vector<1x128xf32> to vector<512x128xf32>
    %4 = arith.mulf %1, %3 : vector<512x128xf32>
    %c0_3 = arith.constant 0 : index
    %c0_4 = arith.constant 0 : index
    %5 = vector.load %arg3[%c0_3, %c0_4] : memref<1x128xf32, #tpu.memory_space<vmem>>, vector<1x128xf32>
    %6 = vector.broadcast %5 : vector<1x128xf32> to vector<512x128xf32>
    %7 = arith.addf %4, %6 : vector<512x128xf32>
    %cst = arith.constant 0.000000e+00 : f32
    %8 = vector.broadcast %cst : f32 to vector<512x128xf32>
    %9 = arith.maximumf %7, %8 : vector<512x128xf32>
    %10 = arith.truncf %9 : vector<512x128xf32> to vector<512x128xbf16>
    %c0_5 = arith.constant 0 : index
    %c0_6 = arith.constant 0 : index
    %11 = vector.load %arg4[%c0_5, %c0_6] : memref<512x128xbf16, #tpu.memory_space<vmem>>, vector<512x128xbf16>
    tpu.vector_store %arg4[%c0_5, %c0_6], %10 {strides = array<i32>} : memref<512x128xbf16, #tpu.memory_space<vmem>>, vector<512x128xbf16>,
    return
  }
  func.func @transform_0(%arg0: i32) -> (i32, i32) {
    %c0_i32 = arith.constant 0 : i32
    %c0_i32_0 = arith.constant 0 : i32
    return %arg0, %c0_i32 : i32, i32
  }
  func.func @transform_1(%arg0: i32) -> (i32, i32) {
    %c0_i32 = arith.constant 0 : i32
    %c0_i32_0 = arith.constant 0 : i32
    %c0_i32_1 = arith.constant 0 : i32
    return %c0_i32, %c0_i32_0 : i32, i32
  }
  func.func @transform_2(%arg0: i32) -> (i32, i32) {
    %c0_i32 = arith.constant 0 : i32
    %c0_i32_0 = arith.constant 0 : i32
    %c0_i32_1 = arith.constant 0 : i32
    return %c0_i32, %c0_i32_0 : i32, i32
  }
  func.func @transform_3(%arg0: i32) -> (i32, i32) {
    %c0_i32 = arith.constant 0 : i32
    %c0_i32_0 = arith.constant 0 : i32
    return %arg0, %c0_i32 : i32, i32
  }
}

module attributes {stable_mosaic.version = 11 : i64} {
  func.func @_gemm_t_tanh_kernel(%arg0: i32, %arg1: i32, %arg2: memref<1x3x32xbf16, #tpu.memory_space<vmem>>, %arg3: memref<1x32x512xbf16, #tpu.memory_space<vmem>>, %arg4: memref<1x3x512xf32, #tpu.memory_space<vmem>>) attributes {dimension_semantics = [#tpu.dimension_semantics<parallel>, #tpu.dimension_semantics<parallel>], iteration_bounds = array<i64: 4, 16>, scalar_prefetch = 0 : i64, scratch_operands = 0 : i64, tpu.core_type = #tpu.core_type<tc>, window_params = [{transform_indices = @transform_0, window_bounds = array<i64: 1, 3, 32>}, {transform_indices = @transform_1, window_bounds = array<i64: 1, 32, 512>}, {transform_indices = @transform_2, window_bounds = array<i64: 1, 3, 512>}]} {
    %c0 = arith.constant 0 : index
    %c0_0 = arith.constant 0 : index
    %c0_1 = arith.constant 0 : index
    %0 = vector.load %arg2[%c0, %c0_0, %c0_1] : memref<1x3x32xbf16, #tpu.memory_space<vmem>>, vector<1x3x32xbf16>
    %1 = vector.shape_cast %0 : vector<1x3x32xbf16> to vector<3x32xbf16>
    %c0_2 = arith.constant 0 : index
    %c0_3 = arith.constant 0 : index
    %c0_4 = arith.constant 0 : index
    %2 = vector.load %arg3[%c0_2, %c0_3, %c0_4] : memref<1x32x512xbf16, #tpu.memory_space<vmem>>, vector<1x32x512xbf16>
    %3 = vector.shape_cast %2 : vector<1x32x512xbf16> to vector<32x512xbf16>
    %cst = arith.constant dense<0.000000e+00> : vector<3x512xf32>
    %4 = tpu.matmul %1, %3, %cst {dimension_numbers = #tpu.dot_dimension_numbers<[1], [0], [0], [1], [0, 0, 1, 1], [], []>} : vector<3x32xbf16>, vector<32x512xbf16>, vector<3x512xf32> -> vector<3x512xf32>
    %5 = math.tanh %4 : vector<3x512xf32>
    %c0_5 = arith.constant 0 : index
    %c0_6 = arith.constant 0 : index
    %c0_7 = arith.constant 0 : index
    %6 = vector.load %arg4[%c0_5, %c0_6, %c0_7] : memref<1x3x512xf32, #tpu.memory_space<vmem>>, vector<1x3x512xf32>
    %7 = vector.shape_cast %6 : vector<1x3x512xf32> to vector<3x512xf32>
    %8 = vector.shape_cast %5 : vector<3x512xf32> to vector<1x3x512xf32>
    tpu.vector_store %arg4[%c0_5, %c0_6, %c0_7], %8 {strides = array<i32>} : memref<1x3x512xf32, #tpu.memory_space<vmem>>, vector<1x3x512xf32>,
    return
  }
  func.func @transform_0(%arg0: i32, %arg1: i32) -> (i32, i32, i32) {
    %c0_i32 = arith.constant 0 : i32
    %c0_i32_0 = arith.constant 0 : i32
    %c0_i32_1 = arith.constant 0 : i32
    return %arg0, %c0_i32, %c0_i32_0 : i32, i32, i32
  }
  func.func @transform_1(%arg0: i32, %arg1: i32) -> (i32, i32, i32) {
    %c0_i32 = arith.constant 0 : i32
    %c0_i32_0 = arith.constant 0 : i32
    return %arg0, %c0_i32, %arg1 : i32, i32, i32
  }
  func.func @transform_2(%arg0: i32, %arg1: i32) -> (i32, i32, i32) {
    %c0_i32 = arith.constant 0 : i32
    %c0_i32_0 = arith.constant 0 : i32
    return %arg0, %c0_i32, %arg1 : i32, i32, i32
  }
}

</mosaic_0001>

<bundles_post_ra>
// kernel: netg_forward.12
= control target key start
LH: loop header
LB: loop body
LE: loop exit
PB: predicated region body
PF: predicated region fallthrough
CT: control target
= control target key end

     0   :  { %s140_s0 = inlined_call_operand.vmem [shape: bf16[32,128], index: 0, kind: input, shape index: {}]   ;;  %s141_s1 = inlined_call_operand.vmem [shape: f32[1,128], index: 1, kind: input, shape index: {}]   ;;  %s142_s2 = inlined_call_operand.vmem [shape: f32[1,128], index: 2, kind: input, shape index: {}]   ;;  %s143_s3 = inlined_call_operand.vmem [shape: bf16[32,128], index: 3, kind: output, shape index: {}]  }
   0x1   :  { %v83_v0 = vld [vmem:[%s140_s0] sm:$0xff]   ;;  %v100_v4 = vld [vmem:[%s140_s0 + $0x8] sm:$0xff]  }
   0x2   :  { %v72_v1 = vld [vmem:[%s141_s1] ss:$0 sm:$0xff]  ;;  %v84_v2 = vunpack.c.l.bf16 %v83_v0  ;;  %v85_v3 = vunpack.c.h.bf16 %v83_v0  ;;  %v88_v6 = vunpack.c.l.bf16 %v100_v4  ;;  %v89_v7 = vunpack.c.h.bf16 %v100_v4 }
   0x3   :  { %v73_v5 = vld [vmem:[%s142_s2] ss:$0 sm:$0xff] }
   0x4   :  { %v29_v8 = vmul.f32 %v84_v2, %v72_v1  ;;  %v30_v9 = vmul.f32 %v85_v3, %v72_v1  ;;  %v31_v10 = vmul.f32 %v88_v6, %v72_v1  ;;  %v32_v11 = vmul.f32 %v89_v7, %v72_v1 }
   0x6   :  { %v40_v12 = vadd.f32 %v73_v5, %v29_v8  ;;  %v41_v13 = vadd.f32 %v73_v5, %v30_v9  ;;  %v42_v14 = vadd.f32 %v73_v5, %v31_v10  ;;  %v43_v15 = vadd.f32 %v73_v5, %v32_v11 }
   0x8   :  { %v44_v16 = vmax.f32 %v40_v12, 0.0  ;;  %v45_v17 = vmax.f32 %v41_v13, 0.0  ;;  %v46_v18 = vmax.f32 %v42_v14, 0.0  ;;  %v47_v19 = vmax.f32 %v43_v15, 0.0 }
   0xa   :  { %v93_v20 = vpack.c.bf16 %v45_v17, %v44_v16  ;;  %v98_v21 = vpack.c.bf16 %v47_v19, %v46_v18 }
   0xc   :  { %94 = vst [vmem:[%s143_s3] sm:$0xff] %v93_v20   ;;  %101 = vst [vmem:[%s143_s3 + $0x8] sm:$0xff] %v98_v21  }

// kernel: netg_forward.11
= control target key start
LH: loop header
LB: loop body
LE: loop exit
PB: predicated region body
PF: predicated region fallthrough
CT: control target
= control target key end

     0   :  { %v1406_v3 = vmov 0   ;;  %vm136_vm0 = vcmask 130048   ;;  %v1407_v34 = vmov 1983009808   ;;  %v489_v36 = vlaneseq  ;;  %s1691_s1 = inlined_call_operand.vmem [shape: bf16[1,16,2048], index: 1, kind: input, shape index: {}]   ;;  %s1692_s0 = inlined_call_operand.vmem [shape: bf16[1,2,16], index: 0, kind: input, shape index: {}]   ;;  %s1693_s2 = inlined_call_operand.vmem [shape: bf16[1,2,2048], index: 2, kind: output, shape index: {0}]   ;;  %s1694_s3 = inlined_call_operand.vmem [shape: f32[1,2048], index: 3, kind: output, shape index: {1}]   ;;  %s1695_s4 = inlined_call_operand.vmem [shape: f32[1,2048], index: 4, kind: output, shape index: {2}]  }
   0x1   :  { %v40_v0 = vld [vmem:[%s1691_s1] sm:$0xff]  ;;  %v41_v2 = vld [vmem:[%s1691_s1 + $0x8] sm:$0xff]  ;;  %172 = vmatprep.mubr.bf16.mxu0 %v1406_v3  ;;  %213 = vmatprep.mubr.bf16.mxu1 %v1406_v3  ;;  %v42_v7 = vld [vmem:[%s1691_s1 + $0x10] sm:$0xff]  ;;  %v487_v35 = vunpack.c.l.s4 %v1407_v34  ;;  %v1408_v44 = vmov 1966171168   ;;  %vm795_vm1 = vcmask 1041408  }
   0x2   :  { %v48_v1 = vld [vmem:[%s1691_s1 + $0x40] sm:$0xff]  ;;  %v49_v5 = vld [vmem:[%s1691_s1 + $0x48] sm:$0xff]  ;;  %v50_v10 = vld [vmem:[%s1691_s1 + $0x50] sm:$0xff]  ;;  %v490_v38 = vshrl.u32 %v489_v36, 7  ;;  %v696_v45 = vunpack.c.l.s4 %v1408_v44 }
   0x3   :  { %v1367_v4 = vcombine.high %v40_v0, %v48_v1  ;;  %v1366_v6 = vcombine.low %v40_v0, %v48_v1  ;;  %v1369_v8 = vcombine.high %v41_v2, %v49_v5  ;;  %v1368_v9 = vcombine.low %v41_v2, %v49_v5  ;;  %v43_v11 = vld [vmem:[%s1691_s1 + $0x18] sm:$0xff]  ;;  %v44_v15 = vld [vmem:[%s1691_s1 + $0x20] sm:$0xff]  ;;  %v45_v19 = vld [vmem:[%s1691_s1 + $0x28] sm:$0xff] }
   0x4   :  { %v51_v12 = vld [vmem:[%s1691_s1 + $0x58] sm:$0xff]  ;;  %v1371_v13 = vcombine.high %v42_v7, %v50_v10  ;;  %v52_v16 = vld [vmem:[%s1691_s1 + $0x60] sm:$0xff]  ;;  %v1370_v18 = vcombine.low %v42_v7, %v50_v10  ;;  %v53_v20 = vld [vmem:[%s1691_s1 + $0x68] sm:$0xff]  ;;  %v488_v37 = vunpack.c.0.s8 %v487_v35  ;;  %v697_v54 = vunpack.c.0.s8 %v696_v45 }
   0x5   :  { %140 = vmatprep.subr.bf16.mxu0 %v1367_v4  ;;  %v1373_v14 = vcombine.high %v43_v11, %v51_v12  ;;  %181 = vmatprep.subr.bf16.mxu1 %v1369_v8  ;;  %v39_v17 = vld [vmem:[%s1692_s0] sm:$0x1]  ;;  %v1372_v21 = vcombine.low %v43_v11, %v51_v12  ;;  %v1375_v22 = vcombine.high %v44_v15, %v52_v16  ;;  %v46_v24 = vld [vmem:[%s1691_s1 + $0x30] sm:$0xff]  ;;  %v47_v27 = vld [vmem:[%s1691_s1 + $0x38] sm:$0xff] }
   0x6   :  { %141 = vmatpush1.bf16.msra.mxu0 %v1366_v6  ;;  %182 = vmatpush1.bf16.msra.mxu1 %v1368_v9  ;;  %v1377_v23 = vcombine.high %v45_v19, %v53_v20  ;;  %v54_v25 = vld [vmem:[%s1691_s1 + $0x70] sm:$0xff]  ;;  %v1374_v26 = vcombine.low %v44_v15, %v52_v16  ;;  %v55_v28 = vld [vmem:[%s1691_s1 + $0x78] sm:$0xff]  ;;  %v1376_v29 = vcombine.low %v45_v19, %v53_v20 }
   0x7   :  { %222 = vmatprep.subr.bf16.mxu0 %v1371_v13  ;;  %263 = vmatprep.subr.bf16.mxu1 %v1373_v14  ;;  %v1379_v30 = vcombine.high %v46_v24, %v54_v25  ;;  %v1381_v31 = vcombine.high %v47_v27, %v55_v28  ;;  %v1378_v32 = vcombine.low %v46_v24, %v54_v25 }
   0x8   :  { %v1380_v33 = vcombine.low %v47_v27, %v55_v28  ;;  %v1493_v40 = vsub.s32 %v488_v37, %v490_v38  ;;  %v1505_v63 = vsub.s32 %v697_v54, %v490_v38 }
   0x9   :  { %1382 = vmatmul.mubr.msk.bf16.vlgmr.msra.gmra.mrb[0].mxu0 %vm136_vm0, %v39_v17  ;;  %1383 = vmatmul.mubr.msk.bf16.vlgmr.msra.gmra.mrb[0].mxu1 %vm136_vm0, %v39_v17 }
   0xa   :  { %223 = vmatpush1.bf16.msra.mxu0 %v1370_v18  ;;  %264 = vmatpush1.bf16.msra.mxu1 %v1372_v21 }
   0xb   :  { %254 = vmatprep.mubr.bf16.mxu0 %v1406_v3  ;;  %295 = vmatprep.mubr.bf16.mxu1 %v1406_v3 }
   0xc   :  { %304 = vmatprep.subr.bf16.mxu0 %v1375_v22  ;;  %345 = vmatprep.subr.bf16.mxu1 %v1377_v23 }
  0x11   :  { %1384 = vmatmul.mubr.msk.bf16.vlgmr.msra.gmra.mrb[4].mxu0 %vm136_vm0, %v39_v17  ;;  %1385 = vmatmul.mubr.msk.bf16.vlgmr.msra.gmra.mrb[4].mxu1 %vm136_vm0, %v39_v17 }
  0x12   :  { %305 = vmatpush1.bf16.msra.mxu0 %v1374_v26  ;;  %346 = vmatpush1.bf16.msra.mxu1 %v1376_v29 }
  0x13   :  { %336 = vmatprep.mubr.bf16.mxu0 %v1406_v3  ;;  %377 = vmatprep.mubr.bf16.mxu1 %v1406_v3 }
  0x14   :  { %386 = vmatprep.subr.bf16.mxu0 %v1379_v30  ;;  %427 = vmatprep.subr.bf16.mxu1 %v1381_v31 }
  0x19   :  { %1386 = vmatmul.mubr.msk.bf16.vlgmr.msra.gmra.mrb[8].mxu0 %vm136_vm0, %v39_v17  ;;  %1387 = vmatmul.mubr.msk.bf16.vlgmr.msra.gmra.mrb[8].mxu1 %vm136_vm0, %v39_v17 }
  0x1a   :  { %387 = vmatpush1.bf16.msra.mxu0 %v1378_v32  ;;  %428 = vmatpush1.bf16.msra.mxu1 %v1380_v33 }
  0x1b   :  { %418 = vmatprep.mubr.bf16.mxu0 %v1406_v3  ;;  %459 = vmatprep.mubr.bf16.mxu1 %v1406_v3 }
  0x21   :  { %1388 = vmatmul.mubr.msk.bf16.vlgmr.msra.gmra.mrb[12].mxu0 %vm136_vm0, %v39_v17  ;;  %1389 = vmatmul.mubr.msk.bf16.vlgmr.msra.gmra.mrb[12].mxu1 %vm136_vm0, %v39_v17 }
  0xdc   :  { %v174_v39 = vpop.f32.mrb[0].mxu0  ;;  %v215_v41 = vpop.f32.mrb[0].mxu1 }
  0xdd   :  { %v176_v42 = vpop.f32.mrb[1].mxu0  ;;  %v217_v46 = vpop.f32.mrb[1].mxu1 }
  0xde   :  { %v484_v43 = vcombine.low %v174_v39, %v176_v42  ;;  %v178_v47 = vpop.f32.mrb[2].mxu0  ;;  %v485_v48 = vcombine.low %v215_v41, %v217_v46  ;;  %v219_v49 = vpop.f32.mrb[2].mxu1 }
  0xdf   :  { %v179_v50 = vpop.f32.mrb[3].mxu0  ;;  %v220_v52 = vpop.f32.mrb[3].mxu1 }
  0xe0   :  { %v492_v51 = vrot.slane %v484_v43, %v1493_v40  ;;  %v499_v53 = vrot.slane %v485_v48, %v1493_v40 }
  0xe2   :  { %v500_v55 = vcombine.low %v492_v51, %v499_v53  ;;  %v1398_v56 = vcombine.low %v499_v53, %v499_v53 }
  0xe4   :  { %v1497_v57 = vpop.f32.mrb[4].mxu0  ;;  %v582_v58 = vrot.slane %v500_v55, %v1493_v40  ;;  %v589_v59 = vrot.slane %v1398_v56, %v1493_v40  ;;  %v1030_v60 = vmul.f32 %v500_v55, %v500_v55  ;;  %v1501_v61 = vpop.f32.mrb[4].mxu1 }
  0xe5   :  { %v1503_v62 = vpop.f32.mrb[5].mxu0  ;;  %v1509_v1 = vpop.f32.mrb[5].mxu1 }
  0xe6   :  { %v501_v0 = vcombine.low %v1497_v57, %v1503_v62  ;;  %v260_v2 = vpop.f32.mrb[6].mxu0  ;;  %v590_v3 = vcombine.high %v582_v58, %v582_v58  ;;  %v591_v4 = vcombine.high %v589_v59, %v589_v59  ;;  %v796_v5 = vsel %vm795_vm1, %v582_v58, 0.0  ;;  %v301_v7 = vpop.f32.mrb[6].mxu1 }
  0xe7   :  { %v810_v6 = vsel %vm795_vm1, %v589_v59, 0.0  ;;  %v261_v8 = vpop.f32.mrb[7].mxu0  ;;  %v797_v9 = vrot.slane %v796_v5, 4  ;;  %v1038_v11 = vcombine.high %v1030_v60, %v1030_v60  ;;  %v1045_v12 = vrot.slane %v1030_v60, %v1493_v40  ;;  %v302_v13 = vpop.f32.mrb[7].mxu1 }
  0xe8   :  { %v811_v10 = vrot.slane %v810_v6, 4  ;;  %v1390_v14 = vpack.c.bf16 %v590_v3, %v582_v58  ;;  %v1391_v15 = vpack.c.bf16 %v591_v4, %v589_v59  ;;  %v803_v16 = vsel %vm795_vm1, %v590_v3, 0.0 }
  0xe9   :  { %v817_v17 = vsel %vm795_vm1, %v591_v4, 0.0  ;;  %v798_v18 = vadd.f32 %v797_v9, %v796_v5  ;;  %v804_v19 = vrot.slane %v803_v16, 4  ;;  %v1052_v24 = vrot.slane %v1038_v11, %v1493_v40 }
  0xea   :  { %v812_v20 = vadd.f32 %v811_v10, %v810_v6  ;;  %v818_v21 = vrot.slane %v817_v17, 4  ;;  %v1517_v22 = vrot.slane %v1390_v14, %v1505_v63  ;;  %v1520_v23 = vrot.slane %v1391_v15, %v1505_v63 }
  0xeb   :  { %v1053_v25 = vcombine.high %v1045_v12, %v1045_v12  ;;  %v799_v26 = vrot.slane %v798_v18, 2  ;;  %v805_v27 = vadd.f32 %v804_v19, %v803_v16  ;;  %v1054_v32 = vcombine.high %v1052_v24, %v1052_v24 }
  0xec   :  { %v813_v28 = vrot.slane %v812_v20, 2  ;;  %v819_v29 = vadd.f32 %v818_v21, %v817_v17  ;;  %v1523_v30 = vpop.f32.mrb[8].mxu0  ;;  %v723_v31 = vcombine.low %v1517_v22, %v1520_v23  ;;  %v1122_v33 = vsel %vm795_vm1, %v1045_v12, 0.0  ;;  %v1529_v35 = vpop.f32.mrb[8].mxu1 }
  0xed   :  { %v1129_v34 = vsel %vm795_vm1, %v1053_v25, 0.0  ;;  %v1531_v36 = vpop.f32.mrb[9].mxu0  ;;  %v800_v37 = vadd.f32 %v799_v26, %v798_v18  ;;  %v806_v38 = vrot.slane %v805_v27, 2  ;;  %v1533_v42 = vpop.f32.mrb[9].mxu1  ;;  %v1123_v44 = vrot.slane %v1122_v33, 4 }
  0xee   :  { %v814_v39 = vadd.f32 %v813_v28, %v812_v20  ;;  %v820_v41 = vrot.slane %v819_v29, 2  ;;  %v342_v43 = vpop.f32.mrb[10].mxu0  ;;  %v1130_v45 = vrot.slane %v1129_v34, 4  ;;  %v1136_v46 = vsel %vm795_vm1, %v1052_v24, 0.0  ;;  %v383_v47 = vpop.f32.mrb[10].mxu1 }
  0xef   :  { %v343_v48 = vpop.f32.mrb[11].mxu0  ;;  %v801_v49 = vrot.slane %v800_v37, 1  ;;  %v807_v50 = vadd.f32 %v806_v38, %v805_v27  ;;  %v384_v53 = vpop.f32.mrb[11].mxu1  ;;  %v1124_v54 = vadd.f32 %v1123_v44, %v1122_v33  ;;  %v1137_v56 = vrot.slane %v1136_v46, 4 }
  0xf0   :  { %v815_v51 = vrot.slane %v814_v39, 1  ;;  %v821_v52 = vadd.f32 %v820_v41, %v819_v29  ;;  %v1131_v55 = vadd.f32 %v1130_v45, %v1129_v34  ;;  %v1143_v58 = vsel %vm795_vm1, %v1054_v32, 0.0 }
  0xf1   :  { %v802_v59 = vadd.f32 %v801_v49, %v800_v37  ;;  %v808_v60 = vrot.slane %v807_v50, 1  ;;  %v1125_v4 = vrot.slane %v1124_v54, 2  ;;  %v1138_v6 = vadd.f32 %v1137_v56, %v1136_v46 }
  0xf2   :  { %v816_v2 = vadd.f32 %v815_v51, %v814_v39  ;;  %v822_v3 = vrot.slane %v821_v52, 1  ;;  %v1132_v5 = vrot.slane %v1131_v55, 2  ;;  %v1144_v7 = vrot.slane %v1143_v58, 4 }
  0xf3   :  { %v809_v8 = vadd.f32 %v808_v60, %v807_v50  ;;  %v509_v10 = vrot.slane %v501_v0, %v1493_v40  ;;  %v502_v11 = vcombine.low %v1501_v61, %v1509_v1  ;;  %v1126_v13 = vadd.f32 %v1125_v4, %v1124_v54 }
  0xf4   :  { %v823_v9 = vadd.f32 %v822_v3, %v821_v52  ;;  %v1543_v12 = vpop.f32.mrb[12].mxu0  ;;  %v1133_v14 = vadd.f32 %v1132_v5, %v1131_v55  ;;  %v1139_v15 = vrot.slane %v1138_v6, 2  ;;  %v1145_v16 = vadd.f32 %v1144_v7, %v1143_v58  ;;  %v1545_v17 = vpop.f32.mrb[12].mxu1 }
  0xf5   :  { %v1547_v18 = vpop.f32.mrb[13].mxu0  ;;  %v924_v19 = vcombine.low %v802_v59, %v809_v8  ;;  %v516_v21 = vrot.slane %v502_v11, %v1493_v40  ;;  %v518_v57 = vcombine.low %v1523_v30, %v1531_v36  ;;  %v1552_v62 = vpop.f32.mrb[13].mxu1  ;;  %v1127_v0 = vrot.slane %v1126_v13, 1 }
  0xf6   :  { %v925_v20 = vcombine.low %v816_v2, %v823_v9  ;;  %v424_v61 = vpop.f32.mrb[14].mxu0  ;;  %v1134_v1 = vrot.slane %v1133_v14, 1  ;;  %v1140_v24 = vadd.f32 %v1139_v15, %v1138_v6  ;;  %v1146_v25 = vrot.slane %v1145_v16, 2  ;;  %v465_v26 = vpop.f32.mrb[14].mxu1 }
  0xf7   :  { %v425_v27 = vpop.f32.mrb[15].mxu0  ;;  %v934_v28 = vrot.slane %v924_v19, %v1505_v63  ;;  %v517_v32 = vcombine.low %v509_v10, %v516_v21  ;;  %v1399_v33 = vcombine.low %v516_v21, %v516_v21  ;;  %v466_v34 = vpop.f32.mrb[15].mxu1  ;;  %v1128_v36 = vadd.f32 %v1127_v0, %v1126_v13 }
  0xf8   :  { %v941_v29 = vrot.slane %v925_v20, %v1505_v63  ;;  %v1135_v37 = vadd.f32 %v1134_v1, %v1133_v14  ;;  %v1141_v38 = vrot.slane %v1140_v24, 1  ;;  %v1147_v39 = vadd.f32 %v1146_v25, %v1145_v16 }
  0xf9   :  { %v599_v41 = vrot.slane %v517_v32, %v1493_v40  ;;  %v606_v43 = vrot.slane %v1399_v33, %v1493_v40  ;;  %v731_v44 = vrot.slane %v723_v31, %v1505_v63  ;;  %v1031_v47 = vmul.f32 %v517_v32, %v517_v32 }
  0xfa   :  { %v956_v30 = vcombine.low %v934_v28, %v941_v29  ;;  %v1142_v45 = vadd.f32 %v1141_v38, %v1140_v24  ;;  %v1148_v46 = vrot.slane %v1147_v39, 1  ;;  %v1250_v48 = vcombine.low %v1128_v36, %v1135_v37 }
  0xfb   :  { %v607_v49 = vcombine.high %v599_v41, %v599_v41  ;;  %v608_v50 = vcombine.high %v606_v43, %v606_v43  ;;  %v824_v51 = vsel %vm795_vm1, %v599_v41, 0.0  ;;  %v838_v54 = vsel %vm795_vm1, %v606_v43, 0.0 }
  0xfc   :  { %v1149_v52 = vadd.f32 %v1148_v46, %v1147_v39  ;;  %v825_v53 = vrot.slane %v824_v51, 4  ;;  %v1565_v55 = vrot.slane %v518_v57, %v1493_v40  ;;  %v839_v23 = vrot.slane %v838_v54, 4 }
  0xfd   :  { %v1392_v56 = vpack.c.bf16 %v607_v49, %v599_v41  ;;  %v1393_v58 = vpack.c.bf16 %v608_v50, %v606_v43  ;;  %v831_v22 = vsel %vm795_vm1, %v607_v49, 0.0  ;;  %v1569_v31 = vrot.slane %v956_v30, %v1505_v63 }
  0xfe   :  { %v826_v59 = vadd.f32 %v825_v53, %v824_v51  ;;  %v832_v60 = vrot.slane %v831_v22, 4  ;;  %v845_v2 = vsel %vm795_vm1, %v608_v50, 0.0  ;;  %v840_v5 = vadd.f32 %v839_v23, %v838_v54 }
  0xff   :  { %v715_v3 = vrot.slane %v1392_v56, %v1505_v63  ;;  %v722_v4 = vrot.slane %v1393_v58, %v1505_v63  ;;  %v846_v6 = vrot.slane %v845_v2, 4  ;;  %v1251_v7 = vcombine.low %v1142_v45, %v1149_v52 }
 0x100   :  { %v827_v8 = vrot.slane %v826_v59, 2  ;;  %v833_v9 = vadd.f32 %v832_v60, %v831_v22  ;;  %v1055_v10 = vcombine.high %v1031_v47, %v1031_v47  ;;  %v841_v13 = vrot.slane %v840_v5, 2 }
 0x101   :  { %v724_v11 = vcombine.low %v715_v3, %v722_v4  ;;  %v847_v14 = vadd.f32 %v846_v6, %v845_v2  ;;  %v1062_v15 = vrot.slane %v1031_v47, %v1493_v40  ;;  %v1576_v16 = vrot.slane %v1250_v48, %v1505_v63 }
 0x102   :  { %v828_v19 = vadd.f32 %v827_v8, %v826_v59  ;;  %v834_v20 = vrot.slane %v833_v9, 2  ;;  %v1069_v21 = vrot.slane %v1055_v10, %v1493_v40  ;;  %v842_v61 = vadd.f32 %v841_v13, %v840_v5 }
 0x103   :  { %v738_v57 = vrot.slane %v724_v11, %v1505_v63  ;;  %v848_v0 = vrot.slane %v847_v14, 2  ;;  %v1070_v1 = vcombine.high %v1062_v15, %v1062_v15  ;;  %v1581_v24 = vrot.slane %v1251_v7, %v1505_v63 }
 0x104   :  { %v829_v25 = vrot.slane %v828_v19, 1  ;;  %v835_v26 = vadd.f32 %v834_v20, %v833_v9  ;;  %v1071_v27 = vcombine.high %v1069_v21, %v1069_v21  ;;  %v843_v29 = vrot.slane %v842_v61, 1 }
 0x105   :  { %v739_v28 = vcombine.low %v731_v44, %v738_v57  ;;  %v849_v32 = vadd.f32 %v848_v0, %v847_v14  ;;  %v1150_v33 = vsel %vm795_vm1, %v1062_v15, 0.0  ;;  %v1157_v39 = vsel %vm795_vm1, %v1070_v1, 0.0 }
 0x106   :  { %v830_v34 = vadd.f32 %v829_v25, %v828_v19  ;;  %v836_v37 = vrot.slane %v835_v26, 1  ;;  %v1151_v38 = vrot.slane %v1150_v33, 4  ;;  %v844_v30 = vadd.f32 %v843_v29, %v842_v61 }
 0x107   :  { %791 = vst [vmem:[%s1693_s2] sm:$0xff] %v739_v28  ;;  %v850_v36 = vrot.slane %v849_v32, 1  ;;  %v1158_v41 = vrot.slane %v1157_v39, 4  ;;  %v1164_v43 = vsel %vm795_vm1, %v1069_v21, 0.0  ;;  %v1171_v47 = vsel %vm795_vm1, %v1071_v27, 0.0 }
 0x108   :  { %v837_v45 = vadd.f32 %v836_v37, %v835_v26  ;;  %v1152_v44 = vadd.f32 %v1151_v38, %v1150_v33  ;;  %v1165_v46 = vrot.slane %v1164_v43, 4  ;;  %v1172_v50 = vrot.slane %v1171_v47, 4 }
 0x109   :  { %v851_v48 = vadd.f32 %v850_v36, %v849_v32  ;;  %v1159_v49 = vadd.f32 %v1158_v41, %v1157_v39  ;;  %v519_v51 = vcombine.low %v1529_v35, %v1533_v42  ;;  %v535_v56 = vcombine.low %v1543_v12, %v1547_v18 }
 0x10a   :  { %v926_v52 = vcombine.low %v830_v34, %v837_v45  ;;  %v1153_v53 = vrot.slane %v1152_v44, 2  ;;  %v1166_v54 = vadd.f32 %v1165_v46, %v1164_v43  ;;  %v1173_v23 = vadd.f32 %v1172_v50, %v1171_v47 }
 0x10b   :  { %v927_v58 = vcombine.low %v844_v30, %v851_v48  ;;  %v1160_v22 = vrot.slane %v1159_v49, 2  ;;  %v533_v59 = vrot.slane %v519_v51, %v1493_v40  ;;  %v1282_v60 = vcombine.low %v1576_v16, %v1581_v24 }
 0x10c   :  { %v948_v2 = vrot.slane %v926_v52, %v1505_v63  ;;  %v1154_v3 = vadd.f32 %v1153_v53, %v1152_v44  ;;  %v1167_v4 = vrot.slane %v1166_v54, 2  ;;  %v1174_v5 = vrot.slane %v1173_v23, 2 }
 0x10d   :  { %v955_v35 = vrot.slane %v927_v58, %v1505_v63  ;;  %v1161_v42 = vadd.f32 %v1160_v22, %v1159_v49  ;;  %v534_v6 = vcombine.low %v1565_v55, %v533_v59  ;;  %v1400_v9 = vcombine.low %v533_v59, %v533_v59 }
 0x10e   :  { %v1155_v7 = vrot.slane %v1154_v3, 1  ;;  %v1168_v8 = vadd.f32 %v1167_v4, %v1166_v54  ;;  %v536_v10 = vcombine.low %v1545_v17, %v1552_v62  ;;  %v1175_v14 = vadd.f32 %v1174_v5, %v1173_v23 }
 0x10f   :  { %v957_v11 = vcombine.low %v948_v2, %v955_v35  ;;  %v1162_v13 = vrot.slane %v1161_v42, 1  ;;  %v616_v15 = vrot.slane %v534_v6, %v1493_v40  ;;  %v623_v20 = vrot.slane %v1400_v9, %v1493_v40 }
 0x110   :  { %v1156_v16 = vadd.f32 %v1155_v7, %v1154_v3  ;;  %v1169_v19 = vrot.slane %v1168_v8, 1  ;;  %v1032_v21 = vmul.f32 %v534_v6, %v534_v6  ;;  %v1176_v55 = vrot.slane %v1175_v14, 1 }
 0x111   :  { %v971_v57 = vrot.slane %v957_v11, %v1505_v63  ;;  %v1163_v61 = vadd.f32 %v1162_v13, %v1161_v42  ;;  %v624_v0 = vcombine.high %v616_v15, %v616_v15  ;;  %v625_v24 = vcombine.high %v623_v20, %v623_v20 }
 0x112   :  { %v1170_v1 = vadd.f32 %v1169_v19, %v1168_v8  ;;  %v852_v25 = vsel %vm795_vm1, %v616_v15, 0.0  ;;  %v866_v26 = vsel %vm795_vm1, %v623_v20, 0.0  ;;  %v1177_v28 = vadd.f32 %v1176_v55, %v1175_v14 }
 0x113   :  { %v972_v27 = vcombine.low %v1569_v31, %v971_v57  ;;  %v1252_v29 = vcombine.low %v1156_v16, %v1163_v61  ;;  %v1394_v32 = vpack.c.bf16 %v624_v0, %v616_v15  ;;  %v1395_v33 = vpack.c.bf16 %v625_v24, %v623_v20 }
 0x114   :  { %v853_v34 = vrot.slane %v852_v25, 4  ;;  %v859_v37 = vsel %vm795_vm1, %v624_v0, 0.0  ;;  %v867_v38 = vrot.slane %v866_v26, 4  ;;  %v1253_v39 = vcombine.low %v1170_v1, %v1177_v28 }
 0x115   :  { %v1274_v30 = vrot.slane %v1252_v29, %v1505_v63  ;;  %v1611_v36 = vrot.slane %v1394_v32, %v1505_v63  ;;  %v1614_v41 = vrot.slane %v1395_v33, %v1505_v63  ;;  %v860_v45 = vrot.slane %v859_v37, 4  ;;  %1026 = vst [vmem:[%s1694_s3] sm:$0xff] %v972_v27 }
 0x116   :  { %v854_v43 = vadd.f32 %v853_v34, %v852_v25  ;;  %v868_v31 = vadd.f32 %v867_v38, %v866_v26  ;;  %v1281_v44 = vrot.slane %v1253_v39, %v1505_v63  ;;  %v873_v46 = vsel %vm795_vm1, %v625_v24, 0.0 }
 0x117   :  { %v1072_v47 = vcombine.high %v1032_v21, %v1032_v21  ;;  %v1079_v48 = vrot.slane %v1032_v21, %v1493_v40  ;;  %v772_v49 = vcombine.low %v1611_v36, %v1614_v41  ;;  %v861_v51 = vadd.f32 %v860_v45, %v859_v37 }
 0x118   :  { %v855_v50 = vrot.slane %v854_v43, 2  ;;  %v869_v52 = vrot.slane %v868_v31, 2  ;;  %v1283_v53 = vcombine.low %v1274_v30, %v1281_v44  ;;  %v874_v54 = vrot.slane %v873_v46, 4 }
 0x119   :  { %v862_v22 = vrot.slane %v861_v51, 2  ;;  %v1086_v23 = vrot.slane %v1072_v47, %v1493_v40  ;;  %v1290_v59 = vrot.slane %v1282_v60, %v1505_v63  ;;  %v1087_v5 = vcombine.high %v1079_v48, %v1079_v48 }
 0x11a   :  { %v856_v58 = vadd.f32 %v855_v50, %v854_v43  ;;  %v1297_v2 = vrot.slane %v1283_v53, %v1505_v63  ;;  %v870_v3 = vadd.f32 %v869_v52, %v868_v31  ;;  %v875_v4 = vadd.f32 %v874_v54, %v873_v46 }
 0x11b   :  { %v863_v42 = vadd.f32 %v862_v22, %v861_v51  ;;  %v1088_v9 = vcombine.high %v1086_v23, %v1086_v23  ;;  %v543_v11 = vrot.slane %v535_v56, %v1493_v40  ;;  %v1178_v60 = vsel %vm795_vm1, %v1079_v48, 0.0 }
 0x11c   :  { %v857_v35 = vrot.slane %v856_v58, 1  ;;  %v1298_v6 = vcombine.low %v1290_v59, %v1297_v2  ;;  %v876_v7 = vrot.slane %v875_v4, 2  ;;  %v871_v13 = vrot.slane %v870_v3, 1 }
 0x11d   :  { %v864_v8 = vrot.slane %v863_v42, 1  ;;  %v1185_v19 = vsel %vm795_vm1, %v1087_v5, 0.0  ;;  %v550_v20 = vrot.slane %v536_v10, %v1493_v40  ;;  %v1192_v12 = vsel %vm795_vm1, %v1086_v23, 0.0 }
 0x11e   :  { %v877_v14 = vadd.f32 %v876_v7, %v875_v4  ;;  %v858_v15 = vadd.f32 %v857_v35, %v856_v58  ;;  %1352 = vst [vmem:[%s1695_s4] sm:$0xff] %v1298_v6  ;;  %v1199_v56 = vsel %vm795_vm1, %v1088_v9, 0.0  ;;  %v872_v55 = vadd.f32 %v871_v13, %v870_v3 }
 0x11f   :  { %v865_v16 = vadd.f32 %v864_v8, %v863_v42  ;;  %v551_v57 = vcombine.low %v543_v11, %v550_v20  ;;  %v1401_v61 = vcombine.low %v550_v20, %v550_v20  ;;  %v1179_v1 = vrot.slane %v1178_v60, 4 }
 0x120   :  { %v878_v21 = vrot.slane %v877_v14, 1  ;;  %v1186_v24 = vrot.slane %v1185_v19, 4  ;;  %v1193_v26 = vrot.slane %v1192_v12, 4  ;;  %v1200_v27 = vrot.slane %v1199_v56, 4 }
 0x121   :  { %v973_v18 = vcombine.low %v858_v15, %v865_v16  ;;  %v633_v25 = vrot.slane %v551_v57, %v1493_v40  ;;  %v640_v17 = vrot.slane %v1401_v61, %v1493_v40  ;;  %v1180_v34 = vadd.f32 %v1179_v1, %v1178_v60 }
 0x122   :  { %v879_v0 = vadd.f32 %v878_v21, %v877_v14  ;;  %v1187_v37 = vadd.f32 %v1186_v24, %v1185_v19  ;;  %v1194_v31 = vadd.f32 %v1193_v26, %v1192_v12  ;;  %v1201_v44 = vadd.f32 %v1200_v27, %v1199_v56 }
 0x123   :  { %v1645_v10 = vrot.slane %v973_v18, %v1505_v63  ;;  %v641_v28 = vcombine.high %v633_v25, %v633_v25  ;;  %v642_v29 = vcombine.high %v640_v17, %v640_v17  ;;  %v880_v32 = vsel %vm795_vm1, %v633_v25, 0.0 }
 0x124   :  { %v974_v62 = vcombine.low %v872_v55, %v879_v0  ;;  %v881_v30 = vrot.slane %v880_v32, 4  ;;  %v780_v51 = vrot.slane %v772_v49, %v1505_v63  ;;  %v1181_v52 = vrot.slane %v1180_v34, 2 }
 0x125   :  { %v1396_v38 = vpack.c.bf16 %v641_v28, %v633_v25  ;;  %v1397_v39 = vpack.c.bf16 %v642_v29, %v640_v17  ;;  %v887_v43 = vsel %vm795_vm1, %v641_v28, 0.0  ;;  %v1188_v53 = vrot.slane %v1187_v37, 2 }
 0x126   :  { %v1649_v33 = vrot.slane %v974_v62, %v1505_v63  ;;  %v882_v48 = vadd.f32 %v881_v30, %v880_v32  ;;  %v888_v50 = vrot.slane %v887_v43, 4  ;;  %v894_v54 = vsel %vm795_vm1, %v640_v17, 0.0 }
 0x127   :  { %v764_v46 = vrot.slane %v1396_v38, %v1505_v63  ;;  %v771_v47 = vrot.slane %v1397_v39, %v1505_v63  ;;  %v895_v59 = vrot.slane %v894_v54, 4  ;;  %v1195_v2 = vrot.slane %v1194_v31, 2 }
 0x128   :  { %v1005_v45 = vcombine.low %v1645_v10, %v1649_v33  ;;  %v883_v22 = vrot.slane %v882_v48, 2  ;;  %v889_v23 = vadd.f32 %v888_v50, %v887_v43  ;;  %v1202_v3 = vrot.slane %v1201_v44, 2 }
 0x129   :  { %v773_v58 = vcombine.low %v764_v46, %v771_v47  ;;  %v901_v4 = vsel %vm795_vm1, %v642_v29, 0.0  ;;  %v1033_v35 = vmul.f32 %v551_v57, %v551_v57  ;;  %v896_v7 = vadd.f32 %v895_v59, %v894_v54 }
 0x12a   :  { %v884_v5 = vadd.f32 %v883_v22, %v882_v48  ;;  %v890_v6 = vrot.slane %v889_v23, 2  ;;  %v1189_v36 = vadd.f32 %v1188_v53, %v1187_v37  ;;  %v902_v41 = vrot.slane %v901_v4, 4 }
 0x12b   :  { %v787_v42 = vrot.slane %v773_v58, %v1505_v63  ;;  %v1089_v49 = vcombine.high %v1033_v35, %v1033_v35  ;;  %v1096_v8 = vrot.slane %v1033_v35, %v1493_v40  ;;  %v897_v14 = vrot.slane %v896_v7, 2 }
 0x12c   :  { %v885_v11 = vrot.slane %v884_v5, 1  ;;  %v891_v13 = vadd.f32 %v890_v6, %v889_v23  ;;  %v1196_v60 = vadd.f32 %v1195_v2, %v1194_v31  ;;  %v903_v15 = vadd.f32 %v902_v41, %v901_v4 }
 0x12d   :  { %v788_v9 = vcombine.low %v780_v51, %v787_v42  ;;  %v1103_v16 = vrot.slane %v1089_v49, %v1493_v40  ;;  %v1104_v19 = vcombine.high %v1096_v8, %v1096_v8  ;;  %v1203_v20 = vadd.f32 %v1202_v3, %v1201_v44 }
 0x12e   :  { %v892_v21 = vrot.slane %v891_v13, 1  ;;  %v898_v12 = vadd.f32 %v897_v14, %v896_v7  ;;  %v1206_v18 = vsel %vm795_vm1, %v1096_v8, 0.0  ;;  %v886_v56 = vadd.f32 %v885_v11, %v884_v5 }
 0x12f   :  { %792 = vst [vmem:[%s1693_s2 + $0x8] sm:$0xff] %v788_v9  ;;  %v904_v57 = vrot.slane %v903_v15, 2  ;;  %v1105_v61 = vcombine.high %v1103_v16, %v1103_v16  ;;  %v1207_v55 = vrot.slane %v1206_v18, 4  ;;  %v1213_v24 = vsel %vm795_vm1, %v1104_v19, 0.0 }
 0x130   :  { %v893_v0 = vadd.f32 %v892_v21, %v891_v13  ;;  %v899_v1 = vrot.slane %v898_v12, 1  ;;  %v1220_v40 = vsel %vm795_vm1, %v1103_v16, 0.0  ;;  %v1214_v62 = vrot.slane %v1213_v24, 4 }
 0x131   :  { %v905_v25 = vadd.f32 %v904_v57, %v903_v15  ;;  %v1208_v17 = vadd.f32 %v1207_v55, %v1206_v18  ;;  %v1221_v26 = vrot.slane %v1220_v40, 4  ;;  %v1182_v27 = vadd.f32 %v1181_v52, %v1180_v34 }
 0x132   :  { %v1204_v28 = vrot.slane %v1203_v20, 1  ;;  %v975_v29 = vcombine.low %v886_v56, %v893_v0  ;;  %v1227_v32 = vsel %vm795_vm1, %v1105_v61, 0.0  ;;  %v1215_v39 = vadd.f32 %v1214_v62, %v1213_v24 }
 0x133   :  { %v906_v37 = vrot.slane %v905_v25, 1  ;;  %v1209_v38 = vrot.slane %v1208_v17, 2  ;;  %v1222_v30 = vadd.f32 %v1221_v26, %v1220_v40  ;;  %v1190_v43 = vrot.slane %v1189_v36, 1 }
 0x134   :  { %v1197_v31 = vrot.slane %v1196_v60, 1  ;;  %v900_v44 = vadd.f32 %v899_v1, %v898_v12  ;;  %v1228_v46 = vrot.slane %v1227_v32, 4  ;;  %v1216_v50 = vrot.slane %v1215_v39, 2 }
 0x135   :  { %v907_v47 = vadd.f32 %v906_v37, %v905_v25  ;;  %v1210_v48 = vadd.f32 %v1209_v38, %v1208_v17  ;;  %v1223_v51 = vrot.slane %v1222_v30, 2  ;;  %v1183_v53 = vrot.slane %v1182_v27, 1 }
 0x136   :  { %v1205_v54 = vadd.f32 %v1204_v28, %v1203_v20  ;;  %v1229_v58 = vadd.f32 %v1228_v46, %v1227_v32  ;;  %v997_v52 = vrot.slane %v975_v29, %v1505_v63  ;;  %v1217_v22 = vadd.f32 %v1216_v50, %v1215_v39 }
 0x137   :  { %v976_v34 = vcombine.low %v900_v44, %v907_v47  ;;  %v1224_v23 = vadd.f32 %v1223_v51, %v1222_v30  ;;  %v1191_v59 = vadd.f32 %v1190_v43, %v1189_v36  ;;  %v1198_v2 = vadd.f32 %v1197_v31, %v1196_v60 }
 0x138   :  { %v1211_v3 = vrot.slane %v1210_v48, 1  ;;  %v1230_v4 = vrot.slane %v1229_v58, 2  ;;  %v1218_v42 = vrot.slane %v1217_v22, 1  ;;  %v1184_v5 = vadd.f32 %v1183_v53, %v1182_v27 }
 0x139   :  { %v1004_v35 = vrot.slane %v976_v34, %v1505_v63  ;;  %v1300_v6 = vcombine.low %v1198_v2, %v1205_v54  ;;  %v1225_v7 = vrot.slane %v1224_v23, 1  ;;  %v1013_v36 = vrot.slane %v1005_v45, %v1505_v63 }
 0x13a   :  { %v1231_v41 = vadd.f32 %v1230_v4, %v1229_v58  ;;  %v1219_v8 = vadd.f32 %v1218_v42, %v1217_v22  ;;  %v1299_v9 = vcombine.low %v1184_v5, %v1191_v59  ;;  %v1212_v11 = vadd.f32 %v1211_v3, %v1210_v48 }
 0x13b   :  { %v1006_v49 = vcombine.low %v997_v52, %v1004_v35  ;;  %v1316_v60 = vrot.slane %v1300_v6, %v1505_v63  ;;  %v1226_v15 = vadd.f32 %v1225_v7, %v1224_v23 }
 0x13c   :  { %v1232_v13 = vrot.slane %v1231_v41, 1  ;;  %v1301_v19 = vcombine.low %v1212_v11, %v1219_v8  ;;  %v1309_v21 = vrot.slane %v1299_v9, %v1505_v63 }
 0x13d   :  { %v1020_v14 = vrot.slane %v1006_v49, %v1505_v63 }
 0x13e   :  { %v1233_v16 = vadd.f32 %v1232_v13, %v1231_v41  ;;  %v1331_v18 = vcombine.low %v1309_v21, %v1316_v60  ;;  %v1323_v56 = vrot.slane %v1301_v19, %v1505_v63 }
 0x13f   :  { %v1021_v20 = vcombine.low %v1013_v36, %v1020_v14 }
 0x140   :  { %v1302_v12 = vcombine.low %v1226_v15, %v1233_v16  ;;  %v1339_v33 = vrot.slane %v1331_v18, %v1505_v63 }
 0x141   :  { %1027 = vst [vmem:[%s1694_s3 + $0x8] sm:$0xff] %v1021_v20 }
 0x142   :  { %v1330_v57 = vrot.slane %v1302_v12, %v1505_v63 }
 0x144   :  { %v1332_v10 = vcombine.low %v1323_v56, %v1330_v57 }
 0x146   :  { %v1346_v45 = vrot.slane %v1332_v10, %v1505_v63 }
 0x148   :  { %v1347_v61 = vcombine.low %v1339_v33, %v1346_v45 }
 0x14a   :  { %1353 = vst [vmem:[%s1695_s4 + $0x8] sm:$0xff] %v1347_v61 }

// kernel: tile.52
= control target key start
LH: loop header
LB: loop body
LE: loop exit
PB: predicated region body
PF: predicated region fallthrough
CT: control target
= control target key end

     0   :  { %s22_s0 = inlined_call_operand.vmem [shape: f32[64], index: 0, kind: input, shape index: {}]   ;;  %s23_s1 = inlined_call_operand.vmem [shape: f32[2,64], index: 1, kind: output, shape index: {}]  }
   0x1   :  { %v4_v0 = vld [vmem:[%s22_s0] ss:$0 sm:$0xff] }
   0x2   :  { %5 = vst [vmem:[%s23_s1] sm:$0x3] %v4_v0 }

// kernel: tile.53
= control target key start
LH: loop header
LB: loop body
LE: loop exit
PB: predicated region body
PF: predicated region fallthrough
CT: control target
= control target key end

     0   :  { %vm7_vm0 = vcmask 523264   ;;  %vm13_vm1 = vcmask 1048064   ;;  %s39_s0 = inlined_call_operand.vmem [shape: f32[2,64], index: 0, kind: input, shape index: {}]   ;;  %s40_s1 = inlined_call_operand.vmem [shape: f32[1,128], index: 1, kind: output, shape index: {}]  }
   0x1   :  { %v4_v0 = vld [vmem:[%s39_s0] sm:$0x3]  ;;  %s22_s0 = smov 64  }
   0x2   :  { %5 = vst [vmem:[#allocation1] sm:$0x3] %v4_v0 }
   0x9   :  { %v10_v1 = vld [vmem:[#allocation1 + $0x1] sm:$0x1]   ;;  %v6_v2 = vld [vmem:[#allocation1] sm:$0x1]  }
   0xa   :  { %11 = vrot.lane.b32.xlu0 %v10_v1, %s22_s0  ;;  %8 = vst.msk [vmem:[#allocation0] sm:$0x1] %vm7_vm0, %v6_v2  }
  0x7c   :  { %v12_v3 = vpop.permute.xlu0 %11  }
  0x7d   :  { %14 = vst.msk [vmem:[#allocation0] sm:$0x1] %vm13_vm1, %v12_v3  }
  0x84   :  { %v18_v4 = vld [vmem:[#allocation0] sm:$0x1] }
  0x85   :  { %20 = vst [vmem:[%s40_s1] sm:$0x1] %v18_v4 }

// kernel: netg_forward.13
= control target key start
LH: loop header
LB: loop body
LE: loop exit
PB: predicated region body
PF: predicated region fallthrough
CT: control target
= control target key end

     0   :  { %s1003_s15 = smov 0   ;;  %s1005_s16 = smov 0   ;;  %s1164_s0 = inlined_call_operand.vmem [shape: bf16[4,32,512], index: 0, kind: input, shape index: {}]   ;;  %s1165_s1 = inlined_call_operand.vmem [shape: bf16[4,512,64], index: 1, kind: input, shape index: {}]   ;;  %s1166_s2 = inlined_call_operand.vmem [shape: bf16[4,32,64], index: 2, kind: output, shape index: {0}]   ;;  %s1167_s3 = inlined_call_operand.vmem [shape: f32[1,64], index: 3, kind: output, shape index: {1}]   ;;  %s1168_s4 = inlined_call_operand.vmem [shape: f32[1,64], index: 4, kind: output, shape index: {2}]  }
   0x1   :  { %s1007_s17 = smov 0   ;;  %s1009_s18 = smov 0  }
   0x2   :  { %s1011_s19 = smov 0   ;;  %s1013_s20 = smov 0  }
   0x3   :  { %s1015_s21 = smov 0  }
   0x4 LB: > { %s27_s22 = sadd.s32 1, %s966_s19  ;;  %s34_s23 = sadd.s32 1, %s970_s20  ;;  %s974_s21 = sphi %s1015_s21, %s15_s21   ;;  %s970_s20 = sphi %s1013_s20, %s1174_s20   ;;  %s966_s19 = sphi %s1011_s19, %s1173_s19   ;;  %s962_s18 = sphi %s1009_s18, %s1172_s18   ;;  %s958_s17 = sphi %s1007_s17, %s1171_s17   ;;  %s954_s16 = sphi %s1005_s16, %s1170_s16   ;;  %s950_s15 = sphi %s1003_s15, %s1169_s15  }
   0x5   : > { %p28_p0 = scmp.ge.s32.totalorder %s27_s22, 2  ;;  %p52_p1 = scmp.ne.s32.totalorder %s954_s16, %s950_s15 }
   0x6   : > { %p53_p2 = scmp.eq.s32.totalorder %s974_s21, 0  ;;  %s45_s27 = sadd.s32 1, %s954_s16 }
   0x7   : > { %s1176_s22 = smov (%p28_p0, %s27_s22), 0  ;;  %s1178_s23 = smov (!%p28_p0, %s34_s23), %s970_s20 }
   0x8   : > { %p54_p3 = por %p53_p2, %p52_p1  ;;  %p36_p4 = scmp.ge.s32.totalorder %s1178_s23, 4 }
   0x9   : > { %s41_s24 = ssub.s32 %s966_s19, %s1176_s22  ;;  %p749_p6 = scmp.ge.s32.totalorder %s974_s21, 8 }
   0xa   : > { %s1180_s23 = smov (%p36_p4, %s1178_s23), 0 }
   0xb   : > { %s38_s25 = ssub.s32 %s970_s20, %s1180_s23  ;;  %176 = sbr.rel (%p749_p6) target bundleno = 27 (0x1b), region = 16 }
   0xc   : > { %s42_s26 = sor.u32 %s41_s24, %s38_s25 }
   0xd   : > { %p43_p5 = scmp.eq.s32.totalorder %s42_s26, 0 }
   0xf   : > { %s1054_s28 = scalar_select %p43_p5, %s954_s16, %s45_s27  }
  0x12   : > { %179 = sbr.rel (!%p54_p3) target bundleno = 27 (0x1b), region = 20  ;;  %s181_s29 = sand.u32 (%p54_p3), 1, %s954_s16  }
  0x13   : > { %s751_s30 = sshll.u32 (%p54_p3), %s966_s19, 1  ;;  %s750_s5 = sshll.u32 (%p54_p3), %s181_s29, 5 }
  0x14   : > { %s752_s6 = sshll.u32 (%p54_p3), %s970_s20, 4  ;;  %s183_s12 = scalar_lea.vmem (%p54_p3), [#allocation3], %s750_s5 }
  0x15   : > { %s189_s7 = sadd.s32 (%p54_p3), %s752_s6, %s751_s30 }
  0x16   : > { %s753_s8 = sshll.u32 (%p54_p3), %s189_s7, 2 }
  0x17   : > { %s191_s11 = scalar_lea.vmem (%p54_p3), %s1164_s0, %s753_s8 }
  0x18   : > { %v225_v0 = vld [vmem:[%s191_s11] sm:$0xff] (%p54_p3)  ;;  %v227_v1 = vld [vmem:[%s191_s11 + $0x10] sm:$0xff] (%p54_p3) }
  0x19   : > { %v229_v2 = vld [vmem:[%s191_s11 + $0x20] sm:$0xff]  ;;  %226 = vst [vmem:[%s183_s12] sm:$0xff] %v225_v0  ;;  %228 = vst [vmem:[%s183_s12 + $0x8] sm:$0xff] %v227_v1  ;;  %v231_v3 = vld [vmem:[%s191_s11 + $0x30] sm:$0xff] }
  0x1a   : > { %230 = vst [vmem:[%s183_s12 + $0x10] sm:$0xff] %v229_v2  ;;  %232 = vst [vmem:[%s183_s12 + $0x18] sm:$0xff] %v231_v3 }
  0x1b PF: > { %p754_p7 = scmp.ge.s32.totalorder %s974_s21, 1  ;;  %p250_p8 = scmp.lt.s32.totalorder %s974_s21, 9 }
  0x1d   : > { %p251_p9 = pnand %p754_p7, %p250_p8 }
  0x1e   : > { %s257_s13 = sand.u32 (!%p251_p9), 1, %s950_s15   ;;  %s756_s14 = sshll.u32 (!%p251_p9), %s958_s17, 5 }
  0x1f   : > { %254 = sbr.rel (%p251_p9) target bundleno = 339 (0x153), region = 62  ;;  %s755_s24 = sshll.u32 (!%p251_p9), %s257_s13, 5 }
  0x20   : > { %p298_p10 = scmp.lt.s32.totalorder (!%p251_p9), %s962_s18, 3  ;;  %p300_p11 = scmp.lt.s32.totalorder (!%p251_p9), %s756_s14, 63 }
  0x21   : > { %p318_p12 = scmp.eq.s32.totalorder (!%p251_p9), %s962_s18, 0  ;;  %p322_p13 = scmp.eq.s32.totalorder (!%p251_p9), %s958_s17, 0 }
  0x22   : > { %s1081_s10 = scalar_lea.vmem (!%p251_p9), [#allocation3], %s755_s24 }
  0x23   : > { %p323_p0 = pnand (!%p251_p9), %p322_p13, %p318_p12 }
  0x26   : > { %s299_s25 = scalar_select %p298_p10, %s962_s18, 3 }
  0x27   : > { %s1182_s14 = smov (!%p300_p11, %s756_s14), 63  ;;  %326 = sbr.rel (%p323_p0) target bundleno = 46 (0x2e), region = 70 }
  0x28   : > { %s757_s26 = sshll.u32 %s299_s25, 6  ;;  %s790_s27 = sshll.u32 %s299_s25, 4  ;;  %vm327_vm0 = vcmask (!%p323_p0), 516096   ;;  %v976_v4 = vmov (!%p323_p0), 0.0  }
  0x29   : > { %s303_s29 = sadd.s32 %s757_s26, %s1182_s14  ;;  %s1072_s6 = scalar_lea.vmem %s1166_s2, %s790_s27  ;;  %328 = vst.msk [vmem:[%s1167_s3] sm:$0x1] (!%p323_p0), %vm327_vm0, %v976_v4  ;;  %329 = vst.msk [vmem:[%s1168_s4] sm:$0x1] (!%p323_p0), %vm327_vm0, %v976_v4 }
  0x2a   : > { %s758_s7 = sshll.u32 %s303_s29, 2 }
  0x2b   : > { %s1078_s15 = scalar_lea.vmem %s1165_s1, %s758_s7 }
  0x2e PF: > { %p762_p1 = scmp.ne.s32.totalorder %s958_s17, 0 }
  0x2f   : > { %vm333_vm1 = vcmask (!%p762_p1), 523264   ;;  %v977_v5 = vmov (!%p762_p1), 0.0  }
  0x30   : > { %332 = sbr.rel (%p762_p1) target bundleno = 55 (0x37), region = 74  ;;  %334 = vst.msk [vmem:[#allocation2] sm:$0xff] (!%p762_p1), %vm333_vm1, %v977_v5  ;;  %335 = vst.msk [vmem:[#allocation2 + $0x8] sm:$0xff] (!%p762_p1), %vm333_vm1, %v977_v5 }
  0x31   : > { %336 = vst.msk [vmem:[#allocation2 + $0x10] sm:$0xff] (!%p762_p1), %vm333_vm1, %v977_v5  ;;  %337 = vst.msk [vmem:[#allocation2 + $0x18] sm:$0xff] (!%p762_p1), %vm333_vm1, %v977_v5 }
  0x37 PF: > { %v898_v6 = vld [vmem:[%s1078_s15 + $0x40] sm:$0xff]   ;;  %v900_v8 = vld [vmem:[%s1078_s15 + $0x48] sm:$0xff]   ;;  %v902_v10 = vld [vmem:[%s1078_s15 + $0x50] sm:$0xff]   ;;  %vm547_vm2 = vcmask 523264   ;;  %p783_p2 = scmp.ne.s32.totalorder %s958_s17, 1 }
  0x38   : > { %v899_v7 = vld [vmem:[%s1078_s15] sm:$0xff]   ;;  %796 = vmatprep.subr.bf16.mxu0 %v898_v6  ;;  %824 = vmatprep.subr.bf16.mxu1 %v898_v6  ;;  %v901_v9 = vld [vmem:[%s1078_s15 + $0x8] sm:$0xff]   ;;  %v903_v11 = vld [vmem:[%s1078_s15 + $0x10] sm:$0xff]   ;;  %vm576_vm3 = vcmask (!%p783_p2), 519168   ;;  %vm596_vm4 = vcmask (!%p783_p2), 516096  }
  0x39   : > { %797 = vmatpush3.bf16.msra.mxu0 %v899_v7  ;;  %832 = vmatpush3.bf16.msra.mxu1 %v899_v7  ;;  %v904_v12 = vld [vmem:[%s1078_s15 + $0x58] sm:$0xff]   ;;  %v906_v14 = vld [vmem:[%s1078_s15 + $0x60] sm:$0xff]   ;;  %v908_v16 = vld [vmem:[%s1078_s15 + $0x68] sm:$0xff]  }
  0x3a   : > { %798 = vmatprep.subr.bf16.mxu0 %v900_v8  ;;  %825 = vmatprep.subr.bf16.mxu1 %v900_v8  ;;  %v905_v13 = vld [vmem:[%s1078_s15 + $0x18] sm:$0xff]   ;;  %v907_v15 = vld [vmem:[%s1078_s15 + $0x20] sm:$0xff]   ;;  %v916_v17 = vld [vmem:[%s1081_s10 + $0x4] ss:$8 sps:$4 sm:$0xff]  }
  0x3b   : > { %v919_v18 = vld [vmem:[%s1081_s10 + $0x14] ss:$8 sps:$4 sm:$0xff]   ;;  %v909_v19 = vld [vmem:[%s1078_s15 + $0x28] sm:$0xff]   ;;  %v910_v20 = vld [vmem:[%s1078_s15 + $0x70] sm:$0xff]   ;;  %526 = vmatprep.mubr.bf16.mxu0 %v916_v17 }
  0x3c   : > { %534 = vmatprep.mubr.bf16.mxu1 %v919_v18  ;;  %v911_v21 = vld [vmem:[%s1078_s15 + $0x30] sm:$0xff]   ;;  %v912_v22 = vld [vmem:[%s1078_s15 + $0x78] sm:$0xff]   ;;  %v338_v28 = vld [vmem:[#allocation2] sm:$0xff] }
  0x3d   : > { %799 = vmatpush3.bf16.msra.mxu0 %v901_v9  ;;  %833 = vmatpush3.bf16.msra.mxu1 %v901_v9  ;;  %v913_v23 = vld [vmem:[%s1078_s15 + $0x38] sm:$0xff]   ;;  %v914_v24 = vld [vmem:[%s1081_s10] ss:$8 sps:$4 sm:$0xff]   ;;  %v341_v38 = vld [vmem:[#allocation2 + $0x18] sm:$0xff] }
  0x3e   : > { %800 = vmatprep.subr.bf16.mxu0 %v902_v10  ;;  %826 = vmatprep.subr.bf16.mxu1 %v902_v10  ;;  %v917_v25 = vld [vmem:[%s1081_s10 + $0x10] ss:$8 sps:$4 sm:$0xff]   ;;  %v339_v36 = vld [vmem:[#allocation2 + $0x8] sm:$0xff] }
  0x3f   : > { %v340_v30 = vld [vmem:[#allocation2 + $0x10] sm:$0xff]  ;;  %v581_v17 = vld [vmem:[%s1167_s3] sm:$0x1] (!%p783_p2) }
  0x41   : > { %801 = vmatpush3.bf16.msra.mxu0 %v903_v11  ;;  %834 = vmatpush3.bf16.msra.mxu1 %v903_v11 }
  0x42   : > { %802 = vmatprep.subr.bf16.mxu0 %v904_v12  ;;  %827 = vmatprep.subr.bf16.mxu1 %v904_v12 }
  0x45   : > { %803 = vmatpush3.bf16.msra.mxu0 %v905_v13  ;;  %835 = vmatpush3.bf16.msra.mxu1 %v905_v13 }
  0x46   : > { %804 = vmatprep.subr.bf16.mxu0 %v906_v14  ;;  %828 = vmatprep.subr.bf16.mxu1 %v906_v14 }
  0x49   : > { %805 = vmatpush3.bf16.msra.mxu0 %v907_v15  ;;  %836 = vmatpush3.bf16.msra.mxu1 %v907_v15 }
  0x4a   : > { %806 = vmatprep.subr.bf16.mxu0 %v908_v16  ;;  %829 = vmatprep.subr.bf16.mxu1 %v908_v16 }
  0x4d   : > { %807 = vmatpush3.bf16.msra.mxu0 %v909_v19  ;;  %837 = vmatpush3.bf16.msra.mxu1 %v909_v19 }
  0x4e   : > { %808 = vmatprep.subr.bf16.mxu0 %v910_v20  ;;  %830 = vmatprep.subr.bf16.mxu1 %v910_v20  ;;  %v598_v20 = vld [vmem:[%s1168_s4] sm:$0x1] (!%p783_p2) }
  0x51   : > { %809 = vmatpush3.bf16.msra.mxu0 %v911_v21  ;;  %838 = vmatpush3.bf16.msra.mxu1 %v911_v21 }
  0x52   : > { %810 = vmatprep.subr.bf16.mxu0 %v912_v22  ;;  %831 = vmatprep.subr.bf16.mxu1 %v912_v22 }
  0x55   : > { %811 = vmatpush3.bf16.msra.mxu0 %v913_v23  ;;  %839 = vmatpush3.bf16.msra.mxu1 %v913_v23 }
  0x58   : > { %527 = vmatmul.mubr.bf16.vlgmr.msra.gmra.mrb[0].mxu0 %v914_v24  ;;  %535 = vmatmul.mubr.bf16.vlgmr.msra.gmra.mrb[0].mxu1 %v917_v25 }
 0x12b   : > { %v812_v26 = vpop.f32.mrb[0].mxu0  ;;  %v818_v27 = vpop.f32.mrb[0].mxu1 }
 0x12c   : > { %v813_v29 = vpop.f32.mrb[1].mxu0  ;;  %v819_v31 = vpop.f32.mrb[1].mxu1 }
 0x12d   : > { %v814_v32 = vadd.f32 %v813_v29, %v812_v26  ;;  %v820_v33 = vadd.f32 %v819_v31, %v818_v27  ;;  %v815_v34 = vpop.f32.mrb[2].mxu0  ;;  %v821_v35 = vpop.f32.mrb[2].mxu1  ;;  %555 = sbr.rel (%p783_p2) target bundleno = 339 (0x153), region = 78 }
 0x12e   : > { %v816_v37 = vpop.f32.mrb[3].mxu0  ;;  %v822_v39 = vpop.f32.mrb[3].mxu1 }
 0x12f   : > { %v543_v40 = vadd.f32 %v814_v32, %v338_v28  ;;  %v545_v41 = vadd.f32 %v820_v33, %v340_v30  ;;  %v817_v42 = vadd.f32 %v816_v37, %v815_v34  ;;  %v823_v43 = vadd.f32 %v822_v39, %v821_v35 }
 0x131   : > { %548 = vst.msk [vmem:[#allocation2] sm:$0xff] %vm547_vm2, %v543_v40  ;;  %550 = vst.msk [vmem:[#allocation2 + $0x10] sm:$0xff] %vm547_vm2, %v545_v41  ;;  %v544_v44 = vadd.f32 %v817_v42, %v339_v36  ;;  %v546_v45 = vadd.f32 %v823_v43, %v341_v38 }
 0x133   : > { %549 = vst.msk [vmem:[#allocation2 + $0x8] sm:$0xff] %vm547_vm2, %v544_v44  ;;  %551 = vst.msk [vmem:[#allocation2 + $0x18] sm:$0xff] %vm547_vm2, %v546_v45 }
 0x138   : > { %v556_v46 = vld [vmem:[#allocation2] sm:$0xff]  ;;  %v558_v48 = vld [vmem:[#allocation2 + $0x10] sm:$0xff] }
 0x139   : > { %v792_v49 = vpack.c.bf16 %v556_v46, %v556_v46  ;;  %v582_v50 = vsel %vm547_vm2, %v556_v46, 0.0  ;;  %v599_v51 = vmul.f32 %v556_v46, %v556_v46  ;;  %v794_v56 = vpack.c.bf16 %v558_v48, %v558_v48 }
 0x13a   : > { %v557_v47 = vld [vmem:[#allocation2 + $0x8] sm:$0xff]  ;;  %v559_v53 = vld [vmem:[#allocation2 + $0x18] sm:$0xff]  ;;  %v585_v57 = vsel %vm547_vm2, %v558_v48, 0.0  ;;  %v601_v60 = vmul.f32 %v558_v48, %v558_v48 }
 0x13b   : > { %v793_v52 = vpack.c.bf16 %v557_v47, %v557_v47  ;;  %v583_v54 = vsel %vm547_vm2, %v557_v47, 0.0  ;;  %v600_v55 = vmul.f32 %v557_v47, %v557_v47  ;;  %577 = vst.msk [vmem:[%s1072_s6] sm:$0xf] %vm576_vm3, %v792_v49  ;;  %v603_v58 = vsel %vm547_vm2, %v599_v51, 0.0  ;;  %579 = vst.msk [vmem:[%s1072_s6 + $0x8] sm:$0xf] %vm576_vm3, %v794_v56 }
 0x13c   : > { %v584_v59 = vadd.f32 %v583_v54, %v582_v50  ;;  %v795_v61 = vpack.c.bf16 %v559_v53, %v559_v53  ;;  %v587_v63 = vsel %vm547_vm2, %v559_v53, 0.0  ;;  %v602_v0 = vmul.f32 %v559_v53, %v559_v53 }
 0x13d   : > { %578 = vst.msk [vmem:[%s1072_s6 + $0x4] sm:$0xf] %vm576_vm3, %v793_v52  ;;  %v604_v62 = vsel %vm547_vm2, %v600_v55, 0.0  ;;  %v606_v3 = vsel %vm547_vm2, %v601_v60, 0.0 }
 0x13e   : > { %v605_v1 = vadd.f32 %v604_v62, %v603_v58  ;;  %v586_v2 = vadd.f32 %v585_v57, %v584_v59  ;;  %580 = vst.msk [vmem:[%s1072_s6 + $0xc] sm:$0xf] %vm576_vm3, %v795_v61  ;;  %v608_v4 = vsel %vm547_vm2, %v602_v0, 0.0 }
 0x140   : > { %v607_v5 = vadd.f32 %v606_v3, %v605_v1  ;;  %v588_v6 = vadd.f32 %v587_v63, %v586_v2 }
 0x142   : > { %v589_v7 = vrot.slane %v588_v6, 4  ;;  %v609_v8 = vadd.f32 %v608_v4, %v607_v5 }
 0x144   : > { %v610_v9 = vrot.slane %v609_v8, 4  ;;  %v590_v10 = vadd.f32 %v589_v7, %v588_v6 }
 0x146   : > { %v591_v11 = vrot.slane %v590_v10, 2  ;;  %v611_v12 = vadd.f32 %v610_v9, %v609_v8 }
 0x148   : > { %v592_v13 = vadd.f32 %v591_v11, %v590_v10  ;;  %v612_v14 = vrot.slane %v611_v12, 2 }
 0x14a   : > { %v593_v15 = vrot.slane %v592_v13, 1  ;;  %v613_v16 = vadd.f32 %v612_v14, %v611_v12 }
 0x14c   : > { %v594_v18 = vadd.f32 %v593_v15, %v592_v13  ;;  %v614_v19 = vrot.slane %v613_v16, 1 }
 0x14e   : > { %v595_v21 = vadd.f32 %v594_v18, %v581_v17  ;;  %v615_v22 = vadd.f32 %v614_v19, %v613_v16 }
 0x150   : > { %597 = vst.msk [vmem:[%s1167_s3] sm:$0x1] %vm596_vm4, %v595_v21  ;;  %v616_v23 = vadd.f32 %v615_v22, %v598_v20 }
 0x152   : > { %617 = vst.msk [vmem:[%s1168_s4] sm:$0x1] %vm596_vm4, %v616_v23 }
 0x153 PF: > { %s15_s21 = sadd.s32 1, %s974_s21   ;;  %s1169_s15 = smov %s954_s16 }
 0x154   : > { %p12_p3 = scmp.ge.s32.totalorder %s15_s21, 10   ;;  %s1170_s16 = smov %s1054_s28 }
 0x155   : > { %s1171_s17 = smov %s966_s19  ;;  %s1172_s18 = smov %s970_s20 }
 0x156   : > { %s1173_s19 = smov %s1176_s22  ;;  %s1174_s20 = smov %s1180_s23 }
 0x157   :  { %14 = sbr.rel (!%p12_p3) target bundleno = 4 (0x4), region = 132 }

// kernel: netg_forward.14
= control target key start
LH: loop header
LB: loop body
LE: loop exit
PB: predicated region body
PF: predicated region fallthrough
CT: control target
= control target key end

     0   :  { %s222_s0 = inlined_call_operand.vmem [shape: bf16[64,128], index: 0, kind: input, shape index: {}]   ;;  %s223_s1 = inlined_call_operand.vmem [shape: f32[1,128], index: 1, kind: input, shape index: {}]   ;;  %s224_s2 = inlined_call_operand.vmem [shape: f32[1,128], index: 2, kind: input, shape index: {}]   ;;  %s225_s3 = inlined_call_operand.vmem [shape: bf16[64,128], index: 3, kind: output, shape index: {}]  }
   0x1   :  { %v131_v0 = vld [vmem:[%s222_s0] sm:$0xff]   ;;  %v166_v4 = vld [vmem:[%s222_s0 + $0x8] sm:$0xff]   ;;  %v167_v5 = vld [vmem:[%s222_s0 + $0x10] sm:$0xff]  }
   0x2   :  { %v112_v1 = vld [vmem:[%s223_s1] ss:$0 sm:$0xff]  ;;  %v132_v2 = vunpack.c.l.bf16 %v131_v0  ;;  %v133_v3 = vunpack.c.h.bf16 %v131_v0  ;;  %v168_v6 = vld [vmem:[%s222_s0 + $0x18] sm:$0xff]   ;;  %v136_v8 = vunpack.c.l.bf16 %v166_v4  ;;  %v137_v9 = vunpack.c.h.bf16 %v166_v4 }
   0x3   :  { %v113_v7 = vld [vmem:[%s224_s2] ss:$0 sm:$0xff]  ;;  %v140_v10 = vunpack.c.l.bf16 %v167_v5  ;;  %v141_v11 = vunpack.c.h.bf16 %v167_v5  ;;  %v144_v14 = vunpack.c.l.bf16 %v168_v6  ;;  %v145_v15 = vunpack.c.h.bf16 %v168_v6 }
   0x4   :  { %v37_v12 = vmul.f32 %v132_v2, %v112_v1  ;;  %v38_v13 = vmul.f32 %v133_v3, %v112_v1  ;;  %v39_v16 = vmul.f32 %v136_v8, %v112_v1  ;;  %v40_v17 = vmul.f32 %v137_v9, %v112_v1 }
   0x5   :  { %v41_v18 = vmul.f32 %v140_v10, %v112_v1  ;;  %v42_v19 = vmul.f32 %v141_v11, %v112_v1  ;;  %v43_v22 = vmul.f32 %v144_v14, %v112_v1  ;;  %v44_v23 = vmul.f32 %v145_v15, %v112_v1 }
   0x6   :  { %v52_v20 = vadd.f32 %v113_v7, %v37_v12  ;;  %v53_v21 = vadd.f32 %v113_v7, %v38_v13  ;;  %v54_v24 = vadd.f32 %v113_v7, %v39_v16  ;;  %v55_v25 = vadd.f32 %v113_v7, %v40_v17 }
   0x7   :  { %v56_v26 = vadd.f32 %v113_v7, %v41_v18  ;;  %v57_v27 = vadd.f32 %v113_v7, %v42_v19  ;;  %v58_v30 = vadd.f32 %v113_v7, %v43_v22  ;;  %v59_v31 = vadd.f32 %v113_v7, %v44_v23 }
   0x8   :  { %v60_v28 = vmax.f32 %v52_v20, 0.0  ;;  %v61_v29 = vmax.f32 %v53_v21, 0.0  ;;  %v62_v32 = vmax.f32 %v54_v24, 0.0  ;;  %v63_v33 = vmax.f32 %v55_v25, 0.0 }
   0x9   :  { %v64_v34 = vmax.f32 %v56_v26, 0.0  ;;  %v65_v35 = vmax.f32 %v57_v27, 0.0  ;;  %v66_v37 = vmax.f32 %v58_v30, 0.0  ;;  %v67_v38 = vmax.f32 %v59_v31, 0.0 }
   0xa   :  { %v149_v36 = vpack.c.bf16 %v61_v29, %v60_v28  ;;  %v154_v39 = vpack.c.bf16 %v63_v33, %v62_v32 }
   0xb   :  { %v159_v40 = vpack.c.bf16 %v65_v35, %v64_v34  ;;  %v164_v41 = vpack.c.bf16 %v67_v38, %v66_v37 }
   0xc   :  { %150 = vst [vmem:[%s225_s3] sm:$0xff] %v149_v36   ;;  %169 = vst [vmem:[%s225_s3 + $0x8] sm:$0xff] %v154_v39  }
   0xd   :  { %170 = vst [vmem:[%s225_s3 + $0x10] sm:$0xff] %v159_v40   ;;  %171 = vst [vmem:[%s225_s3 + $0x18] sm:$0xff] %v164_v41  }

// kernel: tile.62
= control target key start
LH: loop header
LB: loop body
LE: loop exit
PB: predicated region body
PF: predicated region fallthrough
CT: control target
= control target key end

     0   :  { %s22_s0 = inlined_call_operand.vmem [shape: f32[32], index: 0, kind: input, shape index: {}]   ;;  %s23_s1 = inlined_call_operand.vmem [shape: f32[4,32], index: 1, kind: output, shape index: {}]  }
   0x1   :  { %v4_v0 = vld [vmem:[%s22_s0] ss:$0 sm:$0xff] }
   0x2   :  { %5 = vst [vmem:[%s23_s1] sm:$0xf] %v4_v0 }

// kernel: tile.63
= control target key start
LH: loop header
LB: loop body
LE: loop exit
PB: predicated region body
PF: predicated region fallthrough
CT: control target
= control target key end

     0   :  { %vm7_vm0 = vcmask 261120   ;;  %s37_s8 = smov 32   ;;  %s38_s9 = smov 64   ;;  %vm13_vm1 = vcmask 1048320   ;;  %vm19_vm2 = vcmask 785920   ;;  %vm25_vm3 = vcmask 523520   ;;  %s55_s0 = inlined_call_operand.vmem [shape: f32[4,32], index: 0, kind: input, shape index: {}]   ;;  %s56_s1 = inlined_call_operand.vmem [shape: f32[1,128], index: 1, kind: output, shape index: {}]  }
   0x1   :  { %v4_v0 = vld [vmem:[%s55_s0] sm:$0xf]  ;;  %s36_s0 = smov 96  }
   0x2   :  { %5 = vst [vmem:[#allocation1] sm:$0xf] %v4_v0 }
   0x9   :  { %v10_v1 = vld [vmem:[#allocation1 + $0x3] sm:$0x1]   ;;  %v22_v2 = vld [vmem:[#allocation1 + $0x1] sm:$0x1]   ;;  %v6_v3 = vld [vmem:[#allocation1] sm:$0x1]  }
   0xa   :  { %11 = vrot.lane.b32.xlu0 %v10_v1, %s36_s0  ;;  %23 = vrot.lane.b32.xlu1 %v22_v2, %s37_s8  ;;  %v16_v4 = vld [vmem:[#allocation1 + $0x2] sm:$0x1]   ;;  %8 = vst.msk [vmem:[#allocation0] sm:$0x1] %vm7_vm0, %v6_v3  }
   0xe   :  { %17 = vrot.lane.b32.xlu0 %v16_v4, %s38_s9 }
  0x7c   :  { %v12_v5 = vpop.permute.xlu0 %11   ;;  %v24_v6 = vpop.permute.xlu1 %23  }
  0x7d   :  { %14 = vst.msk [vmem:[#allocation0] sm:$0x1] %vm13_vm1, %v12_v5  }
  0x80   :  { %v18_v7 = vpop.permute.xlu0 %17  }
  0x81   :  { %20 = vst.msk [vmem:[#allocation0] sm:$0x1] %vm19_vm2, %v18_v7  }
  0x82   :  { %26 = vst.msk [vmem:[#allocation0] sm:$0x1] %vm25_vm3, %v24_v6  }
  0x89   :  { %v30_v8 = vld [vmem:[#allocation0] sm:$0x1] }
  0x8a   :  { %32 = vst [vmem:[%s56_s1] sm:$0x1] %v30_v8 }

// kernel: netg_forward.15
= control target key start
LH: loop header
LB: loop body
LE: loop exit
PB: predicated region body
PF: predicated region fallthrough
CT: control target
= control target key end

     0   :  { %s1301_s15 = smov 0   ;;  %s1303_s16 = smov 0   ;;  %s1524_s0 = inlined_call_operand.vmem [shape: bf16[4,128,256], index: 0, kind: input, shape index: {}]   ;;  %s1525_s1 = inlined_call_operand.vmem [shape: bf16[4,256,32], index: 1, kind: input, shape index: {}]   ;;  %s1526_s2 = inlined_call_operand.vmem [shape: bf16[4,128,32], index: 2, kind: output, shape index: {0}]   ;;  %s1527_s3 = inlined_call_operand.vmem [shape: f32[1,32], index: 3, kind: output, shape index: {1}]   ;;  %s1528_s4 = inlined_call_operand.vmem [shape: f32[1,32], index: 4, kind: output, shape index: {2}]  }
   0x1   :  { %s1305_s17 = smov 0  }
   0x2 LB: > { %s34_s18 = sadd.s32 1, %s1268_s16  ;;  %p1024_p0 = scmp.ge.s32.totalorder %s1272_s17, 1  ;;  %s1272_s17 = sphi %s1305_s17, %s15_s17   ;;  %s1268_s16 = sphi %s1303_s16, %s1530_s16   ;;  %s1264_s15 = sphi %s1301_s15, %s1529_s15  }
   0x3   : > { %p36_p1 = scmp.ge.s32.totalorder %s34_s18, 4  ;;  %p210_p2 = scmp.lt.s32.totalorder %s1272_s17, 5 }
   0x5   : > { %s1532_s18 = smov (%p36_p1, %s34_s18), 0  ;;  %p211_p3 = pnand %p1024_p0, %p210_p2 }
   0x6   : > { %p260_p4 = scmp.lt.s32.totalorder (!%p211_p3), %s1264_s15, 3  ;;  %p295_p5 = scmp.eq.s32.totalorder (!%p211_p3), %s1264_s15, 0 }
   0x7   : > { %214 = sbr.rel (%p211_p3) target bundleno = 342 (0x156), region = 28 }
   0xe   : > { %s1534_s15 = smov (!%p260_p4, %s1264_s15), 3  ;;  %303 = sbr.rel (!%p295_p5) target bundleno = 21 (0x15), region = 32 }
   0xf   : > { %s1083_s19 = sshll.u32 %s1534_s15, 7  ;;  %s1085_s20 = sshll.u32 %s1534_s15, 6  ;;  %vm304_vm0 = vcmask (%p295_p5), 253952   ;;  %v1274_v0 = vmov (%p295_p5), 0.0  }
  0x10   : > { %s1322_s23 = scalar_lea.vmem %s1524_s0, %s1083_s19  ;;  %s1327_s26 = scalar_lea.vmem %s1525_s1, %s1083_s19  ;;  %305 = vst.msk [vmem:[%s1527_s3] sm:$0x1] (%p295_p5), %vm304_vm0, %v1274_v0  ;;  %306 = vst.msk [vmem:[%s1528_s4] sm:$0x1] (%p295_p5), %vm304_vm0, %v1274_v0 }
  0x11   : > { %s1332_s29 = scalar_lea.vmem %s1526_s2, %s1085_s20 }
  0x15 PF: > { %v1210_v1 = vld [vmem:[%s1327_s26 + $0x40] sm:$0xff]   ;;  %v1212_v3 = vld [vmem:[%s1327_s26 + $0x48] sm:$0xff]   ;;  %v1214_v5 = vld [vmem:[%s1327_s26 + $0x50] sm:$0xff]   ;;  %vm310_vm1 = vcmask 261120   ;;  %v1275_v33 = vmov 0.0   ;;  %vm780_vm2 = vcmask 257024  }
  0x16   : > { %v1211_v2 = vld [vmem:[%s1327_s26] sm:$0xff]   ;;  %1104 = vmatprep.subr.bf16.mxu0 %v1210_v1  ;;  %1168 = vmatprep.subr.bf16.mxu1 %v1210_v1  ;;  %v1213_v4 = vld [vmem:[%s1327_s26 + $0x8] sm:$0xff]   ;;  %v1215_v6 = vld [vmem:[%s1327_s26 + $0x10] sm:$0xff]   ;;  %311 = vst.msk [vmem:[#allocation2] sm:$0xff] %vm310_vm1, %v1275_v33  ;;  %vm836_vm3 = vcmask 253952  }
  0x17   : > { %1105 = vmatpush3.bf16.msra.mxu0 %v1211_v2  ;;  %1176 = vmatpush3.bf16.msra.mxu1 %v1211_v2  ;;  %v1216_v7 = vld [vmem:[%s1327_s26 + $0x58] sm:$0xff]   ;;  %v1218_v9 = vld [vmem:[%s1327_s26 + $0x60] sm:$0xff]   ;;  %v1220_v11 = vld [vmem:[%s1327_s26 + $0x68] sm:$0xff]   ;;  %312 = vst.msk [vmem:[#allocation2 + $0x8] sm:$0xff] %vm310_vm1, %v1275_v33 }
  0x18   : > { %1106 = vmatprep.subr.bf16.mxu0 %v1212_v3  ;;  %1169 = vmatprep.subr.bf16.mxu1 %v1212_v3  ;;  %v1217_v8 = vld [vmem:[%s1327_s26 + $0x18] sm:$0xff]   ;;  %v1219_v10 = vld [vmem:[%s1327_s26 + $0x20] sm:$0xff]   ;;  %v1221_v13 = vld [vmem:[%s1327_s26 + $0x28] sm:$0xff]   ;;  %313 = vst.msk [vmem:[#allocation2 + $0x10] sm:$0xff] %vm310_vm1, %v1275_v33 }
  0x19   : > { %v1228_v12 = vld [vmem:[%s1322_s23 + $0x4] ss:$8 sps:$4 sm:$0xff]   ;;  %v1222_v15 = vld [vmem:[%s1327_s26 + $0x70] sm:$0xff]   ;;  %v1224_v17 = vld [vmem:[%s1327_s26 + $0x78] sm:$0xff]   ;;  %314 = vst.msk [vmem:[#allocation2 + $0x18] sm:$0xff] %vm310_vm1, %v1275_v33 }
  0x1a   : > { %v1234_v14 = vld [vmem:[%s1322_s23 + $0x44] ss:$8 sps:$4 sm:$0xff]   ;;  %599 = vmatprep.mubr.bf16.mxu0 %v1228_v12  ;;  %v1223_v16 = vld [vmem:[%s1327_s26 + $0x30] sm:$0xff]   ;;  %v1225_v18 = vld [vmem:[%s1327_s26 + $0x38] sm:$0xff]   ;;  %315 = vst.msk [vmem:[#allocation2 + $0x20] sm:$0xff] %vm310_vm1, %v1275_v33 }
  0x1b   : > { %1107 = vmatpush3.bf16.msra.mxu0 %v1213_v4  ;;  %1177 = vmatpush3.bf16.msra.mxu1 %v1213_v4  ;;  %v1226_v19 = vld [vmem:[%s1322_s23] ss:$8 sps:$4 sm:$0xff]   ;;  %v1229_v21 = vld [vmem:[%s1322_s23 + $0x14] ss:$8 sps:$4 sm:$0xff]   ;;  %v1231_v23 = vld [vmem:[%s1322_s23 + $0x10] ss:$8 sps:$4 sm:$0xff]  }
  0x1c   : > { %1108 = vmatprep.subr.bf16.mxu0 %v1214_v5  ;;  %1170 = vmatprep.subr.bf16.mxu1 %v1214_v5  ;;  %v1232_v20 = vld [vmem:[%s1322_s23 + $0x40] ss:$8 sps:$4 sm:$0xff]   ;;  %v1238_v22 = vld [vmem:[%s1322_s23 + $0x54] ss:$8 sps:$4 sm:$0xff]   ;;  %v1240_v24 = vld [vmem:[%s1322_s23 + $0x50] ss:$8 sps:$4 sm:$0xff]  }
  0x1d   : > { %631 = vmatprep.mubr.bf16.mxu1 %v1234_v14  ;;  %v1235_v25 = vld [vmem:[%s1322_s23 + $0x24] ss:$8 sps:$4 sm:$0xff]   ;;  %v1237_v27 = vld [vmem:[%s1322_s23 + $0x20] ss:$8 sps:$4 sm:$0xff]   ;;  %v1241_v29 = vld [vmem:[%s1322_s23 + $0x34] ss:$8 sps:$4 sm:$0xff]  }
  0x1e   : > { %v1244_v26 = vld [vmem:[%s1322_s23 + $0x64] ss:$8 sps:$4 sm:$0xff]   ;;  %v1246_v28 = vld [vmem:[%s1322_s23 + $0x60] ss:$8 sps:$4 sm:$0xff]   ;;  %v1247_v30 = vld [vmem:[%s1322_s23 + $0x74] ss:$8 sps:$4 sm:$0xff]  }
  0x1f   : > { %1109 = vmatpush3.bf16.msra.mxu0 %v1215_v6  ;;  %1178 = vmatpush3.bf16.msra.mxu1 %v1215_v6  ;;  %v1243_v31 = vld [vmem:[%s1322_s23 + $0x30] ss:$8 sps:$4 sm:$0xff]   ;;  %316 = vst.msk [vmem:[#allocation2 + $0x28] sm:$0xff] %vm310_vm1, %v1275_v33  ;;  %317 = vst.msk [vmem:[#allocation2 + $0x30] sm:$0xff] %vm310_vm1, %v1275_v33  ;;  %v327_v36 = vld [vmem:[#allocation2] sm:$0xff] }
  0x20   : > { %1110 = vmatprep.subr.bf16.mxu0 %v1216_v7  ;;  %1171 = vmatprep.subr.bf16.mxu1 %v1216_v7  ;;  %v1249_v32 = vld [vmem:[%s1322_s23 + $0x70] ss:$8 sps:$4 sm:$0xff]   ;;  %318 = vst.msk [vmem:[#allocation2 + $0x38] sm:$0xff] %vm310_vm1, %v1275_v33  ;;  %319 = vst.msk [vmem:[#allocation2 + $0x40] sm:$0xff] %vm310_vm1, %v1275_v33  ;;  %v330_v0 = vld [vmem:[#allocation2 + $0x18] sm:$0xff] }
  0x21   : > { %320 = vst.msk [vmem:[#allocation2 + $0x48] sm:$0xff] %vm310_vm1, %v1275_v33  ;;  %321 = vst.msk [vmem:[#allocation2 + $0x50] sm:$0xff] %vm310_vm1, %v1275_v33  ;;  %v328_v44 = vld [vmem:[#allocation2 + $0x8] sm:$0xff]  ;;  %v329_v56 = vld [vmem:[#allocation2 + $0x10] sm:$0xff] }
  0x22   : > { %322 = vst.msk [vmem:[#allocation2 + $0x58] sm:$0xff] %vm310_vm1, %v1275_v33  ;;  %323 = vst.msk [vmem:[#allocation2 + $0x60] sm:$0xff] %vm310_vm1, %v1275_v33 }
  0x23   : > { %1111 = vmatpush3.bf16.msra.mxu0 %v1217_v8  ;;  %1179 = vmatpush3.bf16.msra.mxu1 %v1217_v8  ;;  %324 = vst.msk [vmem:[#allocation2 + $0x68] sm:$0xff] %vm310_vm1, %v1275_v33  ;;  %325 = vst.msk [vmem:[#allocation2 + $0x70] sm:$0xff] %vm310_vm1, %v1275_v33 }
  0x24   : > { %1112 = vmatprep.subr.bf16.mxu0 %v1218_v9  ;;  %1172 = vmatprep.subr.bf16.mxu1 %v1218_v9  ;;  %326 = vst.msk [vmem:[#allocation2 + $0x78] sm:$0xff] %vm310_vm1, %v1275_v33 }
  0x27   : > { %1113 = vmatpush3.bf16.msra.mxu0 %v1219_v10  ;;  %1180 = vmatpush3.bf16.msra.mxu1 %v1219_v10  ;;  %v335_v38 = vld [vmem:[#allocation2 + $0x40] sm:$0xff] }
  0x28   : > { %1114 = vmatprep.subr.bf16.mxu0 %v1220_v11  ;;  %1173 = vmatprep.subr.bf16.mxu1 %v1220_v11  ;;  %v336_v46 = vld [vmem:[#allocation2 + $0x48] sm:$0xff]  ;;  %v337_v58 = vld [vmem:[#allocation2 + $0x50] sm:$0xff] }
  0x29   : > { %v338_v6 = vld [vmem:[#allocation2 + $0x58] sm:$0xff] }
  0x2b   : > { %1115 = vmatpush3.bf16.msra.mxu0 %v1221_v13  ;;  %1181 = vmatpush3.bf16.msra.mxu1 %v1221_v13 }
  0x2c   : > { %1116 = vmatprep.subr.bf16.mxu0 %v1222_v15  ;;  %1174 = vmatprep.subr.bf16.mxu1 %v1222_v15 }
  0x2f   : > { %1117 = vmatpush3.bf16.msra.mxu0 %v1223_v16  ;;  %1182 = vmatpush3.bf16.msra.mxu1 %v1223_v16 }
  0x30   : > { %1118 = vmatprep.subr.bf16.mxu0 %v1224_v17  ;;  %1175 = vmatprep.subr.bf16.mxu1 %v1224_v17 }
  0x33   : > { %1119 = vmatpush3.bf16.msra.mxu0 %v1225_v18  ;;  %1183 = vmatpush3.bf16.msra.mxu1 %v1225_v18 }
  0x36   : > { %600 = vmatmul.mubr.bf16.vlgmr.msra.gmra.mrb[0].mxu0 %v1226_v19  ;;  %632 = vmatmul.mubr.bf16.vlgmr.msra.gmra.mrb[0].mxu1 %v1232_v20  ;;  %v331_v20 = vld [vmem:[#allocation2 + $0x20] sm:$0xff] }
  0x37   : > { %607 = vmatprep.mubr.bf16.mxu0 %v1229_v21  ;;  %639 = vmatprep.mubr.bf16.mxu1 %v1238_v22  ;;  %v339_v22 = vld [vmem:[#allocation2 + $0x60] sm:$0xff] }
  0x3e   : > { %608 = vmatmul.mubr.bf16.gmra.mrb[4].mxu0 %v1231_v23  ;;  %640 = vmatmul.mubr.bf16.gmra.mrb[4].mxu1 %v1240_v24 }
  0x3f   : > { %615 = vmatprep.mubr.bf16.mxu0 %v1235_v25  ;;  %647 = vmatprep.mubr.bf16.mxu1 %v1244_v26 }
  0x46   : > { %616 = vmatmul.mubr.bf16.gmra.mrb[8].mxu0 %v1237_v27  ;;  %648 = vmatmul.mubr.bf16.gmra.mrb[8].mxu1 %v1246_v28  ;;  %v332_v28 = vld [vmem:[#allocation2 + $0x28] sm:$0xff] }
  0x47   : > { %623 = vmatprep.mubr.bf16.mxu0 %v1241_v29  ;;  %655 = vmatprep.mubr.bf16.mxu1 %v1247_v30 }
  0x4e   : > { %624 = vmatmul.mubr.bf16.gmra.mrb[12].mxu0 %v1243_v31  ;;  %656 = vmatmul.mubr.bf16.gmra.mrb[12].mxu1 %v1249_v32 }
 0x109   : > { %v1120_v34 = vpop.f32.mrb[0].mxu0  ;;  %v1144_v35 = vpop.f32.mrb[0].mxu1 }
 0x10a   : > { %v1121_v37 = vpop.f32.mrb[1].mxu0  ;;  %v1145_v39 = vpop.f32.mrb[1].mxu1 }
 0x10b   : > { %v1122_v40 = vadd.f32 %v1121_v37, %v1120_v34  ;;  %v1123_v41 = vpop.f32.mrb[2].mxu0  ;;  %v1146_v42 = vadd.f32 %v1145_v39, %v1144_v35  ;;  %v1147_v43 = vpop.f32.mrb[2].mxu1 }
 0x10c   : > { %v1124_v45 = vpop.f32.mrb[3].mxu0  ;;  %v1148_v47 = vpop.f32.mrb[3].mxu1 }
 0x10d   : > { %v664_v48 = vadd.f32 %v1122_v40, %v327_v36  ;;  %v1125_v49 = vadd.f32 %v1124_v45, %v1123_v41  ;;  %v672_v50 = vadd.f32 %v1146_v42, %v335_v38  ;;  %v1149_v51 = vadd.f32 %v1148_v47, %v1147_v43  ;;  %v340_v45 = vld [vmem:[#allocation2 + $0x68] sm:$0xff] }
 0x10f   : > { %681 = vst.msk [vmem:[#allocation2] sm:$0xff] %vm310_vm1, %v664_v48  ;;  %v665_v52 = vadd.f32 %v1125_v49, %v328_v44  ;;  %689 = vst.msk [vmem:[#allocation2 + $0x40] sm:$0xff] %vm310_vm1, %v672_v50  ;;  %v673_v53 = vadd.f32 %v1149_v51, %v336_v46 }
 0x111   : > { %682 = vst.msk [vmem:[#allocation2 + $0x8] sm:$0xff] %vm310_vm1, %v665_v52  ;;  %v1126_v54 = vpop.f32.mrb[4].mxu0  ;;  %690 = vst.msk [vmem:[#allocation2 + $0x48] sm:$0xff] %vm310_vm1, %v673_v53  ;;  %v1150_v55 = vpop.f32.mrb[4].mxu1 }
 0x112   : > { %v1127_v57 = vpop.f32.mrb[5].mxu0  ;;  %v1151_v59 = vpop.f32.mrb[5].mxu1 }
 0x113   : > { %v1128_v60 = vadd.f32 %v1127_v57, %v1126_v54  ;;  %v1129_v61 = vpop.f32.mrb[6].mxu0  ;;  %v1152_v62 = vadd.f32 %v1151_v59, %v1150_v55  ;;  %v1153_v63 = vpop.f32.mrb[6].mxu1 }
 0x114   : > { %v1130_v1 = vpop.f32.mrb[7].mxu0  ;;  %v1154_v2 = vpop.f32.mrb[7].mxu1 }
 0x115   : > { %v666_v3 = vadd.f32 %v1128_v60, %v329_v56  ;;  %v1131_v4 = vadd.f32 %v1130_v1, %v1129_v61  ;;  %v674_v5 = vadd.f32 %v1152_v62, %v337_v58  ;;  %v1155_v7 = vadd.f32 %v1154_v2, %v1153_v63  ;;  %v333_v56 = vld [vmem:[#allocation2 + $0x30] sm:$0xff] }
 0x116   : > { %v700_v8 = vld [vmem:[#allocation2] sm:$0xff]  ;;  %v341_v63 = vld [vmem:[#allocation2 + $0x70] sm:$0xff] }
 0x117   : > { %v1392_v9 = vld [vmem:[#allocation2 + $0x40] sm:$0xff]  ;;  %v1088_v10 = vpack.c.bf16 %v700_v8, %v700_v8  ;;  %683 = vst.msk [vmem:[#allocation2 + $0x10] sm:$0xff] %vm310_vm1, %v666_v3  ;;  %v667_v11 = vadd.f32 %v1131_v4, %v330_v0  ;;  %691 = vst.msk [vmem:[#allocation2 + $0x50] sm:$0xff] %vm310_vm1, %v674_v5  ;;  %v675_v15 = vadd.f32 %v1155_v7, %v338_v6  ;;  %v798_v46 = vsel %vm310_vm1, %v700_v8, 0.0  ;;  %v334_v3 = vld [vmem:[#allocation2 + $0x38] sm:$0xff] }
 0x118   : > { %v701_v12 = vld [vmem:[#allocation2 + $0x8] sm:$0xff]  ;;  %v1096_v13 = vpack.c.bf16 %v1392_v9, %v1392_v9  ;;  %v839_v35 = vmul.f32 %v700_v8, %v700_v8 }
 0x119   : > { %v1398_v14 = vld [vmem:[#allocation2 + $0x48] sm:$0xff]  ;;  %781 = vst.msk [vmem:[%s1332_s29] sm:$0xf] %vm780_vm2, %v1088_v10  ;;  %v1089_v16 = vpack.c.bf16 %v701_v12, %v701_v12  ;;  %v1132_v17 = vpop.f32.mrb[8].mxu0  ;;  %v1156_v18 = vpop.f32.mrb[8].mxu1  ;;  %v840_v31 = vmul.f32 %v701_v12, %v701_v12  ;;  %v799_v39 = vsel %vm310_vm1, %v701_v12, 0.0 }
 0x11a   : > { %684 = vst.msk [vmem:[#allocation2 + $0x18] sm:$0xff] %vm310_vm1, %v667_v11  ;;  %v1097_v19 = vpack.c.bf16 %v1398_v14, %v1398_v14  ;;  %v1133_v21 = vpop.f32.mrb[9].mxu0  ;;  %692 = vst.msk [vmem:[#allocation2 + $0x58] sm:$0xff] %vm310_vm1, %v675_v15  ;;  %v1157_v23 = vpop.f32.mrb[9].mxu1  ;;  %v800_v53 = vadd.f32 %v799_v39, %v798_v46  ;;  %v855_v59 = vsel %vm310_vm1, %v839_v35, 0.0 }
 0x11b   : > { %789 = vst.msk [vmem:[%s1332_s29 + $0x20] sm:$0xf] %vm780_vm2, %v1096_v13  ;;  %782 = vst.msk [vmem:[%s1332_s29 + $0x4] sm:$0xf] %vm780_vm2, %v1089_v16  ;;  %v1134_v24 = vadd.f32 %v1133_v21, %v1132_v17  ;;  %v1135_v25 = vpop.f32.mrb[10].mxu0  ;;  %v1158_v26 = vadd.f32 %v1157_v23, %v1156_v18  ;;  %v1159_v27 = vpop.f32.mrb[10].mxu1 }
 0x11c   : > { %790 = vst.msk [vmem:[%s1332_s29 + $0x24] sm:$0xf] %vm780_vm2, %v1097_v19  ;;  %v1136_v29 = vpop.f32.mrb[11].mxu0  ;;  %v1160_v30 = vpop.f32.mrb[11].mxu1  ;;  %v856_v47 = vsel %vm310_vm1, %v840_v31, 0.0  ;;  %v342_v23 = vld [vmem:[#allocation2 + $0x78] sm:$0xff] }
 0x11d   : > { %v668_v32 = vadd.f32 %v1134_v24, %v331_v20  ;;  %v1137_v33 = vadd.f32 %v1136_v29, %v1135_v25  ;;  %v676_v34 = vadd.f32 %v1158_v26, %v339_v22  ;;  %v1161_v38 = vadd.f32 %v1160_v30, %v1159_v27 }
 0x11e   : > { %v702_v36 = vld [vmem:[#allocation2 + $0x10] sm:$0xff]  ;;  %v857_v1 = vadd.f32 %v856_v47, %v855_v59 }
 0x11f   : > { %v1412_v37 = vld [vmem:[#allocation2 + $0x50] sm:$0xff]  ;;  %v1090_v40 = vpack.c.bf16 %v702_v36, %v702_v36  ;;  %v841_v41 = vmul.f32 %v702_v36, %v702_v36  ;;  %685 = vst.msk [vmem:[#allocation2 + $0x20] sm:$0xff] %vm310_vm1, %v668_v32  ;;  %v669_v42 = vadd.f32 %v1137_v33, %v332_v28  ;;  %693 = vst.msk [vmem:[#allocation2 + $0x60] sm:$0xff] %vm310_vm1, %v676_v34  ;;  %v801_v48 = vsel %vm310_vm1, %v702_v36, 0.0 }
 0x120   : > { %v1098_v44 = vpack.c.bf16 %v1412_v37, %v1412_v37  ;;  %v802_v2 = vadd.f32 %v801_v48, %v800_v53  ;;  %v677_v5 = vadd.f32 %v1161_v38, %v340_v45  ;;  %v847_v45 = vmul.f32 %v1392_v9, %v1392_v9 }
 0x121   : > { %v703_v43 = vld [vmem:[#allocation2 + $0x18] sm:$0xff]  ;;  %783 = vst.msk [vmem:[%s1332_s29 + $0x8] sm:$0xf] %vm780_vm2, %v1090_v40  ;;  %v1138_v50 = vpop.f32.mrb[12].mxu0  ;;  %v1162_v52 = vpop.f32.mrb[12].mxu1  ;;  %v858_v60 = vsel %vm310_vm1, %v841_v41, 0.0 }
 0x122   : > { %v1091_v49 = vpack.c.bf16 %v703_v43, %v703_v43  ;;  %686 = vst.msk [vmem:[#allocation2 + $0x28] sm:$0xff] %vm310_vm1, %v669_v42  ;;  %v1425_v51 = vld [vmem:[#allocation2 + $0x58] sm:$0xff]  ;;  %v842_v54 = vmul.f32 %v703_v43, %v703_v43  ;;  %v1139_v57 = vpop.f32.mrb[13].mxu0  ;;  %v1163_v58 = vpop.f32.mrb[13].mxu1  ;;  %v803_v8 = vsel %vm310_vm1, %v703_v43, 0.0  ;;  %v859_v13 = vadd.f32 %v858_v60, %v857_v1  ;;  %694 = vst.msk [vmem:[#allocation2 + $0x68] sm:$0xff] %vm310_vm1, %v677_v5 }
 0x123   : > { %791 = vst.msk [vmem:[%s1332_s29 + $0x28] sm:$0xf] %vm780_vm2, %v1098_v44  ;;  %v1099_v55 = vpack.c.bf16 %v1425_v51, %v1425_v51  ;;  %v1140_v61 = vadd.f32 %v1139_v57, %v1138_v50  ;;  %v1141_v62 = vpop.f32.mrb[14].mxu0  ;;  %v1165_v0 = vpop.f32.mrb[14].mxu1  ;;  %v1164_v6 = vadd.f32 %v1163_v58, %v1162_v52  ;;  %v804_v24 = vadd.f32 %v803_v8, %v802_v2 }
 0x124   : > { %784 = vst.msk [vmem:[%s1332_s29 + $0xc] sm:$0xf] %vm780_vm2, %v1091_v49  ;;  %v1142_v4 = vpop.f32.mrb[15].mxu0  ;;  %v1166_v7 = vpop.f32.mrb[15].mxu1  ;;  %v860_v15 = vsel %vm310_vm1, %v842_v54, 0.0  ;;  %v813_v57 = vsel %vm310_vm1, %v1392_v9, 0.0  ;;  %v848_v58 = vmul.f32 %v1398_v14, %v1398_v14  ;;  %v849_v2 = vmul.f32 %v1412_v37, %v1412_v37 }
 0x125   : > { %792 = vst.msk [vmem:[%s1332_s29 + $0x2c] sm:$0xf] %vm780_vm2, %v1099_v55  ;;  %v670_v10 = vadd.f32 %v1140_v61, %v333_v56  ;;  %v1143_v11 = vadd.f32 %v1142_v4, %v1141_v62  ;;  %v1167_v12 = vadd.f32 %v1166_v7, %v1165_v0  ;;  %v678_v18 = vadd.f32 %v1164_v6, %v341_v63 }
 0x126   : > { %v704_v16 = vld [vmem:[#allocation2 + $0x20] sm:$0xff]  ;;  %v861_v30 = vadd.f32 %v860_v15, %v859_v13  ;;  %v870_v0 = vsel %vm310_vm1, %v847_v45, 0.0  ;;  %v815_v1 = vsel %vm310_vm1, %v1398_v14, 0.0  ;;  %v872_v4 = vsel %vm310_vm1, %v848_v58, 0.0 }
 0x127   : > { %v1439_v17 = vld [vmem:[#allocation2 + $0x60] sm:$0xff]  ;;  %v1092_v19 = vpack.c.bf16 %v704_v16, %v704_v16  ;;  %v805_v20 = vsel %vm310_vm1, %v704_v16, 0.0  ;;  %v843_v21 = vmul.f32 %v704_v16, %v704_v16  ;;  %687 = vst.msk [vmem:[#allocation2 + $0x30] sm:$0xff] %vm310_vm1, %v670_v10  ;;  %v671_v22 = vadd.f32 %v1143_v11, %v334_v3  ;;  %695 = vst.msk [vmem:[#allocation2 + $0x70] sm:$0xff] %vm310_vm1, %v678_v18 }
 0x128   : > { %v1100_v26 = vpack.c.bf16 %v1439_v17, %v1439_v17  ;;  %v806_v31 = vadd.f32 %v805_v20, %v804_v24  ;;  %v679_v32 = vadd.f32 %v1167_v12, %v342_v23  ;;  %v817_v5 = vsel %vm310_vm1, %v1412_v37, 0.0 }
 0x129   : > { %v705_v25 = vld [vmem:[#allocation2 + $0x28] sm:$0xff]  ;;  %785 = vst.msk [vmem:[%s1332_s29 + $0x10] sm:$0xf] %vm780_vm2, %v1092_v19  ;;  %v862_v27 = vsel %vm310_vm1, %v843_v21, 0.0  ;;  %v850_v6 = vmul.f32 %v1425_v51, %v1425_v51  ;;  %v874_v10 = vsel %vm310_vm1, %v849_v2, 0.0  ;;  %v819_v14 = vsel %vm310_vm1, %v1425_v51, 0.0 }
 0x12a   : > { %v1093_v28 = vpack.c.bf16 %v705_v25, %v705_v25  ;;  %v844_v29 = vmul.f32 %v705_v25, %v705_v25  ;;  %688 = vst.msk [vmem:[#allocation2 + $0x38] sm:$0xff] %vm310_vm1, %v671_v22  ;;  %v807_v33 = vsel %vm310_vm1, %v705_v25, 0.0  ;;  %v863_v34 = vadd.f32 %v862_v27, %v861_v30  ;;  %696 = vst.msk [vmem:[#allocation2 + $0x78] sm:$0xff] %vm310_vm1, %v679_v32  ;;  %v713_v36 = vld [vmem:[#allocation2 + $0x68] sm:$0xff] }
 0x12b   : > { %793 = vst.msk [vmem:[%s1332_s29 + $0x30] sm:$0xf] %vm780_vm2, %v1100_v26  ;;  %v808_v38 = vadd.f32 %v807_v33, %v806_v31  ;;  %v1101_v40 = vpack.c.bf16 %v713_v36, %v713_v36  ;;  %v851_v11 = vmul.f32 %v1439_v17, %v1439_v17  ;;  %v876_v15 = vsel %vm310_vm1, %v850_v6, 0.0 }
 0x12c   : > { %786 = vst.msk [vmem:[%s1332_s29 + $0x14] sm:$0xf] %vm780_vm2, %v1093_v28  ;;  %v864_v35 = vsel %vm310_vm1, %v844_v29, 0.0  ;;  %v821_v37 = vsel %vm310_vm1, %v1439_v17, 0.0  ;;  %v852_v16 = vmul.f32 %v713_v36, %v713_v36  ;;  %v823_v22 = vsel %vm310_vm1, %v713_v36, 0.0 }
 0x12d   : > { %v865_v46 = vadd.f32 %v864_v35, %v863_v34  ;;  %794 = vst.msk [vmem:[%s1332_s29 + $0x34] sm:$0xf] %vm780_vm2, %v1101_v40  ;;  %v878_v21 = vsel %vm310_vm1, %v851_v11, 0.0 }
 0x12e   : > { %v706_v39 = vld [vmem:[#allocation2 + $0x30] sm:$0xff]  ;;  %v880_v25 = vsel %vm310_vm1, %v852_v16, 0.0 }
 0x12f   : > { %v1094_v41 = vpack.c.bf16 %v706_v39, %v706_v39  ;;  %v809_v42 = vsel %vm310_vm1, %v706_v39, 0.0  ;;  %v845_v43 = vmul.f32 %v706_v39, %v706_v39  ;;  %v714_v44 = vld [vmem:[#allocation2 + $0x70] sm:$0xff] }
 0x130   : > { %v810_v47 = vadd.f32 %v809_v42, %v808_v38  ;;  %v1102_v49 = vpack.c.bf16 %v714_v44, %v714_v44  ;;  %v853_v18 = vmul.f32 %v714_v44, %v714_v44  ;;  %v825_v51 = vsel %vm310_vm1, %v714_v44, 0.0  ;;  %v797_v44 = vld [vmem:[%s1527_s3] sm:$0x1] }
 0x131   : > { %v707_v48 = vld [vmem:[#allocation2 + $0x38] sm:$0xff]  ;;  %787 = vst.msk [vmem:[%s1332_s29 + $0x18] sm:$0xf] %vm780_vm2, %v1094_v41  ;;  %v866_v50 = vsel %vm310_vm1, %v845_v43, 0.0 }
 0x132   : > { %v1095_v52 = vpack.c.bf16 %v707_v48, %v707_v48  ;;  %v811_v53 = vsel %vm310_vm1, %v707_v48, 0.0  ;;  %v846_v54 = vmul.f32 %v707_v48, %v707_v48  ;;  %v867_v55 = vadd.f32 %v866_v50, %v865_v46  ;;  %795 = vst.msk [vmem:[%s1332_s29 + $0x38] sm:$0xf] %vm780_vm2, %v1102_v49  ;;  %v715_v60 = vld [vmem:[#allocation2 + $0x78] sm:$0xff] }
 0x133   : > { %v812_v56 = vadd.f32 %v811_v53, %v810_v47  ;;  %v1103_v63 = vpack.c.bf16 %v715_v60, %v715_v60  ;;  %v882_v26 = vsel %vm310_vm1, %v853_v18, 0.0  ;;  %v854_v27 = vmul.f32 %v715_v60, %v715_v60  ;;  %v838_v47 = vld [vmem:[%s1528_s4] sm:$0x1] }
 0x134   : > { %788 = vst.msk [vmem:[%s1332_s29 + $0x1c] sm:$0xf] %vm780_vm2, %v1095_v52  ;;  %v868_v59 = vsel %vm310_vm1, %v846_v54, 0.0  ;;  %v827_v17 = vsel %vm310_vm1, %v715_v60, 0.0 }
 0x135   : > { %v814_v61 = vadd.f32 %v813_v57, %v812_v56  ;;  %v869_v62 = vadd.f32 %v868_v59, %v867_v55  ;;  %796 = vst.msk [vmem:[%s1332_s29 + $0x3c] sm:$0xf] %vm780_vm2, %v1103_v63  ;;  %v884_v32 = vsel %vm310_vm1, %v854_v27, 0.0 }
 0x137   : > { %v816_v9 = vadd.f32 %v815_v1, %v814_v61  ;;  %v871_v3 = vadd.f32 %v870_v0, %v869_v62 }
 0x139   : > { %v873_v7 = vadd.f32 %v872_v4, %v871_v3  ;;  %v818_v8 = vadd.f32 %v817_v5, %v816_v9 }
 0x13b   : > { %v820_v12 = vadd.f32 %v819_v14, %v818_v8  ;;  %v875_v13 = vadd.f32 %v874_v10, %v873_v7 }
 0x13d   : > { %v822_v19 = vadd.f32 %v821_v37, %v820_v12  ;;  %v877_v20 = vadd.f32 %v876_v15, %v875_v13 }
 0x13f   : > { %v879_v23 = vadd.f32 %v878_v21, %v877_v20  ;;  %v824_v24 = vadd.f32 %v823_v22, %v822_v19 }
 0x141   : > { %v881_v28 = vadd.f32 %v880_v25, %v879_v23  ;;  %v826_v29 = vadd.f32 %v825_v51, %v824_v24 }
 0x143   : > { %v883_v30 = vadd.f32 %v882_v26, %v881_v28  ;;  %v828_v31 = vadd.f32 %v827_v17, %v826_v29 }
 0x145   : > { %v829_v33 = vrot.slane %v828_v31, 4  ;;  %v885_v34 = vadd.f32 %v884_v32, %v883_v30 }
 0x147   : > { %v830_v35 = vadd.f32 %v829_v33, %v828_v31  ;;  %v886_v36 = vrot.slane %v885_v34, 4 }
 0x149   : > { %v831_v38 = vrot.slane %v830_v35, 2  ;;  %v887_v39 = vadd.f32 %v886_v36, %v885_v34 }
 0x14b   : > { %v832_v40 = vadd.f32 %v831_v38, %v830_v35  ;;  %v888_v41 = vrot.slane %v887_v39, 2 }
 0x14d   : > { %v833_v42 = vrot.slane %v832_v40, 1  ;;  %v889_v43 = vadd.f32 %v888_v41, %v887_v39 }
 0x14f   : > { %v834_v45 = vadd.f32 %v833_v42, %v832_v40  ;;  %v890_v46 = vrot.slane %v889_v43, 1 }
 0x151   : > { %v835_v48 = vadd.f32 %v834_v45, %v797_v44  ;;  %v891_v49 = vadd.f32 %v890_v46, %v889_v43 }
 0x153   : > { %837 = vst.msk [vmem:[%s1527_s3] sm:$0x1] %vm836_vm3, %v835_v48  ;;  %v892_v50 = vadd.f32 %v891_v49, %v838_v47 }
 0x155   : > { %893 = vst.msk [vmem:[%s1528_s4] sm:$0x1] %vm836_vm3, %v892_v50 }
 0x156 PF: > { %s15_s17 = sadd.s32 1, %s1272_s17   ;;  %s1529_s15 = smov %s1268_s16 }
 0x157   : > { %p12_p6 = scmp.ge.s32.totalorder %s15_s17, 6   ;;  %s1530_s16 = smov %s1532_s18 }
 0x159   :  { %14 = sbr.rel (!%p12_p6) target bundleno = 2 (0x2), region = 89 }

// kernel: netg_forward.16
= control target key start
LH: loop header
LB: loop body
LE: loop exit
PB: predicated region body
PF: predicated region fallthrough
CT: control target
= control target key end

     0   :  { %s422_s0 = inlined_call_operand.vmem [shape: bf16[128,128], index: 0, kind: input, shape index: {}]   ;;  %s423_s1 = inlined_call_operand.vmem [shape: f32[1,128], index: 1, kind: input, shape index: {}]   ;;  %s424_s2 = inlined_call_operand.vmem [shape: f32[1,128], index: 2, kind: input, shape index: {}]   ;;  %s425_s3 = inlined_call_operand.vmem [shape: bf16[128,128], index: 3, kind: output, shape index: {}]  }
   0x1   :  { %v227_v0 = vld [vmem:[%s422_s0] sm:$0xff]   ;;  %v298_v4 = vld [vmem:[%s422_s0 + $0x8] sm:$0xff]   ;;  %v299_v5 = vld [vmem:[%s422_s0 + $0x10] sm:$0xff]  }
   0x2   :  { %v338_v1 = vld [vmem:[%s423_s1] ss:$0 sm:$0xff]  ;;  %v228_v2 = vunpack.c.l.bf16 %v227_v0  ;;  %v229_v3 = vunpack.c.h.bf16 %v227_v0  ;;  %v300_v6 = vld [vmem:[%s422_s0 + $0x18] sm:$0xff]   ;;  %v232_v8 = vunpack.c.l.bf16 %v298_v4  ;;  %v233_v9 = vunpack.c.h.bf16 %v298_v4  ;;  %v302_v33 = vld [vmem:[%s422_s0 + $0x28] sm:$0xff]  }
   0x3   :  { %v352_v7 = vld [vmem:[%s424_s2] ss:$0 sm:$0xff]  ;;  %v236_v10 = vunpack.c.l.bf16 %v299_v5  ;;  %v237_v11 = vunpack.c.h.bf16 %v299_v5  ;;  %v240_v14 = vunpack.c.l.bf16 %v300_v6  ;;  %v241_v15 = vunpack.c.h.bf16 %v300_v6  ;;  %v303_v38 = vld [vmem:[%s422_s0 + $0x30] sm:$0xff]   ;;  %v304_v43 = vld [vmem:[%s422_s0 + $0x38] sm:$0xff]  }
   0x4   :  { %v53_v12 = vmul.f32 %v228_v2, %v338_v1  ;;  %v54_v13 = vmul.f32 %v229_v3, %v338_v1  ;;  %v55_v16 = vmul.f32 %v232_v8, %v338_v1  ;;  %v56_v17 = vmul.f32 %v233_v9, %v338_v1  ;;  %v301_v28 = vld [vmem:[%s422_s0 + $0x20] sm:$0xff]  }
   0x5   :  { %v57_v18 = vmul.f32 %v236_v10, %v338_v1  ;;  %v58_v19 = vmul.f32 %v237_v11, %v338_v1  ;;  %v59_v22 = vmul.f32 %v240_v14, %v338_v1  ;;  %v60_v23 = vmul.f32 %v241_v15, %v338_v1 }
   0x6   :  { %v76_v20 = vadd.f32 %v352_v7, %v53_v12  ;;  %v77_v21 = vadd.f32 %v352_v7, %v54_v13  ;;  %v78_v24 = vadd.f32 %v352_v7, %v55_v16  ;;  %v79_v25 = vadd.f32 %v352_v7, %v56_v17 }
   0x7   :  { %v80_v26 = vadd.f32 %v352_v7, %v57_v18  ;;  %v81_v27 = vadd.f32 %v352_v7, %v58_v19  ;;  %v82_v31 = vadd.f32 %v352_v7, %v59_v22  ;;  %v83_v32 = vadd.f32 %v352_v7, %v60_v23 }
   0x8   :  { %v92_v29 = vmax.f32 %v76_v20, 0.0  ;;  %v93_v30 = vmax.f32 %v77_v21, 0.0  ;;  %v94_v34 = vmax.f32 %v78_v24, 0.0  ;;  %v95_v35 = vmax.f32 %v79_v25, 0.0 }
   0x9   :  { %v96_v36 = vmax.f32 %v80_v26, 0.0  ;;  %v97_v37 = vmax.f32 %v81_v27, 0.0  ;;  %v98_v40 = vmax.f32 %v82_v31, 0.0  ;;  %v99_v41 = vmax.f32 %v83_v32, 0.0 }
   0xa   :  { %v261_v39 = vpack.c.bf16 %v93_v30, %v92_v29  ;;  %v244_v42 = vunpack.c.l.bf16 %v301_v28  ;;  %v266_v44 = vpack.c.bf16 %v95_v35, %v94_v34  ;;  %v245_v46 = vunpack.c.h.bf16 %v301_v28 }
   0xb   :  { %v271_v45 = vpack.c.bf16 %v97_v37, %v96_v36  ;;  %v248_v47 = vunpack.c.l.bf16 %v302_v33  ;;  %v276_v48 = vpack.c.bf16 %v99_v41, %v98_v40  ;;  %v249_v50 = vunpack.c.h.bf16 %v302_v33 }
   0xc   :  { %262 = vst [vmem:[%s425_s3] sm:$0xff] %v261_v39   ;;  %v61_v49 = vmul.f32 %v244_v42, %v338_v1  ;;  %v252_v51 = vunpack.c.l.bf16 %v303_v38  ;;  %305 = vst [vmem:[%s425_s3 + $0x8] sm:$0xff] %v266_v44   ;;  %v62_v52 = vmul.f32 %v245_v46, %v338_v1  ;;  %v253_v54 = vunpack.c.h.bf16 %v303_v38 }
   0xd   :  { %306 = vst [vmem:[%s425_s3 + $0x10] sm:$0xff] %v271_v45   ;;  %v63_v53 = vmul.f32 %v248_v47, %v338_v1  ;;  %v256_v55 = vunpack.c.l.bf16 %v304_v43  ;;  %307 = vst [vmem:[%s425_s3 + $0x18] sm:$0xff] %v276_v48   ;;  %v64_v57 = vmul.f32 %v249_v50, %v338_v1  ;;  %v257_v59 = vunpack.c.h.bf16 %v304_v43 }
   0xe   :  { %v84_v56 = vadd.f32 %v352_v7, %v61_v49  ;;  %v65_v58 = vmul.f32 %v252_v51, %v338_v1  ;;  %v85_v60 = vadd.f32 %v352_v7, %v62_v52  ;;  %v66_v62 = vmul.f32 %v253_v54, %v338_v1 }
   0xf   :  { %v86_v61 = vadd.f32 %v352_v7, %v63_v53  ;;  %v67_v63 = vmul.f32 %v256_v55, %v338_v1  ;;  %v87_v2 = vadd.f32 %v352_v7, %v64_v57  ;;  %v68_v4 = vmul.f32 %v257_v59, %v338_v1 }
  0x10   :  { %v100_v0 = vmax.f32 %v84_v56, 0.0  ;;  %v88_v3 = vadd.f32 %v352_v7, %v65_v58  ;;  %v101_v5 = vmax.f32 %v85_v60, 0.0  ;;  %v89_v8 = vadd.f32 %v352_v7, %v66_v62 }
  0x11   :  { %v102_v6 = vmax.f32 %v86_v61, 0.0  ;;  %v90_v9 = vadd.f32 %v352_v7, %v67_v63  ;;  %v103_v10 = vmax.f32 %v87_v2, 0.0  ;;  %v91_v12 = vadd.f32 %v352_v7, %v68_v4 }
  0x12   :  { %v104_v11 = vmax.f32 %v88_v3, 0.0  ;;  %v281_v13 = vpack.c.bf16 %v101_v5, %v100_v0  ;;  %v105_v14 = vmax.f32 %v89_v8, 0.0 }
  0x13   :  { %v106_v15 = vmax.f32 %v90_v9, 0.0  ;;  %v286_v16 = vpack.c.bf16 %v103_v10, %v102_v6  ;;  %v107_v17 = vmax.f32 %v91_v12, 0.0 }
  0x14   :  { %308 = vst [vmem:[%s425_s3 + $0x20] sm:$0xff] %v281_v13   ;;  %v291_v1 = vpack.c.bf16 %v105_v14, %v104_v11 }
  0x15   :  { %309 = vst [vmem:[%s425_s3 + $0x28] sm:$0xff] %v286_v16   ;;  %v296_v18 = vpack.c.bf16 %v107_v17, %v106_v15 }
  0x16   :  { %310 = vst [vmem:[%s425_s3 + $0x30] sm:$0xff] %v291_v1  }
  0x17   :  { %311 = vst [vmem:[%s425_s3 + $0x38] sm:$0xff] %v296_v18  }

// kernel: netg_forward.17
= control target key start
LH: loop header
LB: loop body
LE: loop exit
PB: predicated region body
PF: predicated region fallthrough
CT: control target
= control target key end

     0   :  { %s2458_s15 = smov 0   ;;  %s2460_s16 = smov 0   ;;  %s3353_s0 = inlined_call_operand.vmem [shape: bf16[4,512,128], index: 0, kind: input, shape index: {}]   ;;  %s3354_s1 = inlined_call_operand.vmem [shape: bf16[4,128,16], index: 1, kind: input, shape index: {}]   ;;  %s3355_s2 = inlined_call_operand.vmem [shape: bf16[4,512,16], index: 2, kind: output, shape index: {0}]   ;;  %s3356_s3 = inlined_call_operand.vmem [shape: f32[1,16], index: 3, kind: output, shape index: {1}]   ;;  %s3357_s4 = inlined_call_operand.vmem [shape: f32[1,16], index: 4, kind: output, shape index: {2}]  }
   0x1   :  { %s2462_s17 = smov 0  }
   0x2 LB: > { %s34_s18 = sadd.s32 1, %s2425_s16  ;;  %p2021_p0 = scmp.ge.s32.totalorder %s2429_s17, 1  ;;  %s2429_s17 = sphi %s2462_s17, %s15_s17   ;;  %s2425_s16 = sphi %s2460_s16, %s3359_s16   ;;  %s2421_s15 = sphi %s2458_s15, %s3358_s15  }
   0x3   : > { %p36_p1 = scmp.ge.s32.totalorder %s34_s18, 4  ;;  %p207_p2 = scmp.lt.s32.totalorder %s2429_s17, 5 }
   0x5   : > { %s3361_s18 = smov (%p36_p1, %s34_s18), 0  ;;  %p208_p3 = pnand %p2021_p0, %p207_p2 }
   0x6   : > { %p254_p4 = scmp.lt.s32.totalorder (!%p208_p3), %s2421_s15, 3  ;;  %p287_p5 = scmp.eq.s32.totalorder (!%p208_p3), %s2421_s15, 0 }
   0x7   : > { %211 = sbr.rel (%p208_p3) target bundleno = 427 (0x1ab), region = 28 }
   0xe   : > { %s3363_s15 = smov (!%p254_p4, %s2421_s15), 3  ;;  %295 = sbr.rel (!%p287_p5) target bundleno = 21 (0x15), region = 32 }
   0xf   : > { %s2136_s19 = sshll.u32 %s3363_s15, 8  ;;  %s2137_s20 = sshll.u32 %s3363_s15, 6  ;;  %vm296_vm0 = vcmask (%p287_p5), 122880   ;;  %v2431_v0 = vmov (%p287_p5), 0.0  }
  0x10   : > { %s2479_s23 = scalar_lea.vmem %s3353_s0, %s2136_s19  ;;  %s2484_s26 = scalar_lea.vmem %s3354_s1, %s2137_s20  ;;  %297 = vst.msk [vmem:[%s3356_s3] sm:$0x1] (%p287_p5), %vm296_vm0, %v2431_v0  ;;  %298 = vst.msk [vmem:[%s3357_s4] sm:$0x1] (%p287_p5), %vm296_vm0, %v2431_v0 }
  0x11   : > { %s2489_s29 = scalar_lea.vmem %s3355_s2, %s2136_s19 }
  0x15 PF: > { %v2498_v1 = vld [vmem:[%s2484_s26] sm:$0xff]   ;;  %vm302_vm1 = vcmask 130048   ;;  %v2501_v2 = vld [vmem:[%s2484_s26 + $0x8] sm:$0xff]   ;;  %v2432_v3 = vmov 0.0   ;;  %v2369_v4 = vld [vmem:[%s2484_s26 + $0x10] sm:$0xff]   ;;  %vm1492_vm2 = vcmask 125952  }
  0x16   : > { %2245 = vmatprep.subr.bf16.mxu0 %v2498_v1  ;;  %2325 = vmatprep.subr.bf16.mxu1 %v2498_v1  ;;  %305 = vst.msk [vmem:[#allocation2 + $0x10] sm:$0xff] %vm302_vm1, %v2432_v3  ;;  %303 = vst.msk [vmem:[#allocation2] sm:$0xff] %vm302_vm1, %v2432_v3  ;;  %v2370_v5 = vld [vmem:[%s2484_s26 + $0x18] sm:$0xff]   ;;  %v2375_v6 = vld [vmem:[%s2479_s23] sm:$0xff]   ;;  %vm1692_vm3 = vcmask 122880  }
  0x17   : > { %304 = vst.msk [vmem:[#allocation2 + $0x8] sm:$0xff] %vm302_vm1, %v2432_v3  ;;  %306 = vst.msk [vmem:[#allocation2 + $0x18] sm:$0xff] %vm302_vm1, %v2432_v3  ;;  %2246 = vmatpush3.bf16.msra.mxu0 %v2498_v1  ;;  %2333 = vmatpush3.bf16.msra.mxu1 %v2498_v1  ;;  %v2371_v7 = vld [vmem:[%s2484_s26 + $0x20] sm:$0xff]   ;;  %v2372_v8 = vld [vmem:[%s2484_s26 + $0x28] sm:$0xff]  }
  0x18   : > { %307 = vst.msk [vmem:[#allocation2 + $0x20] sm:$0xff] %vm302_vm1, %v2432_v3  ;;  %308 = vst.msk [vmem:[#allocation2 + $0x28] sm:$0xff] %vm302_vm1, %v2432_v3  ;;  %2247 = vmatprep.subr.bf16.mxu0 %v2501_v2  ;;  %2326 = vmatprep.subr.bf16.mxu1 %v2501_v2  ;;  %v2373_v9 = vld [vmem:[%s2484_s26 + $0x30] sm:$0xff]   ;;  %v2374_v10 = vld [vmem:[%s2484_s26 + $0x38] sm:$0xff]  }
  0x19   : > { %309 = vst.msk [vmem:[#allocation2 + $0x30] sm:$0xff] %vm302_vm1, %v2432_v3  ;;  %310 = vst.msk [vmem:[#allocation2 + $0x38] sm:$0xff] %vm302_vm1, %v2432_v3  ;;  %2261 = vmatprep.mubr.bf16.mxu0 %v2375_v6  ;;  %v2391_v11 = vld [vmem:[%s2479_s23 + $0x80] sm:$0xff]   ;;  %v2376_v12 = vld [vmem:[%s2479_s23 + $0x8] sm:$0xff]  }
  0x1a   : > { %311 = vst.msk [vmem:[#allocation2 + $0x40] sm:$0xff] %vm302_vm1, %v2432_v3  ;;  %312 = vst.msk [vmem:[#allocation2 + $0x48] sm:$0xff] %vm302_vm1, %v2432_v3  ;;  %2293 = vmatprep.mubr.bf16.mxu1 %v2391_v11  ;;  %v2377_v13 = vld [vmem:[%s2479_s23 + $0x10] sm:$0xff]   ;;  %v2392_v14 = vld [vmem:[%s2479_s23 + $0x88] sm:$0xff]  }
  0x1b   : > { %313 = vst.msk [vmem:[#allocation2 + $0x50] sm:$0xff] %vm302_vm1, %v2432_v3  ;;  %314 = vst.msk [vmem:[#allocation2 + $0x58] sm:$0xff] %vm302_vm1, %v2432_v3  ;;  %2248 = vmatpush3.bf16.msra.mxu0 %v2501_v2  ;;  %2334 = vmatpush3.bf16.msra.mxu1 %v2501_v2  ;;  %v2393_v15 = vld [vmem:[%s2479_s23 + $0x90] sm:$0xff]   ;;  %v2378_v16 = vld [vmem:[%s2479_s23 + $0x18] sm:$0xff]  }
  0x1c   : > { %315 = vst.msk [vmem:[#allocation2 + $0x60] sm:$0xff] %vm302_vm1, %v2432_v3  ;;  %316 = vst.msk [vmem:[#allocation2 + $0x68] sm:$0xff] %vm302_vm1, %v2432_v3  ;;  %2249 = vmatprep.subr.bf16.mxu0 %v2369_v4  ;;  %2327 = vmatprep.subr.bf16.mxu1 %v2369_v4  ;;  %v2379_v17 = vld [vmem:[%s2479_s23 + $0x20] sm:$0xff]   ;;  %v2394_v18 = vld [vmem:[%s2479_s23 + $0x98] sm:$0xff]  }
  0x1d   : > { %317 = vst.msk [vmem:[#allocation2 + $0x70] sm:$0xff] %vm302_vm1, %v2432_v3  ;;  %318 = vst.msk [vmem:[#allocation2 + $0x78] sm:$0xff] %vm302_vm1, %v2432_v3  ;;  %v2395_v19 = vld [vmem:[%s2479_s23 + $0xa0] sm:$0xff]   ;;  %v2380_v20 = vld [vmem:[%s2479_s23 + $0x28] sm:$0xff]  }
  0x1e   : > { %319 = vst.msk [vmem:[#allocation2 + $0x80] sm:$0xff] %vm302_vm1, %v2432_v3  ;;  %320 = vst.msk [vmem:[#allocation2 + $0x88] sm:$0xff] %vm302_vm1, %v2432_v3  ;;  %v2396_v21 = vld [vmem:[%s2479_s23 + $0xa8] sm:$0xff]   ;;  %v2381_v22 = vld [vmem:[%s2479_s23 + $0x30] sm:$0xff]  }
  0x1f   : > { %321 = vst.msk [vmem:[#allocation2 + $0x90] sm:$0xff] %vm302_vm1, %v2432_v3  ;;  %322 = vst.msk [vmem:[#allocation2 + $0x98] sm:$0xff] %vm302_vm1, %v2432_v3  ;;  %2250 = vmatpush3.bf16.msra.mxu0 %v2369_v4  ;;  %2335 = vmatpush3.bf16.msra.mxu1 %v2369_v4  ;;  %v2397_v23 = vld [vmem:[%s2479_s23 + $0xb0] sm:$0xff]   ;;  %v2382_v24 = vld [vmem:[%s2479_s23 + $0x38] sm:$0xff]  }
  0x20   : > { %323 = vst.msk [vmem:[#allocation2 + $0xa0] sm:$0xff] %vm302_vm1, %v2432_v3  ;;  %324 = vst.msk [vmem:[#allocation2 + $0xa8] sm:$0xff] %vm302_vm1, %v2432_v3  ;;  %2251 = vmatprep.subr.bf16.mxu0 %v2370_v5  ;;  %2328 = vmatprep.subr.bf16.mxu1 %v2370_v5  ;;  %v2398_v25 = vld [vmem:[%s2479_s23 + $0xb8] sm:$0xff]   ;;  %v2383_v26 = vld [vmem:[%s2479_s23 + $0x40] sm:$0xff]  }
  0x21   : > { %325 = vst.msk [vmem:[#allocation2 + $0xb0] sm:$0xff] %vm302_vm1, %v2432_v3  ;;  %326 = vst.msk [vmem:[#allocation2 + $0xb8] sm:$0xff] %vm302_vm1, %v2432_v3  ;;  %v2399_v27 = vld [vmem:[%s2479_s23 + $0xc0] sm:$0xff]   ;;  %v2384_v28 = vld [vmem:[%s2479_s23 + $0x48] sm:$0xff]  }
  0x22   : > { %327 = vst.msk [vmem:[#allocation2 + $0xc0] sm:$0xff] %vm302_vm1, %v2432_v3  ;;  %328 = vst.msk [vmem:[#allocation2 + $0xc8] sm:$0xff] %vm302_vm1, %v2432_v3  ;;  %v2400_v29 = vld [vmem:[%s2479_s23 + $0xc8] sm:$0xff]   ;;  %v2385_v30 = vld [vmem:[%s2479_s23 + $0x50] sm:$0xff]  }
  0x23   : > { %329 = vst.msk [vmem:[#allocation2 + $0xd0] sm:$0xff] %vm302_vm1, %v2432_v3  ;;  %330 = vst.msk [vmem:[#allocation2 + $0xd8] sm:$0xff] %vm302_vm1, %v2432_v3  ;;  %2252 = vmatpush3.bf16.msra.mxu0 %v2370_v5  ;;  %2336 = vmatpush3.bf16.msra.mxu1 %v2370_v5  ;;  %v2401_v31 = vld [vmem:[%s2479_s23 + $0xd0] sm:$0xff]   ;;  %v2386_v32 = vld [vmem:[%s2479_s23 + $0x58] sm:$0xff]  }
  0x24   : > { %331 = vst.msk [vmem:[#allocation2 + $0xe0] sm:$0xff] %vm302_vm1, %v2432_v3  ;;  %332 = vst.msk [vmem:[#allocation2 + $0xe8] sm:$0xff] %vm302_vm1, %v2432_v3  ;;  %2253 = vmatprep.subr.bf16.mxu0 %v2371_v7  ;;  %2329 = vmatprep.subr.bf16.mxu1 %v2371_v7  ;;  %v2402_v33 = vld [vmem:[%s2479_s23 + $0xd8] sm:$0xff]   ;;  %v2387_v34 = vld [vmem:[%s2479_s23 + $0x60] sm:$0xff]  }
  0x25   : > { %333 = vst.msk [vmem:[#allocation2 + $0xf0] sm:$0xff] %vm302_vm1, %v2432_v3  ;;  %334 = vst.msk [vmem:[#allocation2 + $0xf8] sm:$0xff] %vm302_vm1, %v2432_v3  ;;  %v2403_v35 = vld [vmem:[%s2479_s23 + $0xe0] sm:$0xff]   ;;  %v2388_v36 = vld [vmem:[%s2479_s23 + $0x68] sm:$0xff]  }
  0x26   : > { %335 = vst.msk [vmem:[#allocation2 + $0x100] sm:$0xff] %vm302_vm1, %v2432_v3  ;;  %336 = vst.msk [vmem:[#allocation2 + $0x108] sm:$0xff] %vm302_vm1, %v2432_v3  ;;  %v2404_v37 = vld [vmem:[%s2479_s23 + $0xe8] sm:$0xff]   ;;  %v2389_v38 = vld [vmem:[%s2479_s23 + $0x70] sm:$0xff]  }
  0x27   : > { %337 = vst.msk [vmem:[#allocation2 + $0x110] sm:$0xff] %vm302_vm1, %v2432_v3  ;;  %338 = vst.msk [vmem:[#allocation2 + $0x118] sm:$0xff] %vm302_vm1, %v2432_v3  ;;  %2254 = vmatpush3.bf16.msra.mxu0 %v2371_v7  ;;  %2337 = vmatpush3.bf16.msra.mxu1 %v2371_v7  ;;  %v2405_v39 = vld [vmem:[%s2479_s23 + $0xf0] sm:$0xff]   ;;  %v2390_v40 = vld [vmem:[%s2479_s23 + $0x78] sm:$0xff]  }
  0x28   : > { %339 = vst.msk [vmem:[#allocation2 + $0x120] sm:$0xff] %vm302_vm1, %v2432_v3  ;;  %340 = vst.msk [vmem:[#allocation2 + $0x128] sm:$0xff] %vm302_vm1, %v2432_v3  ;;  %2255 = vmatprep.subr.bf16.mxu0 %v2372_v8  ;;  %2330 = vmatprep.subr.bf16.mxu1 %v2372_v8  ;;  %v2406_v41 = vld [vmem:[%s2479_s23 + $0xf8] sm:$0xff]   ;;  %v367_v44 = vld [vmem:[#allocation2] sm:$0xff] }
  0x29   : > { %341 = vst.msk [vmem:[#allocation2 + $0x130] sm:$0xff] %vm302_vm1, %v2432_v3  ;;  %342 = vst.msk [vmem:[#allocation2 + $0x138] sm:$0xff] %vm302_vm1, %v2432_v3  ;;  %v369_v42 = vld [vmem:[#allocation2 + $0x10] sm:$0xff]  ;;  %v370_v47 = vld [vmem:[#allocation2 + $0x18] sm:$0xff] }
  0x2a   : > { %343 = vst.msk [vmem:[#allocation2 + $0x140] sm:$0xff] %vm302_vm1, %v2432_v3  ;;  %344 = vst.msk [vmem:[#allocation2 + $0x148] sm:$0xff] %vm302_vm1, %v2432_v3  ;;  %v368_v52 = vld [vmem:[#allocation2 + $0x8] sm:$0xff]  ;;  %v373_v2 = vld [vmem:[#allocation2 + $0x30] sm:$0xff] }
  0x2b   : > { %345 = vst.msk [vmem:[#allocation2 + $0x150] sm:$0xff] %vm302_vm1, %v2432_v3  ;;  %346 = vst.msk [vmem:[#allocation2 + $0x158] sm:$0xff] %vm302_vm1, %v2432_v3  ;;  %2256 = vmatpush3.bf16.msra.mxu0 %v2372_v8  ;;  %2338 = vmatpush3.bf16.msra.mxu1 %v2372_v8  ;;  %v371_v4 = vld [vmem:[#allocation2 + $0x20] sm:$0xff]  ;;  %v374_v7 = vld [vmem:[#allocation2 + $0x38] sm:$0xff] }
  0x2c   : > { %347 = vst.msk [vmem:[#allocation2 + $0x160] sm:$0xff] %vm302_vm1, %v2432_v3  ;;  %348 = vst.msk [vmem:[#allocation2 + $0x168] sm:$0xff] %vm302_vm1, %v2432_v3  ;;  %2257 = vmatprep.subr.bf16.mxu0 %v2373_v9  ;;  %2331 = vmatprep.subr.bf16.mxu1 %v2373_v9  ;;  %v372_v11 = vld [vmem:[#allocation2 + $0x28] sm:$0xff] }
  0x2d   : > { %349 = vst.msk [vmem:[#allocation2 + $0x170] sm:$0xff] %vm302_vm1, %v2432_v3  ;;  %350 = vst.msk [vmem:[#allocation2 + $0x178] sm:$0xff] %vm302_vm1, %v2432_v3  ;;  %v399_v45 = vld [vmem:[#allocation2 + $0x100] sm:$0xff]  ;;  %v400_v55 = vld [vmem:[#allocation2 + $0x108] sm:$0xff] }
  0x2e   : > { %351 = vst.msk [vmem:[#allocation2 + $0x180] sm:$0xff] %vm302_vm1, %v2432_v3  ;;  %352 = vst.msk [vmem:[#allocation2 + $0x188] sm:$0xff] %vm302_vm1, %v2432_v3  ;;  %v401_v43 = vld [vmem:[#allocation2 + $0x110] sm:$0xff]  ;;  %v402_v49 = vld [vmem:[#allocation2 + $0x118] sm:$0xff] }
  0x2f   : > { %353 = vst.msk [vmem:[#allocation2 + $0x190] sm:$0xff] %vm302_vm1, %v2432_v3  ;;  %354 = vst.msk [vmem:[#allocation2 + $0x198] sm:$0xff] %vm302_vm1, %v2432_v3  ;;  %2258 = vmatpush3.bf16.msra.mxu0 %v2373_v9  ;;  %2339 = vmatpush3.bf16.msra.mxu1 %v2373_v9  ;;  %v403_v5 = vld [vmem:[#allocation2 + $0x120] sm:$0xff] }
  0x30   : > { %355 = vst.msk [vmem:[#allocation2 + $0x1a0] sm:$0xff] %vm302_vm1, %v2432_v3  ;;  %356 = vst.msk [vmem:[#allocation2 + $0x1a8] sm:$0xff] %vm302_vm1, %v2432_v3  ;;  %2259 = vmatprep.subr.bf16.mxu0 %v2374_v10  ;;  %2332 = vmatprep.subr.bf16.mxu1 %v2374_v10 }
  0x31   : > { %357 = vst.msk [vmem:[#allocation2 + $0x1b0] sm:$0xff] %vm302_vm1, %v2432_v3  ;;  %358 = vst.msk [vmem:[#allocation2 + $0x1b8] sm:$0xff] %vm302_vm1, %v2432_v3 }
  0x32   : > { %359 = vst.msk [vmem:[#allocation2 + $0x1c0] sm:$0xff] %vm302_vm1, %v2432_v3  ;;  %360 = vst.msk [vmem:[#allocation2 + $0x1c8] sm:$0xff] %vm302_vm1, %v2432_v3 }
  0x33   : > { %361 = vst.msk [vmem:[#allocation2 + $0x1d0] sm:$0xff] %vm302_vm1, %v2432_v3  ;;  %362 = vst.msk [vmem:[#allocation2 + $0x1d8] sm:$0xff] %vm302_vm1, %v2432_v3  ;;  %2260 = vmatpush3.bf16.msra.mxu0 %v2374_v10  ;;  %2340 = vmatpush3.bf16.msra.mxu1 %v2374_v10 }
  0x34   : > { %363 = vst.msk [vmem:[#allocation2 + $0x1e0] sm:$0xff] %vm302_vm1, %v2432_v3  ;;  %364 = vst.msk [vmem:[#allocation2 + $0x1e8] sm:$0xff] %vm302_vm1, %v2432_v3 }
  0x35   : > { %365 = vst.msk [vmem:[#allocation2 + $0x1f0] sm:$0xff] %vm302_vm1, %v2432_v3  ;;  %366 = vst.msk [vmem:[#allocation2 + $0x1f8] sm:$0xff] %vm302_vm1, %v2432_v3  ;;  %v405_v3 = vld [vmem:[#allocation2 + $0x130] sm:$0xff] }
  0x36   : > { %2262 = vmatmul.mubr.bf16.vlgmr.msra.gmra.mrb[0].mxu0 %v2376_v12  ;;  %2294 = vmatmul.mubr.bf16.vlgmr.msra.gmra.mrb[0].mxu1 %v2392_v14 }
  0x37   : > { %2265 = vmatprep.mubr.bf16.mxu0 %v2377_v13  ;;  %2297 = vmatprep.mubr.bf16.mxu1 %v2393_v15 }
  0x3e   : > { %2266 = vmatmul.mubr.bf16.gmra.mrb[4].mxu0 %v2378_v16  ;;  %2298 = vmatmul.mubr.bf16.gmra.mrb[4].mxu1 %v2394_v18 }
  0x3f   : > { %2269 = vmatprep.mubr.bf16.mxu0 %v2379_v17  ;;  %2301 = vmatprep.mubr.bf16.mxu1 %v2395_v19 }
  0x46   : > { %2270 = vmatmul.mubr.bf16.gmra.mrb[8].mxu0 %v2380_v20  ;;  %2302 = vmatmul.mubr.bf16.gmra.mrb[8].mxu1 %v2396_v21 }
  0x47   : > { %2273 = vmatprep.mubr.bf16.mxu0 %v2381_v22  ;;  %2305 = vmatprep.mubr.bf16.mxu1 %v2397_v23 }
  0x4e   : > { %2274 = vmatmul.mubr.bf16.gmra.mrb[12].mxu0 %v2382_v24  ;;  %2306 = vmatmul.mubr.bf16.gmra.mrb[12].mxu1 %v2398_v25 }
  0x4f   : > { %2277 = vmatprep.mubr.bf16.mxu0 %v2383_v26  ;;  %2309 = vmatprep.mubr.bf16.mxu1 %v2399_v27 }
  0x56   : > { %2278 = vmatmul.mubr.bf16.gmra.mrb[16].mxu0 %v2384_v28  ;;  %2310 = vmatmul.mubr.bf16.gmra.mrb[16].mxu1 %v2400_v29 }
  0x57   : > { %2281 = vmatprep.mubr.bf16.mxu0 %v2385_v30  ;;  %2313 = vmatprep.mubr.bf16.mxu1 %v2401_v31 }
  0x5e   : > { %2282 = vmatmul.mubr.bf16.gmra.mrb[20].mxu0 %v2386_v32  ;;  %2314 = vmatmul.mubr.bf16.gmra.mrb[20].mxu1 %v2402_v33 }
  0x5f   : > { %2285 = vmatprep.mubr.bf16.mxu0 %v2387_v34  ;;  %2317 = vmatprep.mubr.bf16.mxu1 %v2403_v35 }
  0x66   : > { %2286 = vmatmul.mubr.bf16.gmra.mrb[24].mxu0 %v2388_v36  ;;  %2318 = vmatmul.mubr.bf16.gmra.mrb[24].mxu1 %v2404_v37  ;;  %v377_v37 = vld [vmem:[#allocation2 + $0x50] sm:$0xff] }
  0x67   : > { %2289 = vmatprep.mubr.bf16.mxu0 %v2389_v38  ;;  %2321 = vmatprep.mubr.bf16.mxu1 %v2405_v39 }
  0x6e   : > { %2290 = vmatmul.mubr.bf16.gmra.mrb[28].mxu0 %v2390_v40  ;;  %2322 = vmatmul.mubr.bf16.gmra.mrb[28].mxu1 %v2406_v41  ;;  %v375_v40 = vld [vmem:[#allocation2 + $0x40] sm:$0xff] }
 0x109   : > { %v2263_v46 = vpop.f32.mrb[0].mxu0  ;;  %v2295_v48 = vpop.f32.mrb[0].mxu1 }
 0x10a   : > { %v1042_v50 = vadd.f32 %v2263_v46, %v369_v42  ;;  %v785_v51 = vpop.f32.mrb[1].mxu0  ;;  %v1074_v53 = vadd.f32 %v2295_v48, %v401_v43  ;;  %v913_v54 = vpop.f32.mrb[1].mxu1 }
 0x10b   : > { %v1040_v56 = vadd.f32 %v785_v51, %v367_v44  ;;  %v2264_v57 = vpop.f32.mrb[2].mxu0  ;;  %v1072_v58 = vadd.f32 %v913_v54, %v399_v45  ;;  %v2296_v59 = vpop.f32.mrb[2].mxu1 }
 0x10c   : > { %1107 = vst.msk [vmem:[#allocation2 + $0x10] sm:$0xff] %vm302_vm1, %v1042_v50  ;;  %v1043_v60 = vadd.f32 %v2264_v57, %v370_v47  ;;  %v788_v61 = vpop.f32.mrb[3].mxu0  ;;  %1139 = vst.msk [vmem:[#allocation2 + $0x110] sm:$0xff] %vm302_vm1, %v1074_v53  ;;  %v1075_v62 = vadd.f32 %v2296_v59, %v402_v49  ;;  %v916_v63 = vpop.f32.mrb[3].mxu1 }
 0x10d   : > { %1105 = vst.msk [vmem:[#allocation2] sm:$0xff] %vm302_vm1, %v1040_v56  ;;  %v1041_v0 = vadd.f32 %v788_v61, %v368_v52  ;;  %1137 = vst.msk [vmem:[#allocation2 + $0x100] sm:$0xff] %vm302_vm1, %v1072_v58  ;;  %v1073_v1 = vadd.f32 %v916_v63, %v400_v55 }
 0x10e   : > { %1108 = vst.msk [vmem:[#allocation2 + $0x18] sm:$0xff] %vm302_vm1, %v1043_v60  ;;  %1140 = vst.msk [vmem:[#allocation2 + $0x118] sm:$0xff] %vm302_vm1, %v1075_v62 }
 0x10f   : > { %1106 = vst.msk [vmem:[#allocation2 + $0x8] sm:$0xff] %vm302_vm1, %v1041_v0  ;;  %1138 = vst.msk [vmem:[#allocation2 + $0x108] sm:$0xff] %vm302_vm1, %v1073_v1 }
 0x111   : > { %v2267_v6 = vpop.f32.mrb[4].mxu0  ;;  %v2299_v8 = vpop.f32.mrb[4].mxu1 }
 0x112   : > { %v1046_v9 = vadd.f32 %v2267_v6, %v373_v2  ;;  %v801_v10 = vpop.f32.mrb[5].mxu0  ;;  %v1078_v12 = vadd.f32 %v2299_v8, %v405_v3  ;;  %v929_v13 = vpop.f32.mrb[5].mxu1  ;;  %v378_v8 = vld [vmem:[#allocation2 + $0x58] sm:$0xff] }
 0x113   : > { %v1174_v14 = vld [vmem:[#allocation2 + $0x10] sm:$0xff]  ;;  %v1044_v15 = vadd.f32 %v801_v10, %v371_v4  ;;  %v2268_v16 = vpop.f32.mrb[6].mxu0  ;;  %v1076_v17 = vadd.f32 %v929_v13, %v403_v5  ;;  %v2685_v18 = vpop.f32.mrb[6].mxu1  ;;  %v376_v13 = vld [vmem:[#allocation2 + $0x48] sm:$0xff] }
 0x114   : > { %v2143_v19 = vpack.c.bf16 %v1174_v14, %v1174_v14  ;;  %v1172_v20 = vld [vmem:[#allocation2] sm:$0xff]  ;;  %1111 = vst.msk [vmem:[#allocation2 + $0x30] sm:$0xff] %vm302_vm1, %v1046_v9  ;;  %v1047_v21 = vadd.f32 %v2268_v16, %v374_v7  ;;  %v804_v22 = vpop.f32.mrb[7].mxu0  ;;  %1143 = vst.msk [vmem:[#allocation2 + $0x130] sm:$0xff] %vm302_vm1, %v1078_v12  ;;  %v2689_v23 = vpop.f32.mrb[7].mxu1  ;;  %v2692_v28 = vld [vmem:[#allocation2 + $0x110] sm:$0xff]  ;;  %v1697_v29 = vmul.f32 %v1174_v14, %v1174_v14 }
 0x115   : > { %v2141_v24 = vpack.c.bf16 %v1172_v20, %v1172_v20  ;;  %v1695_v25 = vmul.f32 %v1172_v20, %v1172_v20  ;;  %v1175_v26 = vld [vmem:[#allocation2 + $0x18] sm:$0xff]  ;;  %1109 = vst.msk [vmem:[#allocation2 + $0x20] sm:$0xff] %vm302_vm1, %v1044_v15  ;;  %v1045_v27 = vadd.f32 %v804_v22, %v372_v11  ;;  %1141 = vst.msk [vmem:[#allocation2 + $0x120] sm:$0xff] %vm302_vm1, %v1076_v17  ;;  %v2698_v32 = vld [vmem:[#allocation2 + $0x100] sm:$0xff]  ;;  %v1558_v33 = vsel %vm302_vm1, %v1172_v20, 0.0 }
 0x116   : > { %1495 = vst.msk [vmem:[%s2489_s29 + $0x8] sm:$0xf] %vm1492_vm2, %v2143_v19  ;;  %v2144_v30 = vpack.c.bf16 %v1175_v26, %v1175_v26  ;;  %v1173_v31 = vld [vmem:[#allocation2 + $0x8] sm:$0xff]  ;;  %v1561_v38 = vsel %vm302_vm1, %v1174_v14, 0.0  ;;  %v2175_v41 = vpack.c.bf16 %v2692_v28, %v2692_v28  ;;  %v2710_v42 = vld [vmem:[#allocation2 + $0x118] sm:$0xff]  ;;  %v1698_v44 = vmul.f32 %v1175_v26, %v1175_v26  ;;  %v381_v17 = vld [vmem:[#allocation2 + $0x70] sm:$0xff] }
 0x117   : > { %1112 = vst.msk [vmem:[#allocation2 + $0x38] sm:$0xff] %vm302_vm1, %v1047_v21  ;;  %v2142_v34 = vpack.c.bf16 %v1173_v31, %v1173_v31  ;;  %v1559_v35 = vsel %vm302_vm1, %v1173_v31, 0.0  ;;  %v1696_v36 = vmul.f32 %v1173_v31, %v1173_v31  ;;  %1110 = vst.msk [vmem:[#allocation2 + $0x28] sm:$0xff] %vm302_vm1, %v1045_v27  ;;  %v1759_v43 = vsel %vm302_vm1, %v1695_v25, 0.0  ;;  %v2745_v19 = vld [vmem:[#allocation2 + $0x108] sm:$0xff]  ;;  %v379_v25 = vld [vmem:[#allocation2 + $0x60] sm:$0xff] }
 0x118   : > { %1493 = vst.msk [vmem:[%s2489_s29] sm:$0xf] %vm1492_vm2, %v2141_v24  ;;  %1496 = vst.msk [vmem:[%s2489_s29 + $0xc] sm:$0xf] %vm1492_vm2, %v2144_v30  ;;  %v1560_v39 = vadd.f32 %v1559_v35, %v1558_v33  ;;  %v2173_v47 = vpack.c.bf16 %v2698_v32, %v2698_v32  ;;  %v1762_v54 = vsel %vm302_vm1, %v1697_v29, 0.0  ;;  %v1563_v55 = vsel %vm302_vm1, %v1175_v26, 0.0 }
 0x119   : > { %1494 = vst.msk [vmem:[%s2489_s29 + $0x4] sm:$0xf] %vm1492_vm2, %v2142_v34  ;;  %v1760_v45 = vsel %vm302_vm1, %v1696_v36, 0.0  ;;  %v2271_v46 = vpop.f32.mrb[8].mxu0  ;;  %v2718_v48 = vpop.f32.mrb[8].mxu1  ;;  %v2176_v59 = vpack.c.bf16 %v2710_v42, %v2710_v42  ;;  %v1764_v3 = vsel %vm302_vm1, %v1698_v44, 0.0 }
 0x11a   : > { %v1562_v49 = vadd.f32 %v1561_v38, %v1560_v39  ;;  %v1761_v50 = vadd.f32 %v1760_v45, %v1759_v43  ;;  %v1050_v51 = vadd.f32 %v2271_v46, %v377_v37  ;;  %v817_v52 = vpop.f32.mrb[9].mxu0  ;;  %1527 = vst.msk [vmem:[%s2489_s29 + $0x88] sm:$0xf] %vm1492_vm2, %v2175_v41  ;;  %v2722_v53 = vpop.f32.mrb[9].mxu1  ;;  %1525 = vst.msk [vmem:[%s2489_s29 + $0x80] sm:$0xf] %vm1492_vm2, %v2173_v47 }
 0x11b   : > { %v1178_v56 = vld [vmem:[#allocation2 + $0x30] sm:$0xff]  ;;  %v1048_v57 = vadd.f32 %v817_v52, %v375_v40  ;;  %v2272_v58 = vpop.f32.mrb[10].mxu0  ;;  %v2730_v60 = vpop.f32.mrb[10].mxu1  ;;  %1528 = vst.msk [vmem:[%s2489_s29 + $0x8c] sm:$0xf] %vm1492_vm2, %v2176_v59  ;;  %v382_v31 = vld [vmem:[#allocation2 + $0x78] sm:$0xff]  ;;  %v2174_v38 = vpack.c.bf16 %v2745_v19, %v2745_v19 }
 0x11c   : > { %v1564_v61 = vadd.f32 %v1563_v55, %v1562_v49  ;;  %v1763_v62 = vadd.f32 %v1762_v54, %v1761_v50  ;;  %v2147_v63 = vpack.c.bf16 %v1178_v56, %v1178_v56  ;;  %v1176_v0 = vld [vmem:[#allocation2 + $0x20] sm:$0xff]  ;;  %1115 = vst.msk [vmem:[#allocation2 + $0x50] sm:$0xff] %vm302_vm1, %v1050_v51  ;;  %v820_v1 = vpop.f32.mrb[11].mxu0  ;;  %v2733_v2 = vpop.f32.mrb[11].mxu1  ;;  %v1701_v14 = vmul.f32 %v1178_v56, %v1178_v56  ;;  %v380_v46 = vld [vmem:[#allocation2 + $0x68] sm:$0xff] }
 0x11d   : > { %v2145_v4 = vpack.c.bf16 %v1176_v0, %v1176_v0  ;;  %v1565_v5 = vsel %vm302_vm1, %v1176_v0, 0.0  ;;  %v1699_v6 = vmul.f32 %v1176_v0, %v1176_v0  ;;  %1113 = vst.msk [vmem:[#allocation2 + $0x40] sm:$0xff] %vm302_vm1, %v1048_v57  ;;  %v1051_v24 = vadd.f32 %v2272_v58, %v378_v8 }
 0x11e   : > { %v1179_v7 = vld [vmem:[#allocation2 + $0x38] sm:$0xff]  ;;  %v1765_v9 = vadd.f32 %v1764_v3, %v1763_v62  ;;  %1499 = vst.msk [vmem:[%s2489_s29 + $0x18] sm:$0xf] %vm1492_vm2, %v2147_v63  ;;  %v1566_v10 = vadd.f32 %v1565_v5, %v1564_v61  ;;  %v1177_v12 = vld [vmem:[#allocation2 + $0x28] sm:$0xff]  ;;  %v1569_v26 = vsel %vm302_vm1, %v1178_v56, 0.0  ;;  %v1049_v29 = vadd.f32 %v820_v1, %v376_v13  ;;  %v2773_v56 = vld [vmem:[#allocation2 + $0x130] sm:$0xff] }
 0x11f   : > { %v2148_v11 = vpack.c.bf16 %v1179_v7, %v1179_v7  ;;  %1497 = vst.msk [vmem:[%s2489_s29 + $0x10] sm:$0xf] %vm1492_vm2, %v2145_v4  ;;  %v1766_v15 = vsel %vm302_vm1, %v1699_v6, 0.0  ;;  %v2146_v16 = vpack.c.bf16 %v1177_v12, %v1177_v12  ;;  %v1567_v21 = vsel %vm302_vm1, %v1177_v12, 0.0  ;;  %1526 = vst.msk [vmem:[%s2489_s29 + $0x84] sm:$0xf] %vm1492_vm2, %v2174_v38 }
 0x120   : > { %v1767_v20 = vadd.f32 %v1766_v15, %v1765_v9  ;;  %v1700_v22 = vmul.f32 %v1177_v12, %v1177_v12  ;;  %v1568_v27 = vadd.f32 %v1567_v21, %v1566_v10  ;;  %v1702_v34 = vmul.f32 %v1179_v7, %v1179_v7  ;;  %1116 = vst.msk [vmem:[#allocation2 + $0x58] sm:$0xff] %vm302_vm1, %v1051_v24  ;;  %v2779_v63 = vld [vmem:[#allocation2 + $0x120] sm:$0xff]  ;;  %v385_v5 = vld [vmem:[#allocation2 + $0x90] sm:$0xff]  ;;  %v386_v38 = vld [vmem:[#allocation2 + $0x98] sm:$0xff] }
 0x121   : > { %1500 = vst.msk [vmem:[%s2489_s29 + $0x1c] sm:$0xf] %vm1492_vm2, %v2148_v11  ;;  %1498 = vst.msk [vmem:[%s2489_s29 + $0x14] sm:$0xf] %vm1492_vm2, %v2146_v16  ;;  %v2275_v30 = vpop.f32.mrb[12].mxu0  ;;  %v2753_v33 = vpop.f32.mrb[12].mxu1  ;;  %v2179_v6 = vpack.c.bf16 %v2773_v56, %v2773_v56  ;;  %v2177_v10 = vpack.c.bf16 %v2779_v63, %v2779_v63 }
 0x122   : > { %v1768_v35 = vsel %vm302_vm1, %v1700_v22, 0.0  ;;  %v1054_v36 = vadd.f32 %v2275_v30, %v381_v17  ;;  %v833_v37 = vpop.f32.mrb[13].mxu0  ;;  %v2759_v39 = vpop.f32.mrb[13].mxu1  ;;  %v1570_v40 = vadd.f32 %v1569_v26, %v1568_v27  ;;  %1114 = vst.msk [vmem:[#allocation2 + $0x48] sm:$0xff] %vm302_vm1, %v1049_v29  ;;  %v1770_v49 = vsel %vm302_vm1, %v1701_v14, 0.0  ;;  %v383_v9 = vld [vmem:[#allocation2 + $0x80] sm:$0xff] }
 0x123   : > { %v1769_v41 = vadd.f32 %v1768_v35, %v1767_v20  ;;  %v2761_v43 = vld [vmem:[#allocation2 + $0x50] sm:$0xff]  ;;  %v1052_v44 = vadd.f32 %v833_v37, %v379_v25  ;;  %v2276_v45 = vpop.f32.mrb[14].mxu0  ;;  %v2764_v47 = vpop.f32.mrb[14].mxu1  ;;  %v1571_v50 = vsel %vm302_vm1, %v1179_v7, 0.0  ;;  %v1772_v0 = vsel %vm302_vm1, %v1702_v34, 0.0 }
 0x124   : > { %v2151_v51 = vpack.c.bf16 %v2761_v43, %v2761_v43  ;;  %v1180_v52 = vld [vmem:[#allocation2 + $0x40] sm:$0xff]  ;;  %1119 = vst.msk [vmem:[#allocation2 + $0x70] sm:$0xff] %vm302_vm1, %v1054_v36  ;;  %v1055_v54 = vadd.f32 %v2276_v45, %v382_v31  ;;  %v836_v55 = vpop.f32.mrb[15].mxu0  ;;  %v2775_v57 = vpop.f32.mrb[15].mxu1  ;;  %v1572_v61 = vadd.f32 %v1571_v50, %v1570_v40  ;;  %v1705_v11 = vmul.f32 %v2761_v43, %v2761_v43 }
 0x125   : > { %v1771_v58 = vadd.f32 %v1770_v49, %v1769_v41  ;;  %v2149_v59 = vpack.c.bf16 %v1180_v52, %v1180_v52  ;;  %v1573_v62 = vsel %vm302_vm1, %v1180_v52, 0.0  ;;  %1117 = vst.msk [vmem:[#allocation2 + $0x60] sm:$0xff] %vm302_vm1, %v1052_v44  ;;  %v1703_v1 = vmul.f32 %v1180_v52, %v1180_v52 }
 0x126   : > { %1503 = vst.msk [vmem:[%s2489_s29 + $0x28] sm:$0xf] %vm1492_vm2, %v2151_v51  ;;  %v1053_v3 = vadd.f32 %v836_v55, %v380_v46  ;;  %v1574_v7 = vadd.f32 %v1573_v62, %v1572_v61  ;;  %1531 = vst.msk [vmem:[%s2489_s29 + $0x98] sm:$0xf] %vm1492_vm2, %v2179_v6  ;;  %v1577_v44 = vsel %vm302_vm1, %v2761_v43, 0.0  ;;  %v1778_v45 = vsel %vm302_vm1, %v1705_v11, 0.0 }
 0x127   : > { %1120 = vst.msk [vmem:[#allocation2 + $0x78] sm:$0xff] %vm302_vm1, %v1055_v54  ;;  %v1773_v4 = vadd.f32 %v1772_v0, %v1771_v58  ;;  %v1774_v8 = vsel %vm302_vm1, %v1703_v1, 0.0  ;;  %v1183_v12 = vld [vmem:[#allocation2 + $0x58] sm:$0xff]  ;;  %v384_v58 = vld [vmem:[#allocation2 + $0x88] sm:$0xff]  ;;  %v389_v1 = vld [vmem:[#allocation2 + $0xb0] sm:$0xff] }
 0x128   : > { %1501 = vst.msk [vmem:[%s2489_s29 + $0x20] sm:$0xf] %vm1492_vm2, %v2149_v59  ;;  %v2152_v16 = vpack.c.bf16 %v1183_v12, %v1183_v12  ;;  %v1706_v17 = vmul.f32 %v1183_v12, %v1183_v12  ;;  %1529 = vst.msk [vmem:[%s2489_s29 + $0x90] sm:$0xf] %vm1492_vm2, %v2177_v10  ;;  %v1579_v43 = vsel %vm302_vm1, %v1183_v12, 0.0 }
 0x129   : > { %1118 = vst.msk [vmem:[#allocation2 + $0x68] sm:$0xff] %vm302_vm1, %v1053_v3  ;;  %v2279_v13 = vpop.f32.mrb[16].mxu0  ;;  %v2797_v14 = vpop.f32.mrb[16].mxu1  ;;  %v1775_v15 = vadd.f32 %v1774_v8, %v1773_v4  ;;  %v1181_v20 = vld [vmem:[#allocation2 + $0x48] sm:$0xff]  ;;  %v406_v8 = vld [vmem:[#allocation2 + $0x138] sm:$0xff] }
 0x12a   : > { %v1058_v21 = vadd.f32 %v2279_v13, %v385_v5  ;;  %v849_v22 = vpop.f32.mrb[17].mxu0  ;;  %v2801_v24 = vpop.f32.mrb[17].mxu1  ;;  %v2150_v25 = vpack.c.bf16 %v1181_v20, %v1181_v20  ;;  %v1575_v26 = vsel %vm302_vm1, %v1181_v20, 0.0  ;;  %v1704_v27 = vmul.f32 %v1181_v20, %v1181_v20  ;;  %1504 = vst.msk [vmem:[%s2489_s29 + $0x2c] sm:$0xf] %vm1492_vm2, %v2152_v16 }
 0x12b   : > { %v1186_v29 = vld [vmem:[#allocation2 + $0x70] sm:$0xff]  ;;  %v1056_v30 = vadd.f32 %v849_v22, %v383_v9  ;;  %v2280_v31 = vpop.f32.mrb[18].mxu0  ;;  %v2804_v34 = vpop.f32.mrb[18].mxu1  ;;  %v1576_v35 = vadd.f32 %v1575_v26, %v1574_v7  ;;  %v1780_v59 = vsel %vm302_vm1, %v1706_v17, 0.0  ;;  %v387_v7 = vld [vmem:[#allocation2 + $0xa0] sm:$0xff]  ;;  %v390_v22 = vld [vmem:[#allocation2 + $0xb8] sm:$0xff] }
 0x12c   : > { %v2155_v36 = vpack.c.bf16 %v1186_v29, %v1186_v29  ;;  %v1184_v37 = vld [vmem:[#allocation2 + $0x60] sm:$0xff]  ;;  %1123 = vst.msk [vmem:[#allocation2 + $0x90] sm:$0xff] %vm302_vm1, %v1058_v21  ;;  %v852_v40 = vpop.f32.mrb[19].mxu0  ;;  %v2809_v41 = vpop.f32.mrb[19].mxu1  ;;  %v1776_v46 = vsel %vm302_vm1, %v1704_v27, 0.0  ;;  %v1059_v0 = vadd.f32 %v2280_v31, %v386_v38  ;;  %v1709_v4 = vmul.f32 %v1186_v29, %v1186_v29 }
 0x12d   : > { %1502 = vst.msk [vmem:[%s2489_s29 + $0x24] sm:$0xf] %vm1492_vm2, %v2150_v25  ;;  %v2153_v49 = vpack.c.bf16 %v1184_v37, %v1184_v37  ;;  %v1578_v51 = vadd.f32 %v1577_v44, %v1576_v35  ;;  %v1777_v52 = vadd.f32 %v1776_v46, %v1775_v15  ;;  %v1707_v54 = vmul.f32 %v1184_v37, %v1184_v37 }
 0x12e   : > { %v1187_v50 = vld [vmem:[#allocation2 + $0x78] sm:$0xff]  ;;  %1121 = vst.msk [vmem:[#allocation2 + $0x80] sm:$0xff] %vm302_vm1, %v1056_v30  ;;  %v1581_v61 = vsel %vm302_vm1, %v1184_v37, 0.0  ;;  %1124 = vst.msk [vmem:[#allocation2 + $0x98] sm:$0xff] %vm302_vm1, %v1059_v0  ;;  %v1057_v12 = vadd.f32 %v852_v40, %v384_v58  ;;  %v1585_v26 = vsel %vm302_vm1, %v1186_v29, 0.0  ;;  %v1079_v37 = vadd.f32 %v2685_v18, %v406_v8 }
 0x12f   : > { %1507 = vst.msk [vmem:[%s2489_s29 + $0x38] sm:$0xf] %vm1492_vm2, %v2155_v36  ;;  %v2156_v55 = vpack.c.bf16 %v1187_v50, %v1187_v50  ;;  %1505 = vst.msk [vmem:[%s2489_s29 + $0x30] sm:$0xf] %vm1492_vm2, %v2153_v49  ;;  %v1779_v3 = vadd.f32 %v1778_v45, %v1777_v52  ;;  %v1580_v5 = vadd.f32 %v1579_v43, %v1578_v51  ;;  %v1782_v9 = vsel %vm302_vm1, %v1707_v54, 0.0  ;;  %v388_v36 = vld [vmem:[#allocation2 + $0xa8] sm:$0xff] }
 0x130   : > { %v1185_v62 = vld [vmem:[#allocation2 + $0x68] sm:$0xff]  ;;  %1122 = vst.msk [vmem:[#allocation2 + $0x88] sm:$0xff] %vm302_vm1, %v1057_v12  ;;  %v1786_v40 = vsel %vm302_vm1, %v1709_v4, 0.0  ;;  %v409_v52 = vld [vmem:[#allocation2 + $0x150] sm:$0xff]  ;;  %v1587_v18 = vsel %vm302_vm1, %v1187_v50, 0.0  ;;  %1144 = vst.msk [vmem:[#allocation2 + $0x138] sm:$0xff] %vm302_vm1, %v1079_v37 }
 0x131   : > { %1508 = vst.msk [vmem:[%s2489_s29 + $0x3c] sm:$0xf] %vm1492_vm2, %v2156_v55  ;;  %v2154_v6 = vpack.c.bf16 %v1185_v62, %v1185_v62  ;;  %v1583_v10 = vsel %vm302_vm1, %v1185_v62, 0.0  ;;  %v1708_v11 = vmul.f32 %v1185_v62, %v1185_v62  ;;  %v2283_v13 = vpop.f32.mrb[20].mxu0  ;;  %v2830_v15 = vpop.f32.mrb[20].mxu1  ;;  %v1582_v16 = vadd.f32 %v1581_v61, %v1580_v5  ;;  %v404_v51 = vld [vmem:[#allocation2 + $0x128] sm:$0xff] }
 0x132   : > { %v1781_v17 = vadd.f32 %v1780_v59, %v1779_v3  ;;  %v1062_v20 = vadd.f32 %v2283_v13, %v389_v1  ;;  %v865_v21 = vpop.f32.mrb[21].mxu0  ;;  %v2834_v25 = vpop.f32.mrb[21].mxu1  ;;  %v1710_v55 = vmul.f32 %v1187_v50, %v1187_v50  ;;  %v407_v59 = vld [vmem:[#allocation2 + $0x140] sm:$0xff]  ;;  %v410_v61 = vld [vmem:[#allocation2 + $0x158] sm:$0xff]  ;;  %v408_v4 = vld [vmem:[#allocation2 + $0x148] sm:$0xff]  ;;  %v1082_v8 = vadd.f32 %v2718_v48, %v409_v52 }
 0x133   : > { %1506 = vst.msk [vmem:[%s2489_s29 + $0x34] sm:$0xf] %vm1492_vm2, %v2154_v6  ;;  %v1784_v27 = vsel %vm302_vm1, %v1708_v11, 0.0  ;;  %v2838_v30 = vld [vmem:[#allocation2 + $0x90] sm:$0xff]  ;;  %v1060_v31 = vadd.f32 %v865_v21, %v387_v7  ;;  %v2284_v35 = vpop.f32.mrb[22].mxu0  ;;  %v2842_v38 = vpop.f32.mrb[22].mxu1  ;;  %v1584_v45 = vadd.f32 %v1583_v10, %v1582_v16  ;;  %v1077_v7 = vadd.f32 %v2689_v23, %v404_v51 }
 0x134   : > { %v1783_v44 = vadd.f32 %v1782_v9, %v1781_v17  ;;  %v2159_v29 = vpack.c.bf16 %v2838_v30, %v2838_v30  ;;  %1127 = vst.msk [vmem:[#allocation2 + $0xb0] sm:$0xff] %vm302_vm1, %v1062_v20  ;;  %v868_v49 = vpop.f32.mrb[23].mxu0  ;;  %v2848_v54 = vpop.f32.mrb[23].mxu1  ;;  %v1063_v1 = vadd.f32 %v2284_v35, %v390_v22  ;;  %v1713_v5 = vmul.f32 %v2838_v30, %v2838_v30  ;;  %v393_v6 = vld [vmem:[#allocation2 + $0xd0] sm:$0xff] }
 0x135   : > { %v1188_v46 = vld [vmem:[#allocation2 + $0x80] sm:$0xff]  ;;  %1125 = vst.msk [vmem:[#allocation2 + $0xa0] sm:$0xff] %vm302_vm1, %v1060_v31  ;;  %v1586_v62 = vadd.f32 %v1585_v26, %v1584_v45  ;;  %v1061_v3 = vadd.f32 %v868_v49, %v388_v36  ;;  %v413_v9 = vld [vmem:[#allocation2 + $0x170] sm:$0xff]  ;;  %v1191_v12 = vld [vmem:[#allocation2 + $0x98] sm:$0xff]  ;;  %v1080_v13 = vadd.f32 %v2722_v53, %v407_v59  ;;  %v1083_v16 = vadd.f32 %v2730_v60, %v410_v61 }
 0x136   : > { %v2157_v58 = vpack.c.bf16 %v1188_v46, %v1188_v46  ;;  %v1711_v43 = vmul.f32 %v1188_v46, %v1188_v46  ;;  %v1785_v0 = vadd.f32 %v1784_v27, %v1783_v44  ;;  %1511 = vst.msk [vmem:[%s2489_s29 + $0x48] sm:$0xf] %vm1492_vm2, %v2159_v29  ;;  %v1589_v50 = vsel %vm302_vm1, %v1188_v46, 0.0  ;;  %v391_v60 = vld [vmem:[#allocation2 + $0xc0] sm:$0xff]  ;;  %v394_v46 = vld [vmem:[#allocation2 + $0xd8] sm:$0xff] }
 0x137   : > { %v1588_v11 = vadd.f32 %v1587_v18, %v1586_v62  ;;  %1128 = vst.msk [vmem:[#allocation2 + $0xb8] sm:$0xff] %vm302_vm1, %v1063_v1  ;;  %1126 = vst.msk [vmem:[#allocation2 + $0xa8] sm:$0xff] %vm302_vm1, %v1061_v3  ;;  %v1788_v17 = vsel %vm302_vm1, %v1710_v55, 0.0  ;;  %v2160_v21 = vpack.c.bf16 %v1191_v12, %v1191_v12  ;;  %v1081_v48 = vadd.f32 %v2733_v2, %v408_v4  ;;  %v1189_v53 = vld [vmem:[#allocation2 + $0x88] sm:$0xff]  ;;  %v2892_v59 = vld [vmem:[#allocation2 + $0x138] sm:$0xff] }
 0x138   : > { %1509 = vst.msk [vmem:[%s2489_s29 + $0x40] sm:$0xf] %vm1492_vm2, %v2157_v58  ;;  %v1787_v10 = vadd.f32 %v1786_v40, %v1785_v0  ;;  %v1790_v20 = vsel %vm302_vm1, %v1711_v43, 0.0  ;;  %v1086_v36 = vadd.f32 %v2753_v33, %v413_v9  ;;  %v1593_v40 = vsel %vm302_vm1, %v2838_v30, 0.0  ;;  %v392_v58 = vld [vmem:[#allocation2 + $0xc8] sm:$0xff] }
 0x139   : > { %v2287_v23 = vpop.f32.mrb[24].mxu0  ;;  %1142 = vst.msk [vmem:[#allocation2 + $0x128] sm:$0xff] %vm302_vm1, %v1077_v7  ;;  %1147 = vst.msk [vmem:[#allocation2 + $0x150] sm:$0xff] %vm302_vm1, %v1082_v8  ;;  %v2871_v22 = vpop.f32.mrb[24].mxu1  ;;  %v1590_v26 = vadd.f32 %v1589_v50, %v1588_v11  ;;  %v2158_v2 = vpack.c.bf16 %v1189_v53, %v1189_v53  ;;  %v1591_v44 = vsel %vm302_vm1, %v1189_v53, 0.0  ;;  %v1712_v45 = vmul.f32 %v1189_v53, %v1189_v53 }
 0x13a   : > { %v1789_v27 = vadd.f32 %v1788_v17, %v1787_v10  ;;  %v1066_v31 = vadd.f32 %v2287_v23, %v393_v6  ;;  %v881_v35 = vpop.f32.mrb[25].mxu0  ;;  %1145 = vst.msk [vmem:[#allocation2 + $0x140] sm:$0xff] %vm302_vm1, %v1080_v13  ;;  %1148 = vst.msk [vmem:[#allocation2 + $0x158] sm:$0xff] %vm302_vm1, %v1083_v16  ;;  %v2876_v37 = vpop.f32.mrb[25].mxu1  ;;  %v1794_v33 = vsel %vm302_vm1, %v1713_v5, 0.0  ;;  %v1595_v62 = vsel %vm302_vm1, %v1191_v12, 0.0 }
 0x13b   : > { %1512 = vst.msk [vmem:[%s2489_s29 + $0x4c] sm:$0xf] %vm1492_vm2, %v2160_v21  ;;  %v2883_v29 = vld [vmem:[#allocation2 + $0xb0] sm:$0xff]  ;;  %v2288_v49 = vpop.f32.mrb[26].mxu0  ;;  %v2886_v51 = vpop.f32.mrb[26].mxu1  ;;  %v1592_v18 = vadd.f32 %v1591_v44, %v1590_v26  ;;  %v1714_v0 = vmul.f32 %v1191_v12, %v1191_v12  ;;  %v1792_v1 = vsel %vm302_vm1, %v1712_v45, 0.0  ;;  %v1064_v6 = vadd.f32 %v881_v35, %v391_v60 }
 0x13c   : > { %1146 = vst.msk [vmem:[#allocation2 + $0x148] sm:$0xff] %vm302_vm1, %v1081_v48  ;;  %v1791_v52 = vadd.f32 %v1790_v20, %v1789_v27  ;;  %v2163_v30 = vpack.c.bf16 %v2883_v29, %v2883_v29  ;;  %v1192_v55 = vld [vmem:[#allocation2 + $0xa0] sm:$0xff]  ;;  %1131 = vst.msk [vmem:[#allocation2 + $0xd0] sm:$0xff] %vm302_vm1, %v1066_v31  ;;  %v884_v43 = vpop.f32.mrb[27].mxu0  ;;  %v2895_v61 = vpop.f32.mrb[27].mxu1  ;;  %v1067_v10 = vadd.f32 %v2288_v49, %v394_v46  ;;  %v397_v12 = vld [vmem:[#allocation2 + $0xf0] sm:$0xff] }
 0x13d   : > { %1151 = vst.msk [vmem:[#allocation2 + $0x170] sm:$0xff] %vm302_vm1, %v1086_v36  ;;  %v2161_v3 = vpack.c.bf16 %v1192_v55, %v1192_v55  ;;  %v1594_v4 = vadd.f32 %v1593_v40, %v1592_v18  ;;  %v1715_v50 = vmul.f32 %v1192_v55, %v1192_v55  ;;  %v1597_v7 = vsel %vm302_vm1, %v1192_v55, 0.0  ;;  %1129 = vst.msk [vmem:[#allocation2 + $0xc0] sm:$0xff] %vm302_vm1, %v1064_v6  ;;  %v395_v21 = vld [vmem:[#allocation2 + $0xe0] sm:$0xff]  ;;  %v398_v44 = vld [vmem:[#allocation2 + $0xf8] sm:$0xff] }
 0x13e   : > { %1510 = vst.msk [vmem:[%s2489_s29 + $0x44] sm:$0xf] %vm1492_vm2, %v2158_v2  ;;  %v1793_v5 = vadd.f32 %v1792_v1, %v1791_v52  ;;  %1515 = vst.msk [vmem:[%s2489_s29 + $0x58] sm:$0xf] %vm1492_vm2, %v2163_v30  ;;  %v1195_v8 = vld [vmem:[#allocation2 + $0xb8] sm:$0xff]  ;;  %v1193_v9 = vld [vmem:[#allocation2 + $0xa8] sm:$0xff]  ;;  %v1065_v11 = vadd.f32 %v884_v43, %v392_v58  ;;  %v2180_v13 = vpack.c.bf16 %v2892_v59, %v2892_v59 }
 0x13f   : > { %1513 = vst.msk [vmem:[%s2489_s29 + $0x50] sm:$0xf] %vm1492_vm2, %v2161_v3  ;;  %v1596_v17 = vadd.f32 %v1595_v62, %v1594_v4  ;;  %v2164_v20 = vpack.c.bf16 %v1195_v8, %v1195_v8  ;;  %v1796_v23 = vsel %vm302_vm1, %v1714_v0, 0.0  ;;  %v1798_v48 = vsel %vm302_vm1, %v1715_v50, 0.0  ;;  %v396_v45 = vld [vmem:[#allocation2 + $0xe8] sm:$0xff] }
 0x140   : > { %v1795_v16 = vadd.f32 %v1794_v33, %v1793_v5  ;;  %v2162_v26 = vpack.c.bf16 %v1193_v9, %v1193_v9  ;;  %v1599_v27 = vsel %vm302_vm1, %v1193_v9, 0.0  ;;  %1132 = vst.msk [vmem:[#allocation2 + $0xd8] sm:$0xff] %vm302_vm1, %v1067_v10  ;;  %1130 = vst.msk [vmem:[#allocation2 + $0xc8] sm:$0xff] %vm302_vm1, %v1065_v11  ;;  %v1716_v36 = vmul.f32 %v1193_v9, %v1193_v9  ;;  %v2926_v30 = vld [vmem:[#allocation2 + $0x128] sm:$0xff]  ;;  %v2932_v3 = vld [vmem:[#allocation2 + $0x150] sm:$0xff] }
 0x141   : > { %v2291_v53 = vpop.f32.mrb[28].mxu0  ;;  %1532 = vst.msk [vmem:[%s2489_s29 + $0x9c] sm:$0xf] %vm1492_vm2, %v2180_v13  ;;  %v2916_v31 = vpop.f32.mrb[28].mxu1  ;;  %v1598_v60 = vadd.f32 %v1597_v7, %v1596_v17  ;;  %1516 = vst.msk [vmem:[%s2489_s29 + $0x5c] sm:$0xf] %vm1492_vm2, %v2164_v20  ;;  %v1717_v49 = vmul.f32 %v2883_v29, %v2883_v29  ;;  %v1718_v50 = vmul.f32 %v1195_v8, %v1195_v8 }
 0x142   : > { %v1797_v35 = vadd.f32 %v1796_v23, %v1795_v16  ;;  %v1070_v40 = vadd.f32 %v2291_v53, %v397_v12  ;;  %v897_v2 = vpop.f32.mrb[29].mxu0  ;;  %v2920_v46 = vpop.f32.mrb[29].mxu1  ;;  %1514 = vst.msk [vmem:[%s2489_s29 + $0x54] sm:$0xf] %vm1492_vm2, %v2162_v26  ;;  %v1800_v62 = vsel %vm302_vm1, %v1716_v36, 0.0  ;;  %v1601_v5 = vsel %vm302_vm1, %v2883_v29, 0.0 }
 0x143   : > { %v1198_v33 = vld [vmem:[#allocation2 + $0xd0] sm:$0xff]  ;;  %v1068_v52 = vadd.f32 %v897_v2, %v395_v21  ;;  %v2292_v18 = vpop.f32.mrb[30].mxu0  ;;  %v2928_v55 = vpop.f32.mrb[30].mxu1  ;;  %v1600_v43 = vadd.f32 %v1599_v27, %v1598_v60  ;;  %v2178_v11 = vpack.c.bf16 %v2926_v30, %v2926_v30  ;;  %v1802_v12 = vsel %vm302_vm1, %v1717_v49, 0.0 }
 0x144   : > { %v1799_v58 = vadd.f32 %v1798_v48, %v1797_v35  ;;  %v2167_v0 = vpack.c.bf16 %v1198_v33, %v1198_v33  ;;  %1135 = vst.msk [vmem:[#allocation2 + $0xf0] sm:$0xff] %vm302_vm1, %v1070_v40  ;;  %v900_v1 = vpop.f32.mrb[31].mxu0  ;;  %v2934_v4 = vpop.f32.mrb[31].mxu1  ;;  %v1071_v6 = vadd.f32 %v2292_v18, %v398_v44  ;;  %v1603_v13 = vsel %vm302_vm1, %v1195_v8, 0.0  ;;  %v1196_v29 = vld [vmem:[#allocation2 + $0xc0] sm:$0xff] }
 0x145   : > { %1133 = vst.msk [vmem:[#allocation2 + $0xe0] sm:$0xff] %vm302_vm1, %v1068_v52  ;;  %v1069_v7 = vadd.f32 %v900_v1, %v396_v45  ;;  %v1602_v9 = vadd.f32 %v1601_v5, %v1600_v43  ;;  %v2183_v16 = vpack.c.bf16 %v2932_v3, %v2932_v3  ;;  %v2165_v20 = vpack.c.bf16 %v1196_v29, %v1196_v29 }
 0x146   : > { %v1801_v10 = vadd.f32 %v1800_v62, %v1799_v58  ;;  %1519 = vst.msk [vmem:[%s2489_s29 + $0x68] sm:$0xf] %vm1492_vm2, %v2167_v0  ;;  %v1605_v23 = vsel %vm302_vm1, %v1196_v29, 0.0  ;;  %1530 = vst.msk [vmem:[%s2489_s29 + $0x94] sm:$0xf] %vm1492_vm2, %v2178_v11  ;;  %v1804_v8 = vsel %vm302_vm1, %v1718_v50, 0.0  ;;  %v1719_v27 = vmul.f32 %v1196_v29, %v1196_v29 }
 0x147   : > { %1136 = vst.msk [vmem:[#allocation2 + $0xf8] sm:$0xff] %vm302_vm1, %v1071_v6  ;;  %1134 = vst.msk [vmem:[#allocation2 + $0xe8] sm:$0xff] %vm302_vm1, %v1069_v7  ;;  %v1604_v21 = vadd.f32 %v1603_v13, %v1602_v9  ;;  %v1199_v48 = vld [vmem:[#allocation2 + $0xd8] sm:$0xff]  ;;  %v1197_v26 = vld [vmem:[#allocation2 + $0xc8] sm:$0xff]  ;;  %v1721_v2 = vmul.f32 %v1198_v33, %v1198_v33  ;;  %v2965_v62 = vsel %vm302_vm1, %v2692_v28, 0.0  ;;  %v1609_v0 = vsel %vm302_vm1, %v1198_v33, 0.0 }
 0x148   : > { %v1803_v17 = vadd.f32 %v1802_v12, %v1801_v10  ;;  %v2168_v53 = vpack.c.bf16 %v1199_v48, %v1199_v48  ;;  %1535 = vst.msk [vmem:[%s2489_s29 + $0xa8] sm:$0xf] %vm1492_vm2, %v2183_v16  ;;  %1517 = vst.msk [vmem:[%s2489_s29 + $0x60] sm:$0xf] %vm1492_vm2, %v2165_v20  ;;  %v2166_v36 = vpack.c.bf16 %v1197_v26, %v1197_v26  ;;  %v1607_v40 = vsel %vm302_vm1, %v1197_v26, 0.0 }
 0x149   : > { %v1606_v60 = vadd.f32 %v1605_v23, %v1604_v21  ;;  %v1806_v44 = vsel %vm302_vm1, %v1719_v27, 0.0  ;;  %v1720_v45 = vmul.f32 %v1197_v26, %v1197_v26  ;;  %v1722_v1 = vmul.f32 %v1199_v48, %v1199_v48 }
 0x14a   : > { %v1805_v35 = vadd.f32 %v1804_v8, %v1803_v17  ;;  %1520 = vst.msk [vmem:[%s2489_s29 + $0x6c] sm:$0xf] %vm1492_vm2, %v2168_v53  ;;  %1518 = vst.msk [vmem:[%s2489_s29 + $0x64] sm:$0xf] %vm1492_vm2, %v2166_v36  ;;  %v2973_v12 = vmul.f32 %v2692_v28, %v2692_v28  ;;  %v1810_v13 = vsel %vm302_vm1, %v1721_v2, 0.0  ;;  %v1611_v33 = vsel %vm302_vm1, %v1199_v48, 0.0 }
 0x14b   : > { %v1202_v49 = vld [vmem:[#allocation2 + $0xf0] sm:$0xff]  ;;  %v1608_v18 = vadd.f32 %v1607_v40, %v1606_v60  ;;  %v1808_v5 = vsel %vm302_vm1, %v1720_v45, 0.0  ;;  %v2980_v17 = vld [vmem:[#allocation2 + $0x140] sm:$0xff]  ;;  %v1727_v26 = vmul.f32 %v2698_v32, %v2698_v32  ;;  %v2984_v28 = vld [vmem:[#allocation2 + $0x158] sm:$0xff]  ;;  %v1812_v8 = vsel %vm302_vm1, %v1722_v1, 0.0 }
 0x14c   : > { %v1807_v52 = vadd.f32 %v1806_v44, %v1805_v35  ;;  %v2171_v58 = vpack.c.bf16 %v1202_v49, %v1202_v49  ;;  %v1200_v43 = vld [vmem:[#allocation2 + $0xe0] sm:$0xff]  ;;  %v1728_v36 = vmul.f32 %v2745_v19, %v2745_v19  ;;  %v2181_v40 = vpack.c.bf16 %v2980_v17, %v2980_v17  ;;  %v2997_v2 = vld [vmem:[#allocation2 + $0x148] sm:$0xff] }
 0x14d   : > { %v2169_v50 = vpack.c.bf16 %v1200_v43, %v1200_v43  ;;  %v1610_v6 = vadd.f32 %v1609_v0, %v1608_v18  ;;  %v1723_v9 = vmul.f32 %v1200_v43, %v1200_v43  ;;  %v1613_v29 = vsel %vm302_vm1, %v1200_v43, 0.0 }
 0x14e   : > { %v1809_v7 = vadd.f32 %v1808_v5, %v1807_v52  ;;  %1523 = vst.msk [vmem:[%s2489_s29 + $0x78] sm:$0xf] %vm1492_vm2, %v2171_v58  ;;  %v1203_v10 = vld [vmem:[#allocation2 + $0xf8] sm:$0xff]  ;;  %v1201_v11 = vld [vmem:[#allocation2 + $0xe8] sm:$0xff]  ;;  %v1725_v44 = vmul.f32 %v1202_v49, %v1202_v49  ;;  %v1621_v52 = vsel %vm302_vm1, %v2698_v32, 0.0  ;;  %v2184_v18 = vpack.c.bf16 %v2984_v28, %v2984_v28  ;;  %v3004_v58 = vld [vmem:[#allocation2 + $0x170] sm:$0xff] }
 0x14f   : > { %1521 = vst.msk [vmem:[%s2489_s29 + $0x70] sm:$0xf] %vm1492_vm2, %v2169_v50  ;;  %v2172_v16 = vpack.c.bf16 %v1203_v10, %v1203_v10  ;;  %v1612_v21 = vadd.f32 %v1611_v33, %v1610_v6  ;;  %v2170_v23 = vpack.c.bf16 %v1201_v11, %v1201_v11  ;;  %v1814_v48 = vsel %vm302_vm1, %v1723_v9, 0.0  ;;  %1533 = vst.msk [vmem:[%s2489_s29 + $0xa0] sm:$0xf] %vm1492_vm2, %v2181_v40  ;;  %v411_v50 = vld [vmem:[#allocation2 + $0x160] sm:$0xff] }
 0x150   : > { %v1811_v20 = vadd.f32 %v1810_v13, %v1809_v7  ;;  %v1615_v27 = vsel %vm302_vm1, %v1201_v11, 0.0  ;;  %v1724_v53 = vmul.f32 %v1201_v11, %v1201_v11  ;;  %v1822_v1 = vsel %vm302_vm1, %v1727_v26, 0.0  ;;  %1536 = vst.msk [vmem:[%s2489_s29 + $0xac] sm:$0xf] %vm1492_vm2, %v2184_v18  ;;  %v414_v11 = vld [vmem:[#allocation2 + $0x178] sm:$0xff]  ;;  %v412_v13 = vld [vmem:[#allocation2 + $0x168] sm:$0xff] }
 0x151   : > { %1524 = vst.msk [vmem:[%s2489_s29 + $0x7c] sm:$0xf] %vm1492_vm2, %v2172_v16  ;;  %v1614_v60 = vadd.f32 %v1613_v29, %v1612_v21  ;;  %1522 = vst.msk [vmem:[%s2489_s29 + $0x74] sm:$0xf] %vm1492_vm2, %v2170_v23  ;;  %v3009_v5 = vmul.f32 %v2710_v42, %v2710_v42  ;;  %v1617_v6 = vsel %vm302_vm1, %v1202_v49, 0.0  ;;  %v1726_v7 = vmul.f32 %v1203_v10, %v1203_v10  ;;  %v415_v21 = vld [vmem:[#allocation2 + $0x180] sm:$0xff] }
 0x152   : > { %v1813_v35 = vadd.f32 %v1812_v8, %v1811_v20  ;;  %v1816_v45 = vsel %vm302_vm1, %v1724_v53, 0.0  ;;  %v1623_v32 = vsel %vm302_vm1, %v2745_v19, 0.0  ;;  %v2182_v9 = vpack.c.bf16 %v2997_v2, %v2997_v2  ;;  %v417_v20 = vld [vmem:[#allocation2 + $0x190] sm:$0xff]  ;;  %v418_v23 = vld [vmem:[#allocation2 + $0x198] sm:$0xff] }
 0x153   : > { %v1616_v0 = vadd.f32 %v1615_v27, %v1614_v60  ;;  %v1824_v16 = vsel %vm302_vm1, %v1728_v36, 0.0  ;;  %v2187_v49 = vpack.c.bf16 %v3004_v58, %v3004_v58  ;;  %v1818_v19 = vsel %vm302_vm1, %v1725_v44, 0.0  ;;  %v416_v27 = vld [vmem:[#allocation2 + $0x188] sm:$0xff]  ;;  %v421_v53 = vld [vmem:[#allocation2 + $0x1b0] sm:$0xff]  ;;  %v419_v60 = vld [vmem:[#allocation2 + $0x1a0] sm:$0xff] }
 0x154   : > { %v1815_v43 = vadd.f32 %v1814_v48, %v1813_v35  ;;  %v1619_v26 = vsel %vm302_vm1, %v1203_v10, 0.0  ;;  %v3027_v8 = vmul.f32 %v2779_v63, %v2779_v63  ;;  %1534 = vst.msk [vmem:[%s2489_s29 + $0xa4] sm:$0xf] %vm1492_vm2, %v2182_v9  ;;  %v1084_v48 = vadd.f32 %v2759_v39, %v411_v50  ;;  %v422_v10 = vld [vmem:[#allocation2 + $0x1b8] sm:$0xff]  ;;  %v425_v18 = vld [vmem:[#allocation2 + $0x1d0] sm:$0xff] }
 0x155   : > { %v1618_v33 = vadd.f32 %v1617_v6, %v1616_v0  ;;  %1539 = vst.msk [vmem:[%s2489_s29 + $0xb8] sm:$0xf] %vm1492_vm2, %v2187_v49  ;;  %v1087_v40 = vadd.f32 %v2764_v47, %v414_v11  ;;  %v1085_v44 = vadd.f32 %v2775_v57, %v412_v13  ;;  %v1090_v39 = vadd.f32 %v2797_v14, %v417_v20  ;;  %v423_v6 = vld [vmem:[#allocation2 + $0x1c0] sm:$0xff]  ;;  %v426_v9 = vld [vmem:[#allocation2 + $0x1d8] sm:$0xff]  ;;  %v429_v11 = vld [vmem:[#allocation2 + $0x1f0] sm:$0xff] }
 0x156   : > { %v1817_v29 = vadd.f32 %v1816_v45, %v1815_v43  ;;  %v420_v45 = vld [vmem:[#allocation2 + $0x1a8] sm:$0xff]  ;;  %v1820_v43 = vsel %vm302_vm1, %v1726_v7, 0.0  ;;  %1149 = vst.msk [vmem:[#allocation2 + $0x160] sm:$0xff] %vm302_vm1, %v1084_v48  ;;  %v1088_v0 = vadd.f32 %v2801_v24, %v415_v21  ;;  %v1091_v50 = vadd.f32 %v2804_v34, %v418_v23  ;;  %v427_v13 = vld [vmem:[#allocation2 + $0x1e0] sm:$0xff]  ;;  %v430_v14 = vld [vmem:[#allocation2 + $0x1f8] sm:$0xff] }
 0x157   : > { %v1620_v36 = vadd.f32 %v1619_v26, %v1618_v33  ;;  %v424_v33 = vld [vmem:[#allocation2 + $0x1c8] sm:$0xff]  ;;  %1152 = vst.msk [vmem:[#allocation2 + $0x178] sm:$0xff] %vm302_vm1, %v1087_v40  ;;  %1150 = vst.msk [vmem:[#allocation2 + $0x168] sm:$0xff] %vm302_vm1, %v1085_v44  ;;  %v1089_v57 = vadd.f32 %v2809_v41, %v416_v27  ;;  %v1094_v7 = vadd.f32 %v2830_v15, %v421_v53 }
 0x158   : > { %v1819_v35 = vadd.f32 %v1818_v19, %v1817_v29  ;;  %1155 = vst.msk [vmem:[#allocation2 + $0x190] sm:$0xff] %vm302_vm1, %v1090_v39  ;;  %1153 = vst.msk [vmem:[#allocation2 + $0x180] sm:$0xff] %vm302_vm1, %v1088_v0  ;;  %v1092_v24 = vadd.f32 %v2834_v25, %v419_v60  ;;  %v1095_v34 = vadd.f32 %v2842_v38, %v422_v10  ;;  %v428_v41 = vld [vmem:[#allocation2 + $0x1e8] sm:$0xff]  ;;  %v1631_v60 = vsel %vm302_vm1, %v2926_v30, 0.0 }
 0x159   : > { %v1622_v29 = vadd.f32 %v1621_v52, %v1620_v36  ;;  %1156 = vst.msk [vmem:[#allocation2 + $0x198] sm:$0xff] %vm302_vm1, %v1091_v50  ;;  %v1093_v52 = vadd.f32 %v2848_v54, %v420_v45  ;;  %v1098_v49 = vadd.f32 %v2871_v22, %v425_v18  ;;  %1154 = vst.msk [vmem:[#allocation2 + $0x188] sm:$0xff] %vm302_vm1, %v1089_v57  ;;  %v1633_v36 = vsel %vm302_vm1, %v2773_v56, 0.0 }
 0x15a   : > { %v1821_v47 = vadd.f32 %v1820_v43, %v1819_v35  ;;  %1159 = vst.msk [vmem:[#allocation2 + $0x1b0] sm:$0xff] %vm302_vm1, %v1094_v7  ;;  %v1096_v21 = vadd.f32 %v2876_v37, %v423_v6  ;;  %v1099_v23 = vadd.f32 %v2886_v51, %v426_v9  ;;  %1157 = vst.msk [vmem:[#allocation2 + $0x1a0] sm:$0xff] %vm302_vm1, %v1092_v24 }
 0x15b   : > { %v1624_v15 = vadd.f32 %v1623_v32, %v1622_v29  ;;  %1160 = vst.msk [vmem:[#allocation2 + $0x1b8] sm:$0xff] %vm302_vm1, %v1095_v34  ;;  %1158 = vst.msk [vmem:[#allocation2 + $0x1a8] sm:$0xff] %vm302_vm1, %v1093_v52  ;;  %v1097_v25 = vadd.f32 %v2895_v61, %v424_v33  ;;  %v1102_v38 = vadd.f32 %v2916_v31, %v429_v11  ;;  %v1826_v32 = vsel %vm302_vm1, %v2973_v12, 0.0 }
 0x15c   : > { %v1823_v20 = vadd.f32 %v1822_v1, %v1821_v47  ;;  %1163 = vst.msk [vmem:[#allocation2 + $0x1d0] sm:$0xff] %vm302_vm1, %v1098_v49  ;;  %v1100_v54 = vadd.f32 %v2920_v46, %v427_v13  ;;  %v1103_v22 = vadd.f32 %v2928_v55, %v430_v14  ;;  %1161 = vst.msk [vmem:[#allocation2 + $0x1c0] sm:$0xff] %vm302_vm1, %v1096_v21  ;;  %v1627_v61 = vsel %vm302_vm1, %v2710_v42, 0.0 }
 0x15d   : > { %v1626_v37 = vadd.f32 %v2965_v62, %v1624_v15  ;;  %1164 = vst.msk [vmem:[#allocation2 + $0x1d8] sm:$0xff] %vm302_vm1, %v1099_v23  ;;  %v1101_v51 = vadd.f32 %v2934_v4, %v428_v41  ;;  %v1629_v31 = vsel %vm302_vm1, %v2779_v63, 0.0  ;;  %1162 = vst.msk [vmem:[#allocation2 + $0x1c8] sm:$0xff] %vm302_vm1, %v1097_v25  ;;  %v3078_v4 = vld [vmem:[#allocation2 + $0x160] sm:$0xff]  ;;  %v1828_v42 = vsel %vm302_vm1, %v3009_v5, 0.0 }
 0x15e   : > { %v1825_v1 = vadd.f32 %v1824_v16, %v1823_v20  ;;  %1167 = vst.msk [vmem:[#allocation2 + $0x1f0] sm:$0xff] %vm302_vm1, %v1102_v38  ;;  %1165 = vst.msk [vmem:[#allocation2 + $0x1e0] sm:$0xff] %vm302_vm1, %v1100_v54  ;;  %v1830_v63 = vsel %vm302_vm1, %v3027_v8, 0.0  ;;  %v1732_v62 = vmul.f32 %v2926_v30, %v2926_v30  ;;  %v2185_v12 = vpack.c.bf16 %v3078_v4, %v3078_v4  ;;  %v3089_v16 = vld [vmem:[#allocation2 + $0x178] sm:$0xff]  ;;  %v3091_v19 = vld [vmem:[#allocation2 + $0x168] sm:$0xff] }
 0x15f   : > { %1168 = vst.msk [vmem:[#allocation2 + $0x1f8] sm:$0xff] %vm302_vm1, %v1103_v22  ;;  %v1628_v55 = vadd.f32 %v1627_v61, %v1626_v37  ;;  %1166 = vst.msk [vmem:[#allocation2 + $0x1e8] sm:$0xff] %vm302_vm1, %v1101_v51  ;;  %v2188_v27 = vpack.c.bf16 %v3089_v16, %v3089_v16  ;;  %v3095_v5 = vld [vmem:[#allocation2 + $0x190] sm:$0xff]  ;;  %v3097_v8 = vld [vmem:[#allocation2 + $0x180] sm:$0xff]  ;;  %v1733_v53 = vmul.f32 %v2773_v56, %v2773_v56  ;;  %v1635_v33 = vsel %vm302_vm1, %v2892_v59, 0.0 }
 0x160   : > { %v1827_v46 = vadd.f32 %v1826_v32, %v1825_v1  ;;  %1537 = vst.msk [vmem:[%s2489_s29 + $0xb0] sm:$0xf] %vm1492_vm2, %v2185_v12  ;;  %v2186_v35 = vpack.c.bf16 %v3091_v19, %v3091_v19  ;;  %v2191_v10 = vpack.c.bf16 %v3095_v5, %v3095_v5  ;;  %v3113_v45 = vld [vmem:[#allocation2 + $0x198] sm:$0xff]  ;;  %v1734_v30 = vmul.f32 %v2892_v59, %v2892_v59  ;;  %v3124_v39 = vld [vmem:[#allocation2 + $0x188] sm:$0xff] }
 0x161   : > { %v1630_v26 = vadd.f32 %v1629_v31, %v1628_v55  ;;  %1540 = vst.msk [vmem:[%s2489_s29 + $0xbc] sm:$0xf] %vm1492_vm2, %v2188_v27  ;;  %v1832_v18 = vsel %vm302_vm1, %v1732_v62, 0.0  ;;  %v1735_v43 = vmul.f32 %v2980_v17, %v2980_v17  ;;  %v2189_v56 = vpack.c.bf16 %v3097_v8, %v3097_v8  ;;  %v3128_v6 = vld [vmem:[#allocation2 + $0x1b0] sm:$0xff]  ;;  %v3141_v13 = vld [vmem:[#allocation2 + $0x1a0] sm:$0xff] }
 0x162   : > { %v1829_v48 = vadd.f32 %v1828_v42, %v1827_v46  ;;  %1538 = vst.msk [vmem:[%s2489_s29 + $0xb4] sm:$0xf] %vm1492_vm2, %v2186_v35  ;;  %1543 = vst.msk [vmem:[%s2489_s29 + $0xc8] sm:$0xf] %vm1492_vm2, %v2191_v10  ;;  %v1834_v9 = vsel %vm302_vm1, %v1733_v53, 0.0  ;;  %v1637_v29 = vsel %vm302_vm1, %v2980_v17, 0.0  ;;  %v2192_v47 = vpack.c.bf16 %v3113_v45, %v3113_v45 }
 0x163   : > { %v1632_v44 = vadd.f32 %v1631_v60, %v1630_v26  ;;  %1541 = vst.msk [vmem:[%s2489_s29 + $0xc0] sm:$0xf] %vm1492_vm2, %v2189_v56  ;;  %v2190_v11 = vpack.c.bf16 %v3124_v39, %v3124_v39  ;;  %v1836_v14 = vsel %vm302_vm1, %v1734_v30, 0.0  ;;  %v1838_v59 = vsel %vm302_vm1, %v1735_v43, 0.0  ;;  %v3151_v34 = vld [vmem:[#allocation2 + $0x1b8] sm:$0xff]  ;;  %v3155_v41 = vld [vmem:[#allocation2 + $0x1a8] sm:$0xff] }
 0x164   : > { %v1831_v40 = vadd.f32 %v1830_v63, %v1829_v48  ;;  %v1736_v17 = vmul.f32 %v2997_v2, %v2997_v2  ;;  %1544 = vst.msk [vmem:[%s2489_s29 + $0xcc] sm:$0xf] %vm1492_vm2, %v2192_v47  ;;  %v2195_v24 = vpack.c.bf16 %v3128_v6, %v3128_v6  ;;  %v1737_v20 = vmul.f32 %v2932_v3, %v2932_v3  ;;  %v3169_v22 = vld [vmem:[#allocation2 + $0x1d0] sm:$0xff]  ;;  %v3180_v51 = vld [vmem:[#allocation2 + $0x1c0] sm:$0xff]  ;;  %v3184_v31 = vld [vmem:[#allocation2 + $0x1d8] sm:$0xff] }
 0x165   : > { %v1634_v0 = vadd.f32 %v1633_v36, %v1632_v44  ;;  %1542 = vst.msk [vmem:[%s2489_s29 + $0xc4] sm:$0xf] %vm1492_vm2, %v2190_v11  ;;  %v1639_v15 = vsel %vm302_vm1, %v2997_v2, 0.0  ;;  %v2193_v21 = vpack.c.bf16 %v3141_v13, %v3141_v13  ;;  %v1641_v23 = vsel %vm302_vm1, %v2932_v3, 0.0  ;;  %v3197_v48 = vld [vmem:[#allocation2 + $0x1c8] sm:$0xff]  ;;  %v3207_v60 = vld [vmem:[#allocation2 + $0x1f0] sm:$0xff] }
 0x166   : > { %v1833_v50 = vadd.f32 %v1832_v18, %v1831_v40  ;;  %1547 = vst.msk [vmem:[%s2489_s29 + $0xd8] sm:$0xf] %vm1492_vm2, %v2195_v24  ;;  %v2196_v54 = vpack.c.bf16 %v3151_v34, %v3151_v34  ;;  %v1738_v2 = vmul.f32 %v2984_v28, %v2984_v28  ;;  %v1840_v37 = vsel %vm302_vm1, %v1736_v17, 0.0  ;;  %v3211_v40 = vld [vmem:[#allocation2 + $0x1e0] sm:$0xff] }
 0x167   : > { %v1636_v7 = vadd.f32 %v1635_v33, %v1634_v0  ;;  %v1739_v1 = vmul.f32 %v3078_v4, %v3078_v4  ;;  %1545 = vst.msk [vmem:[%s2489_s29 + $0xd0] sm:$0xf] %vm1492_vm2, %v2193_v21  ;;  %v2194_v3 = vpack.c.bf16 %v3155_v41, %v3155_v41  ;;  %v1842_v46 = vsel %vm302_vm1, %v1737_v20, 0.0 }
 0x168   : > { %v1835_v57 = vadd.f32 %v1834_v9, %v1833_v50  ;;  %1548 = vst.msk [vmem:[%s2489_s29 + $0xdc] sm:$0xf] %vm1492_vm2, %v2196_v54  ;;  %v1643_v55 = vsel %vm302_vm1, %v2984_v28, 0.0  ;;  %v1645_v42 = vsel %vm302_vm1, %v3078_v4, 0.0  ;;  %v2199_v63 = vpack.c.bf16 %v3169_v22, %v3169_v22  ;;  %v3225_v50 = vld [vmem:[#allocation2 + $0x1f8] sm:$0xff] }
 0x169   : > { %v1638_v52 = vadd.f32 %v1637_v29, %v1636_v7  ;;  %1546 = vst.msk [vmem:[%s2489_s29 + $0xd4] sm:$0xf] %vm1492_vm2, %v2194_v3  ;;  %v2197_v26 = vpack.c.bf16 %v3180_v51, %v3180_v51  ;;  %v1844_v27 = vsel %vm302_vm1, %v1738_v2, 0.0  ;;  %v1846_v28 = vsel %vm302_vm1, %v1739_v1, 0.0  ;;  %v3236_v29 = vld [vmem:[#allocation2 + $0x1e8] sm:$0xff] }
 0x16a   : > { %v1837_v49 = vadd.f32 %v1836_v14, %v1835_v57  ;;  %v1740_v4 = vmul.f32 %v3091_v19, %v3091_v19  ;;  %1551 = vst.msk [vmem:[%s2489_s29 + $0xe8] sm:$0xf] %vm1492_vm2, %v2199_v63  ;;  %v2200_v53 = vpack.c.bf16 %v3184_v31, %v3184_v31  ;;  %v1741_v44 = vmul.f32 %v3004_v58, %v3004_v58 }
 0x16b   : > { %v1640_v38 = vadd.f32 %v1639_v15, %v1638_v52  ;;  %1549 = vst.msk [vmem:[%s2489_s29 + $0xe0] sm:$0xf] %vm1492_vm2, %v2197_v26  ;;  %v1647_v10 = vsel %vm302_vm1, %v3091_v19, 0.0  ;;  %v2198_v30 = vpack.c.bf16 %v3197_v48, %v3197_v48  ;;  %v1649_v18 = vsel %vm302_vm1, %v3004_v58, 0.0 }
 0x16c   : > { %v1839_v25 = vadd.f32 %v1838_v59, %v1837_v49  ;;  %1552 = vst.msk [vmem:[%s2489_s29 + $0xec] sm:$0xf] %vm1492_vm2, %v2200_v53  ;;  %v2203_v0 = vpack.c.bf16 %v3207_v60, %v3207_v60  ;;  %v1742_v19 = vmul.f32 %v3089_v16, %v3089_v16  ;;  %v1848_v9 = vsel %vm302_vm1, %v1740_v4, 0.0 }
 0x16d   : > { %v1642_v32 = vadd.f32 %v1641_v23, %v1640_v38  ;;  %v1743_v33 = vmul.f32 %v3097_v8, %v3097_v8  ;;  %1550 = vst.msk [vmem:[%s2489_s29 + $0xe4] sm:$0xf] %vm1492_vm2, %v2198_v30  ;;  %v2201_v58 = vpack.c.bf16 %v3211_v40, %v3211_v40  ;;  %v1850_v7 = vsel %vm302_vm1, %v1741_v44, 0.0 }
 0x16e   : > { %v1841_v61 = vadd.f32 %v1840_v37, %v1839_v25  ;;  %1555 = vst.msk [vmem:[%s2489_s29 + $0xf8] sm:$0xf] %vm1492_vm2, %v2203_v0  ;;  %v1651_v11 = vsel %vm302_vm1, %v3089_v16, 0.0  ;;  %v1653_v14 = vsel %vm302_vm1, %v3097_v8, 0.0  ;;  %v2204_v59 = vpack.c.bf16 %v3225_v50, %v3225_v50 }
 0x16f   : > { %v1644_v12 = vadd.f32 %v1643_v55, %v1642_v32  ;;  %1553 = vst.msk [vmem:[%s2489_s29 + $0xf0] sm:$0xf] %vm1492_vm2, %v2201_v58  ;;  %v2202_v52 = vpack.c.bf16 %v3236_v29, %v3236_v29  ;;  %v1852_v49 = vsel %vm302_vm1, %v1742_v19, 0.0  ;;  %v1854_v20 = vsel %vm302_vm1, %v1743_v33, 0.0 }
 0x170   : > { %v1843_v62 = vadd.f32 %v1842_v46, %v1841_v61  ;;  %v1744_v16 = vmul.f32 %v3124_v39, %v3124_v39  ;;  %1556 = vst.msk [vmem:[%s2489_s29 + $0xfc] sm:$0xf] %vm1492_vm2, %v2204_v59  ;;  %v1745_v21 = vmul.f32 %v3095_v5, %v3095_v5  ;;  %v1655_v23 = vsel %vm302_vm1, %v3124_v39, 0.0 }
 0x171   : > { %v1646_v35 = vadd.f32 %v1645_v42, %v1644_v12  ;;  %1554 = vst.msk [vmem:[%s2489_s29 + $0xf4] sm:$0xf] %vm1492_vm2, %v2202_v52  ;;  %v1657_v54 = vsel %vm302_vm1, %v3095_v5, 0.0  ;;  %v1746_v2 = vmul.f32 %v3113_v45, %v3113_v45  ;;  %v1747_v1 = vmul.f32 %v3141_v13, %v3141_v13 }
 0x172   : > { %v1845_v36 = vadd.f32 %v1844_v27, %v1843_v62  ;;  %v1856_v37 = vsel %vm302_vm1, %v1744_v16, 0.0  ;;  %v1858_v61 = vsel %vm302_vm1, %v1745_v21, 0.0  ;;  %v1659_v39 = vsel %vm302_vm1, %v3113_v45, 0.0 }
 0x173   : > { %v1648_v56 = vadd.f32 %v1647_v10, %v1646_v35  ;;  %v1661_v46 = vsel %vm302_vm1, %v3141_v13, 0.0  ;;  %v1860_v42 = vsel %vm302_vm1, %v1746_v2, 0.0  ;;  %v1862_v63 = vsel %vm302_vm1, %v1747_v1, 0.0 }
 0x174   : > { %v1847_v43 = vadd.f32 %v1846_v28, %v1845_v36  ;;  %v1748_v62 = vmul.f32 %v3155_v41, %v3155_v41  ;;  %v1749_v27 = vmul.f32 %v3128_v6, %v3128_v6  ;;  %v1663_v45 = vsel %vm302_vm1, %v3155_v41, 0.0 }
 0x175   : > { %v1650_v47 = vadd.f32 %v1649_v18, %v1648_v56  ;;  %v1665_v13 = vsel %vm302_vm1, %v3128_v6, 0.0  ;;  %v1750_v53 = vmul.f32 %v3151_v34, %v3151_v34  ;;  %v1751_v36 = vmul.f32 %v3180_v51, %v3180_v51 }
 0x176   : > { %v1849_v57 = vadd.f32 %v1848_v9, %v1847_v43  ;;  %v1864_v35 = vsel %vm302_vm1, %v1748_v62, 0.0  ;;  %v1866_v30 = vsel %vm302_vm1, %v1749_v27, 0.0  ;;  %v1667_v41 = vsel %vm302_vm1, %v3151_v34, 0.0 }
 0x177   : > { %v1652_v24 = vadd.f32 %v1651_v11, %v1650_v47  ;;  %v1669_v18 = vsel %vm302_vm1, %v3180_v51, 0.0  ;;  %v1868_v56 = vsel %vm302_vm1, %v1750_v53, 0.0  ;;  %v1870_v0 = vsel %vm302_vm1, %v1751_v36, 0.0 }
 0x178   : > { %v1851_v17 = vadd.f32 %v1850_v7, %v1849_v57  ;;  %v1752_v19 = vmul.f32 %v3197_v48, %v3197_v48  ;;  %v1753_v58 = vmul.f32 %v3169_v22, %v3169_v22  ;;  %v1671_v34 = vsel %vm302_vm1, %v3197_v48, 0.0 }
 0x179   : > { %v1654_v8 = vadd.f32 %v1653_v14, %v1652_v24  ;;  %v1673_v51 = vsel %vm302_vm1, %v3169_v22, 0.0  ;;  %v1754_v7 = vmul.f32 %v3184_v31, %v3184_v31  ;;  %v1755_v14 = vmul.f32 %v3211_v40, %v3211_v40 }
 0x17a   : > { %v1853_v15 = vadd.f32 %v1852_v49, %v1851_v17  ;;  %v1872_v11 = vsel %vm302_vm1, %v1752_v19, 0.0  ;;  %v1874_v24 = vsel %vm302_vm1, %v1753_v58, 0.0  ;;  %v1675_v48 = vsel %vm302_vm1, %v3184_v31, 0.0 }
 0x17b   : > { %v1656_v38 = vadd.f32 %v1655_v23, %v1654_v8  ;;  %v1677_v52 = vsel %vm302_vm1, %v3211_v40, 0.0  ;;  %v1878_v16 = vsel %vm302_vm1, %v1755_v14, 0.0  ;;  %v1756_v8 = vmul.f32 %v3236_v29, %v3236_v29 }
 0x17c   : > { %v1855_v25 = vadd.f32 %v1854_v20, %v1853_v15  ;;  %v1876_v20 = vsel %vm302_vm1, %v1754_v7, 0.0  ;;  %v1757_v23 = vmul.f32 %v3207_v60, %v3207_v60  ;;  %v1679_v31 = vsel %vm302_vm1, %v3236_v29, 0.0 }
 0x17d   : > { %v1658_v3 = vadd.f32 %v1657_v54, %v1656_v38  ;;  %v1681_v40 = vsel %vm302_vm1, %v3207_v60, 0.0  ;;  %v1758_v54 = vmul.f32 %v3225_v50, %v3225_v50  ;;  %v1880_v2 = vsel %vm302_vm1, %v1756_v8, 0.0 }
 0x17e   : > { %v1857_v32 = vadd.f32 %v1856_v37, %v1855_v25 }
 0x17f   : > { %v1660_v5 = vadd.f32 %v1659_v39, %v1658_v3  ;;  %v1882_v3 = vsel %vm302_vm1, %v1757_v23, 0.0  ;;  %v1884_v29 = vsel %vm302_vm1, %v1758_v54, 0.0 }
 0x180   : > { %v1859_v55 = vadd.f32 %v1858_v61, %v1857_v32  ;;  %v1683_v32 = vsel %vm302_vm1, %v3225_v50, 0.0 }
 0x181   : > { %v1662_v12 = vadd.f32 %v1661_v46, %v1660_v5 }
 0x182   : > { %v1861_v26 = vadd.f32 %v1860_v42, %v1859_v55 }
 0x183   : > { %v1664_v4 = vadd.f32 %v1663_v45, %v1662_v12  ;;  %v1557_v45 = vld [vmem:[%s3356_s3] sm:$0x1] }
 0x184   : > { %v1863_v28 = vadd.f32 %v1862_v63, %v1861_v26 }
 0x185   : > { %v1666_v44 = vadd.f32 %v1665_v13, %v1664_v4  ;;  %v1694_v4 = vld [vmem:[%s3357_s4] sm:$0x1] }
 0x186   : > { %v1865_v10 = vadd.f32 %v1864_v35, %v1863_v28 }
 0x187   : > { %v1668_v6 = vadd.f32 %v1667_v41, %v1666_v44 }
 0x188   : > { %v1867_v43 = vadd.f32 %v1866_v30, %v1865_v10 }
 0x189   : > { %v1670_v9 = vadd.f32 %v1669_v18, %v1668_v6 }
 0x18a   : > { %v1869_v33 = vadd.f32 %v1868_v56, %v1867_v43 }
 0x18b   : > { %v1672_v57 = vadd.f32 %v1671_v34, %v1670_v9 }
 0x18c   : > { %v1871_v47 = vadd.f32 %v1870_v0, %v1869_v33 }
 0x18d   : > { %v1674_v59 = vadd.f32 %v1673_v51, %v1672_v57 }
 0x18e   : > { %v1873_v17 = vadd.f32 %v1872_v11, %v1871_v47 }
 0x18f   : > { %v1676_v22 = vadd.f32 %v1675_v48, %v1674_v59 }
 0x190   : > { %v1875_v49 = vadd.f32 %v1874_v24, %v1873_v17 }
 0x191   : > { %v1678_v15 = vadd.f32 %v1677_v52, %v1676_v22 }
 0x192   : > { %v1877_v21 = vadd.f32 %v1876_v20, %v1875_v49 }
 0x193   : > { %v1680_v38 = vadd.f32 %v1679_v31, %v1678_v15 }
 0x194   : > { %v1879_v25 = vadd.f32 %v1878_v16, %v1877_v21 }
 0x195   : > { %v1682_v37 = vadd.f32 %v1681_v40, %v1680_v38 }
 0x196   : > { %v1881_v1 = vadd.f32 %v1880_v2, %v1879_v25 }
 0x197   : > { %v1684_v61 = vadd.f32 %v1683_v32, %v1682_v37 }
 0x198   : > { %v1883_v39 = vadd.f32 %v1882_v3, %v1881_v1 }
 0x199   : > { %v1685_v46 = vrot.slane %v1684_v61, 4 }
 0x19a   : > { %v1885_v55 = vadd.f32 %v1884_v29, %v1883_v39 }
 0x19b   : > { %v1686_v5 = vadd.f32 %v1685_v46, %v1684_v61 }
 0x19c   : > { %v1886_v60 = vrot.slane %v1885_v55, 4 }
 0x19d   : > { %v1687_v42 = vrot.slane %v1686_v5, 2 }
 0x19e   : > { %v1887_v63 = vadd.f32 %v1886_v60, %v1885_v55 }
 0x19f   : > { %v1688_v62 = vadd.f32 %v1687_v42, %v1686_v5 }
 0x1a0   : > { %v1888_v12 = vrot.slane %v1887_v63, 2 }
 0x1a1   : > { %v1689_v26 = vrot.slane %v1688_v62, 1 }
 0x1a2   : > { %v1889_v27 = vadd.f32 %v1888_v12, %v1887_v63 }
 0x1a3   : > { %v1690_v28 = vadd.f32 %v1689_v26, %v1688_v62 }
 0x1a4   : > { %v1890_v50 = vrot.slane %v1889_v27, 1 }
 0x1a5   : > { %v1691_v13 = vadd.f32 %v1690_v28, %v1557_v45 }
 0x1a6   : > { %v1891_v53 = vadd.f32 %v1890_v50, %v1889_v27 }
 0x1a7   : > { %1693 = vst.msk [vmem:[%s3356_s3] sm:$0x1] %vm1692_vm3, %v1691_v13 }
 0x1a8   : > { %v1892_v35 = vadd.f32 %v1891_v53, %v1694_v4 }
 0x1aa   : > { %1893 = vst.msk [vmem:[%s3357_s4] sm:$0x1] %vm1692_vm3, %v1892_v35 }
 0x1ab PF: > { %s15_s17 = sadd.s32 1, %s2429_s17   ;;  %s3358_s15 = smov %s2425_s16 }
 0x1ac   : > { %p12_p6 = scmp.ge.s32.totalorder %s15_s17, 6   ;;  %s3359_s16 = smov %s3361_s18 }
 0x1ae   :  { %14 = sbr.rel (!%p12_p6) target bundleno = 2 (0x2), region = 89 }

// kernel: tile.72
= control target key start
LH: loop header
LB: loop body
LE: loop exit
PB: predicated region body
PF: predicated region fallthrough
CT: control target
= control target key end

     0   :  { %s22_s0 = inlined_call_operand.vmem [shape: f32[16], index: 0, kind: input, shape index: {}]   ;;  %s23_s1 = inlined_call_operand.vmem [shape: f32[8,16], index: 1, kind: output, shape index: {}]  }
   0x1   :  { %v4_v0 = vld [vmem:[%s22_s0] ss:$0 sm:$0xff] }
   0x2   :  { %5 = vst [vmem:[%s23_s1] sm:$0xff] %v4_v0 }

// kernel: tile.73
= control target key start
LH: loop header
LB: loop body
LE: loop exit
PB: predicated region body
PF: predicated region fallthrough
CT: control target
= control target key end

     0   :  { %s67_s10 = smov 112   ;;  %s68_s11 = smov 80   ;;  %vm3_vm0 = vcmask 130048   ;;  %vm9_vm1 = vcmask 1048448   ;;  %vm15_vm2 = vcmask 917248   ;;  %vm21_vm3 = vcmask 786048   ;;  %s111_s0 = inlined_call_operand.vmem [shape: f32[8,16], index: 0, kind: input, shape index: {}]   ;;  %s112_s1 = inlined_call_operand.vmem [shape: f32[1,128], index: 1, kind: output, shape index: {}]  }
   0x1   :  { %v53_v0 = vld [vmem:[%s111_s0 + $0x7] sm:$0x1]   ;;  %v55_v1 = vld [vmem:[%s111_s0 + $0x5] sm:$0x1]   ;;  %v54_v2 = vld [vmem:[%s111_s0 + $0x6] sm:$0x1]  }
   0x2   :  { %7 = vrot.lane.b32.xlu0 %v53_v0, %s67_s10  ;;  %19 = vrot.lane.b32.xlu1 %v55_v1, %s68_s11  ;;  %v56_v3 = vld [vmem:[%s111_s0 + $0x4] sm:$0x1]   ;;  %v2_v4 = vld [vmem:[%s111_s0] sm:$0x1]   ;;  %s69_s18 = smov 96   ;;  %s70_s19 = smov 64  }
   0x3   :  { %4 = vst.msk [vmem:[#allocation0] sm:$0x1] %vm3_vm0, %v2_v4   ;;  %v57_v5 = vld [vmem:[%s111_s0 + $0x3] sm:$0x1]   ;;  %v58_v6 = vld [vmem:[%s111_s0 + $0x2] sm:$0x1]  }
   0x4   :  { %s71_s24 = smov 48   ;;  %s72_s25 = smov 32   ;;  %v59_v7 = vld [vmem:[%s111_s0 + $0x1] sm:$0x1]   ;;  %vm27_vm4 = vcmask 654848   ;;  %vm33_vm5 = vcmask 523648  }
   0x5   :  { %s73_s0 = smov 16   ;;  %vm39_vm6 = vcmask 392448   ;;  %vm45_vm7 = vcmask 261248  }
   0x6   :  { %13 = vrot.lane.b32.xlu0 %v54_v2, %s69_s18  ;;  %25 = vrot.lane.b32.xlu1 %v56_v3, %s70_s19 }
   0xa   :  { %31 = vrot.lane.b32.xlu0 %v57_v5, %s71_s24  ;;  %37 = vrot.lane.b32.xlu1 %v58_v6, %s72_s25 }
   0xe   :  { %43 = vrot.lane.b32.xlu0 %v59_v7, %s73_s0 }
  0x74   :  { %v8_v8 = vpop.permute.xlu0 %7   ;;  %v20_v9 = vpop.permute.xlu1 %19  }
  0x75   :  { %10 = vst.msk [vmem:[#allocation0] sm:$0x1] %vm9_vm1, %v8_v8  }
  0x78   :  { %v14_v10 = vpop.permute.xlu0 %13   ;;  %v26_v11 = vpop.permute.xlu1 %25  }
  0x79   :  { %16 = vst.msk [vmem:[#allocation0] sm:$0x1] %vm15_vm2, %v14_v10  }
  0x7a   :  { %22 = vst.msk [vmem:[#allocation0] sm:$0x1] %vm21_vm3, %v20_v9  }
  0x7b   :  { %28 = vst.msk [vmem:[#allocation0] sm:$0x1] %vm27_vm4, %v26_v11  }
  0x7c   :  { %v32_v12 = vpop.permute.xlu0 %31   ;;  %v38_v13 = vpop.permute.xlu1 %37  }
  0x7d   :  { %34 = vst.msk [vmem:[#allocation0] sm:$0x1] %vm33_vm5, %v32_v12  }
  0x7e   :  { %40 = vst.msk [vmem:[#allocation0] sm:$0x1] %vm39_vm6, %v38_v13  }
  0x80   :  { %v44_v14 = vpop.permute.xlu0 %43  }
  0x81   :  { %46 = vst.msk [vmem:[#allocation0] sm:$0x1] %vm45_vm7, %v44_v14  }
  0x88   :  { %v50_v15 = vld [vmem:[#allocation0] sm:$0x1] }
  0x89   :  { %52 = vst [vmem:[%s112_s1] sm:$0x1] %v50_v15 }

// kernel: netg_forward.18
= control target key start
LH: loop header
LB: loop body
LE: loop exit
PB: predicated region body
PF: predicated region fallthrough
CT: control target
= control target key end

     0   :  { %s782_s0 = inlined_call_operand.vmem [shape: bf16[256,128], index: 0, kind: input, shape index: {}]   ;;  %s783_s1 = inlined_call_operand.vmem [shape: f32[1,128], index: 1, kind: input, shape index: {}]   ;;  %s784_s2 = inlined_call_operand.vmem [shape: f32[1,128], index: 2, kind: input, shape index: {}]   ;;  %s785_s3 = inlined_call_operand.vmem [shape: bf16[256,128], index: 3, kind: output, shape index: {}]  }
   0x1   :  { %v419_v0 = vld [vmem:[%s782_s0] sm:$0xff]   ;;  %v562_v4 = vld [vmem:[%s782_s0 + $0x8] sm:$0xff]   ;;  %v563_v5 = vld [vmem:[%s782_s0 + $0x10] sm:$0xff]  }
   0x2   :  { %v618_v1 = vld [vmem:[%s783_s1] ss:$0 sm:$0xff]  ;;  %v420_v2 = vunpack.c.l.bf16 %v419_v0  ;;  %v421_v3 = vunpack.c.h.bf16 %v419_v0  ;;  %v564_v6 = vld [vmem:[%s782_s0 + $0x18] sm:$0xff]   ;;  %v424_v8 = vunpack.c.l.bf16 %v562_v4  ;;  %v425_v9 = vunpack.c.h.bf16 %v562_v4  ;;  %v566_v33 = vld [vmem:[%s782_s0 + $0x28] sm:$0xff]  }
   0x3   :  { %v632_v7 = vld [vmem:[%s784_s2] ss:$0 sm:$0xff]  ;;  %v428_v10 = vunpack.c.l.bf16 %v563_v5  ;;  %v429_v11 = vunpack.c.h.bf16 %v563_v5  ;;  %v432_v14 = vunpack.c.l.bf16 %v564_v6  ;;  %v433_v15 = vunpack.c.h.bf16 %v564_v6  ;;  %v567_v38 = vld [vmem:[%s782_s0 + $0x30] sm:$0xff]   ;;  %v568_v43 = vld [vmem:[%s782_s0 + $0x38] sm:$0xff]  }
   0x4   :  { %v85_v12 = vmul.f32 %v420_v2, %v618_v1  ;;  %v86_v13 = vmul.f32 %v421_v3, %v618_v1  ;;  %v87_v16 = vmul.f32 %v424_v8, %v618_v1  ;;  %v88_v17 = vmul.f32 %v425_v9, %v618_v1  ;;  %v565_v28 = vld [vmem:[%s782_s0 + $0x20] sm:$0xff]  }
   0x5   :  { %v89_v18 = vmul.f32 %v428_v10, %v618_v1  ;;  %v90_v19 = vmul.f32 %v429_v11, %v618_v1  ;;  %v91_v22 = vmul.f32 %v432_v14, %v618_v1  ;;  %v92_v23 = vmul.f32 %v433_v15, %v618_v1  ;;  %v569_v0 = vld [vmem:[%s782_s0 + $0x40] sm:$0xff]   ;;  %v570_v11 = vld [vmem:[%s782_s0 + $0x48] sm:$0xff]  }
   0x6   :  { %v124_v20 = vadd.f32 %v632_v7, %v85_v12  ;;  %v125_v21 = vadd.f32 %v632_v7, %v86_v13  ;;  %v126_v24 = vadd.f32 %v632_v7, %v87_v16  ;;  %v127_v25 = vadd.f32 %v632_v7, %v88_v17  ;;  %v571_v16 = vld [vmem:[%s782_s0 + $0x50] sm:$0xff]  }
   0x7   :  { %v128_v26 = vadd.f32 %v632_v7, %v89_v18  ;;  %v129_v27 = vadd.f32 %v632_v7, %v90_v19  ;;  %v130_v31 = vadd.f32 %v632_v7, %v91_v22  ;;  %v131_v32 = vadd.f32 %v632_v7, %v92_v23 }
   0x8   :  { %v156_v29 = vmax.f32 %v124_v20, 0.0  ;;  %v157_v30 = vmax.f32 %v125_v21, 0.0  ;;  %v158_v34 = vmax.f32 %v126_v24, 0.0  ;;  %v159_v35 = vmax.f32 %v127_v25, 0.0  ;;  %v572_v25 = vld [vmem:[%s782_s0 + $0x58] sm:$0xff]  }
   0x9   :  { %v160_v36 = vmax.f32 %v128_v26, 0.0  ;;  %v161_v37 = vmax.f32 %v129_v27, 0.0  ;;  %v162_v40 = vmax.f32 %v130_v31, 0.0  ;;  %v163_v41 = vmax.f32 %v131_v32, 0.0 }
   0xa   :  { %v485_v39 = vpack.c.bf16 %v157_v30, %v156_v29  ;;  %v436_v42 = vunpack.c.l.bf16 %v565_v28  ;;  %v490_v44 = vpack.c.bf16 %v159_v35, %v158_v34  ;;  %v437_v46 = vunpack.c.h.bf16 %v565_v28 }
   0xb   :  { %v495_v45 = vpack.c.bf16 %v161_v37, %v160_v36  ;;  %v440_v47 = vunpack.c.l.bf16 %v566_v33  ;;  %v500_v48 = vpack.c.bf16 %v163_v41, %v162_v40  ;;  %v441_v50 = vunpack.c.h.bf16 %v566_v33 }
   0xc   :  { %486 = vst [vmem:[%s785_s3] sm:$0xff] %v485_v39   ;;  %v93_v49 = vmul.f32 %v436_v42, %v618_v1  ;;  %v444_v51 = vunpack.c.l.bf16 %v567_v38  ;;  %577 = vst [vmem:[%s785_s3 + $0x8] sm:$0xff] %v490_v44   ;;  %v94_v52 = vmul.f32 %v437_v46, %v618_v1  ;;  %v445_v54 = vunpack.c.h.bf16 %v567_v38  ;;  %v573_v38 = vld [vmem:[%s782_s0 + $0x60] sm:$0xff]  }
   0xd   :  { %578 = vst [vmem:[%s785_s3 + $0x10] sm:$0xff] %v495_v45   ;;  %v95_v53 = vmul.f32 %v440_v47, %v618_v1  ;;  %v448_v55 = vunpack.c.l.bf16 %v568_v43  ;;  %579 = vst [vmem:[%s785_s3 + $0x18] sm:$0xff] %v500_v48   ;;  %v96_v57 = vmul.f32 %v441_v50, %v618_v1  ;;  %v449_v59 = vunpack.c.h.bf16 %v568_v43 }
   0xe   :  { %v132_v56 = vadd.f32 %v632_v7, %v93_v49  ;;  %v97_v58 = vmul.f32 %v444_v51, %v618_v1  ;;  %v133_v60 = vadd.f32 %v632_v7, %v94_v52  ;;  %v98_v62 = vmul.f32 %v445_v54, %v618_v1  ;;  %v574_v51 = vld [vmem:[%s782_s0 + $0x68] sm:$0xff]  }
   0xf   :  { %v134_v61 = vadd.f32 %v632_v7, %v95_v53  ;;  %v99_v63 = vmul.f32 %v448_v55, %v618_v1  ;;  %v135_v3 = vadd.f32 %v632_v7, %v96_v57  ;;  %v100_v5 = vmul.f32 %v449_v59, %v618_v1 }
  0x10   :  { %v164_v2 = vmax.f32 %v132_v56, 0.0  ;;  %v136_v4 = vadd.f32 %v632_v7, %v97_v58  ;;  %v165_v6 = vmax.f32 %v133_v60, 0.0  ;;  %v137_v9 = vadd.f32 %v632_v7, %v98_v62  ;;  %v575_v60 = vld [vmem:[%s782_s0 + $0x70] sm:$0xff]  }
  0x11   :  { %v166_v8 = vmax.f32 %v134_v61, 0.0  ;;  %v138_v10 = vadd.f32 %v632_v7, %v99_v63  ;;  %v167_v12 = vmax.f32 %v135_v3, 0.0  ;;  %v139_v14 = vadd.f32 %v632_v7, %v100_v5 }
  0x12   :  { %v168_v13 = vmax.f32 %v136_v4, 0.0  ;;  %v452_v15 = vunpack.c.l.bf16 %v569_v0  ;;  %v505_v17 = vpack.c.bf16 %v165_v6, %v164_v2  ;;  %v169_v18 = vmax.f32 %v137_v9, 0.0  ;;  %v576_v2 = vld [vmem:[%s782_s0 + $0x78] sm:$0xff]  }
  0x13   :  { %v170_v19 = vmax.f32 %v138_v10, 0.0  ;;  %v453_v20 = vunpack.c.h.bf16 %v569_v0  ;;  %v510_v21 = vpack.c.bf16 %v167_v12, %v166_v8  ;;  %v171_v22 = vmax.f32 %v139_v14, 0.0 }
  0x14   :  { %v101_v23 = vmul.f32 %v452_v15, %v618_v1  ;;  %v456_v24 = vunpack.c.l.bf16 %v570_v11  ;;  %580 = vst [vmem:[%s785_s3 + $0x20] sm:$0xff] %v505_v17   ;;  %v515_v26 = vpack.c.bf16 %v169_v18, %v168_v13  ;;  %v457_v28 = vunpack.c.h.bf16 %v570_v11 }
  0x15   :  { %v102_v27 = vmul.f32 %v453_v20, %v618_v1  ;;  %v460_v29 = vunpack.c.l.bf16 %v571_v16  ;;  %581 = vst [vmem:[%s785_s3 + $0x28] sm:$0xff] %v510_v21   ;;  %v520_v30 = vpack.c.bf16 %v171_v22, %v170_v19  ;;  %v461_v33 = vunpack.c.h.bf16 %v571_v16 }
  0x16   :  { %v140_v31 = vadd.f32 %v632_v7, %v101_v23  ;;  %v103_v32 = vmul.f32 %v456_v24, %v618_v1  ;;  %582 = vst [vmem:[%s785_s3 + $0x30] sm:$0xff] %v515_v26   ;;  %v104_v35 = vmul.f32 %v457_v28, %v618_v1  ;;  %v464_v37 = vunpack.c.l.bf16 %v572_v25 }
  0x17   :  { %v141_v34 = vadd.f32 %v632_v7, %v102_v27  ;;  %v105_v36 = vmul.f32 %v460_v29, %v618_v1  ;;  %583 = vst [vmem:[%s785_s3 + $0x38] sm:$0xff] %v520_v30   ;;  %v106_v41 = vmul.f32 %v461_v33, %v618_v1  ;;  %v465_v42 = vunpack.c.h.bf16 %v572_v25 }
  0x18   :  { %v172_v39 = vmax.f32 %v140_v31, 0.0  ;;  %v142_v40 = vadd.f32 %v632_v7, %v103_v32  ;;  %v143_v44 = vadd.f32 %v632_v7, %v104_v35  ;;  %v107_v46 = vmul.f32 %v464_v37, %v618_v1 }
  0x19   :  { %v173_v43 = vmax.f32 %v141_v34, 0.0  ;;  %v144_v45 = vadd.f32 %v632_v7, %v105_v36  ;;  %v145_v48 = vadd.f32 %v632_v7, %v106_v41  ;;  %v108_v49 = vmul.f32 %v465_v42, %v618_v1 }
  0x1a   :  { %v174_v47 = vmax.f32 %v142_v40, 0.0  ;;  %v468_v50 = vunpack.c.l.bf16 %v573_v38  ;;  %v175_v53 = vmax.f32 %v143_v44, 0.0  ;;  %v146_v55 = vadd.f32 %v632_v7, %v107_v46 }
  0x1b   :  { %v525_v52 = vpack.c.bf16 %v173_v43, %v172_v39  ;;  %v176_v54 = vmax.f32 %v144_v45, 0.0  ;;  %v177_v56 = vmax.f32 %v145_v48, 0.0  ;;  %v147_v57 = vadd.f32 %v632_v7, %v108_v49 }
  0x1c   :  { %v469_v58 = vunpack.c.h.bf16 %v573_v38  ;;  %v109_v59 = vmul.f32 %v468_v50, %v618_v1  ;;  %v530_v61 = vpack.c.bf16 %v175_v53, %v174_v47  ;;  %v178_v62 = vmax.f32 %v146_v55, 0.0 }
  0x1d   :  { %584 = vst [vmem:[%s785_s3 + $0x40] sm:$0xff] %v525_v52   ;;  %v472_v63 = vunpack.c.l.bf16 %v574_v51  ;;  %v473_v0 = vunpack.c.h.bf16 %v574_v51  ;;  %v535_v3 = vpack.c.bf16 %v177_v56, %v176_v54  ;;  %v179_v4 = vmax.f32 %v147_v57, 0.0 }
  0x1e   :  { %v110_v5 = vmul.f32 %v469_v58, %v618_v1  ;;  %v148_v6 = vadd.f32 %v632_v7, %v109_v59  ;;  %585 = vst [vmem:[%s785_s3 + $0x48] sm:$0xff] %v530_v61   ;;  %v476_v10 = vunpack.c.l.bf16 %v575_v60  ;;  %v477_v11 = vunpack.c.h.bf16 %v575_v60 }
  0x1f   :  { %v111_v8 = vmul.f32 %v472_v63, %v618_v1  ;;  %v112_v9 = vmul.f32 %v473_v0, %v618_v1  ;;  %586 = vst [vmem:[%s785_s3 + $0x50] sm:$0xff] %v535_v3   ;;  %v540_v12 = vpack.c.bf16 %v179_v4, %v178_v62  ;;  %v480_v15 = vunpack.c.l.bf16 %v576_v2 }
  0x20   :  { %v149_v13 = vadd.f32 %v632_v7, %v110_v5  ;;  %v180_v14 = vmax.f32 %v148_v6, 0.0  ;;  %v113_v18 = vmul.f32 %v476_v10, %v618_v1  ;;  %v114_v19 = vmul.f32 %v477_v11, %v618_v1 }
  0x21   :  { %v150_v16 = vadd.f32 %v632_v7, %v111_v8  ;;  %v151_v17 = vadd.f32 %v632_v7, %v112_v9  ;;  %587 = vst [vmem:[%s785_s3 + $0x58] sm:$0xff] %v540_v12   ;;  %v481_v21 = vunpack.c.h.bf16 %v576_v2  ;;  %v115_v22 = vmul.f32 %v480_v15, %v618_v1 }
  0x22   :  { %v181_v20 = vmax.f32 %v149_v13, 0.0  ;;  %v152_v25 = vadd.f32 %v632_v7, %v113_v18  ;;  %v153_v26 = vadd.f32 %v632_v7, %v114_v19 }
  0x23   :  { %v182_v23 = vmax.f32 %v150_v16, 0.0  ;;  %v183_v24 = vmax.f32 %v151_v17, 0.0  ;;  %v116_v28 = vmul.f32 %v481_v21, %v618_v1  ;;  %v154_v29 = vadd.f32 %v632_v7, %v115_v22 }
  0x24   :  { %v545_v27 = vpack.c.bf16 %v181_v20, %v180_v14  ;;  %v184_v31 = vmax.f32 %v152_v25, 0.0  ;;  %v185_v32 = vmax.f32 %v153_v26, 0.0 }
  0x25   :  { %v550_v30 = vpack.c.bf16 %v183_v24, %v182_v23  ;;  %v155_v33 = vadd.f32 %v632_v7, %v116_v28  ;;  %v186_v34 = vmax.f32 %v154_v29, 0.0 }
  0x26   :  { %588 = vst [vmem:[%s785_s3 + $0x60] sm:$0xff] %v545_v27   ;;  %v555_v35 = vpack.c.bf16 %v185_v32, %v184_v31 }
  0x27   :  { %589 = vst [vmem:[%s785_s3 + $0x68] sm:$0xff] %v550_v30   ;;  %v187_v36 = vmax.f32 %v155_v33, 0.0 }
  0x28   :  { %590 = vst [vmem:[%s785_s3 + $0x70] sm:$0xff] %v555_v35  }
  0x29   :  { %v560_v1 = vpack.c.bf16 %v187_v36, %v186_v34 }
  0x2b   :  { %591 = vst [vmem:[%s785_s3 + $0x78] sm:$0xff] %v560_v1  }

// kernel: netg_forward.19
= control target key start
LH: loop header
LB: loop body
LE: loop exit
PB: predicated region body
PF: predicated region fallthrough
CT: control target
= control target key end

     0   :  { %s2527_s15 = smov 0   ;;  %s2529_s16 = smov 0   ;;  %s3480_s0 = inlined_call_operand.vmem [shape: bf16[4,2048,64], index: 0, kind: input, shape index: {}]   ;;  %s3481_s1 = inlined_call_operand.vmem [shape: bf16[4,64,8], index: 1, kind: input, shape index: {}]   ;;  %s3482_s2 = inlined_call_operand.vmem [shape: bf16[4,2048,8], index: 2, kind: output, shape index: {0}]   ;;  %s3483_s3 = inlined_call_operand.vmem [shape: f32[1,8], index: 3, kind: output, shape index: {1}]   ;;  %s3484_s4 = inlined_call_operand.vmem [shape: f32[1,8], index: 4, kind: output, shape index: {2}]  }
   0x1   :  { %s2531_s17 = smov 0   ;;  %s2533_s18 = smov 0  }
   0x2   :  { %s2535_s19 = smov 0  }
   0x3 LB: > { %s30_s20 = sadd.s32 1, %s2490_s17  ;;  %s34_s21 = sadd.s32 1, %s2494_s18  ;;  %s2498_s19 = sphi %s2535_s19, %s15_s19   ;;  %s2494_s18 = sphi %s2533_s18, %s3488_s18   ;;  %s2490_s17 = sphi %s2531_s17, %s3487_s17   ;;  %s2486_s16 = sphi %s2529_s16, %s3486_s16   ;;  %s2482_s15 = sphi %s2527_s15, %s3485_s15  }
   0x4   : > { %p32_p0 = scmp.ge.s32.totalorder %s30_s20, 4  ;;  %p2057_p1 = scmp.ge.s32.totalorder %s2498_s19, 1 }
   0x5   : > { %p207_p2 = scmp.lt.s32.totalorder %s2498_s19, 17 }
   0x6   : > { %s3490_s20 = smov (%p32_p0, %s30_s20), 0  ;;  %s3492_s21 = smov (!%p32_p0, %s34_s21), %s2494_s18 }
   0x7   : > { %p208_p3 = pnand %p2057_p1, %p207_p2  ;;  %p36_p4 = scmp.ge.s32.totalorder %s3492_s21, 4 }
   0x8   : > { %s2058_s22 = sshll.u32 (!%p208_p3), %s2482_s15, 6  ;;  %p254_p5 = scmp.lt.s32.totalorder (!%p208_p3), %s2486_s16, 3 }
   0x9   : > { %s3494_s21 = smov (%p36_p4, %s3492_s21), 0  ;;  %211 = sbr.rel (%p208_p3) target bundleno = 416 (0x1a0), region = 28 }
   0xa   : > { %p256_p6 = scmp.lt.s32.totalorder (!%p208_p3), %s2058_s22, 255  ;;  %p287_p7 = scmp.eq.s32.totalorder (!%p208_p3), %s2486_s16, 0 }
   0xb   : > { %p288_p8 = scmp.eq.s32.totalorder (!%p208_p3), %s2482_s15, 0 }
   0xd   : > { %p289_p9 = pnand (!%p208_p3), %p288_p8, %p287_p7 }
  0x10   : > { %s3496_s16 = smov (!%p254_p5, %s2486_s16), 3  ;;  %s3498_s22 = smov (!%p256_p6, %s2058_s22), 255 }
  0x11   : > { %s2059_s23 = sshll.u32 %s3496_s16, 8  ;;  %s2201_s24 = sshll.u32 %s3496_s16, 5  ;;  %vm296_vm0 = vcmask (!%p289_p9), 57344   ;;  %v2500_v0 = vmov (!%p289_p9), 0.0  }
  0x12   : > { %s262_s25 = sadd.s32 %s2059_s23, %s3498_s22  ;;  %s2568_s28 = scalar_lea.vmem %s3481_s1, %s2201_s24  ;;  %297 = vst.msk [vmem:[%s3483_s3] sm:$0x1] (!%p289_p9), %vm296_vm0, %v2500_v0  ;;  %298 = vst.msk [vmem:[%s3484_s4] sm:$0x1] (!%p289_p9), %vm296_vm0, %v2500_v0 }
  0x13   : > { %s2060_s29 = sshll.u32 %s262_s25, 2  ;;  %295 = sbr.rel (%p289_p9) target bundleno = 26 (0x1a), region = 32 }
  0x14   : > { %s2574_s6 = scalar_lea.vmem %s3480_s0, %s2060_s29  ;;  %s2579_s9 = scalar_lea.vmem %s3482_s2, %s2060_s29 }
  0x1a PF: > { %v2424_v1 = vld [vmem:[%s2568_s28] sm:$0xff]   ;;  %v2589_v2 = vld [vmem:[%s2568_s28 + $0x8] sm:$0xff]   ;;  %vm302_vm1 = vcmask 64512   ;;  %v2592_v3 = vld [vmem:[%s2568_s28 + $0x10] sm:$0xff]   ;;  %vm687_vm2 = vcmask 523264   ;;  %v2501_v4 = vmov 0.0  }
  0x1b   : > { %2302 = vmatprep.subr.bf16.mxu0 %v2424_v1  ;;  %2374 = vmatprep.subr.bf16.mxu1 %v2424_v1  ;;  %305 = vst.msk [vmem:[#allocation2 + $0x10] sm:$0xff] %vm302_vm1, %v2501_v4  ;;  %303 = vst.msk [vmem:[#allocation2] sm:$0xff] %vm302_vm1, %v2501_v4  ;;  %v2428_v5 = vld [vmem:[%s2574_s6] sm:$0xff]   ;;  %v2427_v6 = vld [vmem:[%s2568_s28 + $0x18] sm:$0xff]   ;;  %vm1525_vm3 = vcmask 60416   ;;  %vm1725_vm4 = vcmask 57344  }
  0x1c   : > { %2303 = vmatpush3.bf16.msra.mxu0 %v2424_v1  ;;  %2378 = vmatpush3.bf16.msra.mxu1 %v2424_v1  ;;  %304 = vst.msk [vmem:[#allocation2 + $0x8] sm:$0xff] %vm302_vm1, %v2501_v4  ;;  %306 = vst.msk [vmem:[#allocation2 + $0x18] sm:$0xff] %vm302_vm1, %v2501_v4  ;;  %v2429_v7 = vld [vmem:[%s2574_s6 + $0x8] sm:$0xff]   ;;  %v2430_v8 = vld [vmem:[%s2574_s6 + $0x10] sm:$0xff]  }
  0x1d   : > { %307 = vst.msk [vmem:[#allocation2 + $0x20] sm:$0xff] %vm302_vm1, %v2501_v4  ;;  %308 = vst.msk [vmem:[#allocation2 + $0x28] sm:$0xff] %vm302_vm1, %v2501_v4  ;;  %2304 = vmatprep.subr.bf16.mxu0 %v2589_v2  ;;  %2375 = vmatprep.subr.bf16.mxu1 %v2589_v2  ;;  %v2431_v9 = vld [vmem:[%s2574_s6 + $0x18] sm:$0xff]   ;;  %v2444_v10 = vld [vmem:[%s2574_s6 + $0x80] sm:$0xff]  }
  0x1e   : > { %309 = vst.msk [vmem:[#allocation2 + $0x30] sm:$0xff] %vm302_vm1, %v2501_v4  ;;  %310 = vst.msk [vmem:[#allocation2 + $0x38] sm:$0xff] %vm302_vm1, %v2501_v4  ;;  %2310 = vmatprep.mubr.msk.bf16.mxu0 %vm687_vm2, %v2428_v5  ;;  %v2445_v11 = vld [vmem:[%s2574_s6 + $0x88] sm:$0xff]   ;;  %2342 = vmatprep.mubr.msk.bf16.mxu1 %vm687_vm2, %v2444_v10  ;;  %v2446_v12 = vld [vmem:[%s2574_s6 + $0x90] sm:$0xff]  }
  0x1f   : > { %311 = vst.msk [vmem:[#allocation2 + $0x40] sm:$0xff] %vm302_vm1, %v2501_v4  ;;  %312 = vst.msk [vmem:[#allocation2 + $0x48] sm:$0xff] %vm302_vm1, %v2501_v4  ;;  %v2432_v13 = vld [vmem:[%s2574_s6 + $0x20] sm:$0xff]   ;;  %v2447_v14 = vld [vmem:[%s2574_s6 + $0x98] sm:$0xff]  }
  0x20   : > { %313 = vst.msk [vmem:[#allocation2 + $0x50] sm:$0xff] %vm302_vm1, %v2501_v4  ;;  %314 = vst.msk [vmem:[#allocation2 + $0x58] sm:$0xff] %vm302_vm1, %v2501_v4  ;;  %2305 = vmatpush3.bf16.msra.mxu0 %v2589_v2  ;;  %2379 = vmatpush3.bf16.msra.mxu1 %v2589_v2  ;;  %v2448_v15 = vld [vmem:[%s2574_s6 + $0xa0] sm:$0xff]   ;;  %v2433_v16 = vld [vmem:[%s2574_s6 + $0x28] sm:$0xff]  }
  0x21   : > { %315 = vst.msk [vmem:[#allocation2 + $0x60] sm:$0xff] %vm302_vm1, %v2501_v4  ;;  %316 = vst.msk [vmem:[#allocation2 + $0x68] sm:$0xff] %vm302_vm1, %v2501_v4  ;;  %2306 = vmatprep.subr.bf16.mxu0 %v2592_v3  ;;  %2376 = vmatprep.subr.bf16.mxu1 %v2592_v3  ;;  %v2434_v17 = vld [vmem:[%s2574_s6 + $0x30] sm:$0xff]   ;;  %v2449_v18 = vld [vmem:[%s2574_s6 + $0xa8] sm:$0xff]  }
  0x22   : > { %317 = vst.msk [vmem:[#allocation2 + $0x70] sm:$0xff] %vm302_vm1, %v2501_v4  ;;  %318 = vst.msk [vmem:[#allocation2 + $0x78] sm:$0xff] %vm302_vm1, %v2501_v4  ;;  %v2450_v19 = vld [vmem:[%s2574_s6 + $0xb0] sm:$0xff]   ;;  %v2435_v20 = vld [vmem:[%s2574_s6 + $0x38] sm:$0xff]  }
  0x23   : > { %319 = vst.msk [vmem:[#allocation2 + $0x80] sm:$0xff] %vm302_vm1, %v2501_v4  ;;  %320 = vst.msk [vmem:[#allocation2 + $0x88] sm:$0xff] %vm302_vm1, %v2501_v4  ;;  %v2436_v21 = vld [vmem:[%s2574_s6 + $0x40] sm:$0xff]   ;;  %v2451_v22 = vld [vmem:[%s2574_s6 + $0xb8] sm:$0xff]  }
  0x24   : > { %321 = vst.msk [vmem:[#allocation2 + $0x90] sm:$0xff] %vm302_vm1, %v2501_v4  ;;  %322 = vst.msk [vmem:[#allocation2 + $0x98] sm:$0xff] %vm302_vm1, %v2501_v4  ;;  %2307 = vmatpush3.bf16.msra.mxu0 %v2592_v3  ;;  %2380 = vmatpush3.bf16.msra.mxu1 %v2592_v3  ;;  %v2452_v23 = vld [vmem:[%s2574_s6 + $0xc0] sm:$0xff]   ;;  %v2437_v24 = vld [vmem:[%s2574_s6 + $0x48] sm:$0xff]  }
  0x25   : > { %323 = vst.msk [vmem:[#allocation2 + $0xa0] sm:$0xff] %vm302_vm1, %v2501_v4  ;;  %324 = vst.msk [vmem:[#allocation2 + $0xa8] sm:$0xff] %vm302_vm1, %v2501_v4  ;;  %2308 = vmatprep.subr.bf16.mxu0 %v2427_v6  ;;  %2377 = vmatprep.subr.bf16.mxu1 %v2427_v6  ;;  %v2438_v25 = vld [vmem:[%s2574_s6 + $0x50] sm:$0xff]   ;;  %v2453_v26 = vld [vmem:[%s2574_s6 + $0xc8] sm:$0xff]  }
  0x26   : > { %325 = vst.msk [vmem:[#allocation2 + $0xb0] sm:$0xff] %vm302_vm1, %v2501_v4  ;;  %326 = vst.msk [vmem:[#allocation2 + $0xb8] sm:$0xff] %vm302_vm1, %v2501_v4  ;;  %v2454_v27 = vld [vmem:[%s2574_s6 + $0xd0] sm:$0xff]   ;;  %v2439_v28 = vld [vmem:[%s2574_s6 + $0x58] sm:$0xff]  }
  0x27   : > { %327 = vst.msk [vmem:[#allocation2 + $0xc0] sm:$0xff] %vm302_vm1, %v2501_v4  ;;  %328 = vst.msk [vmem:[#allocation2 + $0xc8] sm:$0xff] %vm302_vm1, %v2501_v4  ;;  %v2440_v29 = vld [vmem:[%s2574_s6 + $0x60] sm:$0xff]   ;;  %v2455_v30 = vld [vmem:[%s2574_s6 + $0xd8] sm:$0xff]  }
  0x28   : > { %329 = vst.msk [vmem:[#allocation2 + $0xd0] sm:$0xff] %vm302_vm1, %v2501_v4  ;;  %330 = vst.msk [vmem:[#allocation2 + $0xd8] sm:$0xff] %vm302_vm1, %v2501_v4  ;;  %2309 = vmatpush3.bf16.msra.mxu0 %v2427_v6  ;;  %2381 = vmatpush3.bf16.msra.mxu1 %v2427_v6  ;;  %v2456_v31 = vld [vmem:[%s2574_s6 + $0xe0] sm:$0xff]   ;;  %v2441_v32 = vld [vmem:[%s2574_s6 + $0x68] sm:$0xff]  }
  0x29   : > { %331 = vst.msk [vmem:[#allocation2 + $0xe0] sm:$0xff] %vm302_vm1, %v2501_v4  ;;  %332 = vst.msk [vmem:[#allocation2 + $0xe8] sm:$0xff] %vm302_vm1, %v2501_v4  ;;  %v2442_v33 = vld [vmem:[%s2574_s6 + $0x70] sm:$0xff]   ;;  %v2457_v34 = vld [vmem:[%s2574_s6 + $0xe8] sm:$0xff]  }
  0x2a   : > { %333 = vst.msk [vmem:[#allocation2 + $0xf0] sm:$0xff] %vm302_vm1, %v2501_v4  ;;  %334 = vst.msk [vmem:[#allocation2 + $0xf8] sm:$0xff] %vm302_vm1, %v2501_v4  ;;  %v2458_v35 = vld [vmem:[%s2574_s6 + $0xf0] sm:$0xff]   ;;  %v2443_v36 = vld [vmem:[%s2574_s6 + $0x78] sm:$0xff]  }
  0x2b   : > { %335 = vst.msk [vmem:[#allocation2 + $0x100] sm:$0xff] %vm302_vm1, %v2501_v4  ;;  %336 = vst.msk [vmem:[#allocation2 + $0x108] sm:$0xff] %vm302_vm1, %v2501_v4  ;;  %2311 = vmatmul.mubr.msk.bf16.vlgmr.msra.gmra.mrb[0].mxu0 %vm687_vm2, %v2429_v7  ;;  %2343 = vmatmul.mubr.msk.bf16.vlgmr.msra.gmra.mrb[0].mxu1 %vm687_vm2, %v2445_v11  ;;  %v2459_v37 = vld [vmem:[%s2574_s6 + $0xf8] sm:$0xff]   ;;  %v367_v39 = vld [vmem:[#allocation2] sm:$0xff] }
  0x2c   : > { %337 = vst.msk [vmem:[#allocation2 + $0x110] sm:$0xff] %vm302_vm1, %v2501_v4  ;;  %338 = vst.msk [vmem:[#allocation2 + $0x118] sm:$0xff] %vm302_vm1, %v2501_v4  ;;  %2314 = vmatprep.mubr.msk.bf16.mxu0 %vm687_vm2, %v2430_v8  ;;  %2346 = vmatprep.mubr.msk.bf16.mxu1 %vm687_vm2, %v2446_v12  ;;  %v369_v38 = vld [vmem:[#allocation2 + $0x10] sm:$0xff]  ;;  %v370_v41 = vld [vmem:[#allocation2 + $0x18] sm:$0xff] }
  0x2d   : > { %339 = vst.msk [vmem:[#allocation2 + $0x120] sm:$0xff] %vm302_vm1, %v2501_v4  ;;  %340 = vst.msk [vmem:[#allocation2 + $0x128] sm:$0xff] %vm302_vm1, %v2501_v4  ;;  %v368_v44 = vld [vmem:[#allocation2 + $0x8] sm:$0xff]  ;;  %v373_v54 = vld [vmem:[#allocation2 + $0x30] sm:$0xff] }
  0x2e   : > { %341 = vst.msk [vmem:[#allocation2 + $0x130] sm:$0xff] %vm302_vm1, %v2501_v4  ;;  %342 = vst.msk [vmem:[#allocation2 + $0x138] sm:$0xff] %vm302_vm1, %v2501_v4  ;;  %v371_v58 = vld [vmem:[#allocation2 + $0x20] sm:$0xff]  ;;  %v374_v62 = vld [vmem:[#allocation2 + $0x38] sm:$0xff] }
  0x2f   : > { %343 = vst.msk [vmem:[#allocation2 + $0x140] sm:$0xff] %vm302_vm1, %v2501_v4  ;;  %344 = vst.msk [vmem:[#allocation2 + $0x148] sm:$0xff] %vm302_vm1, %v2501_v4  ;;  %v372_v3 = vld [vmem:[#allocation2 + $0x28] sm:$0xff] }
  0x30   : > { %345 = vst.msk [vmem:[#allocation2 + $0x150] sm:$0xff] %vm302_vm1, %v2501_v4  ;;  %346 = vst.msk [vmem:[#allocation2 + $0x158] sm:$0xff] %vm302_vm1, %v2501_v4 }
  0x31   : > { %347 = vst.msk [vmem:[#allocation2 + $0x160] sm:$0xff] %vm302_vm1, %v2501_v4  ;;  %348 = vst.msk [vmem:[#allocation2 + $0x168] sm:$0xff] %vm302_vm1, %v2501_v4 }
  0x32   : > { %349 = vst.msk [vmem:[#allocation2 + $0x170] sm:$0xff] %vm302_vm1, %v2501_v4  ;;  %350 = vst.msk [vmem:[#allocation2 + $0x178] sm:$0xff] %vm302_vm1, %v2501_v4  ;;  %v399_v51 = vld [vmem:[#allocation2 + $0x100] sm:$0xff]  ;;  %v400_v57 = vld [vmem:[#allocation2 + $0x108] sm:$0xff] }
  0x33   : > { %351 = vst.msk [vmem:[#allocation2 + $0x180] sm:$0xff] %vm302_vm1, %v2501_v4  ;;  %352 = vst.msk [vmem:[#allocation2 + $0x188] sm:$0xff] %vm302_vm1, %v2501_v4  ;;  %2315 = vmatmul.mubr.msk.bf16.gmra.mrb[4].mxu0 %vm687_vm2, %v2431_v9  ;;  %2347 = vmatmul.mubr.msk.bf16.gmra.mrb[4].mxu1 %vm687_vm2, %v2447_v14  ;;  %v401_v49 = vld [vmem:[#allocation2 + $0x110] sm:$0xff]  ;;  %v402_v53 = vld [vmem:[#allocation2 + $0x118] sm:$0xff] }
  0x34   : > { %353 = vst.msk [vmem:[#allocation2 + $0x190] sm:$0xff] %vm302_vm1, %v2501_v4  ;;  %354 = vst.msk [vmem:[#allocation2 + $0x198] sm:$0xff] %vm302_vm1, %v2501_v4  ;;  %2318 = vmatprep.mubr.msk.bf16.mxu0 %vm687_vm2, %v2432_v13  ;;  %2350 = vmatprep.mubr.msk.bf16.mxu1 %vm687_vm2, %v2448_v15 }
  0x35   : > { %355 = vst.msk [vmem:[#allocation2 + $0x1a0] sm:$0xff] %vm302_vm1, %v2501_v4  ;;  %356 = vst.msk [vmem:[#allocation2 + $0x1a8] sm:$0xff] %vm302_vm1, %v2501_v4 }
  0x36   : > { %357 = vst.msk [vmem:[#allocation2 + $0x1b0] sm:$0xff] %vm302_vm1, %v2501_v4  ;;  %358 = vst.msk [vmem:[#allocation2 + $0x1b8] sm:$0xff] %vm302_vm1, %v2501_v4 }
  0x37   : > { %359 = vst.msk [vmem:[#allocation2 + $0x1c0] sm:$0xff] %vm302_vm1, %v2501_v4  ;;  %360 = vst.msk [vmem:[#allocation2 + $0x1c8] sm:$0xff] %vm302_vm1, %v2501_v4 }
  0x38   : > { %361 = vst.msk [vmem:[#allocation2 + $0x1d0] sm:$0xff] %vm302_vm1, %v2501_v4  ;;  %362 = vst.msk [vmem:[#allocation2 + $0x1d8] sm:$0xff] %vm302_vm1, %v2501_v4 }
  0x39   : > { %363 = vst.msk [vmem:[#allocation2 + $0x1e0] sm:$0xff] %vm302_vm1, %v2501_v4  ;;  %364 = vst.msk [vmem:[#allocation2 + $0x1e8] sm:$0xff] %vm302_vm1, %v2501_v4 }
  0x3a   : > { %365 = vst.msk [vmem:[#allocation2 + $0x1f0] sm:$0xff] %vm302_vm1, %v2501_v4  ;;  %366 = vst.msk [vmem:[#allocation2 + $0x1f8] sm:$0xff] %vm302_vm1, %v2501_v4 }
  0x3b   : > { %2319 = vmatmul.mubr.msk.bf16.gmra.mrb[8].mxu0 %vm687_vm2, %v2433_v16  ;;  %2351 = vmatmul.mubr.msk.bf16.gmra.mrb[8].mxu1 %vm687_vm2, %v2449_v18  ;;  %v405_v16 = vld [vmem:[#allocation2 + $0x130] sm:$0xff] }
  0x3c   : > { %2322 = vmatprep.mubr.msk.bf16.mxu0 %vm687_vm2, %v2434_v17  ;;  %2354 = vmatprep.mubr.msk.bf16.mxu1 %vm687_vm2, %v2450_v19  ;;  %v403_v17 = vld [vmem:[#allocation2 + $0x120] sm:$0xff] }
  0x43   : > { %2323 = vmatmul.mubr.msk.bf16.gmra.mrb[12].mxu0 %vm687_vm2, %v2435_v20  ;;  %2355 = vmatmul.mubr.msk.bf16.gmra.mrb[12].mxu1 %vm687_vm2, %v2451_v22 }
  0x44   : > { %2326 = vmatprep.mubr.msk.bf16.mxu0 %vm687_vm2, %v2436_v21  ;;  %2358 = vmatprep.mubr.msk.bf16.mxu1 %vm687_vm2, %v2452_v23 }
  0x4b   : > { %2327 = vmatmul.mubr.msk.bf16.gmra.mrb[16].mxu0 %vm687_vm2, %v2437_v24  ;;  %2359 = vmatmul.mubr.msk.bf16.gmra.mrb[16].mxu1 %vm687_vm2, %v2453_v26  ;;  %v377_v26 = vld [vmem:[#allocation2 + $0x50] sm:$0xff] }
  0x4c   : > { %2330 = vmatprep.mubr.msk.bf16.mxu0 %vm687_vm2, %v2438_v25  ;;  %2362 = vmatprep.mubr.msk.bf16.mxu1 %vm687_vm2, %v2454_v27 }
  0x53   : > { %2331 = vmatmul.mubr.msk.bf16.gmra.mrb[20].mxu0 %vm687_vm2, %v2439_v28  ;;  %2363 = vmatmul.mubr.msk.bf16.gmra.mrb[20].mxu1 %vm687_vm2, %v2455_v30  ;;  %v375_v30 = vld [vmem:[#allocation2 + $0x40] sm:$0xff] }
  0x54   : > { %2334 = vmatprep.mubr.msk.bf16.mxu0 %vm687_vm2, %v2440_v29  ;;  %2366 = vmatprep.mubr.msk.bf16.mxu1 %vm687_vm2, %v2456_v31 }
  0x5b   : > { %2335 = vmatmul.mubr.msk.bf16.gmra.mrb[24].mxu0 %vm687_vm2, %v2441_v32  ;;  %2367 = vmatmul.mubr.msk.bf16.gmra.mrb[24].mxu1 %vm687_vm2, %v2457_v34 }
  0x5c   : > { %2338 = vmatprep.mubr.msk.bf16.mxu0 %vm687_vm2, %v2442_v33  ;;  %2370 = vmatprep.mubr.msk.bf16.mxu1 %vm687_vm2, %v2458_v35 }
  0x63   : > { %2339 = vmatmul.mubr.msk.bf16.gmra.mrb[28].mxu0 %vm687_vm2, %v2443_v36  ;;  %2371 = vmatmul.mubr.msk.bf16.gmra.mrb[28].mxu1 %vm687_vm2, %v2459_v37 }
  0xfe   : > { %v2312_v40 = vpop.f32.mrb[0].mxu0  ;;  %v2344_v52 = vpop.f32.mrb[0].mxu1 }
  0xff   : > { %v1075_v42 = vadd.f32 %v2312_v40, %v369_v38  ;;  %v818_v43 = vpop.f32.mrb[1].mxu0  ;;  %v1107_v55 = vadd.f32 %v2344_v52, %v401_v49  ;;  %v946_v56 = vpop.f32.mrb[1].mxu1 }
 0x100   : > { %v1073_v45 = vadd.f32 %v818_v43, %v367_v39  ;;  %v2313_v46 = vpop.f32.mrb[2].mxu0  ;;  %v1105_v59 = vadd.f32 %v946_v56, %v399_v51  ;;  %v2345_v60 = vpop.f32.mrb[2].mxu1 }
 0x101   : > { %1140 = vst.msk [vmem:[#allocation2 + $0x10] sm:$0xff] %vm302_vm1, %v1075_v42  ;;  %v1076_v47 = vadd.f32 %v2313_v46, %v370_v41  ;;  %v821_v48 = vpop.f32.mrb[3].mxu0  ;;  %1172 = vst.msk [vmem:[#allocation2 + $0x110] sm:$0xff] %vm302_vm1, %v1107_v55  ;;  %v1108_v63 = vadd.f32 %v2345_v60, %v402_v53  ;;  %v949_v0 = vpop.f32.mrb[3].mxu1 }
 0x102   : > { %1138 = vst.msk [vmem:[#allocation2] sm:$0xff] %vm302_vm1, %v1073_v45  ;;  %v1074_v50 = vadd.f32 %v821_v48, %v368_v44  ;;  %1170 = vst.msk [vmem:[#allocation2 + $0x100] sm:$0xff] %vm302_vm1, %v1105_v59  ;;  %v1106_v4 = vadd.f32 %v949_v0, %v400_v57 }
 0x103   : > { %1141 = vst.msk [vmem:[#allocation2 + $0x18] sm:$0xff] %vm302_vm1, %v1076_v47  ;;  %1173 = vst.msk [vmem:[#allocation2 + $0x118] sm:$0xff] %vm302_vm1, %v1108_v63 }
 0x104   : > { %1139 = vst.msk [vmem:[#allocation2 + $0x8] sm:$0xff] %vm302_vm1, %v1074_v50  ;;  %1171 = vst.msk [vmem:[#allocation2 + $0x108] sm:$0xff] %vm302_vm1, %v1106_v4 }
 0x106   : > { %v2316_v61 = vpop.f32.mrb[4].mxu0  ;;  %v2348_v21 = vpop.f32.mrb[4].mxu1 }
 0x107   : > { %v1079_v1 = vadd.f32 %v2316_v61, %v373_v54  ;;  %v834_v2 = vpop.f32.mrb[5].mxu0  ;;  %v962_v27 = vpop.f32.mrb[5].mxu1  ;;  %v1111_v32 = vadd.f32 %v2348_v21, %v405_v16  ;;  %v382_v21 = vld [vmem:[#allocation2 + $0x78] sm:$0xff] }
 0x108   : > { %v1207_v5 = vld [vmem:[#allocation2 + $0x10] sm:$0xff]  ;;  %v1077_v6 = vadd.f32 %v834_v2, %v371_v58  ;;  %v2317_v7 = vpop.f32.mrb[6].mxu0  ;;  %v1109_v33 = vadd.f32 %v962_v27, %v403_v17  ;;  %v2818_v34 = vpop.f32.mrb[6].mxu1 }
 0x109   : > { %v2204_v8 = vpack.c.bf16 %v1207_v5, %v1207_v5  ;;  %v1205_v9 = vld [vmem:[#allocation2] sm:$0xff]  ;;  %1144 = vst.msk [vmem:[#allocation2 + $0x30] sm:$0xff] %vm302_vm1, %v1079_v1  ;;  %v1080_v10 = vadd.f32 %v2317_v7, %v374_v62  ;;  %v837_v11 = vpop.f32.mrb[7].mxu0  ;;  %v1730_v18 = vmul.f32 %v1207_v5, %v1207_v5  ;;  %v1594_v28 = vsel %vm302_vm1, %v1207_v5, 0.0  ;;  %v2816_v31 = vld [vmem:[#allocation2 + $0x110] sm:$0xff]  ;;  %v2828_v41 = vpop.f32.mrb[7].mxu1 }
 0x10a   : > { %v2202_v12 = vpack.c.bf16 %v1205_v9, %v1205_v9  ;;  %v1728_v13 = vmul.f32 %v1205_v9, %v1205_v9  ;;  %v1208_v14 = vld [vmem:[#allocation2 + $0x18] sm:$0xff]  ;;  %1142 = vst.msk [vmem:[#allocation2 + $0x20] sm:$0xff] %vm302_vm1, %v1077_v6  ;;  %v1078_v15 = vadd.f32 %v837_v11, %v372_v3  ;;  %v1591_v22 = vsel %vm302_vm1, %v1205_v9, 0.0  ;;  %v2826_v40 = vld [vmem:[#allocation2 + $0x100] sm:$0xff]  ;;  %1176 = vst.msk [vmem:[#allocation2 + $0x130] sm:$0xff] %vm302_vm1, %v1111_v32 }
 0x10b   : > { %1528 = vst.msk [vmem:[%s2579_s9 + $0x8] sm:$0xf] %vm1525_vm3, %v2204_v8  ;;  %v2205_v19 = vpack.c.bf16 %v1208_v14, %v1208_v14  ;;  %v1206_v20 = vld [vmem:[#allocation2 + $0x8] sm:$0xff]  ;;  %v1731_v36 = vmul.f32 %v1208_v14, %v1208_v14  ;;  %v2236_v39 = vpack.c.bf16 %v2816_v31, %v2816_v31  ;;  %v2234_v46 = vpack.c.bf16 %v2826_v40, %v2826_v40  ;;  %v378_v62 = vld [vmem:[#allocation2 + $0x58] sm:$0xff]  ;;  %v381_v8 = vld [vmem:[#allocation2 + $0x70] sm:$0xff] }
 0x10c   : > { %1145 = vst.msk [vmem:[#allocation2 + $0x38] sm:$0xff] %vm302_vm1, %v1080_v10  ;;  %v2203_v23 = vpack.c.bf16 %v1206_v20, %v1206_v20  ;;  %v1592_v24 = vsel %vm302_vm1, %v1206_v20, 0.0  ;;  %v1729_v25 = vmul.f32 %v1206_v20, %v1206_v20  ;;  %1143 = vst.msk [vmem:[#allocation2 + $0x28] sm:$0xff] %vm302_vm1, %v1078_v15  ;;  %v1792_v35 = vsel %vm302_vm1, %v1728_v13, 0.0  ;;  %v376_v3 = vld [vmem:[#allocation2 + $0x48] sm:$0xff]  ;;  %v2851_v9 = vld [vmem:[#allocation2 + $0x118] sm:$0xff] }
 0x10d   : > { %1526 = vst.msk [vmem:[%s2579_s9] sm:$0xf] %vm1525_vm3, %v2202_v12  ;;  %1529 = vst.msk [vmem:[%s2579_s9 + $0xc] sm:$0xf] %vm1525_vm3, %v2205_v19  ;;  %v1593_v29 = vadd.f32 %v1592_v24, %v1591_v22  ;;  %v1795_v47 = vsel %vm302_vm1, %v1730_v18, 0.0  ;;  %v1596_v48 = vsel %vm302_vm1, %v1208_v14, 0.0  ;;  %v2237_v27 = vpack.c.bf16 %v2851_v9, %v2851_v9 }
 0x10e   : > { %1527 = vst.msk [vmem:[%s2579_s9 + $0x4] sm:$0xf] %vm1525_vm3, %v2203_v23  ;;  %v1793_v37 = vsel %vm302_vm1, %v1729_v25, 0.0  ;;  %v2320_v38 = vpop.f32.mrb[8].mxu0  ;;  %1560 = vst.msk [vmem:[%s2579_s9 + $0x88] sm:$0xf] %vm1525_vm3, %v2236_v39 }
 0x10f   : > { %v1595_v42 = vadd.f32 %v1594_v28, %v1593_v29  ;;  %v1794_v43 = vadd.f32 %v1793_v37, %v1792_v35  ;;  %v1083_v44 = vadd.f32 %v2320_v38, %v377_v26  ;;  %v850_v45 = vpop.f32.mrb[9].mxu0  ;;  %1174 = vst.msk [vmem:[#allocation2 + $0x120] sm:$0xff] %vm302_vm1, %v1109_v33  ;;  %v1797_v57 = vsel %vm302_vm1, %v1731_v36, 0.0  ;;  %v2846_v4 = vpop.f32.mrb[8].mxu1  ;;  %v379_v15 = vld [vmem:[#allocation2 + $0x60] sm:$0xff]  ;;  %v380_v35 = vld [vmem:[#allocation2 + $0x68] sm:$0xff] }
 0x110   : > { %v1211_v49 = vld [vmem:[#allocation2 + $0x30] sm:$0xff]  ;;  %v1081_v50 = vadd.f32 %v850_v45, %v375_v30  ;;  %v2321_v51 = vpop.f32.mrb[10].mxu0  ;;  %1558 = vst.msk [vmem:[%s2579_s9 + $0x80] sm:$0xf] %vm1525_vm3, %v2234_v46  ;;  %v2853_v10 = vpop.f32.mrb[9].mxu1 }
 0x111   : > { %v1597_v52 = vadd.f32 %v1596_v48, %v1595_v42  ;;  %v1796_v53 = vadd.f32 %v1795_v47, %v1794_v43  ;;  %v2208_v54 = vpack.c.bf16 %v1211_v49, %v1211_v49  ;;  %v1209_v55 = vld [vmem:[#allocation2 + $0x20] sm:$0xff]  ;;  %1148 = vst.msk [vmem:[#allocation2 + $0x50] sm:$0xff] %vm302_vm1, %v1083_v44  ;;  %v853_v56 = vpop.f32.mrb[11].mxu0  ;;  %v1734_v5 = vmul.f32 %v1211_v49, %v1211_v49  ;;  %v2858_v16 = vpop.f32.mrb[10].mxu1  ;;  %v2879_v44 = vld [vmem:[#allocation2 + $0x108] sm:$0xff] }
 0x112   : > { %v2206_v58 = vpack.c.bf16 %v1209_v55, %v1209_v55  ;;  %v1598_v59 = vsel %vm302_vm1, %v1209_v55, 0.0  ;;  %v1732_v60 = vmul.f32 %v1209_v55, %v1209_v55  ;;  %1146 = vst.msk [vmem:[#allocation2 + $0x40] sm:$0xff] %vm302_vm1, %v1081_v50  ;;  %v1084_v14 = vadd.f32 %v2321_v51, %v378_v62  ;;  %v2863_v22 = vpop.f32.mrb[11].mxu1 }
 0x113   : > { %v1212_v61 = vld [vmem:[#allocation2 + $0x38] sm:$0xff]  ;;  %v1798_v63 = vadd.f32 %v1797_v57, %v1796_v53  ;;  %1532 = vst.msk [vmem:[%s2579_s9 + $0x18] sm:$0xf] %vm1525_vm3, %v2208_v54  ;;  %v1599_v0 = vadd.f32 %v1598_v59, %v1597_v52  ;;  %v1210_v2 = vld [vmem:[#allocation2 + $0x28] sm:$0xff]  ;;  %v1602_v17 = vsel %vm302_vm1, %v1211_v49, 0.0  ;;  %v1082_v19 = vadd.f32 %v853_v56, %v376_v3  ;;  %v2883_v49 = vld [vmem:[#allocation2 + $0x130] sm:$0xff] }
 0x114   : > { %v2209_v1 = vpack.c.bf16 %v1212_v61, %v1212_v61  ;;  %1530 = vst.msk [vmem:[%s2579_s9 + $0x10] sm:$0xf] %vm1525_vm3, %v2206_v58  ;;  %v1799_v6 = vsel %vm302_vm1, %v1732_v60, 0.0  ;;  %v2207_v7 = vpack.c.bf16 %v1210_v2, %v1210_v2  ;;  %v1600_v12 = vsel %vm302_vm1, %v1210_v2, 0.0  ;;  %1561 = vst.msk [vmem:[%s2579_s9 + $0x8c] sm:$0xf] %vm1525_vm3, %v2237_v27 }
 0x115   : > { %v1800_v11 = vadd.f32 %v1799_v6, %v1798_v63  ;;  %v1733_v13 = vmul.f32 %v1210_v2, %v1210_v2  ;;  %v1601_v18 = vadd.f32 %v1600_v12, %v1599_v0  ;;  %v1735_v23 = vmul.f32 %v1212_v61, %v1212_v61  ;;  %1149 = vst.msk [vmem:[#allocation2 + $0x58] sm:$0xff] %vm302_vm1, %v1084_v14  ;;  %v385_v56 = vld [vmem:[#allocation2 + $0x90] sm:$0xff] }
 0x116   : > { %1533 = vst.msk [vmem:[%s2579_s9 + $0x1c] sm:$0xf] %vm1525_vm3, %v2209_v1  ;;  %1531 = vst.msk [vmem:[%s2579_s9 + $0x14] sm:$0xf] %vm1525_vm3, %v2207_v7  ;;  %v2324_v20 = vpop.f32.mrb[12].mxu0  ;;  %v1803_v36 = vsel %vm302_vm1, %v1734_v5, 0.0  ;;  %v2235_v57 = vpack.c.bf16 %v2879_v44, %v2879_v44  ;;  %v2240_v62 = vpack.c.bf16 %v2883_v49, %v2883_v49 }
 0x117   : > { %v1801_v24 = vsel %vm302_vm1, %v1733_v13, 0.0  ;;  %v1087_v25 = vadd.f32 %v2324_v20, %v381_v8  ;;  %v866_v26 = vpop.f32.mrb[13].mxu0  ;;  %v1603_v28 = vadd.f32 %v1602_v17, %v1601_v18  ;;  %1147 = vst.msk [vmem:[#allocation2 + $0x48] sm:$0xff] %vm302_vm1, %v1082_v19  ;;  %v1604_v37 = vsel %vm302_vm1, %v1212_v61, 0.0  ;;  %v2889_v53 = vld [vmem:[#allocation2 + $0x120] sm:$0xff]  ;;  %v2891_v54 = vpop.f32.mrb[12].mxu1 }
 0x118   : > { %v1802_v29 = vadd.f32 %v1801_v24, %v1800_v11  ;;  %v2869_v30 = vld [vmem:[#allocation2 + $0x50] sm:$0xff]  ;;  %v1085_v32 = vadd.f32 %v866_v26, %v379_v15  ;;  %v2325_v33 = vpop.f32.mrb[14].mxu0  ;;  %v1805_v50 = vsel %vm302_vm1, %v1735_v23, 0.0  ;;  %v2897_v58 = vpop.f32.mrb[13].mxu1  ;;  %v383_v61 = vld [vmem:[#allocation2 + $0x80] sm:$0xff]  ;;  %v2238_v3 = vpack.c.bf16 %v2889_v53, %v2889_v53 }
 0x119   : > { %v2212_v38 = vpack.c.bf16 %v2869_v30, %v2869_v30  ;;  %v1213_v39 = vld [vmem:[#allocation2 + $0x40] sm:$0xff]  ;;  %1152 = vst.msk [vmem:[#allocation2 + $0x70] sm:$0xff] %vm302_vm1, %v1087_v25  ;;  %v1088_v42 = vadd.f32 %v2325_v33, %v382_v21  ;;  %v869_v43 = vpop.f32.mrb[15].mxu0  ;;  %v1605_v47 = vadd.f32 %v1604_v37, %v1603_v28  ;;  %v2903_v63 = vpop.f32.mrb[14].mxu1  ;;  %v1738_v0 = vmul.f32 %v2869_v30, %v2869_v30  ;;  %v386_v25 = vld [vmem:[#allocation2 + $0x98] sm:$0xff] }
 0x11a   : > { %v1804_v45 = vadd.f32 %v1803_v36, %v1802_v29  ;;  %v2210_v46 = vpack.c.bf16 %v1213_v39, %v1213_v39  ;;  %v1606_v48 = vsel %vm302_vm1, %v1213_v39, 0.0  ;;  %1150 = vst.msk [vmem:[#allocation2 + $0x60] sm:$0xff] %vm302_vm1, %v1085_v32  ;;  %v1736_v51 = vmul.f32 %v1213_v39, %v1213_v39  ;;  %v2911_v5 = vpop.f32.mrb[15].mxu1 }
 0x11b   : > { %1536 = vst.msk [vmem:[%s2579_s9 + $0x28] sm:$0xf] %vm1525_vm3, %v2212_v38  ;;  %v1086_v52 = vadd.f32 %v869_v43, %v380_v35  ;;  %v1607_v59 = vadd.f32 %v1606_v48, %v1605_v47  ;;  %1559 = vst.msk [vmem:[%s2579_s9 + $0x84] sm:$0xf] %vm1525_vm3, %v2235_v57  ;;  %v1610_v27 = vsel %vm302_vm1, %v2869_v30, 0.0  ;;  %v1811_v28 = vsel %vm302_vm1, %v1738_v0, 0.0 }
 0x11c   : > { %1153 = vst.msk [vmem:[#allocation2 + $0x78] sm:$0xff] %vm302_vm1, %v1088_v42  ;;  %v1806_v55 = vadd.f32 %v1805_v50, %v1804_v45  ;;  %v1807_v60 = vsel %vm302_vm1, %v1736_v51, 0.0  ;;  %v1216_v1 = vld [vmem:[#allocation2 + $0x58] sm:$0xff]  ;;  %v384_v38 = vld [vmem:[#allocation2 + $0x88] sm:$0xff]  ;;  %v389_v48 = vld [vmem:[#allocation2 + $0xb0] sm:$0xff] }
 0x11d   : > { %1534 = vst.msk [vmem:[%s2579_s9 + $0x20] sm:$0xf] %vm1525_vm3, %v2210_v46  ;;  %v2213_v7 = vpack.c.bf16 %v1216_v1, %v1216_v1  ;;  %v1739_v8 = vmul.f32 %v1216_v1, %v1216_v1  ;;  %1564 = vst.msk [vmem:[%s2579_s9 + $0x98] sm:$0xf] %vm1525_vm3, %v2240_v62  ;;  %v1612_v42 = vsel %vm302_vm1, %v1216_v1, 0.0  ;;  %v387_v57 = vld [vmem:[#allocation2 + $0xa0] sm:$0xff] }
 0x11e   : > { %1151 = vst.msk [vmem:[#allocation2 + $0x68] sm:$0xff] %vm302_vm1, %v1086_v52  ;;  %v2328_v2 = vpop.f32.mrb[16].mxu0  ;;  %v1808_v6 = vadd.f32 %v1807_v60, %v1806_v55  ;;  %v1214_v11 = vld [vmem:[#allocation2 + $0x48] sm:$0xff]  ;;  %v2934_v39 = vpop.f32.mrb[16].mxu1 }
 0x11f   : > { %v1091_v12 = vadd.f32 %v2328_v2, %v385_v56  ;;  %v882_v13 = vpop.f32.mrb[17].mxu0  ;;  %v2211_v14 = vpack.c.bf16 %v1214_v11, %v1214_v11  ;;  %v1608_v15 = vsel %vm302_vm1, %v1214_v11, 0.0  ;;  %v1737_v17 = vmul.f32 %v1214_v11, %v1214_v11  ;;  %1562 = vst.msk [vmem:[%s2579_s9 + $0x90] sm:$0xf] %vm1525_vm3, %v2238_v3  ;;  %1537 = vst.msk [vmem:[%s2579_s9 + $0x2c] sm:$0xf] %vm1525_vm3, %v2213_v7 }
 0x120   : > { %v1219_v18 = vld [vmem:[#allocation2 + $0x70] sm:$0xff]  ;;  %v1089_v19 = vadd.f32 %v882_v13, %v383_v61  ;;  %v2329_v20 = vpop.f32.mrb[18].mxu0  ;;  %v1609_v21 = vadd.f32 %v1608_v15, %v1607_v59  ;;  %v1813_v43 = vsel %vm302_vm1, %v1739_v8, 0.0  ;;  %v2941_v50 = vpop.f32.mrb[17].mxu1 }
 0x121   : > { %v2216_v23 = vpack.c.bf16 %v1219_v18, %v1219_v18  ;;  %v1217_v24 = vld [vmem:[#allocation2 + $0x60] sm:$0xff]  ;;  %1156 = vst.msk [vmem:[#allocation2 + $0x90] sm:$0xff] %vm302_vm1, %v1091_v12  ;;  %v885_v26 = vpop.f32.mrb[19].mxu0  ;;  %v1809_v29 = vsel %vm302_vm1, %v1737_v17, 0.0  ;;  %v1092_v47 = vadd.f32 %v2329_v20, %v386_v25  ;;  %v1742_v52 = vmul.f32 %v1219_v18, %v1219_v18  ;;  %v2945_v59 = vpop.f32.mrb[18].mxu1  ;;  %v388_v17 = vld [vmem:[#allocation2 + $0xa8] sm:$0xff] }
 0x122   : > { %1535 = vst.msk [vmem:[%s2579_s9 + $0x24] sm:$0xf] %vm1525_vm3, %v2211_v14  ;;  %v2214_v32 = vpack.c.bf16 %v1217_v24, %v1217_v24  ;;  %v1611_v35 = vadd.f32 %v1610_v27, %v1609_v21  ;;  %v1810_v36 = vadd.f32 %v1809_v29, %v1808_v6  ;;  %v1740_v37 = vmul.f32 %v1217_v24, %v1217_v24  ;;  %v2950_v2 = vpop.f32.mrb[19].mxu1  ;;  %v390_v14 = vld [vmem:[#allocation2 + $0xb8] sm:$0xff] }
 0x123   : > { %v2927_v33 = vld [vmem:[#allocation2 + $0x78] sm:$0xff]  ;;  %1154 = vst.msk [vmem:[#allocation2 + $0x80] sm:$0xff] %vm302_vm1, %v1089_v19  ;;  %v1614_v45 = vsel %vm302_vm1, %v1217_v24, 0.0  ;;  %1157 = vst.msk [vmem:[#allocation2 + $0x98] sm:$0xff] %vm302_vm1, %v1092_v47  ;;  %v1090_v0 = vadd.f32 %v885_v26, %v384_v38  ;;  %v1618_v19 = vsel %vm302_vm1, %v1219_v18, 0.0  ;;  %v1819_v27 = vsel %vm302_vm1, %v1742_v52, 0.0 }
 0x124   : > { %1540 = vst.msk [vmem:[%s2579_s9 + $0x38] sm:$0xf] %vm1525_vm3, %v2216_v23  ;;  %v2217_v30 = vpack.c.bf16 %v2927_v33, %v2927_v33  ;;  %1538 = vst.msk [vmem:[%s2579_s9 + $0x30] sm:$0xf] %vm1525_vm3, %v2214_v32  ;;  %v1812_v51 = vadd.f32 %v1811_v28, %v1810_v36  ;;  %v1613_v55 = vadd.f32 %v1612_v42, %v1611_v35  ;;  %v1815_v60 = vsel %vm302_vm1, %v1740_v37, 0.0  ;;  %v406_v26 = vld [vmem:[#allocation2 + $0x138] sm:$0xff] }
 0x125   : > { %v1218_v46 = vld [vmem:[#allocation2 + $0x68] sm:$0xff]  ;;  %1155 = vst.msk [vmem:[#allocation2 + $0x88] sm:$0xff] %vm302_vm1, %v1090_v0  ;;  %v1743_v28 = vmul.f32 %v2927_v33, %v2927_v33  ;;  %v409_v35 = vld [vmem:[#allocation2 + $0x150] sm:$0xff]  ;;  %v407_v42 = vld [vmem:[#allocation2 + $0x140] sm:$0xff] }
 0x126   : > { %1541 = vst.msk [vmem:[%s2579_s9 + $0x3c] sm:$0xf] %vm1525_vm3, %v2217_v30  ;;  %v2215_v56 = vpack.c.bf16 %v1218_v46, %v1218_v46  ;;  %v1616_v61 = vsel %vm302_vm1, %v1218_v46, 0.0  ;;  %v1741_v62 = vmul.f32 %v1218_v46, %v1218_v46  ;;  %v2332_v1 = vpop.f32.mrb[20].mxu0  ;;  %v1615_v3 = vadd.f32 %v1614_v45, %v1613_v55  ;;  %v404_v18 = vld [vmem:[#allocation2 + $0x128] sm:$0xff]  ;;  %v410_v52 = vld [vmem:[#allocation2 + $0x158] sm:$0xff] }
 0x127   : > { %v1814_v6 = vadd.f32 %v1813_v43, %v1812_v51  ;;  %v1095_v7 = vadd.f32 %v2332_v1, %v389_v48  ;;  %v898_v8 = vpop.f32.mrb[21].mxu0  ;;  %v2964_v43 = vpop.f32.mrb[20].mxu1  ;;  %v1620_v45 = vsel %vm302_vm1, %v2927_v33, 0.0  ;;  %v393_v48 = vld [vmem:[#allocation2 + $0xd0] sm:$0xff]  ;;  %v1112_v51 = vadd.f32 %v2818_v34, %v406_v26 }
 0x128   : > { %1539 = vst.msk [vmem:[%s2579_s9 + $0x34] sm:$0xf] %vm1525_vm3, %v2215_v56  ;;  %v1817_v11 = vsel %vm302_vm1, %v1741_v62, 0.0  ;;  %v1223_v12 = vld [vmem:[#allocation2 + $0x90] sm:$0xff]  ;;  %v1093_v13 = vadd.f32 %v898_v8, %v387_v57  ;;  %v2333_v15 = vpop.f32.mrb[22].mxu0  ;;  %v1617_v21 = vadd.f32 %v1616_v61, %v1615_v3  ;;  %v2972_v55 = vpop.f32.mrb[21].mxu1  ;;  %v1110_v33 = vadd.f32 %v2828_v41, %v404_v18 }
 0x129   : > { %v1816_v20 = vadd.f32 %v1815_v60, %v1814_v6  ;;  %v2220_v23 = vpack.c.bf16 %v1223_v12, %v1223_v12  ;;  %1160 = vst.msk [vmem:[#allocation2 + $0xb0] sm:$0xff] %vm302_vm1, %v1095_v7  ;;  %v901_v25 = vpop.f32.mrb[23].mxu0  ;;  %v1096_v30 = vadd.f32 %v2333_v15, %v390_v14  ;;  %v1746_v46 = vmul.f32 %v1223_v12, %v1223_v12  ;;  %v2978_v62 = vpop.f32.mrb[22].mxu1 }
 0x12a   : > { %v1221_v24 = vld [vmem:[#allocation2 + $0x80] sm:$0xff]  ;;  %1158 = vst.msk [vmem:[#allocation2 + $0xa0] sm:$0xff] %vm302_vm1, %v1093_v13  ;;  %v1619_v36 = vadd.f32 %v1618_v19, %v1617_v21  ;;  %v1094_v38 = vadd.f32 %v901_v25, %v388_v17  ;;  %v1224_v60 = vld [vmem:[#allocation2 + $0x98] sm:$0xff]  ;;  %v1115_v61 = vadd.f32 %v2846_v4, %v409_v35  ;;  %v1821_v0 = vsel %vm302_vm1, %v1743_v28, 0.0  ;;  %1177 = vst.msk [vmem:[#allocation2 + $0x138] sm:$0xff] %vm302_vm1, %v1112_v51  ;;  %v2984_v7 = vpop.f32.mrb[23].mxu1 }
 0x12b   : > { %v2218_v29 = vpack.c.bf16 %v1221_v24, %v1221_v24  ;;  %v1744_v32 = vmul.f32 %v1221_v24, %v1221_v24  ;;  %v1818_v37 = vadd.f32 %v1817_v11, %v1816_v20  ;;  %1544 = vst.msk [vmem:[%s2579_s9 + $0x48] sm:$0xf] %vm1525_vm3, %v2220_v23  ;;  %v1622_v47 = vsel %vm302_vm1, %v1221_v24, 0.0  ;;  %v391_v21 = vld [vmem:[#allocation2 + $0xc0] sm:$0xff]  ;;  %v394_v23 = vld [vmem:[#allocation2 + $0xd8] sm:$0xff]  ;;  %v392_v28 = vld [vmem:[#allocation2 + $0xc8] sm:$0xff] }
 0x12c   : > { %v1621_v57 = vadd.f32 %v1620_v45, %v1619_v36  ;;  %1161 = vst.msk [vmem:[#allocation2 + $0xb8] sm:$0xff] %vm302_vm1, %v1096_v30  ;;  %1159 = vst.msk [vmem:[#allocation2 + $0xa8] sm:$0xff] %vm302_vm1, %v1094_v38  ;;  %v2221_v1 = vpack.c.bf16 %v1224_v60, %v1224_v60  ;;  %v1113_v6 = vadd.f32 %v2853_v10, %v407_v42  ;;  %v1222_v41 = vld [vmem:[#allocation2 + $0x88] sm:$0xff]  ;;  %v1626_v15 = vsel %vm302_vm1, %v1223_v12, 0.0 }
 0x12d   : > { %1542 = vst.msk [vmem:[%s2579_s9 + $0x40] sm:$0xf] %vm1525_vm3, %v2218_v29  ;;  %v1820_v56 = vadd.f32 %v1819_v27, %v1818_v37  ;;  %v1823_v34 = vsel %vm302_vm1, %v1744_v32, 0.0  ;;  %v1116_v14 = vadd.f32 %v2858_v16, %v410_v52  ;;  %v2219_v17 = vpack.c.bf16 %v1222_v41, %v1222_v41  ;;  %v408_v32 = vld [vmem:[#allocation2 + $0x148] sm:$0xff] }
 0x12e   : > { %v2336_v3 = vpop.f32.mrb[24].mxu0  ;;  %v1623_v8 = vadd.f32 %v1622_v47, %v1621_v57  ;;  %1175 = vst.msk [vmem:[#allocation2 + $0x128] sm:$0xff] %vm302_vm1, %v1110_v33  ;;  %1180 = vst.msk [vmem:[#allocation2 + $0x150] sm:$0xff] %vm302_vm1, %v1115_v61  ;;  %v1624_v10 = vsel %vm302_vm1, %v1222_v41, 0.0  ;;  %v1745_v19 = vmul.f32 %v1222_v41, %v1222_v41  ;;  %v1827_v25 = vsel %vm302_vm1, %v1746_v46, 0.0  ;;  %v3007_v46 = vpop.f32.mrb[24].mxu1 }
 0x12f   : > { %v1822_v11 = vadd.f32 %v1821_v0, %v1820_v56  ;;  %v1099_v13 = vadd.f32 %v2336_v3, %v393_v48  ;;  %v914_v4 = vpop.f32.mrb[25].mxu0  ;;  %1545 = vst.msk [vmem:[%s2579_s9 + $0x4c] sm:$0xf] %vm1525_vm3, %v2221_v1  ;;  %v1628_v18 = vsel %vm302_vm1, %v1224_v60, 0.0  ;;  %v1747_v35 = vmul.f32 %v1224_v60, %v1224_v60  ;;  %1543 = vst.msk [vmem:[%s2579_s9 + $0x44] sm:$0xf] %vm1525_vm3, %v2219_v17 }
 0x130   : > { %v2993_v20 = vld [vmem:[#allocation2 + $0xb0] sm:$0xff]  ;;  %v2337_v24 = vpop.f32.mrb[26].mxu0  ;;  %1178 = vst.msk [vmem:[#allocation2 + $0x140] sm:$0xff] %vm302_vm1, %v1113_v6  ;;  %v1625_v16 = vadd.f32 %v1624_v10, %v1623_v8  ;;  %1181 = vst.msk [vmem:[#allocation2 + $0x158] sm:$0xff] %vm302_vm1, %v1116_v14  ;;  %v1825_v36 = vsel %vm302_vm1, %v1745_v19, 0.0  ;;  %v1097_v45 = vadd.f32 %v914_v4, %v391_v21  ;;  %v1114_v60 = vadd.f32 %v2863_v22, %v408_v32  ;;  %v3013_v33 = vpop.f32.mrb[25].mxu1 }
 0x131   : > { %v1824_v26 = vadd.f32 %v1823_v34, %v1822_v11  ;;  %v2224_v12 = vpack.c.bf16 %v2993_v20, %v2993_v20  ;;  %v1225_v27 = vld [vmem:[#allocation2 + $0xa0] sm:$0xff]  ;;  %1164 = vst.msk [vmem:[#allocation2 + $0xd0] sm:$0xff] %vm302_vm1, %v1099_v13  ;;  %v917_v29 = vpop.f32.mrb[27].mxu0  ;;  %v1100_v52 = vadd.f32 %v2337_v24, %v394_v23  ;;  %v397_v57 = vld [vmem:[#allocation2 + $0xf0] sm:$0xff]  ;;  %v3016_v3 = vld [vmem:[#allocation2 + $0x138] sm:$0xff]  ;;  %v3018_v6 = vpop.f32.mrb[26].mxu1  ;;  %v1750_v24 = vmul.f32 %v2993_v20, %v2993_v20 }
 0x132   : > { %v2222_v37 = vpack.c.bf16 %v1225_v27, %v1225_v27  ;;  %v1627_v30 = vadd.f32 %v1626_v15, %v1625_v16  ;;  %v1748_v42 = vmul.f32 %v1225_v27, %v1225_v27  ;;  %v1630_v47 = vsel %vm302_vm1, %v1225_v27, 0.0  ;;  %1162 = vst.msk [vmem:[#allocation2 + $0xc0] sm:$0xff] %vm302_vm1, %v1097_v45  ;;  %v395_v1 = vld [vmem:[#allocation2 + $0xe0] sm:$0xff]  ;;  %1179 = vst.msk [vmem:[#allocation2 + $0x148] sm:$0xff] %vm302_vm1, %v1114_v60  ;;  %v3026_v4 = vpop.f32.mrb[27].mxu1  ;;  %v398_v21 = vld [vmem:[#allocation2 + $0xf8] sm:$0xff] }
 0x133   : > { %v1826_v38 = vadd.f32 %v1825_v36, %v1824_v26  ;;  %1548 = vst.msk [vmem:[%s2579_s9 + $0x58] sm:$0xf] %vm1525_vm3, %v2224_v12  ;;  %v1228_v48 = vld [vmem:[#allocation2 + $0xb8] sm:$0xff]  ;;  %v1226_v51 = vld [vmem:[#allocation2 + $0xa8] sm:$0xff]  ;;  %v1098_v56 = vadd.f32 %v917_v29, %v392_v28  ;;  %v1829_v8 = vsel %vm302_vm1, %v1747_v35, 0.0  ;;  %v2241_v12 = vpack.c.bf16 %v3016_v3, %v3016_v3 }
 0x134   : > { %1546 = vst.msk [vmem:[%s2579_s9 + $0x50] sm:$0xf] %vm1525_vm3, %v2222_v37  ;;  %v1629_v0 = vadd.f32 %v1628_v18, %v1627_v30  ;;  %v2225_v34 = vpack.c.bf16 %v1228_v48, %v1228_v48  ;;  %v1831_v11 = vsel %vm302_vm1, %v1748_v42, 0.0  ;;  %v2223_v41 = vpack.c.bf16 %v1226_v51, %v1226_v51  ;;  %v396_v23 = vld [vmem:[#allocation2 + $0xe8] sm:$0xff] }
 0x135   : > { %v1828_v61 = vadd.f32 %v1827_v25, %v1826_v38  ;;  %v1632_v22 = vsel %vm302_vm1, %v1226_v51, 0.0  ;;  %1165 = vst.msk [vmem:[#allocation2 + $0xd8] sm:$0xff] %vm302_vm1, %v1100_v52  ;;  %1163 = vst.msk [vmem:[#allocation2 + $0xc8] sm:$0xff] %vm302_vm1, %v1098_v56  ;;  %v1749_v17 = vmul.f32 %v1226_v51, %v1226_v51  ;;  %v3036_v27 = vld [vmem:[#allocation2 + $0x128] sm:$0xff]  ;;  %v3040_v36 = vld [vmem:[#allocation2 + $0x150] sm:$0xff]  ;;  %v1634_v37 = vsel %vm302_vm1, %v2993_v20, 0.0 }
 0x136   : > { %v2340_v13 = vpop.f32.mrb[28].mxu0  ;;  %v1631_v14 = vadd.f32 %v1630_v47, %v1629_v0  ;;  %1549 = vst.msk [vmem:[%s2579_s9 + $0x5c] sm:$0xf] %vm1525_vm3, %v2225_v34  ;;  %1547 = vst.msk [vmem:[%s2579_s9 + $0x54] sm:$0xf] %vm1525_vm3, %v2223_v41  ;;  %v1751_v30 = vmul.f32 %v1228_v48, %v1228_v48  ;;  %v2239_v51 = vpack.c.bf16 %v3036_v27, %v3036_v27  ;;  %v3051_v52 = vpop.f32.mrb[28].mxu1 }
 0x137   : > { %v1830_v15 = vadd.f32 %v1829_v8, %v1828_v61  ;;  %v1103_v10 = vadd.f32 %v2340_v13, %v397_v57  ;;  %v930_v19 = vpop.f32.mrb[29].mxu0  ;;  %v1833_v32 = vsel %vm302_vm1, %v1749_v17, 0.0  ;;  %1565 = vst.msk [vmem:[%s2579_s9 + $0x9c] sm:$0xf] %vm1525_vm3, %v2241_v12  ;;  %v1835_v56 = vsel %vm302_vm1, %v1750_v24, 0.0  ;;  %v3059_v61 = vpop.f32.mrb[29].mxu1 }
 0x138   : > { %v1231_v25 = vld [vmem:[#allocation2 + $0xd0] sm:$0xff]  ;;  %v1101_v26 = vadd.f32 %v930_v19, %v395_v1  ;;  %v2341_v16 = vpop.f32.mrb[30].mxu0  ;;  %v1633_v29 = vadd.f32 %v1632_v22, %v1631_v14  ;;  %v1636_v20 = vsel %vm302_vm1, %v1228_v48, 0.0  ;;  %v2244_v60 = vpack.c.bf16 %v3040_v36, %v3040_v36  ;;  %1563 = vst.msk [vmem:[%s2579_s9 + $0x94] sm:$0xf] %vm1525_vm3, %v2239_v51  ;;  %v3064_v41 = vpop.f32.mrb[30].mxu1 }
 0x139   : > { %v1832_v28 = vadd.f32 %v1831_v11, %v1830_v15  ;;  %v2228_v18 = vpack.c.bf16 %v1231_v25, %v1231_v25  ;;  %1168 = vst.msk [vmem:[#allocation2 + $0xf0] sm:$0xff] %vm302_vm1, %v1103_v10  ;;  %v933_v35 = vpop.f32.mrb[31].mxu0  ;;  %v1104_v38 = vadd.f32 %v2341_v16, %v398_v21  ;;  %v1229_v57 = vld [vmem:[#allocation2 + $0xc0] sm:$0xff]  ;;  %v1837_v22 = vsel %vm302_vm1, %v1751_v30, 0.0  ;;  %v3069_v15 = vpop.f32.mrb[31].mxu1 }
 0x13a   : > { %1166 = vst.msk [vmem:[#allocation2 + $0xe0] sm:$0xff] %vm302_vm1, %v1101_v26  ;;  %v1102_v42 = vadd.f32 %v933_v35, %v396_v23  ;;  %v1635_v45 = vadd.f32 %v1634_v37, %v1633_v29  ;;  %v2226_v34 = vpack.c.bf16 %v1229_v57, %v1229_v57  ;;  %v1638_v8 = vsel %vm302_vm1, %v1229_v57, 0.0 }
 0x13b   : > { %v1834_v47 = vadd.f32 %v1833_v32, %v1832_v28  ;;  %1552 = vst.msk [vmem:[%s2579_s9 + $0x68] sm:$0xf] %vm1525_vm3, %v2228_v18  ;;  %v1752_v13 = vmul.f32 %v1229_v57, %v1229_v57  ;;  %1568 = vst.msk [vmem:[%s2579_s9 + $0xa8] sm:$0xf] %vm1525_vm3, %v2244_v60  ;;  %v1754_v23 = vmul.f32 %v1231_v25, %v1231_v25  ;;  %v3079_v12 = vsel %vm302_vm1, %v2816_v31, 0.0 }
 0x13c   : > { %1169 = vst.msk [vmem:[#allocation2 + $0xf8] sm:$0xff] %vm302_vm1, %v1104_v38  ;;  %1167 = vst.msk [vmem:[#allocation2 + $0xe8] sm:$0xff] %vm302_vm1, %v1102_v42  ;;  %v1637_v1 = vadd.f32 %v1636_v20, %v1635_v45  ;;  %v1232_v11 = vld [vmem:[#allocation2 + $0xd8] sm:$0xff]  ;;  %v1230_v48 = vld [vmem:[#allocation2 + $0xc8] sm:$0xff]  ;;  %v3085_v35 = vmul.f32 %v2816_v31, %v2816_v31  ;;  %v1642_v37 = vsel %vm302_vm1, %v1231_v25, 0.0  ;;  %v1760_v57 = vmul.f32 %v2826_v40, %v2826_v40 }
 0x13d   : > { %v1836_v0 = vadd.f32 %v1835_v56, %v1834_v47  ;;  %v2229_v14 = vpack.c.bf16 %v1232_v11, %v1232_v11  ;;  %1550 = vst.msk [vmem:[%s2579_s9 + $0x60] sm:$0xf] %vm1525_vm3, %v2226_v34  ;;  %v2227_v19 = vpack.c.bf16 %v1230_v48, %v1230_v48  ;;  %v1640_v21 = vsel %vm302_vm1, %v1230_v48, 0.0  ;;  %v3098_v34 = vld [vmem:[#allocation2 + $0x140] sm:$0xff] }
 0x13e   : > { %v1639_v17 = vadd.f32 %v1638_v8, %v1637_v1  ;;  %v1839_v24 = vsel %vm302_vm1, %v1752_v13, 0.0  ;;  %v1753_v26 = vmul.f32 %v1230_v48, %v1230_v48  ;;  %v1755_v30 = vmul.f32 %v1232_v11, %v1232_v11  ;;  %v3102_v13 = vld [vmem:[#allocation2 + $0x158] sm:$0xff] }
 0x13f   : > { %v1838_v10 = vadd.f32 %v1837_v22, %v1836_v0  ;;  %1553 = vst.msk [vmem:[%s2579_s9 + $0x6c] sm:$0xf] %vm1525_vm3, %v2229_v14  ;;  %1551 = vst.msk [vmem:[%s2579_s9 + $0x64] sm:$0xf] %vm1525_vm3, %v2227_v19  ;;  %v1843_v31 = vsel %vm302_vm1, %v1754_v23, 0.0  ;;  %v1644_v60 = vsel %vm302_vm1, %v1232_v11, 0.0  ;;  %v1761_v22 = vmul.f32 %v2879_v44, %v2879_v44 }
 0x140   : > { %v1235_v16 = vld [vmem:[#allocation2 + $0xf0] sm:$0xff]  ;;  %v1641_v29 = vadd.f32 %v1640_v21, %v1639_v17  ;;  %v1841_v38 = vsel %vm302_vm1, %v1753_v26, 0.0  ;;  %v1845_v14 = vsel %vm302_vm1, %v1755_v30, 0.0  ;;  %v3113_v26 = vld [vmem:[#allocation2 + $0x148] sm:$0xff] }
 0x141   : > { %v1840_v28 = vadd.f32 %v1839_v24, %v1838_v10  ;;  %v2232_v32 = vpack.c.bf16 %v1235_v16, %v1235_v16  ;;  %v1233_v18 = vld [vmem:[#allocation2 + $0xe0] sm:$0xff]  ;;  %v1758_v19 = vmul.f32 %v1235_v16, %v1235_v16  ;;  %v2242_v24 = vpack.c.bf16 %v3098_v34, %v3098_v34 }
 0x142   : > { %v2230_v42 = vpack.c.bf16 %v1233_v18, %v1233_v18  ;;  %v1643_v45 = vadd.f32 %v1642_v37, %v1641_v29  ;;  %v1756_v51 = vmul.f32 %v1233_v18, %v1233_v18  ;;  %v1646_v25 = vsel %vm302_vm1, %v1233_v18, 0.0  ;;  %v413_v37 = vld [vmem:[#allocation2 + $0x170] sm:$0xff] }
 0x143   : > { %v1842_v47 = vadd.f32 %v1841_v38, %v1840_v28  ;;  %1556 = vst.msk [vmem:[%s2579_s9 + $0x78] sm:$0xf] %vm1525_vm3, %v2232_v32  ;;  %v1236_v56 = vld [vmem:[#allocation2 + $0xf8] sm:$0xff]  ;;  %v1234_v20 = vld [vmem:[#allocation2 + $0xe8] sm:$0xff]  ;;  %v1654_v29 = vsel %vm302_vm1, %v2826_v40, 0.0  ;;  %v3119_v32 = vsel %vm302_vm1, %v1760_v57, 0.0  ;;  %v2245_v18 = vpack.c.bf16 %v3102_v13, %v3102_v13 }
 0x144   : > { %1554 = vst.msk [vmem:[%s2579_s9 + $0x70] sm:$0xf] %vm1525_vm3, %v2230_v42  ;;  %v2233_v0 = vpack.c.bf16 %v1236_v56, %v1236_v56  ;;  %v1645_v8 = vadd.f32 %v1644_v60, %v1643_v45  ;;  %v2231_v48 = vpack.c.bf16 %v1234_v20, %v1234_v20  ;;  %v1847_v11 = vsel %vm302_vm1, %v1756_v51, 0.0  ;;  %1566 = vst.msk [vmem:[%s2579_s9 + $0xa0] sm:$0xf] %vm1525_vm3, %v2242_v24  ;;  %v414_v51 = vld [vmem:[#allocation2 + $0x178] sm:$0xff] }
 0x145   : > { %v1844_v1 = vadd.f32 %v1843_v31, %v1842_v47  ;;  %v1648_v17 = vsel %vm302_vm1, %v1234_v20, 0.0  ;;  %v1757_v10 = vmul.f32 %v1234_v20, %v1234_v20  ;;  %v1759_v38 = vmul.f32 %v1236_v56, %v1236_v56  ;;  %v411_v47 = vld [vmem:[#allocation2 + $0x160] sm:$0xff]  ;;  %v412_v20 = vld [vmem:[#allocation2 + $0x168] sm:$0xff]  ;;  %1569 = vst.msk [vmem:[%s2579_s9 + $0xac] sm:$0xf] %vm1525_vm3, %v2245_v18  ;;  %v422_v24 = vld [vmem:[#allocation2 + $0x1b8] sm:$0xff] }
 0x146   : > { %1557 = vst.msk [vmem:[%s2579_s9 + $0x7c] sm:$0xf] %vm1525_vm3, %v2233_v0  ;;  %v1647_v21 = vadd.f32 %v1646_v25, %v1645_v8  ;;  %1555 = vst.msk [vmem:[%s2579_s9 + $0x74] sm:$0xf] %vm1525_vm3, %v2231_v48  ;;  %v3125_v45 = vmul.f32 %v2851_v9, %v2851_v9  ;;  %v1650_v40 = vsel %vm302_vm1, %v1235_v16, 0.0  ;;  %v1656_v57 = vsel %vm302_vm1, %v2879_v44, 0.0 }
 0x147   : > { %v1846_v23 = vadd.f32 %v1845_v14, %v1844_v1  ;;  %v1849_v28 = vsel %vm302_vm1, %v1757_v10, 0.0  ;;  %v3133_v31 = vsel %vm302_vm1, %v1761_v22, 0.0  ;;  %v2243_v60 = vpack.c.bf16 %v3113_v26, %v3113_v26  ;;  %v417_v25 = vld [vmem:[#allocation2 + $0x190] sm:$0xff]  ;;  %v415_v0 = vld [vmem:[#allocation2 + $0x180] sm:$0xff]  ;;  %v418_v16 = vld [vmem:[#allocation2 + $0x198] sm:$0xff] }
 0x148   : > { %v1649_v42 = vadd.f32 %v1648_v17, %v1647_v21  ;;  %v1851_v1 = vsel %vm302_vm1, %v1758_v19, 0.0  ;;  %v1119_v14 = vadd.f32 %v2891_v54, %v413_v37  ;;  %v421_v17 = vld [vmem:[#allocation2 + $0x1b0] sm:$0xff]  ;;  %v1652_v44 = vsel %vm302_vm1, %v1236_v56, 0.0  ;;  %v420_v19 = vld [vmem:[#allocation2 + $0x1a8] sm:$0xff] }
 0x149   : > { %v1848_v30 = vadd.f32 %v1847_v11, %v1846_v23  ;;  %v416_v11 = vld [vmem:[#allocation2 + $0x188] sm:$0xff]  ;;  %1567 = vst.msk [vmem:[%s2579_s9 + $0xa4] sm:$0xf] %vm1525_vm3, %v2243_v60  ;;  %v1117_v22 = vadd.f32 %v2897_v58, %v411_v47  ;;  %v1120_v10 = vadd.f32 %v2903_v63, %v414_v51  ;;  %v1118_v21 = vadd.f32 %v2911_v5, %v412_v20  ;;  %v419_v23 = vld [vmem:[#allocation2 + $0x1a0] sm:$0xff]  ;;  %v425_v56 = vld [vmem:[#allocation2 + $0x1d0] sm:$0xff] }
 0x14a   : > { %v1651_v8 = vadd.f32 %v1650_v40, %v1649_v42  ;;  %1184 = vst.msk [vmem:[#allocation2 + $0x170] sm:$0xff] %vm302_vm1, %v1119_v14  ;;  %v1123_v37 = vadd.f32 %v2934_v39, %v417_v25  ;;  %v426_v42 = vld [vmem:[#allocation2 + $0x1d8] sm:$0xff]  ;;  %v1121_v58 = vadd.f32 %v2941_v50, %v415_v0  ;;  %v1124_v63 = vadd.f32 %v2945_v59, %v418_v16  ;;  %v424_v47 = vld [vmem:[#allocation2 + $0x1c8] sm:$0xff]  ;;  %v429_v51 = vld [vmem:[#allocation2 + $0x1f0] sm:$0xff] }
 0x14b   : > { %v1850_v48 = vadd.f32 %v1849_v28, %v1848_v30  ;;  %v1853_v28 = vsel %vm302_vm1, %v1759_v38, 0.0  ;;  %v423_v30 = vld [vmem:[#allocation2 + $0x1c0] sm:$0xff]  ;;  %1182 = vst.msk [vmem:[#allocation2 + $0x160] sm:$0xff] %vm302_vm1, %v1117_v22  ;;  %1185 = vst.msk [vmem:[#allocation2 + $0x178] sm:$0xff] %vm302_vm1, %v1120_v10  ;;  %v1122_v5 = vadd.f32 %v2950_v2, %v416_v11  ;;  %v1127_v38 = vadd.f32 %v2964_v43, %v421_v17 }
 0x14c   : > { %v1653_v54 = vadd.f32 %v1652_v44, %v1651_v8  ;;  %1183 = vst.msk [vmem:[#allocation2 + $0x168] sm:$0xff] %vm302_vm1, %v1118_v21  ;;  %1188 = vst.msk [vmem:[#allocation2 + $0x190] sm:$0xff] %vm302_vm1, %v1123_v37  ;;  %v1125_v40 = vadd.f32 %v2972_v55, %v419_v23  ;;  %v1128_v60 = vadd.f32 %v2978_v62, %v422_v24  ;;  %v427_v25 = vld [vmem:[#allocation2 + $0x1e0] sm:$0xff]  ;;  %v428_v8 = vld [vmem:[#allocation2 + $0x1e8] sm:$0xff]  ;;  %v1664_v21 = vsel %vm302_vm1, %v3036_v27, 0.0 }
 0x14d   : > { %v1852_v18 = vadd.f32 %v1851_v1, %v1850_v48  ;;  %v430_v1 = vld [vmem:[#allocation2 + $0x1f8] sm:$0xff]  ;;  %1186 = vst.msk [vmem:[#allocation2 + $0x180] sm:$0xff] %vm302_vm1, %v1121_v58  ;;  %1189 = vst.msk [vmem:[#allocation2 + $0x198] sm:$0xff] %vm302_vm1, %v1124_v63  ;;  %v1126_v50 = vadd.f32 %v2984_v7, %v420_v19  ;;  %v1131_v59 = vadd.f32 %v3007_v46, %v425_v56  ;;  %v1861_v48 = vsel %vm302_vm1, %v3125_v45, 0.0 }
 0x14e   : > { %v1655_v39 = vadd.f32 %v1654_v29, %v1653_v54  ;;  %1187 = vst.msk [vmem:[#allocation2 + $0x188] sm:$0xff] %vm302_vm1, %v1122_v5  ;;  %1192 = vst.msk [vmem:[#allocation2 + $0x1b0] sm:$0xff] %vm302_vm1, %v1127_v38  ;;  %v1129_v2 = vadd.f32 %v3013_v33, %v423_v30  ;;  %v1132_v43 = vadd.f32 %v3018_v6, %v426_v42  ;;  %v1666_v19 = vsel %vm302_vm1, %v2883_v49, 0.0 }
 0x14f   : > { %v1854_v20 = vadd.f32 %v1853_v28, %v1852_v18  ;;  %1190 = vst.msk [vmem:[#allocation2 + $0x1a0] sm:$0xff] %vm302_vm1, %v1125_v40  ;;  %1193 = vst.msk [vmem:[#allocation2 + $0x1b8] sm:$0xff] %vm302_vm1, %v1128_v60  ;;  %v1130_v29 = vadd.f32 %v3026_v4, %v424_v47  ;;  %v1135_v0 = vadd.f32 %v3051_v52, %v429_v51  ;;  %v1668_v38 = vsel %vm302_vm1, %v3016_v3, 0.0 }
 0x150   : > { %v1657_v62 = vadd.f32 %v1656_v57, %v1655_v39  ;;  %v1764_v7 = vmul.f32 %v2889_v53, %v2889_v53  ;;  %1191 = vst.msk [vmem:[#allocation2 + $0x1a8] sm:$0xff] %vm302_vm1, %v1126_v50  ;;  %1196 = vst.msk [vmem:[#allocation2 + $0x1d0] sm:$0xff] %vm302_vm1, %v1131_v59  ;;  %v1133_v46 = vadd.f32 %v3059_v61, %v427_v25  ;;  %v1660_v57 = vsel %vm302_vm1, %v2851_v9, 0.0 }
 0x151   : > { %v1856_v55 = vadd.f32 %v3119_v32, %v1854_v20  ;;  %1194 = vst.msk [vmem:[#allocation2 + $0x1c0] sm:$0xff] %vm302_vm1, %v1129_v2  ;;  %1197 = vst.msk [vmem:[#allocation2 + $0x1d8] sm:$0xff] %vm302_vm1, %v1132_v43  ;;  %v1136_v33 = vadd.f32 %v3064_v41, %v430_v1  ;;  %v1134_v6 = vadd.f32 %v3069_v15, %v428_v8  ;;  %v1859_v32 = vsel %vm302_vm1, %v3085_v35, 0.0  ;;  %v3192_v41 = vld [vmem:[#allocation2 + $0x170] sm:$0xff] }
 0x152   : > { %v1659_v4 = vadd.f32 %v3079_v12, %v1657_v62  ;;  %1195 = vst.msk [vmem:[#allocation2 + $0x1c8] sm:$0xff] %vm302_vm1, %v1130_v29  ;;  %1200 = vst.msk [vmem:[#allocation2 + $0x1f0] sm:$0xff] %vm302_vm1, %v1135_v0  ;;  %v1662_v61 = vsel %vm302_vm1, %v2889_v53, 0.0  ;;  %v2248_v35 = vpack.c.bf16 %v3192_v41, %v3192_v41  ;;  %v3201_v9 = vld [vmem:[#allocation2 + $0x178] sm:$0xff]  ;;  %v1863_v14 = vsel %vm302_vm1, %v1764_v7, 0.0 }
 0x153   : > { %v1858_v52 = vadd.f32 %v3133_v31, %v1856_v55  ;;  %1198 = vst.msk [vmem:[#allocation2 + $0x1e0] sm:$0xff] %vm302_vm1, %v1133_v46  ;;  %1201 = vst.msk [vmem:[#allocation2 + $0x1f8] sm:$0xff] %vm302_vm1, %v1136_v33  ;;  %v3199_v31 = vld [vmem:[#allocation2 + $0x160] sm:$0xff]  ;;  %v3203_v53 = vld [vmem:[#allocation2 + $0x168] sm:$0xff]  ;;  %v1765_v16 = vmul.f32 %v3036_v27, %v3036_v27  ;;  %v2249_v22 = vpack.c.bf16 %v3201_v9, %v3201_v9  ;;  %v1670_v47 = vsel %vm302_vm1, %v3098_v34, 0.0 }
 0x154   : > { %1199 = vst.msk [vmem:[#allocation2 + $0x1e8] sm:$0xff] %vm302_vm1, %v1134_v6  ;;  %v1661_v12 = vadd.f32 %v1660_v57, %v1659_v4  ;;  %v2246_v11 = vpack.c.bf16 %v3199_v31, %v3199_v31  ;;  %v3216_v10 = vld [vmem:[#allocation2 + $0x190] sm:$0xff]  ;;  %v1766_v45 = vmul.f32 %v2883_v49, %v2883_v49  ;;  %v2247_v23 = vpack.c.bf16 %v3203_v53, %v3203_v53  ;;  %v3226_v24 = vld [vmem:[#allocation2 + $0x180] sm:$0xff]  ;;  %v3232_v54 = vld [vmem:[#allocation2 + $0x198] sm:$0xff] }
 0x155   : > { %v1860_v15 = vadd.f32 %v1859_v32, %v1858_v52  ;;  %1572 = vst.msk [vmem:[%s2579_s9 + $0xb8] sm:$0xf] %vm1525_vm3, %v2248_v35  ;;  %1573 = vst.msk [vmem:[%s2579_s9 + $0xbc] sm:$0xf] %vm1525_vm3, %v2249_v22  ;;  %v1767_v27 = vmul.f32 %v3016_v3, %v3016_v3  ;;  %v1865_v37 = vsel %vm302_vm1, %v1765_v16, 0.0  ;;  %v1768_v56 = vmul.f32 %v3098_v34, %v3098_v34  ;;  %v3245_v63 = vld [vmem:[#allocation2 + $0x188] sm:$0xff] }
 0x156   : > { %v1663_v17 = vadd.f32 %v1662_v61, %v1661_v12  ;;  %1570 = vst.msk [vmem:[%s2579_s9 + $0xb0] sm:$0xf] %vm1525_vm3, %v2246_v11  ;;  %1571 = vst.msk [vmem:[%s2579_s9 + $0xb4] sm:$0xf] %vm1525_vm3, %v2247_v23  ;;  %v2252_v49 = vpack.c.bf16 %v3216_v10, %v3216_v10  ;;  %v2250_v58 = vpack.c.bf16 %v3226_v24, %v3226_v24  ;;  %v1867_v5 = vsel %vm302_vm1, %v1766_v45, 0.0  ;;  %v3256_v39 = vld [vmem:[#allocation2 + $0x1b0] sm:$0xff] }
 0x157   : > { %v1862_v44 = vadd.f32 %v1861_v48, %v1860_v15  ;;  %v2253_v51 = vpack.c.bf16 %v3232_v54, %v3232_v54  ;;  %v3260_v60 = vld [vmem:[#allocation2 + $0x1a0] sm:$0xff]  ;;  %v1869_v25 = vsel %vm302_vm1, %v1767_v27, 0.0  ;;  %v1871_v3 = vsel %vm302_vm1, %v1768_v56, 0.0  ;;  %v3272_v2 = vld [vmem:[#allocation2 + $0x1b8] sm:$0xff]  ;;  %v3282_v29 = vld [vmem:[#allocation2 + $0x1a8] sm:$0xff] }
 0x158   : > { %v1665_v18 = vadd.f32 %v1664_v21, %v1663_v17  ;;  %1576 = vst.msk [vmem:[%s2579_s9 + $0xc8] sm:$0xf] %vm1525_vm3, %v2252_v49  ;;  %1574 = vst.msk [vmem:[%s2579_s9 + $0xc0] sm:$0xf] %vm1525_vm3, %v2250_v58  ;;  %v1769_v34 = vmul.f32 %v3113_v26, %v3113_v26  ;;  %v2251_v1 = vpack.c.bf16 %v3245_v63, %v3245_v63  ;;  %v1672_v55 = vsel %vm302_vm1, %v3113_v26, 0.0  ;;  %v3288_v33 = vld [vmem:[#allocation2 + $0x1d0] sm:$0xff] }
 0x159   : > { %v1864_v28 = vadd.f32 %v1863_v14, %v1862_v44  ;;  %1577 = vst.msk [vmem:[%s2579_s9 + $0xcc] sm:$0xf] %vm1525_vm3, %v2253_v51  ;;  %v2256_v59 = vpack.c.bf16 %v3256_v39, %v3256_v39  ;;  %v1770_v43 = vmul.f32 %v3040_v36, %v3040_v36  ;;  %v2254_v62 = vpack.c.bf16 %v3260_v60, %v3260_v60  ;;  %v3301_v61 = vld [vmem:[#allocation2 + $0x1c0] sm:$0xff]  ;;  %v3312_v14 = vld [vmem:[#allocation2 + $0x1d8] sm:$0xff]  ;;  %v3316_v17 = vld [vmem:[#allocation2 + $0x1c8] sm:$0xff] }
 0x15a   : > { %v1667_v30 = vadd.f32 %v1666_v19, %v1665_v18  ;;  %1575 = vst.msk [vmem:[%s2579_s9 + $0xc4] sm:$0xf] %vm1525_vm3, %v2251_v1  ;;  %v1674_v0 = vsel %vm302_vm1, %v3040_v36, 0.0  ;;  %v1771_v26 = vmul.f32 %v3102_v13, %v3102_v13  ;;  %v1873_v6 = vsel %vm302_vm1, %v1769_v34, 0.0  ;;  %v3328_v19 = vld [vmem:[#allocation2 + $0x1f0] sm:$0xff] }
 0x15b   : > { %v1866_v42 = vadd.f32 %v1865_v37, %v1864_v28  ;;  %1580 = vst.msk [vmem:[%s2579_s9 + $0xd8] sm:$0xf] %vm1525_vm3, %v2256_v59  ;;  %v1772_v4 = vmul.f32 %v3199_v31, %v3199_v31  ;;  %1578 = vst.msk [vmem:[%s2579_s9 + $0xd0] sm:$0xf] %vm1525_vm3, %v2254_v62  ;;  %v2257_v36 = vpack.c.bf16 %v3272_v2, %v3272_v2  ;;  %v1875_v15 = vsel %vm302_vm1, %v1770_v43, 0.0  ;;  %v3338_v37 = vld [vmem:[#allocation2 + $0x1e0] sm:$0xff] }
 0x15c   : > { %v1669_v40 = vadd.f32 %v1668_v38, %v1667_v30  ;;  %v2255_v57 = vpack.c.bf16 %v3282_v29, %v3282_v29  ;;  %v1676_v12 = vsel %vm302_vm1, %v3102_v13, 0.0  ;;  %v1678_v35 = vsel %vm302_vm1, %v3199_v31, 0.0 }
 0x15d   : > { %v1868_v20 = vadd.f32 %v1867_v5, %v1866_v42  ;;  %1581 = vst.msk [vmem:[%s2579_s9 + $0xdc] sm:$0xf] %vm1525_vm3, %v2257_v36  ;;  %v2260_v48 = vpack.c.bf16 %v3288_v33, %v3288_v33  ;;  %v1877_v44 = vsel %vm302_vm1, %v1771_v26, 0.0  ;;  %v1879_v13 = vsel %vm302_vm1, %v1772_v4, 0.0  ;;  %v3344_v42 = vld [vmem:[#allocation2 + $0x1f8] sm:$0xff] }
 0x15e   : > { %v1671_v8 = vadd.f32 %v1670_v47, %v1669_v40  ;;  %1579 = vst.msk [vmem:[%s2579_s9 + $0xd4] sm:$0xf] %vm1525_vm3, %v2255_v57  ;;  %v1773_v31 = vmul.f32 %v3203_v53, %v3203_v53  ;;  %v2258_v22 = vpack.c.bf16 %v3301_v61, %v3301_v61  ;;  %v2261_v23 = vpack.c.bf16 %v3312_v14, %v3312_v14 }
 0x15f   : > { %v1870_v50 = vadd.f32 %v1869_v25, %v1868_v20  ;;  %1584 = vst.msk [vmem:[%s2579_s9 + $0xe8] sm:$0xf] %vm1525_vm3, %v2260_v48  ;;  %v1774_v28 = vmul.f32 %v3192_v41, %v3192_v41  ;;  %v1680_v18 = vsel %vm302_vm1, %v3203_v53, 0.0  ;;  %v2259_v27 = vpack.c.bf16 %v3316_v17, %v3316_v17  ;;  %v3357_v20 = vld [vmem:[#allocation2 + $0x1e8] sm:$0xff] }
 0x160   : > { %v1673_v46 = vadd.f32 %v1672_v55, %v1671_v8  ;;  %1582 = vst.msk [vmem:[%s2579_s9 + $0xe0] sm:$0xf] %vm1525_vm3, %v2258_v22  ;;  %v1682_v56 = vsel %vm302_vm1, %v3192_v41, 0.0  ;;  %1585 = vst.msk [vmem:[%s2579_s9 + $0xec] sm:$0xf] %vm1525_vm3, %v2261_v23  ;;  %v1775_v53 = vmul.f32 %v3201_v9, %v3201_v9  ;;  %v1881_v58 = vsel %vm302_vm1, %v1773_v31, 0.0 }
 0x161   : > { %v1872_v7 = vadd.f32 %v1871_v3, %v1870_v50  ;;  %v1776_v5 = vmul.f32 %v3226_v24, %v3226_v24  ;;  %1583 = vst.msk [vmem:[%s2579_s9 + $0xe4] sm:$0xf] %vm1525_vm3, %v2259_v27  ;;  %v2264_v41 = vpack.c.bf16 %v3328_v19, %v3328_v19  ;;  %v2262_v51 = vpack.c.bf16 %v3338_v37, %v3338_v37 }
 0x162   : > { %v1675_v52 = vadd.f32 %v1674_v0, %v1673_v46  ;;  %v1883_v40 = vsel %vm302_vm1, %v1774_v28, 0.0  ;;  %v1684_v25 = vsel %vm302_vm1, %v3201_v9, 0.0  ;;  %v1686_v3 = vsel %vm302_vm1, %v3226_v24, 0.0 }
 0x163   : > { %v1874_v32 = vadd.f32 %v1873_v6, %v1872_v7  ;;  %1588 = vst.msk [vmem:[%s2579_s9 + $0xf8] sm:$0xf] %vm1525_vm3, %v2264_v41  ;;  %v2265_v34 = vpack.c.bf16 %v3344_v42, %v3344_v42  ;;  %1586 = vst.msk [vmem:[%s2579_s9 + $0xf0] sm:$0xf] %vm1525_vm3, %v2262_v51  ;;  %v1885_v50 = vsel %vm302_vm1, %v1775_v53, 0.0  ;;  %v1887_v59 = vsel %vm302_vm1, %v1776_v5, 0.0 }
 0x164   : > { %v1677_v11 = vadd.f32 %v1676_v12, %v1675_v52  ;;  %v1777_v9 = vmul.f32 %v3245_v63, %v3245_v63  ;;  %v2263_v24 = vpack.c.bf16 %v3357_v20, %v3357_v20  ;;  %v1778_v62 = vmul.f32 %v3216_v10, %v3216_v10 }
 0x165   : > { %v1876_v16 = vadd.f32 %v1875_v15, %v1874_v32  ;;  %1589 = vst.msk [vmem:[%s2579_s9 + $0xfc] sm:$0xf] %vm1525_vm3, %v2265_v34  ;;  %v1688_v0 = vsel %vm302_vm1, %v3245_v63, 0.0  ;;  %v1690_v26 = vsel %vm302_vm1, %v3216_v10, 0.0  ;;  %v1779_v6 = vmul.f32 %v3232_v54, %v3232_v54 }
 0x166   : > { %v1679_v45 = vadd.f32 %v1678_v35, %v1677_v11  ;;  %1587 = vst.msk [vmem:[%s2579_s9 + $0xf4] sm:$0xf] %vm1525_vm3, %v2263_v24  ;;  %v1889_v4 = vsel %vm302_vm1, %v1777_v9, 0.0  ;;  %v1780_v36 = vmul.f32 %v3260_v60, %v3260_v60  ;;  %v1891_v57 = vsel %vm302_vm1, %v1778_v62, 0.0 }
 0x167   : > { %v1878_v21 = vadd.f32 %v1877_v44, %v1876_v16  ;;  %v1692_v63 = vsel %vm302_vm1, %v3232_v54, 0.0  ;;  %v1694_v15 = vsel %vm302_vm1, %v3260_v60, 0.0  ;;  %v1893_v35 = vsel %vm302_vm1, %v1779_v6, 0.0 }
 0x168   : > { %v1681_v30 = vadd.f32 %v1680_v18, %v1679_v45  ;;  %v1895_v48 = vsel %vm302_vm1, %v1780_v36, 0.0  ;;  %v1781_v16 = vmul.f32 %v3282_v29, %v3282_v29  ;;  %v1696_v54 = vsel %vm302_vm1, %v3282_v29, 0.0 }
 0x169   : > { %v1880_v49 = vadd.f32 %v1879_v13, %v1878_v21  ;;  %v1782_v13 = vmul.f32 %v3256_v39, %v3256_v39  ;;  %v1698_v60 = vsel %vm302_vm1, %v3256_v39, 0.0  ;;  %v1783_v45 = vmul.f32 %v3272_v2, %v3272_v2 }
 0x16a   : > { %v1683_v38 = vadd.f32 %v1682_v56, %v1681_v30  ;;  %v1897_v21 = vsel %vm302_vm1, %v1781_v16, 0.0  ;;  %v1784_v23 = vmul.f32 %v3301_v61, %v3301_v61  ;;  %v1700_v29 = vsel %vm302_vm1, %v3272_v2, 0.0 }
 0x16b   : > { %v1882_v47 = vadd.f32 %v1881_v58, %v1880_v49  ;;  %v1899_v27 = vsel %vm302_vm1, %v1782_v13, 0.0  ;;  %v1702_v56 = vsel %vm302_vm1, %v3301_v61, 0.0  ;;  %v1901_v30 = vsel %vm302_vm1, %v1783_v45, 0.0 }
 0x16c   : > { %v1685_v8 = vadd.f32 %v1684_v25, %v1683_v38  ;;  %v1903_v53 = vsel %vm302_vm1, %v1784_v23, 0.0  ;;  %v1785_v58 = vmul.f32 %v3316_v17, %v3316_v17  ;;  %v1786_v38 = vmul.f32 %v3288_v33, %v3288_v33 }
 0x16d   : > { %v1884_v1 = vadd.f32 %v1883_v40, %v1882_v47  ;;  %v1704_v2 = vsel %vm302_vm1, %v3316_v17, 0.0  ;;  %v1706_v61 = vsel %vm302_vm1, %v3288_v33, 0.0  ;;  %v1787_v40 = vmul.f32 %v3312_v14, %v3312_v14 }
 0x16e   : > { %v1687_v43 = vadd.f32 %v1686_v3, %v1685_v8  ;;  %v1905_v25 = vsel %vm302_vm1, %v1785_v58, 0.0  ;;  %v1788_v3 = vmul.f32 %v3338_v37, %v3338_v37  ;;  %v1907_v8 = vsel %vm302_vm1, %v1786_v38, 0.0 }
 0x16f   : > { %v1886_v55 = vadd.f32 %v1885_v50, %v1884_v1  ;;  %v1708_v17 = vsel %vm302_vm1, %v3312_v14, 0.0  ;;  %v1710_v50 = vsel %vm302_vm1, %v3338_v37, 0.0  ;;  %v1909_v9 = vsel %vm302_vm1, %v1787_v40, 0.0 }
 0x170   : > { %v1689_v46 = vadd.f32 %v1688_v0, %v1687_v43  ;;  %v1911_v24 = vsel %vm302_vm1, %v1788_v3, 0.0  ;;  %v1789_v43 = vmul.f32 %v3357_v20, %v3357_v20  ;;  %v1790_v0 = vmul.f32 %v3328_v19, %v3328_v19 }
 0x171   : > { %v1888_v7 = vadd.f32 %v1887_v59, %v1886_v55  ;;  %v1712_v14 = vsel %vm302_vm1, %v3357_v20, 0.0  ;;  %v1714_v37 = vsel %vm302_vm1, %v3328_v19, 0.0 }
 0x172   : > { %v1691_v52 = vadd.f32 %v1690_v26, %v1689_v46  ;;  %v1791_v26 = vmul.f32 %v3344_v42, %v3344_v42  ;;  %v1913_v6 = vsel %vm302_vm1, %v1789_v43, 0.0 }
 0x173   : > { %v1890_v32 = vadd.f32 %v1889_v4, %v1888_v7 }
 0x174   : > { %v1693_v10 = vadd.f32 %v1692_v63, %v1691_v52  ;;  %v1915_v52 = vsel %vm302_vm1, %v1790_v0, 0.0  ;;  %v1917_v20 = vsel %vm302_vm1, %v1791_v26, 0.0 }
 0x175   : > { %v1892_v12 = vadd.f32 %v1891_v57, %v1890_v32  ;;  %v1716_v32 = vsel %vm302_vm1, %v3344_v42, 0.0 }
 0x176   : > { %v1695_v11 = vadd.f32 %v1694_v15, %v1693_v10 }
 0x177   : > { %v1894_v44 = vadd.f32 %v1893_v35, %v1892_v12 }
 0x178   : > { %v1697_v22 = vadd.f32 %v1696_v54, %v1695_v11  ;;  %v1590_v54 = vld [vmem:[%s3483_s3] sm:$0x1] }
 0x179   : > { %v1896_v31 = vadd.f32 %v1895_v48, %v1894_v44 }
 0x17a   : > { %v1699_v28 = vadd.f32 %v1698_v60, %v1697_v22  ;;  %v1727_v22 = vld [vmem:[%s3484_s4] sm:$0x1] }
 0x17b   : > { %v1898_v18 = vadd.f32 %v1897_v21, %v1896_v31 }
 0x17c   : > { %v1701_v39 = vadd.f32 %v1700_v29, %v1699_v28 }
 0x17d   : > { %v1900_v49 = vadd.f32 %v1899_v27, %v1898_v18 }
 0x17e   : > { %v1703_v5 = vadd.f32 %v1702_v56, %v1701_v39 }
 0x17f   : > { %v1902_v41 = vadd.f32 %v1901_v30, %v1900_v49 }
 0x180   : > { %v1705_v51 = vadd.f32 %v1704_v2, %v1703_v5 }
 0x181   : > { %v1904_v47 = vadd.f32 %v1903_v53, %v1902_v41 }
 0x182   : > { %v1707_v34 = vadd.f32 %v1706_v61, %v1705_v51 }
 0x183   : > { %v1906_v1 = vadd.f32 %v1905_v25, %v1904_v47 }
 0x184   : > { %v1709_v33 = vadd.f32 %v1708_v17, %v1707_v34 }
 0x185   : > { %v1908_v59 = vadd.f32 %v1907_v8, %v1906_v1 }
 0x186   : > { %v1711_v55 = vadd.f32 %v1710_v50, %v1709_v33 }
 0x187   : > { %v1910_v62 = vadd.f32 %v1909_v9, %v1908_v59 }
 0x188   : > { %v1713_v46 = vadd.f32 %v1712_v14, %v1711_v55 }
 0x189   : > { %v1912_v7 = vadd.f32 %v1911_v24, %v1910_v62 }
 0x18a   : > { %v1715_v4 = vadd.f32 %v1714_v37, %v1713_v46 }
 0x18b   : > { %v1914_v36 = vadd.f32 %v1913_v6, %v1912_v7 }
 0x18c   : > { %v1717_v57 = vadd.f32 %v1716_v32, %v1715_v4 }
 0x18d   : > { %v1916_v63 = vadd.f32 %v1915_v52, %v1914_v36 }
 0x18e   : > { %v1718_v15 = vrot.slane %v1717_v57, 4 }
 0x18f   : > { %v1918_v12 = vadd.f32 %v1917_v20, %v1916_v63 }
 0x190   : > { %v1719_v10 = vadd.f32 %v1718_v15, %v1717_v57 }
 0x191   : > { %v1919_v19 = vrot.slane %v1918_v12, 4 }
 0x192   : > { %v1720_v35 = vrot.slane %v1719_v10, 2 }
 0x193   : > { %v1920_v48 = vadd.f32 %v1919_v19, %v1918_v12 }
 0x194   : > { %v1721_v16 = vadd.f32 %v1720_v35, %v1719_v10 }
 0x195   : > { %v1921_v11 = vrot.slane %v1920_v48, 2 }
 0x196   : > { %v1722_v44 = vrot.slane %v1721_v16, 1 }
 0x197   : > { %v1922_v13 = vadd.f32 %v1921_v11, %v1920_v48 }
 0x198   : > { %v1723_v31 = vadd.f32 %v1722_v44, %v1721_v16 }
 0x199   : > { %v1923_v42 = vrot.slane %v1922_v13, 1 }
 0x19a   : > { %v1724_v60 = vadd.f32 %v1723_v31, %v1590_v54 }
 0x19b   : > { %v1924_v45 = vadd.f32 %v1923_v42, %v1922_v13 }
 0x19c   : > { %1726 = vst.msk [vmem:[%s3483_s3] sm:$0x1] %vm1725_vm4, %v1724_v60 }
 0x19d   : > { %v1925_v21 = vadd.f32 %v1924_v45, %v1727_v22 }
 0x19f   : > { %1926 = vst.msk [vmem:[%s3484_s4] sm:$0x1] %vm1725_vm4, %v1925_v21 }
 0x1a0 PF: > { %s15_s19 = sadd.s32 1, %s2498_s19   ;;  %s3485_s15 = smov %s2490_s17 }
 0x1a1   : > { %p12_p10 = scmp.ge.s32.totalorder %s15_s19, 18   ;;  %s3486_s16 = smov %s2494_s18 }
 0x1a2   : > { %s3487_s17 = smov %s3490_s20  ;;  %s3488_s18 = smov %s3494_s21 }
 0x1a3   :  { %14 = sbr.rel (!%p12_p10) target bundleno = 3 (0x3), region = 89 }

// kernel: tile.82
= control target key start
LH: loop header
LB: loop body
LE: loop exit
PB: predicated region body
PF: predicated region fallthrough
CT: control target
= control target key end

     0   :  { %s28_s0 = inlined_call_operand.vmem [shape: f32[8], index: 0, kind: input, shape index: {}]   ;;  %s29_s1 = inlined_call_operand.vmem [shape: f32[16,8], index: 1, kind: output, shape index: {}]  }
   0x1   :  { %v4_v0 = vld [vmem:[%s28_s0] ss:$0 sm:$0xff] }
   0x2   :  { %5 = vst [vmem:[%s29_s1] sm:$0xff] %v4_v0  ;;  %8 = vst [vmem:[%s29_s1 + $0x8] sm:$0xff] %v4_v0 }

// kernel: tile.83
= control target key start
LH: loop header
LB: loop body
LE: loop exit
PB: predicated region body
PF: predicated region fallthrough
CT: control target
= control target key end

     0   :  { %s131_s10 = smov 120   ;;  %s132_s11 = smov 104   ;;  %vm3_vm0 = vcmask 64512   ;;  %vm9_vm1 = vcmask 1048512   ;;  %vm15_vm2 = vcmask 982912   ;;  %vm21_vm3 = vcmask 917312   ;;  %s207_s0 = inlined_call_operand.vmem [shape: f32[16,8], index: 0, kind: input, shape index: {}]   ;;  %s208_s1 = inlined_call_operand.vmem [shape: f32[1,128], index: 1, kind: output, shape index: {}]  }
   0x1   :  { %v101_v0 = vld [vmem:[%s207_s0 + $0xf] sm:$0x1]   ;;  %v103_v1 = vld [vmem:[%s207_s0 + $0xd] sm:$0x1]   ;;  %v102_v2 = vld [vmem:[%s207_s0 + $0xe] sm:$0x1]  }
   0x2   :  { %7 = vrot.lane.b32.xlu0 %v101_v0, %s131_s10  ;;  %19 = vrot.lane.b32.xlu1 %v103_v1, %s132_s11  ;;  %v104_v3 = vld [vmem:[%s207_s0 + $0xc] sm:$0x1]   ;;  %s133_s16 = smov 112   ;;  %s134_s17 = smov 96   ;;  %v105_v4 = vld [vmem:[%s207_s0 + $0xb] sm:$0x1]  }
   0x3   :  { %v106_v5 = vld [vmem:[%s207_s0 + $0xa] sm:$0x1]   ;;  %v2_v6 = vld [vmem:[%s207_s0] sm:$0x1]   ;;  %s135_s24 = smov 88   ;;  %s136_s25 = smov 80  }
   0x4   :  { %4 = vst.msk [vmem:[#allocation0] sm:$0x1] %vm3_vm0, %v2_v6   ;;  %v107_v7 = vld [vmem:[%s207_s0 + $0x9] sm:$0x1]   ;;  %v108_v8 = vld [vmem:[%s207_s0 + $0x8] sm:$0x1]  }
   0x5   :  { %s137_s30 = smov 72   ;;  %s138_s2 = smov 64   ;;  %v109_v9 = vld [vmem:[%s207_s0 + $0x7] sm:$0x1]   ;;  %v110_v10 = vld [vmem:[%s207_s0 + $0x6] sm:$0x1]  }
   0x6   :  { %13 = vrot.lane.b32.xlu0 %v102_v2, %s133_s16  ;;  %25 = vrot.lane.b32.xlu1 %v104_v3, %s134_s17  ;;  %s139_s7 = smov 56   ;;  %s140_s8 = smov 48   ;;  %v111_v11 = vld [vmem:[%s207_s0 + $0x5] sm:$0x1]   ;;  %v112_v12 = vld [vmem:[%s207_s0 + $0x4] sm:$0x1]  }
   0x7   :  { %s141_s13 = smov 40   ;;  %s142_s14 = smov 32   ;;  %v113_v13 = vld [vmem:[%s207_s0 + $0x3] sm:$0x1]   ;;  %v114_v14 = vld [vmem:[%s207_s0 + $0x2] sm:$0x1]  }
   0x8   :  { %s143_s19 = smov 24   ;;  %s144_s20 = smov 16   ;;  %v115_v15 = vld [vmem:[%s207_s0 + $0x1] sm:$0x1]   ;;  %vm27_vm4 = vcmask 851712   ;;  %vm33_vm5 = vcmask 786112  }
   0x9   :  { %s145_s0 = smov 8   ;;  %vm39_vm6 = vcmask 720512   ;;  %vm45_vm7 = vcmask 654912   ;;  %vm51_vm8 = vcmask 589312   ;;  %vm57_vm9 = vcmask 523712  }
   0xa   :  { %31 = vrot.lane.b32.xlu0 %v105_v4, %s135_s24  ;;  %37 = vrot.lane.b32.xlu1 %v106_v5, %s136_s25  ;;  %vm63_vm10 = vcmask 458112   ;;  %vm69_vm11 = vcmask 392512   ;;  %vm75_vm12 = vcmask 326912   ;;  %vm81_vm13 = vcmask 261312  }
   0xb   :  { %vm87_vm14 = vcmask 195712   ;;  %vm93_vm15 = vcmask 130112  }
   0xe   :  { %43 = vrot.lane.b32.xlu0 %v107_v7, %s137_s30  ;;  %49 = vrot.lane.b32.xlu1 %v108_v8, %s138_s2 }
  0x12   :  { %55 = vrot.lane.b32.xlu0 %v109_v9, %s139_s7  ;;  %61 = vrot.lane.b32.xlu1 %v110_v10, %s140_s8 }
  0x16   :  { %67 = vrot.lane.b32.xlu0 %v111_v11, %s141_s13  ;;  %73 = vrot.lane.b32.xlu1 %v112_v12, %s142_s14 }
  0x1a   :  { %79 = vrot.lane.b32.xlu0 %v113_v13, %s143_s19  ;;  %85 = vrot.lane.b32.xlu1 %v114_v14, %s144_s20 }
  0x1e   :  { %91 = vrot.lane.b32.xlu0 %v115_v15, %s145_s0 }
  0x74   :  { %v8_v16 = vpop.permute.xlu0 %7   ;;  %v20_v17 = vpop.permute.xlu1 %19  }
  0x75   :  { %10 = vst.msk [vmem:[#allocation0] sm:$0x1] %vm9_vm1, %v8_v16  }
  0x78   :  { %v14_v18 = vpop.permute.xlu0 %13   ;;  %v26_v19 = vpop.permute.xlu1 %25  }
  0x79   :  { %16 = vst.msk [vmem:[#allocation0] sm:$0x1] %vm15_vm2, %v14_v18  }
  0x7a   :  { %22 = vst.msk [vmem:[#allocation0] sm:$0x1] %vm21_vm3, %v20_v17  }
  0x7b   :  { %28 = vst.msk [vmem:[#allocation0] sm:$0x1] %vm27_vm4, %v26_v19  }
  0x7c   :  { %v32_v20 = vpop.permute.xlu0 %31   ;;  %v38_v21 = vpop.permute.xlu1 %37  }
  0x7d   :  { %34 = vst.msk [vmem:[#allocation0] sm:$0x1] %vm33_vm5, %v32_v20  }
  0x7e   :  { %40 = vst.msk [vmem:[#allocation0] sm:$0x1] %vm39_vm6, %v38_v21  }
  0x80   :  { %v44_v22 = vpop.permute.xlu0 %43   ;;  %v50_v23 = vpop.permute.xlu1 %49  }
  0x81   :  { %46 = vst.msk [vmem:[#allocation0] sm:$0x1] %vm45_vm7, %v44_v22  }
  0x82   :  { %52 = vst.msk [vmem:[#allocation0] sm:$0x1] %vm51_vm8, %v50_v23  }
  0x84   :  { %v56_v24 = vpop.permute.xlu0 %55   ;;  %v62_v25 = vpop.permute.xlu1 %61  }
  0x85   :  { %58 = vst.msk [vmem:[#allocation0] sm:$0x1] %vm57_vm9, %v56_v24  }
  0x86   :  { %64 = vst.msk [vmem:[#allocation0] sm:$0x1] %vm63_vm10, %v62_v25  }
  0x88   :  { %v68_v26 = vpop.permute.xlu0 %67   ;;  %v74_v27 = vpop.permute.xlu1 %73  }
  0x89   :  { %70 = vst.msk [vmem:[#allocation0] sm:$0x1] %vm69_vm11, %v68_v26  }
  0x8a   :  { %76 = vst.msk [vmem:[#allocation0] sm:$0x1] %vm75_vm12, %v74_v27  }
  0x8c   :  { %v80_v28 = vpop.permute.xlu0 %79   ;;  %v86_v29 = vpop.permute.xlu1 %85  }
  0x8d   :  { %82 = vst.msk [vmem:[#allocation0] sm:$0x1] %vm81_vm13, %v80_v28  }
  0x8e   :  { %88 = vst.msk [vmem:[#allocation0] sm:$0x1] %vm87_vm14, %v86_v29  }
  0x90   :  { %v92_v30 = vpop.permute.xlu0 %91  }
  0x91   :  { %94 = vst.msk [vmem:[#allocation0] sm:$0x1] %vm93_vm15, %v92_v30  }
  0x98   :  { %v98_v31 = vld [vmem:[#allocation0] sm:$0x1] }
  0x99   :  { %100 = vst [vmem:[%s208_s1] sm:$0x1] %v98_v31 }

// kernel: netg_forward.20
= control target key start
LH: loop header
LB: loop body
LE: loop exit
PB: predicated region body
PF: predicated region fallthrough
CT: control target
= control target key end

     0   :  { %s1502_s0 = inlined_call_operand.vmem [shape: bf16[512,128], index: 0, kind: input, shape index: {}]   ;;  %s1503_s1 = inlined_call_operand.vmem [shape: f32[1,128], index: 1, kind: input, shape index: {}]   ;;  %s1504_s2 = inlined_call_operand.vmem [shape: f32[1,128], index: 2, kind: input, shape index: {}]   ;;  %s1505_s3 = inlined_call_operand.vmem [shape: bf16[512,128], index: 3, kind: output, shape index: {}]  }
   0x1   :  { %v803_v0 = vld [vmem:[%s1502_s0] sm:$0xff]   ;;  %v1090_v4 = vld [vmem:[%s1502_s0 + $0x8] sm:$0xff]   ;;  %v1091_v5 = vld [vmem:[%s1502_s0 + $0x10] sm:$0xff]  }
   0x2   :  { %v1178_v1 = vld [vmem:[%s1503_s1] ss:$0 sm:$0xff]  ;;  %v804_v2 = vunpack.c.l.bf16 %v803_v0  ;;  %v805_v3 = vunpack.c.h.bf16 %v803_v0  ;;  %v1092_v6 = vld [vmem:[%s1502_s0 + $0x18] sm:$0xff]   ;;  %v808_v8 = vunpack.c.l.bf16 %v1090_v4  ;;  %v809_v9 = vunpack.c.h.bf16 %v1090_v4  ;;  %v1094_v33 = vld [vmem:[%s1502_s0 + $0x28] sm:$0xff]  }
   0x3   :  { %v1192_v7 = vld [vmem:[%s1504_s2] ss:$0 sm:$0xff]  ;;  %v812_v10 = vunpack.c.l.bf16 %v1091_v5  ;;  %v813_v11 = vunpack.c.h.bf16 %v1091_v5  ;;  %v816_v14 = vunpack.c.l.bf16 %v1092_v6  ;;  %v817_v15 = vunpack.c.h.bf16 %v1092_v6  ;;  %v1095_v38 = vld [vmem:[%s1502_s0 + $0x30] sm:$0xff]   ;;  %v1096_v43 = vld [vmem:[%s1502_s0 + $0x38] sm:$0xff]  }
   0x4   :  { %v149_v12 = vmul.f32 %v804_v2, %v1178_v1  ;;  %v150_v13 = vmul.f32 %v805_v3, %v1178_v1  ;;  %v151_v16 = vmul.f32 %v808_v8, %v1178_v1  ;;  %v152_v17 = vmul.f32 %v809_v9, %v1178_v1  ;;  %v1093_v28 = vld [vmem:[%s1502_s0 + $0x20] sm:$0xff]  }
   0x5   :  { %v153_v18 = vmul.f32 %v812_v10, %v1178_v1  ;;  %v154_v19 = vmul.f32 %v813_v11, %v1178_v1  ;;  %v155_v22 = vmul.f32 %v816_v14, %v1178_v1  ;;  %v156_v23 = vmul.f32 %v817_v15, %v1178_v1  ;;  %v1097_v0 = vld [vmem:[%s1502_s0 + $0x40] sm:$0xff]   ;;  %v1098_v11 = vld [vmem:[%s1502_s0 + $0x48] sm:$0xff]  }
   0x6   :  { %v220_v20 = vadd.f32 %v1192_v7, %v149_v12  ;;  %v221_v21 = vadd.f32 %v1192_v7, %v150_v13  ;;  %v222_v24 = vadd.f32 %v1192_v7, %v151_v16  ;;  %v223_v25 = vadd.f32 %v1192_v7, %v152_v17  ;;  %v1099_v16 = vld [vmem:[%s1502_s0 + $0x50] sm:$0xff]  }
   0x7   :  { %v224_v26 = vadd.f32 %v1192_v7, %v153_v18  ;;  %v225_v27 = vadd.f32 %v1192_v7, %v154_v19  ;;  %v226_v31 = vadd.f32 %v1192_v7, %v155_v22  ;;  %v227_v32 = vadd.f32 %v1192_v7, %v156_v23 }
   0x8   :  { %v284_v29 = vmax.f32 %v220_v20, 0.0  ;;  %v285_v30 = vmax.f32 %v221_v21, 0.0  ;;  %v286_v34 = vmax.f32 %v222_v24, 0.0  ;;  %v287_v35 = vmax.f32 %v223_v25, 0.0  ;;  %v1100_v25 = vld [vmem:[%s1502_s0 + $0x58] sm:$0xff]  }
   0x9   :  { %v288_v36 = vmax.f32 %v224_v26, 0.0  ;;  %v289_v37 = vmax.f32 %v225_v27, 0.0  ;;  %v290_v40 = vmax.f32 %v226_v31, 0.0  ;;  %v291_v41 = vmax.f32 %v227_v32, 0.0 }
   0xa   :  { %v933_v39 = vpack.c.bf16 %v285_v30, %v284_v29  ;;  %v820_v42 = vunpack.c.l.bf16 %v1093_v28  ;;  %v938_v44 = vpack.c.bf16 %v287_v35, %v286_v34  ;;  %v821_v46 = vunpack.c.h.bf16 %v1093_v28 }
   0xb   :  { %v943_v45 = vpack.c.bf16 %v289_v37, %v288_v36  ;;  %v824_v47 = vunpack.c.l.bf16 %v1094_v33  ;;  %v948_v48 = vpack.c.bf16 %v291_v41, %v290_v40  ;;  %v825_v50 = vunpack.c.h.bf16 %v1094_v33 }
   0xc   :  { %934 = vst [vmem:[%s1505_s3] sm:$0xff] %v933_v39   ;;  %v157_v49 = vmul.f32 %v820_v42, %v1178_v1  ;;  %v828_v51 = vunpack.c.l.bf16 %v1095_v38  ;;  %1121 = vst [vmem:[%s1505_s3 + $0x8] sm:$0xff] %v938_v44   ;;  %v158_v52 = vmul.f32 %v821_v46, %v1178_v1  ;;  %v829_v54 = vunpack.c.h.bf16 %v1095_v38  ;;  %v1101_v38 = vld [vmem:[%s1502_s0 + $0x60] sm:$0xff]  }
   0xd   :  { %1122 = vst [vmem:[%s1505_s3 + $0x10] sm:$0xff] %v943_v45   ;;  %v159_v53 = vmul.f32 %v824_v47, %v1178_v1  ;;  %v832_v55 = vunpack.c.l.bf16 %v1096_v43  ;;  %1123 = vst [vmem:[%s1505_s3 + $0x18] sm:$0xff] %v948_v48   ;;  %v160_v57 = vmul.f32 %v825_v50, %v1178_v1  ;;  %v833_v59 = vunpack.c.h.bf16 %v1096_v43 }
   0xe   :  { %v228_v56 = vadd.f32 %v1192_v7, %v157_v49  ;;  %v161_v58 = vmul.f32 %v828_v51, %v1178_v1  ;;  %v229_v60 = vadd.f32 %v1192_v7, %v158_v52  ;;  %v162_v62 = vmul.f32 %v829_v54, %v1178_v1  ;;  %v1102_v51 = vld [vmem:[%s1502_s0 + $0x68] sm:$0xff]  }
   0xf   :  { %v230_v61 = vadd.f32 %v1192_v7, %v159_v53  ;;  %v163_v63 = vmul.f32 %v832_v55, %v1178_v1  ;;  %v231_v3 = vadd.f32 %v1192_v7, %v160_v57  ;;  %v164_v5 = vmul.f32 %v833_v59, %v1178_v1 }
  0x10   :  { %v292_v2 = vmax.f32 %v228_v56, 0.0  ;;  %v232_v4 = vadd.f32 %v1192_v7, %v161_v58  ;;  %v293_v6 = vmax.f32 %v229_v60, 0.0  ;;  %v233_v9 = vadd.f32 %v1192_v7, %v162_v62  ;;  %v1103_v60 = vld [vmem:[%s1502_s0 + $0x70] sm:$0xff]  }
  0x11   :  { %v294_v8 = vmax.f32 %v230_v61, 0.0  ;;  %v234_v10 = vadd.f32 %v1192_v7, %v163_v63  ;;  %v295_v12 = vmax.f32 %v231_v3, 0.0  ;;  %v235_v14 = vadd.f32 %v1192_v7, %v164_v5 }
  0x12   :  { %v296_v13 = vmax.f32 %v232_v4, 0.0  ;;  %v836_v15 = vunpack.c.l.bf16 %v1097_v0  ;;  %v953_v17 = vpack.c.bf16 %v293_v6, %v292_v2  ;;  %v297_v18 = vmax.f32 %v233_v9, 0.0  ;;  %v1104_v2 = vld [vmem:[%s1502_s0 + $0x78] sm:$0xff]  }
  0x13   :  { %v298_v19 = vmax.f32 %v234_v10, 0.0  ;;  %v837_v20 = vunpack.c.h.bf16 %v1097_v0  ;;  %v958_v21 = vpack.c.bf16 %v295_v12, %v294_v8  ;;  %v299_v22 = vmax.f32 %v235_v14, 0.0  ;;  %v1105_v12 = vld [vmem:[%s1502_s0 + $0x80] sm:$0xff]  }
  0x14   :  { %v165_v23 = vmul.f32 %v836_v15, %v1178_v1  ;;  %v840_v24 = vunpack.c.l.bf16 %v1098_v11  ;;  %1124 = vst [vmem:[%s1505_s3 + $0x20] sm:$0xff] %v953_v17   ;;  %v963_v26 = vpack.c.bf16 %v297_v18, %v296_v13  ;;  %v841_v28 = vunpack.c.h.bf16 %v1098_v11 }
  0x15   :  { %v166_v27 = vmul.f32 %v837_v20, %v1178_v1  ;;  %v844_v29 = vunpack.c.l.bf16 %v1099_v16  ;;  %1125 = vst [vmem:[%s1505_s3 + $0x28] sm:$0xff] %v958_v21   ;;  %v968_v30 = vpack.c.bf16 %v299_v22, %v298_v19  ;;  %v845_v33 = vunpack.c.h.bf16 %v1099_v16 }
  0x16   :  { %v236_v31 = vadd.f32 %v1192_v7, %v165_v23  ;;  %v167_v32 = vmul.f32 %v840_v24, %v1178_v1  ;;  %1126 = vst [vmem:[%s1505_s3 + $0x30] sm:$0xff] %v963_v26   ;;  %v168_v35 = vmul.f32 %v841_v28, %v1178_v1  ;;  %v848_v37 = vunpack.c.l.bf16 %v1100_v25 }
  0x17   :  { %v237_v34 = vadd.f32 %v1192_v7, %v166_v27  ;;  %v169_v36 = vmul.f32 %v844_v29, %v1178_v1  ;;  %1127 = vst [vmem:[%s1505_s3 + $0x38] sm:$0xff] %v968_v30   ;;  %v170_v41 = vmul.f32 %v845_v33, %v1178_v1  ;;  %v849_v42 = vunpack.c.h.bf16 %v1100_v25  ;;  %v1106_v29 = vld [vmem:[%s1502_s0 + $0x88] sm:$0xff]  }
  0x18   :  { %v300_v39 = vmax.f32 %v236_v31, 0.0  ;;  %v238_v40 = vadd.f32 %v1192_v7, %v167_v32  ;;  %v239_v44 = vadd.f32 %v1192_v7, %v168_v35  ;;  %v171_v46 = vmul.f32 %v848_v37, %v1178_v1 }
  0x19   :  { %v301_v43 = vmax.f32 %v237_v34, 0.0  ;;  %v240_v45 = vadd.f32 %v1192_v7, %v169_v36  ;;  %v241_v48 = vadd.f32 %v1192_v7, %v170_v41  ;;  %v172_v49 = vmul.f32 %v849_v42, %v1178_v1  ;;  %v1107_v34 = vld [vmem:[%s1502_s0 + $0x90] sm:$0xff]  }
  0x1a   :  { %v302_v47 = vmax.f32 %v238_v40, 0.0  ;;  %v852_v50 = vunpack.c.l.bf16 %v1101_v38  ;;  %v303_v53 = vmax.f32 %v239_v44, 0.0  ;;  %v242_v55 = vadd.f32 %v1192_v7, %v171_v46 }
  0x1b   :  { %v973_v52 = vpack.c.bf16 %v301_v43, %v300_v39  ;;  %v304_v54 = vmax.f32 %v240_v45, 0.0  ;;  %v305_v56 = vmax.f32 %v241_v48, 0.0  ;;  %v243_v57 = vadd.f32 %v1192_v7, %v172_v49  ;;  %v1108_v43 = vld [vmem:[%s1502_s0 + $0x98] sm:$0xff]  }
  0x1c   :  { %v853_v58 = vunpack.c.h.bf16 %v1101_v38  ;;  %v173_v59 = vmul.f32 %v852_v50, %v1178_v1  ;;  %v978_v61 = vpack.c.bf16 %v303_v53, %v302_v47  ;;  %v306_v62 = vmax.f32 %v242_v55, 0.0 }
  0x1d   :  { %1128 = vst [vmem:[%s1505_s3 + $0x40] sm:$0xff] %v973_v52   ;;  %v856_v63 = vunpack.c.l.bf16 %v1102_v51  ;;  %v857_v0 = vunpack.c.h.bf16 %v1102_v51  ;;  %v983_v3 = vpack.c.bf16 %v305_v56, %v304_v54  ;;  %v307_v4 = vmax.f32 %v243_v57, 0.0  ;;  %v1109_v56 = vld [vmem:[%s1502_s0 + $0xa0] sm:$0xff]  }
  0x1e   :  { %v174_v5 = vmul.f32 %v853_v58, %v1178_v1  ;;  %v244_v6 = vadd.f32 %v1192_v7, %v173_v59  ;;  %1129 = vst [vmem:[%s1505_s3 + $0x48] sm:$0xff] %v978_v61   ;;  %v860_v10 = vunpack.c.l.bf16 %v1103_v60  ;;  %v861_v11 = vunpack.c.h.bf16 %v1103_v60 }
  0x1f   :  { %v175_v8 = vmul.f32 %v856_v63, %v1178_v1  ;;  %v176_v9 = vmul.f32 %v857_v0, %v1178_v1  ;;  %1130 = vst [vmem:[%s1505_s3 + $0x50] sm:$0xff] %v983_v3   ;;  %v988_v13 = vpack.c.bf16 %v307_v4, %v306_v62  ;;  %v864_v16 = vunpack.c.l.bf16 %v1104_v2 }
  0x20   :  { %v245_v14 = vadd.f32 %v1192_v7, %v174_v5  ;;  %v308_v15 = vmax.f32 %v244_v6, 0.0  ;;  %v177_v19 = vmul.f32 %v860_v10, %v1178_v1  ;;  %v178_v20 = vmul.f32 %v861_v11, %v1178_v1 }
  0x21   :  { %v246_v17 = vadd.f32 %v1192_v7, %v175_v8  ;;  %v247_v18 = vadd.f32 %v1192_v7, %v176_v9  ;;  %1131 = vst [vmem:[%s1505_s3 + $0x58] sm:$0xff] %v988_v13   ;;  %v865_v22 = vunpack.c.h.bf16 %v1104_v2  ;;  %v179_v23 = vmul.f32 %v864_v16, %v1178_v1  ;;  %v1110_v2 = vld [vmem:[%s1502_s0 + $0xa8] sm:$0xff]   ;;  %v1111_v16 = vld [vmem:[%s1502_s0 + $0xb0] sm:$0xff]  }
  0x22   :  { %v309_v21 = vmax.f32 %v245_v14, 0.0  ;;  %v868_v24 = vunpack.c.l.bf16 %v1105_v12  ;;  %v248_v27 = vadd.f32 %v1192_v7, %v177_v19  ;;  %v249_v28 = vadd.f32 %v1192_v7, %v178_v20 }
  0x23   :  { %v310_v25 = vmax.f32 %v246_v17, 0.0  ;;  %v311_v26 = vmax.f32 %v247_v18, 0.0  ;;  %v180_v31 = vmul.f32 %v865_v22, %v1178_v1  ;;  %v250_v32 = vadd.f32 %v1192_v7, %v179_v23 }
  0x24   :  { %v993_v30 = vpack.c.bf16 %v309_v21, %v308_v15  ;;  %v869_v33 = vunpack.c.h.bf16 %v1105_v12  ;;  %v312_v36 = vmax.f32 %v248_v27, 0.0  ;;  %v313_v37 = vmax.f32 %v249_v28, 0.0  ;;  %v1112_v21 = vld [vmem:[%s1502_s0 + $0xb8] sm:$0xff]  }
  0x25   :  { %v998_v35 = vpack.c.bf16 %v311_v26, %v310_v25  ;;  %v181_v38 = vmul.f32 %v868_v24, %v1178_v1  ;;  %v251_v39 = vadd.f32 %v1192_v7, %v180_v31  ;;  %v314_v40 = vmax.f32 %v250_v32, 0.0 }
  0x26   :  { %1132 = vst [vmem:[%s1505_s3 + $0x60] sm:$0xff] %v993_v30   ;;  %v182_v41 = vmul.f32 %v869_v33, %v1178_v1  ;;  %v872_v42 = vunpack.c.l.bf16 %v1106_v29  ;;  %v1003_v44 = vpack.c.bf16 %v313_v37, %v312_v36  ;;  %v873_v46 = vunpack.c.h.bf16 %v1106_v29 }
  0x27   :  { %1133 = vst [vmem:[%s1505_s3 + $0x68] sm:$0xff] %v998_v35   ;;  %v252_v45 = vadd.f32 %v1192_v7, %v181_v38  ;;  %v876_v47 = vunpack.c.l.bf16 %v1107_v34  ;;  %v315_v48 = vmax.f32 %v251_v39, 0.0  ;;  %v877_v51 = vunpack.c.h.bf16 %v1107_v34  ;;  %v1113_v34 = vld [vmem:[%s1502_s0 + $0xc0] sm:$0xff]  }
  0x28   :  { %v253_v49 = vadd.f32 %v1192_v7, %v182_v41  ;;  %v183_v50 = vmul.f32 %v872_v42, %v1178_v1  ;;  %1134 = vst [vmem:[%s1505_s3 + $0x70] sm:$0xff] %v1003_v44   ;;  %v184_v53 = vmul.f32 %v873_v46, %v1178_v1  ;;  %v880_v55 = vunpack.c.l.bf16 %v1108_v43 }
  0x29   :  { %v316_v52 = vmax.f32 %v252_v45, 0.0  ;;  %v185_v54 = vmul.f32 %v876_v47, %v1178_v1  ;;  %v1008_v57 = vpack.c.bf16 %v315_v48, %v314_v40  ;;  %v186_v60 = vmul.f32 %v877_v51, %v1178_v1  ;;  %v1114_v47 = vld [vmem:[%s1502_s0 + $0xc8] sm:$0xff]  }
  0x2a   :  { %v317_v58 = vmax.f32 %v253_v49, 0.0  ;;  %v254_v59 = vadd.f32 %v1192_v7, %v183_v50  ;;  %v255_v61 = vadd.f32 %v1192_v7, %v184_v53  ;;  %v881_v63 = vunpack.c.h.bf16 %v1108_v43 }
  0x2b   :  { %v256_v62 = vadd.f32 %v1192_v7, %v185_v54  ;;  %v187_v0 = vmul.f32 %v880_v55, %v1178_v1  ;;  %1135 = vst [vmem:[%s1505_s3 + $0x78] sm:$0xff] %v1008_v57   ;;  %v257_v5 = vadd.f32 %v1192_v7, %v186_v60  ;;  %v884_v6 = vunpack.c.l.bf16 %v1109_v56 }
  0x2c   :  { %v1013_v3 = vpack.c.bf16 %v317_v58, %v316_v52  ;;  %v318_v4 = vmax.f32 %v254_v59, 0.0  ;;  %v319_v8 = vmax.f32 %v255_v61, 0.0  ;;  %v188_v10 = vmul.f32 %v881_v63, %v1178_v1  ;;  %v1115_v52 = vld [vmem:[%s1502_s0 + $0xd0] sm:$0xff]   ;;  %v1116_v61 = vld [vmem:[%s1502_s0 + $0xd8] sm:$0xff]  }
  0x2d   :  { %v320_v9 = vmax.f32 %v256_v62, 0.0  ;;  %v258_v11 = vadd.f32 %v1192_v7, %v187_v0  ;;  %v321_v12 = vmax.f32 %v257_v5, 0.0  ;;  %v885_v13 = vunpack.c.h.bf16 %v1109_v56 }
  0x2e   :  { %1136 = vst [vmem:[%s1505_s3 + $0x80] sm:$0xff] %v1013_v3   ;;  %v189_v14 = vmul.f32 %v884_v6, %v1178_v1  ;;  %v888_v15 = vunpack.c.l.bf16 %v1110_v2  ;;  %v1018_v17 = vpack.c.bf16 %v319_v8, %v318_v4  ;;  %v259_v18 = vadd.f32 %v1192_v7, %v188_v10 }
  0x2f   :  { %v322_v19 = vmax.f32 %v258_v11, 0.0  ;;  %v889_v20 = vunpack.c.h.bf16 %v1110_v2  ;;  %v1023_v22 = vpack.c.bf16 %v321_v12, %v320_v9  ;;  %v190_v23 = vmul.f32 %v885_v13, %v1178_v1  ;;  %v1117_v12 = vld [vmem:[%s1502_s0 + $0xe0] sm:$0xff]  }
  0x30   :  { %v260_v24 = vadd.f32 %v1192_v7, %v189_v14  ;;  %v191_v25 = vmul.f32 %v888_v15, %v1178_v1  ;;  %1137 = vst [vmem:[%s1505_s3 + $0x88] sm:$0xff] %v1018_v17   ;;  %v323_v26 = vmax.f32 %v259_v18, 0.0  ;;  %v892_v28 = vunpack.c.l.bf16 %v1111_v16 }
  0x31   :  { %v192_v27 = vmul.f32 %v889_v20, %v1178_v1  ;;  %v893_v29 = vunpack.c.h.bf16 %v1111_v16  ;;  %1138 = vst [vmem:[%s1505_s3 + $0x90] sm:$0xff] %v1023_v22   ;;  %v261_v30 = vadd.f32 %v1192_v7, %v190_v23  ;;  %v896_v33 = vunpack.c.l.bf16 %v1112_v21 }
  0x32   :  { %v324_v31 = vmax.f32 %v260_v24, 0.0  ;;  %v262_v32 = vadd.f32 %v1192_v7, %v191_v25  ;;  %v1028_v35 = vpack.c.bf16 %v323_v26, %v322_v19  ;;  %v193_v37 = vmul.f32 %v892_v28, %v1178_v1 }
  0x33   :  { %v263_v36 = vadd.f32 %v1192_v7, %v192_v27  ;;  %v194_v38 = vmul.f32 %v893_v29, %v1178_v1  ;;  %v325_v39 = vmax.f32 %v261_v30, 0.0  ;;  %v897_v41 = vunpack.c.h.bf16 %v1112_v21  ;;  %v1118_v21 = vld [vmem:[%s1502_s0 + $0xe8] sm:$0xff]  }
  0x34   :  { %v326_v40 = vmax.f32 %v262_v32, 0.0  ;;  %v195_v42 = vmul.f32 %v896_v33, %v1178_v1  ;;  %1139 = vst [vmem:[%s1505_s3 + $0x98] sm:$0xff] %v1028_v35   ;;  %v264_v44 = vadd.f32 %v1192_v7, %v193_v37  ;;  %v900_v46 = vunpack.c.l.bf16 %v1113_v34 }
  0x35   :  { %v327_v43 = vmax.f32 %v263_v36, 0.0  ;;  %v265_v45 = vadd.f32 %v1192_v7, %v194_v38  ;;  %v1033_v48 = vpack.c.bf16 %v325_v39, %v324_v31  ;;  %v196_v49 = vmul.f32 %v897_v41, %v1178_v1  ;;  %v1120_v39 = vld [vmem:[%s1502_s0 + $0xf8] sm:$0xff]  }
  0x36   :  { %v266_v50 = vadd.f32 %v1192_v7, %v195_v42  ;;  %v901_v51 = vunpack.c.h.bf16 %v1113_v34  ;;  %v328_v54 = vmax.f32 %v264_v44, 0.0  ;;  %v197_v56 = vmul.f32 %v900_v46, %v1178_v1  ;;  %v1119_v34 = vld [vmem:[%s1502_s0 + $0xf0] sm:$0xff]  }
  0x37   :  { %v1038_v53 = vpack.c.bf16 %v327_v43, %v326_v40  ;;  %v329_v55 = vmax.f32 %v265_v45, 0.0  ;;  %1140 = vst [vmem:[%s1505_s3 + $0xa0] sm:$0xff] %v1033_v48   ;;  %v267_v57 = vadd.f32 %v1192_v7, %v196_v49  ;;  %v904_v60 = vunpack.c.l.bf16 %v1114_v47 }
  0x38   :  { %v330_v58 = vmax.f32 %v266_v50, 0.0  ;;  %v198_v59 = vmul.f32 %v901_v51, %v1178_v1  ;;  %v268_v63 = vadd.f32 %v1192_v7, %v197_v56  ;;  %v905_v0 = vunpack.c.h.bf16 %v1114_v47 }
  0x39   :  { %1141 = vst [vmem:[%s1505_s3 + $0xa8] sm:$0xff] %v1038_v53   ;;  %v1043_v62 = vpack.c.bf16 %v329_v55, %v328_v54  ;;  %v908_v2 = vunpack.c.l.bf16 %v1115_v52  ;;  %v331_v3 = vmax.f32 %v267_v57, 0.0  ;;  %v199_v5 = vmul.f32 %v904_v60, %v1178_v1 }
  0x3a   :  { %v269_v4 = vadd.f32 %v1192_v7, %v198_v59  ;;  %v909_v6 = vunpack.c.h.bf16 %v1115_v52  ;;  %v332_v8 = vmax.f32 %v268_v63, 0.0  ;;  %v200_v9 = vmul.f32 %v905_v0, %v1178_v1 }
  0x3b   :  { %1142 = vst [vmem:[%s1505_s3 + $0xb0] sm:$0xff] %v1043_v62   ;;  %v201_v10 = vmul.f32 %v908_v2, %v1178_v1  ;;  %v912_v11 = vunpack.c.l.bf16 %v1116_v61  ;;  %v1048_v13 = vpack.c.bf16 %v331_v3, %v330_v58  ;;  %v270_v15 = vadd.f32 %v1192_v7, %v199_v5 }
  0x3c   :  { %v333_v14 = vmax.f32 %v269_v4, 0.0  ;;  %v202_v16 = vmul.f32 %v909_v6, %v1178_v1  ;;  %v271_v17 = vadd.f32 %v1192_v7, %v200_v9  ;;  %v913_v19 = vunpack.c.h.bf16 %v1116_v61 }
  0x3d   :  { %v272_v18 = vadd.f32 %v1192_v7, %v201_v10  ;;  %v203_v20 = vmul.f32 %v912_v11, %v1178_v1  ;;  %1143 = vst [vmem:[%s1505_s3 + $0xb8] sm:$0xff] %v1048_v13   ;;  %v334_v23 = vmax.f32 %v270_v15, 0.0  ;;  %v916_v25 = vunpack.c.l.bf16 %v1117_v12 }
  0x3e   :  { %v1053_v22 = vpack.c.bf16 %v333_v14, %v332_v8  ;;  %v273_v24 = vadd.f32 %v1192_v7, %v202_v16  ;;  %v335_v26 = vmax.f32 %v271_v17, 0.0  ;;  %v204_v28 = vmul.f32 %v913_v19, %v1178_v1 }
  0x3f   :  { %v336_v27 = vmax.f32 %v272_v18, 0.0  ;;  %v274_v29 = vadd.f32 %v1192_v7, %v203_v20  ;;  %v917_v31 = vunpack.c.h.bf16 %v1117_v12  ;;  %v205_v32 = vmul.f32 %v916_v25, %v1178_v1 }
  0x40   :  { %1144 = vst [vmem:[%s1505_s3 + $0xc0] sm:$0xff] %v1053_v22   ;;  %v337_v30 = vmax.f32 %v273_v24, 0.0  ;;  %v920_v33 = vunpack.c.l.bf16 %v1118_v21  ;;  %v1058_v35 = vpack.c.bf16 %v335_v26, %v334_v23  ;;  %v275_v36 = vadd.f32 %v1192_v7, %v204_v28 }
  0x41   :  { %v338_v37 = vmax.f32 %v274_v29, 0.0  ;;  %v921_v38 = vunpack.c.h.bf16 %v1118_v21  ;;  %v206_v41 = vmul.f32 %v917_v31, %v1178_v1  ;;  %v276_v42 = vadd.f32 %v1192_v7, %v205_v32 }
  0x42   :  { %v1063_v40 = vpack.c.bf16 %v337_v30, %v336_v27  ;;  %v207_v43 = vmul.f32 %v920_v33, %v1178_v1  ;;  %1145 = vst [vmem:[%s1505_s3 + $0xc8] sm:$0xff] %v1058_v35   ;;  %v339_v44 = vmax.f32 %v275_v36, 0.0  ;;  %v924_v46 = vunpack.c.l.bf16 %v1119_v34 }
  0x43   :  { %v208_v45 = vmul.f32 %v921_v38, %v1178_v1  ;;  %v925_v47 = vunpack.c.h.bf16 %v1119_v34  ;;  %v277_v48 = vadd.f32 %v1192_v7, %v206_v41  ;;  %v340_v49 = vmax.f32 %v276_v42, 0.0 }
  0x44   :  { %1146 = vst [vmem:[%s1505_s3 + $0xd0] sm:$0xff] %v1063_v40   ;;  %v278_v50 = vadd.f32 %v1192_v7, %v207_v43  ;;  %v928_v51 = vunpack.c.l.bf16 %v1120_v39  ;;  %v1068_v52 = vpack.c.bf16 %v339_v44, %v338_v37  ;;  %v209_v54 = vmul.f32 %v924_v46, %v1178_v1 }
  0x45   :  { %v279_v53 = vadd.f32 %v1192_v7, %v208_v45  ;;  %v210_v55 = vmul.f32 %v925_v47, %v1178_v1  ;;  %v341_v56 = vmax.f32 %v277_v48, 0.0  ;;  %v929_v58 = vunpack.c.h.bf16 %v1120_v39 }
  0x46   :  { %v342_v57 = vmax.f32 %v278_v50, 0.0  ;;  %v211_v59 = vmul.f32 %v928_v51, %v1178_v1  ;;  %1147 = vst [vmem:[%s1505_s3 + $0xd8] sm:$0xff] %v1068_v52   ;;  %v280_v61 = vadd.f32 %v1192_v7, %v209_v54 }
  0x47   :  { %v343_v60 = vmax.f32 %v279_v53, 0.0  ;;  %v281_v62 = vadd.f32 %v1192_v7, %v210_v55  ;;  %v1073_v63 = vpack.c.bf16 %v341_v56, %v340_v49  ;;  %v212_v0 = vmul.f32 %v929_v58, %v1178_v1 }
  0x48   :  { %v282_v2 = vadd.f32 %v1192_v7, %v211_v59  ;;  %v344_v4 = vmax.f32 %v280_v61, 0.0 }
  0x49   :  { %v1078_v3 = vpack.c.bf16 %v343_v60, %v342_v57  ;;  %v345_v5 = vmax.f32 %v281_v62, 0.0  ;;  %1148 = vst [vmem:[%s1505_s3 + $0xe0] sm:$0xff] %v1073_v63   ;;  %v283_v6 = vadd.f32 %v1192_v7, %v212_v0 }
  0x4a   :  { %v346_v8 = vmax.f32 %v282_v2, 0.0 }
  0x4b   :  { %1149 = vst [vmem:[%s1505_s3 + $0xe8] sm:$0xff] %v1078_v3   ;;  %v1083_v9 = vpack.c.bf16 %v345_v5, %v344_v4  ;;  %v347_v10 = vmax.f32 %v283_v6, 0.0 }
  0x4d   :  { %1150 = vst [vmem:[%s1505_s3 + $0xf0] sm:$0xff] %v1083_v9   ;;  %v1088_v1 = vpack.c.bf16 %v347_v10, %v346_v8 }
  0x4f   :  { %1151 = vst [vmem:[%s1505_s3 + $0xf8] sm:$0xff] %v1088_v1  }

// kernel: netg_forward.21
= control target key start
LH: loop header
LB: loop body
LE: loop exit
PB: predicated region body
PF: predicated region fallthrough
CT: control target
= control target key end

     0   :  { %s653_s9 = smov 0   ;;  %s655_s10 = smov 0   ;;  %s750_s0 = inlined_call_operand.vmem [shape: bf16[4,3,32], index: 0, kind: input, shape index: {}]   ;;  %s751_s1 = inlined_call_operand.vmem [shape: bf16[4,32,8192], index: 1, kind: input, shape index: {}]   ;;  %s752_s2 = inlined_call_operand.vmem [shape: f32[4,3,8192], index: 2, kind: output, shape index: {}]  }
   0x1   :  { %s657_s11 = smov 0   ;;  %s659_s12 = smov 0  }
   0x2   :  { %s661_s13 = smov 0   ;;  %s663_s14 = smov 0  }
   0x3   :  { %s665_s15 = smov 0  }
   0x4 LB: > { %s21_s16 = sadd.s32 1, %s627_s13  ;;  %s24_s17 = sadd.s32 1, %s631_s14  ;;  %s635_s15 = sphi %s665_s15, %s12_s15   ;;  %s631_s14 = sphi %s663_s14, %s758_s14   ;;  %s627_s13 = sphi %s661_s13, %s757_s13   ;;  %s623_s12 = sphi %s659_s12, %s756_s12   ;;  %s619_s11 = sphi %s657_s11, %s755_s11   ;;  %s615_s10 = sphi %s655_s10, %s754_s10   ;;  %s611_s9 = sphi %s653_s9, %s753_s9  }
   0x5   : > { %p22_p0 = scmp.ge.s32.totalorder %s21_s16, 16  ;;  %p66_p1 = scmp.ne.s32.totalorder %s615_s10, %s611_s9 }
   0x6   : > { %p67_p2 = scmp.eq.s32.totalorder %s635_s15, 0  ;;  %s59_s21 = sadd.s32 1, %s615_s10 }
   0x7   : > { %s760_s16 = smov (%p22_p0, %s21_s16), 0  ;;  %s762_s17 = smov (!%p22_p0, %s24_s17), %s631_s14 }
   0x8   : > { %p68_p3 = por %p67_p2, %p66_p1  ;;  %p26_p4 = scmp.ge.s32.totalorder %s762_s17, 4 }
   0x9   : > { %s55_s18 = ssub.s32 %s627_s13, %s760_s16  ;;  %p481_p6 = scmp.ge.s32.totalorder %s635_s15, 64 }
   0xa   : > { %s764_s17 = smov (%p26_p4, %s762_s17), 0 }
   0xb   : > { %s54_s19 = ssub.s32 %s631_s14, %s764_s17  ;;  %120 = sbr.rel (%p481_p6) target bundleno = 29 (0x1d), region = 16 }
   0xc   : > { %s56_s20 = sor.u32 %s55_s18, %s54_s19 }
   0xd   : > { %p57_p5 = scmp.eq.s32.totalorder %s56_s20, 0 }
   0xf   : > { %s704_s22 = scalar_select %p57_p5, %s615_s10, %s59_s21  }
  0x12   : > { %130 = sbr.rel (!%p68_p3) target bundleno = 29 (0x1d), region = 24  ;;  %s132_s23 = sand.u32 (%p68_p3), 1, %s615_s10  }
  0x13   : > { %s483_s24 = sshll.u32 (%p68_p3), %s627_s13, 2  ;;  %s482_s25 = sshll.u32 (%p68_p3), %s132_s23, 6 }
  0x14   : > { %s484_s26 = sshll.u32 (%p68_p3), %s631_s14, 8  ;;  %s134_s4 = scalar_lea.vmem (%p68_p3), [#allocation2], %s482_s25 }
  0x15   : > { %s137_s27 = sadd.s32 (%p68_p3), %s484_s26, %s483_s24 }
  0x16   : > { %s485_s28 = sshll.u32 (%p68_p3), %s137_s27, 2 }
  0x17   : > { %s139_s3 = scalar_lea.vmem (%p68_p3), %s751_s1, %s485_s28 }
  0x18   : > { %v152_v0 = vld [vmem:[%s139_s3] sm:$0xff] (%p68_p3)  ;;  %v154_v1 = vld [vmem:[%s139_s3 + $0x8] sm:$0xff] (%p68_p3) }
  0x19   : > { %v156_v2 = vld [vmem:[%s139_s3 + $0x100] sm:$0xff]  ;;  %153 = vst [vmem:[%s134_s4] sm:$0xff] %v152_v0  ;;  %155 = vst [vmem:[%s134_s4 + $0x8] sm:$0xff] %v154_v1  ;;  %v158_v3 = vld [vmem:[%s139_s3 + $0x108] sm:$0xff] }
  0x1a   : > { %157 = vst [vmem:[%s134_s4 + $0x10] sm:$0xff] %v156_v2  ;;  %v160_v4 = vld [vmem:[%s139_s3 + $0x200] sm:$0xff]  ;;  %v162_v5 = vld [vmem:[%s139_s3 + $0x208] sm:$0xff]  ;;  %159 = vst [vmem:[%s134_s4 + $0x18] sm:$0xff] %v158_v3 }
  0x1b   : > { %161 = vst [vmem:[%s134_s4 + $0x20] sm:$0xff] %v160_v4  ;;  %163 = vst [vmem:[%s134_s4 + $0x28] sm:$0xff] %v162_v5  ;;  %v164_v6 = vld [vmem:[%s139_s3 + $0x300] sm:$0xff]  ;;  %v166_v7 = vld [vmem:[%s139_s3 + $0x308] sm:$0xff] }
  0x1c   : > { %165 = vst [vmem:[%s134_s4 + $0x30] sm:$0xff] %v164_v6  ;;  %167 = vst [vmem:[%s134_s4 + $0x38] sm:$0xff] %v166_v7 }
  0x1d PF: > { %p486_p7 = scmp.ge.s32.totalorder %s635_s15, 1  ;;  %p172_p8 = scmp.lt.s32.totalorder %s635_s15, 65 }
  0x1f   : > { %p173_p9 = pnand %p486_p7, %p172_p8 }
  0x20   : > { %s179_s5 = sand.u32 (!%p173_p9), 1, %s611_s9   ;;  %p208_p10 = scmp.lt.s32.totalorder (!%p173_p9), %s623_s12, 3  ;;  %v637_v8 = vmov (!%p173_p9), 0   ;;  %vm273_vm0 = vcmask (!%p173_p9), 261120  }
  0x21   : > { %176 = sbr.rel (%p173_p9) target bundleno = 273 (0x111), region = 47  ;;  %s487_s6 = sshll.u32 (!%p173_p9), %s179_s5, 6  ;;  %309 = vmatprep.mubr.bf16.mxu0 (!%p173_p9), %v637_v8  ;;  %350 = vmatprep.mubr.bf16.mxu1 (!%p173_p9), %v637_v8 }
  0x22   : > { %s181_s7 = scalar_lea.vmem (!%p173_p9), [#allocation2], %s487_s6  ;;  %s489_s20 = sshll.u32 (!%p173_p9), %s619_s11, 2 }
  0x23   : > { %v561_v9 = vld [vmem:[%s181_s7 + $0x4] ss:$16 sps:$4 sm:$0xff] (!%p173_p9)   ;;  %v563_v10 = vld [vmem:[%s181_s7 + $0xc] ss:$16 sps:$4 sm:$0xff] (!%p173_p9)   ;;  %v565_v11 = vld [vmem:[%s181_s7] ss:$16 sps:$4 sm:$0xff] (!%p173_p9)  }
  0x24   : > { %277 = vmatprep.subr.bf16.mxu0 (!%p173_p9), %v561_v9  ;;  %v566_v12 = vld [vmem:[%s181_s7 + $0x8] ss:$16 sps:$4 sm:$0xff] (!%p173_p9)   ;;  %318 = vmatprep.subr.bf16.mxu1 (!%p173_p9), %v563_v10  ;;  %v567_v13 = vld [vmem:[%s181_s7 + $0x24] ss:$16 sps:$4 sm:$0xff] (!%p173_p9)   ;;  %v569_v14 = vld [vmem:[%s181_s7 + $0x2c] ss:$16 sps:$4 sm:$0xff] (!%p173_p9)  }
  0x25   : > { %278 = vmatpush1.bf16.msra.mxu0 (!%p173_p9), %v565_v11  ;;  %319 = vmatpush1.bf16.msra.mxu1 (!%p173_p9), %v566_v12  ;;  %v571_v15 = vld [vmem:[%s181_s7 + $0x20] ss:$16 sps:$4 sm:$0xff] (!%p173_p9)   ;;  %v572_v16 = vld [vmem:[%s181_s7 + $0x28] ss:$16 sps:$4 sm:$0xff] (!%p173_p9)   ;;  %p216_p11 = scmp.lt.s32.totalorder (!%p173_p9), %s489_s20, 63 }
  0x26   : > { %279 = vmatprep.subr.bf16.mxu0 (!%p173_p9), %v567_v13  ;;  %320 = vmatprep.subr.bf16.mxu1 (!%p173_p9), %v569_v14 }
  0x28   : > { %s766_s12 = smov (!%p208_p10, %s623_s12), 3  ;;  %s768_s20 = smov (!%p216_p11, %s489_s20), 63 }
  0x29   : > { %s488_s8 = sshll.u32 %s766_s12, 1  ;;  %280 = vmatpush1.bf16.msra.mxu0 %v571_v15  ;;  %321 = vmatpush1.bf16.msra.mxu1 %v572_v16  ;;  %s490_s21 = sshll.u32 %s766_s12, 6 }
  0x2a   : > { %s211_s19 = scalar_lea.vmem %s750_s0, %s488_s8  ;;  %s219_s23 = sadd.s32 %s490_s21, %s768_s20 }
  0x2b   : > { %v224_v17 = vld [vmem:[%s211_s19] sm:$0x3]  ;;  %s491_s24 = sshll.u32 %s219_s23, 2 }
  0x2c   : > { %500 = vmatmul.mubr.msk.bf16.vlgmr.msra.gmra.mrb[0].mxu0 %vm273_vm0, %v224_v17  ;;  %501 = vmatmul.mubr.msk.bf16.vlgmr.msra.gmra.mrb[0].mxu1 %vm273_vm0, %v224_v17  ;;  %s221_s26 = scalar_lea.vmem %s752_s2, %s491_s24 }
  0xff   : > { %v311_v18 = vpop.f32.mrb[0].mxu0  ;;  %v352_v19 = vpop.f32.mrb[0].mxu1 }
 0x100   : > { %573 = vtanh.f32 %v311_v18  ;;  %v313_v20 = vpop.f32.mrb[1].mxu0  ;;  %v354_v21 = vpop.f32.mrb[1].mxu1 }
 0x101   : > { %575 = vtanh.f32 %v352_v19  ;;  %v315_v22 = vpop.f32.mrb[2].mxu0  ;;  %v356_v23 = vpop.f32.mrb[2].mxu1 }
 0x102   : > { %577 = vtanh.f32 %v313_v20  ;;  %v316_v24 = vpop.f32.mrb[3].mxu0  ;;  %v357_v25 = vpop.f32.mrb[3].mxu1 }
 0x103   : > { %579 = vtanh.f32 %v354_v21 }
 0x10a   : > { %v574_v26 = vpop.eup %573 }
 0x10b   : > { %v576_v27 = vpop.eup %575 }
 0x10c   : > { %v578_v28 = vpop.eup %577 }
 0x10d   : > { %v580_v29 = vpop.eup %579  ;;  %v367_v30 = vcombine.low %v574_v26, %v578_v28 }
 0x10e   : > { %v368_v31 = vcombine.low %v576_v27, %v580_v29 }
 0x10f   : > { %371 = vst [vmem:[%s221_s26] sm:$0x77] %v367_v30 }
 0x110   : > { %372 = vst [vmem:[%s221_s26 + $0x8] sm:$0x77] %v368_v31 }
 0x111 PF: > { %s12_s15 = sadd.s32 1, %s635_s15   ;;  %s753_s9 = smov %s615_s10 }
 0x112   : > { %p9_p12 = scmp.ge.s32.totalorder %s12_s15, 66   ;;  %s754_s10 = smov %s704_s22 }
 0x113   : > { %s755_s11 = smov %s627_s13  ;;  %s756_s12 = smov %s631_s14 }
 0x114   : > { %s757_s13 = smov %s760_s16  ;;  %s758_s14 = smov %s764_s17 }
 0x115   :  { %11 = sbr.rel (!%p9_p12) target bundleno = 4 (0x4), region = 89 }

</bundles_post_ra>
